<compile_context>
chip_gen: v7x
topology: tpu7x:2x2x1
jax: 0.10.0
libtpu: 0.0.40
codegen_flags: <defaults>
</compile_context>

<pallas_src>
import functools

import jax
import jax.numpy as jnp
from jax.experimental import pallas as pl
from jax.experimental.pallas import tpu as pltpu


_LANE = 128                       # pad tiny cluster / latent dims to this
_NEG_INF = -1e30
_VMEM_LIMIT_BYTES = 48 * 1024 * 1024   # headroom below v7x's 64 MiB physical


def _round_up(x, m):
    return ((x + m - 1) // m) * m


def _mosaic_params(dimension_semantics):
    return pltpu.CompilerParams(dimension_semantics=dimension_semantics,
                                vmem_limit_bytes=_VMEM_LIMIT_BYTES)


# ---------------------------------------------------------------------------
# Kernel 1: AE branch (encoder, decoder, classifier head, Student-t q).
# Row-parallel over node tiles; weights are small full (untiled) VMEM blocks.
# ---------------------------------------------------------------------------
def _ae_kernel(n_clusters, v, cdt,
               x_ref,
               e1w, e1b, e2w, e2b, e3w, e3b, zw, zb,
               d1w, d1b, d2w, d2b, d3w, d3b, xw, xb,
               cw, cb, clu_t, csq,
               xbar_ref, tra1_ref, tra2_ref, tra3_ref, z_ref, q_ref, c_ref):

    def dense(h, w_ref, b_ref, relu):
        y = jnp.dot(h.astype(cdt), w_ref[...].astype(cdt),
                    preferred_element_type=jnp.float32) + b_ref[...]
        return jnp.maximum(y, 0.0) if relu else y

    x = x_ref[...]
    tra1 = dense(x, e1w, e1b, True)
    tra2 = dense(tra1, e2w, e2b, True)
    tra3 = dense(tra2, e3w, e3b, True)
    z = dense(tra3, zw, zb, False)          # (TM, ZP), lanes >= n_z are zero
    dec1 = dense(z, d1w, d1b, True)
    dec2 = dense(dec1, d2w, d2b, True)
    dec3 = dense(dec2, d3w, d3b, True)
    x_bar = dense(dec3, xw, xb, False)

    # classifier head: c = log_softmax(relu(z) @ cw + cb) over real clusters
    logits = dense(jnp.maximum(z, 0.0), cw, cb, False)       # (TM, KP)
    col = jax.lax.broadcasted_iota(jnp.int32, logits.shape, 1)
    valid = col < n_clusters
    lg = jnp.where(valid, logits, _NEG_INF)
    m = jnp.max(lg, axis=1, keepdims=True)
    ex = jnp.where(valid, jnp.exp(lg - m), 0.0)
    lse = m + jnp.log(jnp.sum(ex, axis=1, keepdims=True))
    c = jnp.where(valid, logits - lse, 0.0)

    # Student-t q: ||z-c||^2 = ||z||^2 + ||c||^2 - 2 z.c  (cluster matrix is
    # pre-transposed and its norms precomputed wrapper-side).
    z_sq = jnp.sum(z * z, axis=1, keepdims=True)              # (TM, 1)
    cross = jnp.dot(z.astype(cdt), clu_t[...].astype(cdt),
                    preferred_element_type=jnp.float32)       # (TM, KP)
    dist = jnp.maximum(z_sq + csq[...] - 2.0 * cross, 0.0)
    q = 1.0 / (1.0 + dist / v)
    power = (v + 1.0) / 2.0
    if power != 1.0:                        # static: no-op power skipped (v=1)
        q = jnp.exp(power * jnp.log(q))
    q = jnp.where(valid, q, 0.0)            # drop padded clusters
    q = q / jnp.sum(q, axis=1, keepdims=True)

    xbar_ref[...] = x_bar
    tra1_ref[...] = tra1
    tra2_ref[...] = tra2
    tra3_ref[...] = tra3
    z_ref[...] = z
    q_ref[...] = q
    c_ref[...] = c


# ---------------------------------------------------------------------------
# Kernel 2: support = (h [+ skip]) @ W       (row-parallel)
# ---------------------------------------------------------------------------
def _linear_kernel(cdt, h_ref, w_ref, out_ref):
    out_ref[...] = jnp.dot(h_ref[...].astype(cdt), w_ref[...].astype(cdt),
                           preferred_element_type=jnp.float32)


def _linear_skip_kernel(cdt, h_ref, skip_ref, w_ref, out_ref):
    hs = (h_ref[...] + skip_ref[...]).astype(cdt)     # add in f32, cast for MXU
    out_ref[...] = jnp.dot(hs, w_ref[...].astype(cdt),
                           preferred_element_type=jnp.float32)


# ---------------------------------------------------------------------------
# Kernel 3: out = act(adj @ support)   grid = (row tiles, node K-tiles)
# f32 VMEM accumulator, pl.when init/finalize, reduction axis last/"arbitrary".
# ---------------------------------------------------------------------------
def _spmm_kernel(act, n_valid, cdt, adj_ref, s_ref, out_ref, acc_ref):
    k = pl.program_id(1)

    @pl.when(k == 0)
    def _():
        acc_ref[...] = jnp.zeros_like(acc_ref)

    acc_ref[...] += jnp.dot(adj_ref[...].astype(cdt), s_ref[...].astype(cdt),
                            preferred_element_type=jnp.float32)

    @pl.when(k == pl.num_programs(1) - 1)
    def _():
        h = acc_ref[...]
        if act == "relu":
            h = jnp.maximum(h, 0.0)
        elif act == "log_softmax":
            col = jax.lax.broadcasted_iota(jnp.int32, h.shape, 1)
            valid = col < n_valid
            hm = jnp.where(valid, h, _NEG_INF)
            m = jnp.max(hm, axis=1, keepdims=True)
            ex = jnp.where(valid, jnp.exp(hm - m), 0.0)
            lse = m + jnp.log(jnp.sum(ex, axis=1, keepdims=True))
            h = jnp.where(valid, h - lse, 0.0)
        out_ref[...] = h


# ---------------------------------------------------------------------------
# pallas_call wrappers
# ---------------------------------------------------------------------------
def _ae_call(xp, wlist, out_dims, n_clusters, v, tm, cdt):
    np_, n_input = xp.shape
    grid = (np_ // tm,)

    def row_spec(d):
        return pl.BlockSpec((tm, d), lambda i: (i, 0))

    in_specs = [row_spec(n_input)] + [
        pl.BlockSpec(w.shape, lambda i: (0, 0)) for w in wlist
    ]
    out_specs = tuple(row_spec(d) for d in out_dims)
    out_shape = tuple(jax.ShapeDtypeStruct((np_, d), jnp.float32) for d in out_dims)

    kernel = functools.partial(_ae_kernel, n_clusters, v, cdt)
    return pl.pallas_call(
        kernel,
        out_shape=out_shape,
        grid=grid,
        in_specs=in_specs,
        out_specs=out_specs,
        compiler_params=_mosaic_params(("parallel",)),
    )(xp, *wlist)


def _gcn_layer(adjp, h, skip, w, *, act, n_valid, tm, tk, cdt):
    np_, fin = h.shape
    fout = w.shape[1]

    # --- support = (h [+ skip]) @ W, row-parallel ---
    if skip is None:
        lin = functools.partial(_linear_kernel, cdt)
        lin_in_specs = [pl.BlockSpec((tm, fin), lambda i: (i, 0)),
                        pl.BlockSpec(w.shape, lambda i: (0, 0))]
        lin_args = (h, w)
    else:
        lin = functools.partial(_linear_skip_kernel, cdt)
        lin_in_specs = [pl.BlockSpec((tm, fin), lambda i: (i, 0)),
                        pl.BlockSpec((tm, fin), lambda i: (i, 0)),
                        pl.BlockSpec(w.shape, lambda i: (0, 0))]
        lin_args = (h, skip, w)

    support = pl.pallas_call(
        lin,
        out_shape=jax.ShapeDtypeStruct((np_, fout), jnp.float32),
        grid=(np_ // tm,),
        in_specs=lin_in_specs,
        out_specs=pl.BlockSpec((tm, fout), lambda i: (i, 0)),
        compiler_params=_mosaic_params(("parallel",)),
    )(*lin_args)

    # --- out = act(adj @ support), reduction over node K-tiles ---
    spmm = functools.partial(_spmm_kernel, act, n_valid, cdt)
    return pl.pallas_call(
        spmm,
        out_shape=jax.ShapeDtypeStruct((np_, fout), jnp.float32),
        grid=(np_ // tm, np_ // tk),
        in_specs=[pl.BlockSpec((tm, tk), lambda i, k: (i, k)),
                  pl.BlockSpec((tk, fout), lambda i, k: (k, 0))],
        out_specs=pl.BlockSpec((tm, fout), lambda i, k: (i, 0)),
        scratch_shapes=[pltpu.VMEM((tm, fout), jnp.float32)],
        compiler_params=_mosaic_params(("parallel", "arbitrary")),
    )(adjp, support)


# ---------------------------------------------------------------------------
# Full TSDCN forward
# ---------------------------------------------------------------------------
def tsdcn_forward(x, adj, p, v=1.0, *, tm=128, tk=128,
                  mxu_dtype=jnp.bfloat16):
    f32 = jnp.float32
    n, n_input = x.shape
    n_z = p["zw"].shape[1]
    n_clusters = p["clusters"].shape[0]
    zp = _round_up(n_z, _LANE)
    kp = _round_up(n_clusters, _LANE)
    np_ = _round_up(n, max(tm, tk))
    assert np_ % tm == 0 and np_ % tk == 0

    def pad2(a, rows, cols):
        a = a.astype(f32)
        return jnp.pad(a, ((0, rows - a.shape[0]), (0, cols - a.shape[1])))

    def as_bias(b, cols):
        return pad2(jnp.reshape(b.astype(f32), (1, -1)), 1, cols)

    # --- pad inputs to a multiple of the row tile ---
    xp = pad2(x, np_, n_input)
    adjp = pad2(adj, np_, np_).astype(mxu_dtype)   # bf16 adj = dominant HBM term

    # --- weights: zero-pad n_z / n_clusters dims to 128 lanes (semantics
    #     preserved; masked log-softmax / masked q handle the padded lanes) ---
    zw_p = pad2(p["zw"], p["zw"].shape[0], zp)
    zb_p = as_bias(p["zb"], zp)
    d1w_p = pad2(p["d1w"], zp, p["d1w"].shape[1])
    cw_p = pad2(p["cw"], zp, kp)
    cb_p = as_bias(p["cb"], kp)
    clu_t_p = pad2(p["clusters"].T, zp, kp)
    csq_p = pad2(jnp.sum(p["clusters"].astype(f32) ** 2, axis=1,
                         keepdims=True).T, 1, kp)
    g4w_p = pad2(p["g4w"], p["g4w"].shape[0], zp)
    g5w_p = pad2(p["g5w"], zp, kp)

    ae_weights = [
        p["e1w"].astype(f32), as_bias(p["e1b"], p["e1w"].shape[1]),
        p["e2w"].astype(f32), as_bias(p["e2b"], p["e2w"].shape[1]),
        p["e3w"].astype(f32), as_bias(p["e3b"], p["e3w"].shape[1]),
        zw_p, zb_p,
        d1w_p, as_bias(p["d1b"], p["d1w"].shape[1]),
        p["d2w"].astype(f32), as_bias(p["d2b"], p["d2w"].shape[1]),
        p["d3w"].astype(f32), as_bias(p["d3b"], p["d3w"].shape[1]),
        p["xw"].astype(f32), as_bias(p["xb"], p["xw"].shape[1]),
        cw_p, cb_p, clu_t_p, csq_p,
    ]
    out_dims = (n_input, p["e1w"].shape[1], p["e2w"].shape[1],
                p["e3w"].shape[1], zp, kp, kp)

    # --- AE branch: x_bar, skip activations, z, q, classifier c ---
    x_bar, tra1, tra2, tra3, z_p, q_p, c_p = _ae_call(
        xp, ae_weights, out_dims, n_clusters, float(v), tm, mxu_dtype)

    # --- GCN branch with AE skip connections ---
    kw = dict(tm=tm, tk=tk, cdt=mxu_dtype)
    h = _gcn_layer(adjp, xp, None, p["g1w"].astype(f32),
                   act="relu", n_valid=0, **kw)
    h = _gcn_layer(adjp, h, tra1, p["g2w"].astype(f32),
                   act="relu", n_valid=0, **kw)
    h = _gcn_layer(adjp, h, tra2, p["g3w"].astype(f32),
                   act="relu", n_valid=0, **kw)
    h = _gcn_layer(adjp, h, tra3, g4w_p, act="relu", n_valid=0, **kw)
    pred_p = _gcn_layer(adjp, h, z_p, g5w_p,
                        act="log_softmax", n_valid=n_clusters, **kw)

    # --- slice the lane/row padding back off (wrapper-side plumbing only) ---
    x_bar = x_bar[:n]
    q = q_p[:n, :n_clusters]
    predict = pred_p[:n, :n_clusters]
    z = z_p[:n, :n_z]
    c = c_p[:n, :n_clusters]
    return x_bar, q, predict, z, c


# ---------------------------------------------------------------------------
# Deterministic parameter init (mirrors TSDCN.__init__ shapes; weights stored
# pre-transposed to (in_features, out_features))
# ---------------------------------------------------------------------------
def _linear_params(key, fan_in, fan_out):
    kw, kb = jax.random.split(key)
    bound = 1.0 / (float(fan_in) ** 0.5)
    w = jax.random.uniform(kw, (fan_in, fan_out), jnp.float32, -bound, bound)
    b = jax.random.uniform(kb, (fan_out,), jnp.float32, -bound, bound)
    return w, b


def _gnn_weight(key, fan_in, fan_out):
    bound = (6.0 / (fan_in + fan_out)) ** 0.5
    return jax.random.uniform(key, (fan_in, fan_out), jnp.float32, -bound, bound)


def init_params(key, d):
    k = jax.random.split(key, 15)
    p = {}
    p["e1w"], p["e1b"] = _linear_params(k[0], d["n_input"], d["n_enc_1"])
    p["e2w"], p["e2b"] = _linear_params(k[1], d["n_enc_1"], d["n_enc_2"])
    p["e3w"], p["e3b"] = _linear_params(k[2], d["n_enc_2"], d["n_enc_3"])
    p["zw"], p["zb"] = _linear_params(k[3], d["n_enc_3"], d["n_z"])
    p["d1w"], p["d1b"] = _linear_params(k[4], d["n_z"], d["n_dec_1"])
    p["d2w"], p["d2b"] = _linear_params(k[5], d["n_dec_1"], d["n_dec_2"])
    p["d3w"], p["d3b"] = _linear_params(k[6], d["n_dec_2"], d["n_dec_3"])
    p["xw"], p["xb"] = _linear_params(k[7], d["n_dec_3"], d["n_input"])
    p["cw"], p["cb"] = _linear_params(k[8], d["n_z"], d["n_clusters"])
    p["g1w"] = _gnn_weight(k[9], d["n_input"], d["n_enc_1"])
    p["g2w"] = _gnn_weight(k[10], d["n_enc_1"], d["n_enc_2"])
    p["g3w"] = _gnn_weight(k[11], d["n_enc_2"], d["n_enc_3"])
    p["g4w"] = _gnn_weight(k[12], d["n_enc_3"], d["n_z"])
    p["g5w"] = _gnn_weight(k[13], d["n_z"], d["n_clusters"])
    std = (2.0 / (d["n_clusters"] + d["n_z"])) ** 0.5
    p["clusters"] = std * jax.random.normal(
        k[14], (d["n_clusters"], d["n_z"]), jnp.float32)
    return p


# ---------------------------------------------------------------------------
# Pure-JAX reference.  mxu_dtype=None reproduces the f32 PyTorch semantics;
# mxu_dtype=jnp.bfloat16 mirrors the kernel's bf16-operand / f32-accumulation
# numerics so the check below is tolerance-tight.
# ---------------------------------------------------------------------------
def tsdcn_reference(x, adj, p, v=1.0, mxu_dtype=None):
    if mxu_dtype is None:
        dot = jnp.dot
    else:
        def dot(a, b):
            return jnp.dot(a.astype(mxu_dtype), b.astype(mxu_dtype),
                           preferred_element_type=jnp.float32)
    relu = jax.nn.relu

    tra1 = relu(dot(x, p["e1w"]) + p["e1b"])
    tra2 = relu(dot(tra1, p["e2w"]) + p["e2b"])
    tra3 = relu(dot(tra2, p["e3w"]) + p["e3b"])
    z = dot(tra3, p["zw"]) + p["zb"]
    dec1 = relu(dot(z, p["d1w"]) + p["d1b"])
    dec2 = relu(dot(dec1, p["d2w"]) + p["d2b"])
    dec3 = relu(dot(dec2, p["d3w"]) + p["d3b"])
    x_bar = dot(dec3, p["xw"]) + p["xb"]
    c = jax.nn.log_softmax(dot(relu(z), p["cw"]) + p["cb"], axis=1)

    h = relu(dot(adj, dot(x, p["g1w"])))
    h = relu(dot(adj, dot(h + tra1, p["g2w"])))
    h = relu(dot(adj, dot(h + tra2, p["g3w"])))
    h = relu(dot(adj, dot(h + tra3, p["g4w"])))
    h = dot(adj, dot(h + z, p["g5w"]))
    predict = jax.nn.log_softmax(h, axis=1)

    clu = p["clusters"]
    if mxu_dtype is None:
        dist = jnp.sum((z[:, None, :] - clu[None, :, :]) ** 2, axis=2)
    else:
        z_sq = jnp.sum(z * z, axis=1, keepdims=True)
        c_sq = jnp.sum(clu * clu, axis=1)[None, :]
        dist = jnp.maximum(z_sq + c_sq - 2.0 * dot(z, clu.T), 0.0)
    q = 1.0 / (1.0 + dist / v)
    power = (v + 1.0) / 2.0
    if power != 1.0:
        q = q ** power
    q = q / jnp.sum(q, axis=1, keepdims=True)
    return x_bar, q, predict, z, c


if __name__ == "__main__":
    key = jax.random.PRNGKey(0)
    dims = dict(n_enc_1=64, n_enc_2=32, n_enc_3=80,
                n_dec_1=80, n_dec_2=32, n_dec_3=64,
                n_input=48, n_z=12, n_clusters=5)
    N = 200          # deliberately not a multiple of the 128-row tile
    v = 1.0

    k_x, k_adj, k_p = jax.random.split(key, 3)
    x = jax.random.normal(k_x, (N, dims["n_input"]), jnp.float32)
    # row-stochastic dense adjacency (stands in for the normalized graph adj)
    adj = jax.nn.softmax(jax.random.normal(k_adj, (N, N), jnp.float32), axis=1)
    params = init_params(k_p, dims)

    forward = jax.jit(functools.partial(tsdcn_forward, v=v))
    outs = jax.block_until_ready(forward(x, adj, params))

    refs = tsdcn_reference(x, adj, params, v=v, mxu_dtype=jnp.bfloat16)
    names = ("x_bar", "q", "predict", "z", "c")
    for name, o, r in zip(names, outs, refs):
        assert o.shape == r.shape, (name, o.shape, r.shape)
        err = float(jnp.max(jnp.abs(o - r)))
        assert err < 2e-3, (name, err)

    print("KERNEL_OK")
</pallas_src>

<mosaic_0001>
module attributes {stable_mosaic.version = 11 : i64} {
  func.func @_linear_kernel(%arg0: i32, %arg1: memref<128x48xf32, #tpu.memory_space<vmem>>, %arg2: memref<48x64xf32, #tpu.memory_space<vmem>>, %arg3: memref<128x64xf32, #tpu.memory_space<vmem>>) attributes {dimension_semantics = [#tpu.dimension_semantics<parallel>], iteration_bounds = array<i64: 2>, scalar_prefetch = 0 : i64, scratch_operands = 0 : i64, tpu.core_type = #tpu.core_type<tc>, window_params = [{transform_indices = @transform_0, window_bounds = array<i64: 128, 48>}, {pipeline_mode = #tpu.pipeline_mode<synchronous>, transform_indices = @transform_1, window_bounds = array<i64: 48, 64>}, {transform_indices = @transform_2, window_bounds = array<i64: 128, 64>}]} {
    %c0 = arith.constant 0 : index
    %c0_0 = arith.constant 0 : index
    %0 = vector.load %arg1[%c0, %c0_0] : memref<128x48xf32, #tpu.memory_space<vmem>>, vector<128x48xf32>
    %1 = arith.truncf %0 : vector<128x48xf32> to vector<128x48xbf16>
    %c0_1 = arith.constant 0 : index
    %c0_2 = arith.constant 0 : index
    %2 = vector.load %arg2[%c0_1, %c0_2] : memref<48x64xf32, #tpu.memory_space<vmem>>, vector<48x64xf32>
    %3 = arith.truncf %2 : vector<48x64xf32> to vector<48x64xbf16>
    %cst = arith.constant dense<0.000000e+00> : vector<128x64xf32>
    %4 = tpu.matmul %1, %3, %cst {dimension_numbers = #tpu.dot_dimension_numbers<[1], [0], [0], [1], [0, 0, 1, 1], [], []>} : vector<128x48xbf16>, vector<48x64xbf16>, vector<128x64xf32> -> vector<128x64xf32>
    %c0_3 = arith.constant 0 : index
    %c0_4 = arith.constant 0 : index
    %5 = vector.load %arg3[%c0_3, %c0_4] : memref<128x64xf32, #tpu.memory_space<vmem>>, vector<128x64xf32>
    tpu.vector_store %arg3[%c0_3, %c0_4], %4 {strides = array<i32>} : memref<128x64xf32, #tpu.memory_space<vmem>>, vector<128x64xf32>,
    return
  }
  func.func @transform_0(%arg0: i32) -> (i32, i32) {
    %c0_i32 = arith.constant 0 : i32
    %c0_i32_0 = arith.constant 0 : i32
    return %arg0, %c0_i32 : i32, i32
  }
  func.func @transform_1(%arg0: i32) -> (i32, i32) {
    %c0_i32 = arith.constant 0 : i32
    %c0_i32_0 = arith.constant 0 : i32
    %c0_i32_1 = arith.constant 0 : i32
    return %c0_i32, %c0_i32_0 : i32, i32
  }
  func.func @transform_2(%arg0: i32) -> (i32, i32) {
    %c0_i32 = arith.constant 0 : i32
    %c0_i32_0 = arith.constant 0 : i32
    return %arg0, %c0_i32 : i32, i32
  }
}

module attributes {stable_mosaic.version = 11 : i64} {
  func.func @_ae_kernel(%arg0: i32, %arg1: memref<128x48xf32, #tpu.memory_space<vmem>>, %arg2: memref<48x64xf32, #tpu.memory_space<vmem>>, %arg3: memref<1x64xf32, #tpu.memory_space<vmem>>, %arg4: memref<64x32xf32, #tpu.memory_space<vmem>>, %arg5: memref<1x32xf32, #tpu.memory_space<vmem>>, %arg6: memref<32x80xf32, #tpu.memory_space<vmem>>, %arg7: memref<1x80xf32, #tpu.memory_space<vmem>>, %arg8: memref<80x128xf32, #tpu.memory_space<vmem>>, %arg9: memref<1x128xf32, #tpu.memory_space<vmem>>, %arg10: memref<128x80xf32, #tpu.memory_space<vmem>>, %arg11: memref<1x80xf32, #tpu.memory_space<vmem>>, %arg12: memref<80x32xf32, #tpu.memory_space<vmem>>, %arg13: memref<1x32xf32, #tpu.memory_space<vmem>>, %arg14: memref<32x64xf32, #tpu.memory_space<vmem>>, %arg15: memref<1x64xf32, #tpu.memory_space<vmem>>, %arg16: memref<64x48xf32, #tpu.memory_space<vmem>>, %arg17: memref<1x48xf32, #tpu.memory_space<vmem>>, %arg18: memref<128x128xf32, #tpu.memory_space<vmem>>, %arg19: memref<1x128xf32, #tpu.memory_space<vmem>>, %arg20: memref<128x128xf32, #tpu.memory_space<vmem>>, %arg21: memref<1x128xf32, #tpu.memory_space<vmem>>, %arg22: memref<128x48xf32, #tpu.memory_space<vmem>>, %arg23: memref<128x64xf32, #tpu.memory_space<vmem>>, %arg24: memref<128x32xf32, #tpu.memory_space<vmem>>, %arg25: memref<128x80xf32, #tpu.memory_space<vmem>>, %arg26: memref<128x128xf32, #tpu.memory_space<vmem>>, %arg27: memref<128x128xf32, #tpu.memory_space<vmem>>, %arg28: memref<128x128xf32, #tpu.memory_space<vmem>>) attributes {dimension_semantics = [#tpu.dimension_semantics<parallel>], iteration_bounds = array<i64: 2>, scalar_prefetch = 0 : i64, scratch_operands = 0 : i64, tpu.core_type = #tpu.core_type<tc>, window_params = [{transform_indices = @transform_0, window_bounds = array<i64: 128, 48>}, {pipeline_mode = #tpu.pipeline_mode<synchronous>, transform_indices = @transform_1, window_bounds = array<i64: 48, 64>}, {pipeline_mode = #tpu.pipeline_mode<synchronous>, transform_indices = @transform_2, window_bounds = array<i64: 1, 64>}, {pipeline_mode = #tpu.pipeline_mode<synchronous>, transform_indices = @transform_3, window_bounds = array<i64: 64, 32>}, {pipeline_mode = #tpu.pipeline_mode<synchronous>, transform_indices = @transform_4, window_bounds = array<i64: 1, 32>}, {pipeline_mode = #tpu.pipeline_mode<synchronous>, transform_indices = @transform_5, window_bounds = array<i64: 32, 80>}, {pipeline_mode = #tpu.pipeline_mode<synchronous>, transform_indices = @transform_6, window_bounds = array<i64: 1, 80>}, {pipeline_mode = #tpu.pipeline_mode<synchronous>, transform_indices = @transform_7, window_bounds = array<i64: 80, 128>}, {pipeline_mode = #tpu.pipeline_mode<synchronous>, transform_indices = @transform_8, window_bounds = array<i64: 1, 128>}, {pipeline_mode = #tpu.pipeline_mode<synchronous>, transform_indices = @transform_9, window_bounds = array<i64: 128, 80>}, {pipeline_mode = #tpu.pipeline_mode<synchronous>, transform_indices = @transform_10, window_bounds = array<i64: 1, 80>}, {pipeline_mode = #tpu.pipeline_mode<synchronous>, transform_indices = @transform_11, window_bounds = array<i64: 80, 32>}, {pipeline_mode = #tpu.pipeline_mode<synchronous>, transform_indices = @transform_12, window_bounds = array<i64: 1, 32>}, {pipeline_mode = #tpu.pipeline_mode<synchronous>, transform_indices = @transform_13, window_bounds = array<i64: 32, 64>}, {pipeline_mode = #tpu.pipeline_mode<synchronous>, transform_indices = @transform_14, window_bounds = array<i64: 1, 64>}, {pipeline_mode = #tpu.pipeline_mode<synchronous>, transform_indices = @transform_15, window_bounds = array<i64: 64, 48>}, {pipeline_mode = #tpu.pipeline_mode<synchronous>, transform_indices = @transform_16, window_bounds = array<i64: 1, 48>}, {pipeline_mode = #tpu.pipeline_mode<synchronous>, transform_indices = @transform_17, window_bounds = array<i64: 128, 128>}, {pipeline_mode = #tpu.pipeline_mode<synchronous>, transform_indices = @transform_18, window_bounds = array<i64: 1, 128>}, {pipeline_mode = #tpu.pipeline_mode<synchronous>, transform_indices = @transform_19, window_bounds = array<i64: 128, 128>}, {pipeline_mode = #tpu.pipeline_mode<synchronous>, transform_indices = @transform_20, window_bounds = array<i64: 1, 128>}, {transform_indices = @transform_21, window_bounds = array<i64: 128, 48>}, {transform_indices = @transform_22, window_bounds = array<i64: 128, 64>}, {transform_indices = @transform_23, window_bounds = array<i64: 128, 32>}, {transform_indices = @transform_24, window_bounds = array<i64: 128, 80>}, {transform_indices = @transform_25, window_bounds = array<i64: 128, 128>}, {transform_indices = @transform_26, window_bounds = array<i64: 128, 128>}, {transform_indices = @transform_27, window_bounds = array<i64: 128, 128>}]} {
    %c0 = arith.constant 0 : index
    %c0_0 = arith.constant 0 : index
    %0 = vector.load %arg1[%c0, %c0_0] : memref<128x48xf32, #tpu.memory_space<vmem>>, vector<128x48xf32>
    %1 = arith.truncf %0 : vector<128x48xf32> to vector<128x48xbf16>
    %c0_1 = arith.constant 0 : index
    %c0_2 = arith.constant 0 : index
    %2 = vector.load %arg2[%c0_1, %c0_2] : memref<48x64xf32, #tpu.memory_space<vmem>>, vector<48x64xf32>
    %3 = arith.truncf %2 : vector<48x64xf32> to vector<48x64xbf16>
    %cst = arith.constant dense<0.000000e+00> : vector<128x64xf32>
    %4 = tpu.matmul %1, %3, %cst {dimension_numbers = #tpu.dot_dimension_numbers<[1], [0], [0], [1], [0, 0, 1, 1], [], []>} : vector<128x48xbf16>, vector<48x64xbf16>, vector<128x64xf32> -> vector<128x64xf32>
    %c0_3 = arith.constant 0 : index
    %c0_4 = arith.constant 0 : index
    %5 = vector.load %arg3[%c0_3, %c0_4] : memref<1x64xf32, #tpu.memory_space<vmem>>, vector<1x64xf32>
    %6 = vector.broadcast %5 : vector<1x64xf32> to vector<128x64xf32>
    %7 = arith.addf %4, %6 : vector<128x64xf32>
    %cst_5 = arith.constant 0.000000e+00 : f32
    %8 = vector.broadcast %cst_5 : f32 to vector<128x64xf32>
    %9 = arith.maximumf %7, %8 : vector<128x64xf32>
    %10 = arith.truncf %9 : vector<128x64xf32> to vector<128x64xbf16>
    %c0_6 = arith.constant 0 : index
    %c0_7 = arith.constant 0 : index
    %11 = vector.load %arg4[%c0_6, %c0_7] : memref<64x32xf32, #tpu.memory_space<vmem>>, vector<64x32xf32>
    %12 = arith.truncf %11 : vector<64x32xf32> to vector<64x32xbf16>
    %cst_8 = arith.constant dense<0.000000e+00> : vector<128x32xf32>
    %13 = tpu.matmul %10, %12, %cst_8 {dimension_numbers = #tpu.dot_dimension_numbers<[1], [0], [0], [1], [0, 0, 1, 1], [], []>} : vector<128x64xbf16>, vector<64x32xbf16>, vector<128x32xf32> -> vector<128x32xf32>
    %c0_9 = arith.constant 0 : index
    %c0_10 = arith.constant 0 : index
    %14 = vector.load %arg5[%c0_9, %c0_10] : memref<1x32xf32, #tpu.memory_space<vmem>>, vector<1x32xf32>
    %15 = vector.broadcast %14 : vector<1x32xf32> to vector<128x32xf32>
    %16 = arith.addf %13, %15 : vector<128x32xf32>
    %cst_11 = arith.constant 0.000000e+00 : f32
    %17 = vector.broadcast %cst_11 : f32 to vector<128x32xf32>
    %18 = arith.maximumf %16, %17 : vector<128x32xf32>
    %19 = arith.truncf %18 : vector<128x32xf32> to vector<128x32xbf16>
    %c0_12 = arith.constant 0 : index
    %c0_13 = arith.constant 0 : index
    %20 = vector.load %arg6[%c0_12, %c0_13] : memref<32x80xf32, #tpu.memory_space<vmem>>, vector<32x80xf32>
    %21 = arith.truncf %20 : vector<32x80xf32> to vector<32x80xbf16>
    %cst_14 = arith.constant dense<0.000000e+00> : vector<128x80xf32>
    %22 = tpu.matmul %19, %21, %cst_14 {dimension_numbers = #tpu.dot_dimension_numbers<[1], [0], [0], [1], [0, 0, 1, 1], [], []>} : vector<128x32xbf16>, vector<32x80xbf16>, vector<128x80xf32> -> vector<128x80xf32>
    %c0_15 = arith.constant 0 : index
    %c0_16 = arith.constant 0 : index
    %23 = vector.load %arg7[%c0_15, %c0_16] : memref<1x80xf32, #tpu.memory_space<vmem>>, vector<1x80xf32>
    %24 = vector.broadcast %23 : vector<1x80xf32> to vector<128x80xf32>
    %25 = arith.addf %22, %24 : vector<128x80xf32>
    %cst_17 = arith.constant 0.000000e+00 : f32
    %26 = vector.broadcast %cst_17 : f32 to vector<128x80xf32>
    %27 = arith.maximumf %25, %26 : vector<128x80xf32>
    %28 = arith.truncf %27 : vector<128x80xf32> to vector<128x80xbf16>
    %c0_18 = arith.constant 0 : index
    %c0_19 = arith.constant 0 : index
    %29 = vector.load %arg8[%c0_18, %c0_19] : memref<80x128xf32, #tpu.memory_space<vmem>>, vector<80x128xf32>
    %30 = arith.truncf %29 : vector<80x128xf32> to vector<80x128xbf16>
    %cst_20 = arith.constant dense<0.000000e+00> : vector<128x128xf32>
    %31 = tpu.matmul %28, %30, %cst_20 {dimension_numbers = #tpu.dot_dimension_numbers<[1], [0], [0], [1], [0, 0, 1, 1], [], []>} : vector<128x80xbf16>, vector<80x128xbf16>, vector<128x128xf32> -> vector<128x128xf32>
    %c0_21 = arith.constant 0 : index
    %c0_22 = arith.constant 0 : index
    %32 = vector.load %arg9[%c0_21, %c0_22] : memref<1x128xf32, #tpu.memory_space<vmem>>, vector<1x128xf32>
    %33 = vector.broadcast %32 : vector<1x128xf32> to vector<128x128xf32>
    %34 = arith.addf %31, %33 : vector<128x128xf32>
    %35 = arith.truncf %34 : vector<128x128xf32> to vector<128x128xbf16>
    %c0_23 = arith.constant 0 : index
    %c0_24 = arith.constant 0 : index
    %36 = vector.load %arg10[%c0_23, %c0_24] : memref<128x80xf32, #tpu.memory_space<vmem>>, vector<128x80xf32>
    %37 = arith.truncf %36 : vector<128x80xf32> to vector<128x80xbf16>
    %cst_25 = arith.constant dense<0.000000e+00> : vector<128x80xf32>
    %38 = tpu.matmul %35, %37, %cst_25 {dimension_numbers = #tpu.dot_dimension_numbers<[1], [0], [0], [1], [0, 0, 1, 1], [], []>} : vector<128x128xbf16>, vector<128x80xbf16>, vector<128x80xf32> -> vector<128x80xf32>
    %c0_26 = arith.constant 0 : index
    %c0_27 = arith.constant 0 : index
    %39 = vector.load %arg11[%c0_26, %c0_27] : memref<1x80xf32, #tpu.memory_space<vmem>>, vector<1x80xf32>
    %40 = vector.broadcast %39 : vector<1x80xf32> to vector<128x80xf32>
    %41 = arith.addf %38, %40 : vector<128x80xf32>
    %cst_28 = arith.constant 0.000000e+00 : f32
    %42 = vector.broadcast %cst_28 : f32 to vector<128x80xf32>
    %43 = arith.maximumf %41, %42 : vector<128x80xf32>
    %44 = arith.truncf %43 : vector<128x80xf32> to vector<128x80xbf16>
    %c0_29 = arith.constant 0 : index
    %c0_30 = arith.constant 0 : index
    %45 = vector.load %arg12[%c0_29, %c0_30] : memref<80x32xf32, #tpu.memory_space<vmem>>, vector<80x32xf32>
    %46 = arith.truncf %45 : vector<80x32xf32> to vector<80x32xbf16>
    %cst_31 = arith.constant dense<0.000000e+00> : vector<128x32xf32>
    %47 = tpu.matmul %44, %46, %cst_31 {dimension_numbers = #tpu.dot_dimension_numbers<[1], [0], [0], [1], [0, 0, 1, 1], [], []>} : vector<128x80xbf16>, vector<80x32xbf16>, vector<128x32xf32> -> vector<128x32xf32>
    %c0_32 = arith.constant 0 : index
    %c0_33 = arith.constant 0 : index
    %48 = vector.load %arg13[%c0_32, %c0_33] : memref<1x32xf32, #tpu.memory_space<vmem>>, vector<1x32xf32>
    %49 = vector.broadcast %48 : vector<1x32xf32> to vector<128x32xf32>
    %50 = arith.addf %47, %49 : vector<128x32xf32>
    %cst_34 = arith.constant 0.000000e+00 : f32
    %51 = vector.broadcast %cst_34 : f32 to vector<128x32xf32>
    %52 = arith.maximumf %50, %51 : vector<128x32xf32>
    %53 = arith.truncf %52 : vector<128x32xf32> to vector<128x32xbf16>
    %c0_35 = arith.constant 0 : index
    %c0_36 = arith.constant 0 : index
    %54 = vector.load %arg14[%c0_35, %c0_36] : memref<32x64xf32, #tpu.memory_space<vmem>>, vector<32x64xf32>
    %55 = arith.truncf %54 : vector<32x64xf32> to vector<32x64xbf16>
    %cst_37 = arith.constant dense<0.000000e+00> : vector<128x64xf32>
    %56 = tpu.matmul %53, %55, %cst_37 {dimension_numbers = #tpu.dot_dimension_numbers<[1], [0], [0], [1], [0, 0, 1, 1], [], []>} : vector<128x32xbf16>, vector<32x64xbf16>, vector<128x64xf32> -> vector<128x64xf32>
    %c0_38 = arith.constant 0 : index
    %c0_39 = arith.constant 0 : index
    %57 = vector.load %arg15[%c0_38, %c0_39] : memref<1x64xf32, #tpu.memory_space<vmem>>, vector<1x64xf32>
    %58 = vector.broadcast %57 : vector<1x64xf32> to vector<128x64xf32>
    %59 = arith.addf %56, %58 : vector<128x64xf32>
    %cst_40 = arith.constant 0.000000e+00 : f32
    %60 = vector.broadcast %cst_40 : f32 to vector<128x64xf32>
    %61 = arith.maximumf %59, %60 : vector<128x64xf32>
    %62 = arith.truncf %61 : vector<128x64xf32> to vector<128x64xbf16>
    %c0_41 = arith.constant 0 : index
    %c0_42 = arith.constant 0 : index
    %63 = vector.load %arg16[%c0_41, %c0_42] : memref<64x48xf32, #tpu.memory_space<vmem>>, vector<64x48xf32>
    %64 = arith.truncf %63 : vector<64x48xf32> to vector<64x48xbf16>
    %cst_43 = arith.constant dense<0.000000e+00> : vector<128x48xf32>
    %65 = tpu.matmul %62, %64, %cst_43 {dimension_numbers = #tpu.dot_dimension_numbers<[1], [0], [0], [1], [0, 0, 1, 1], [], []>} : vector<128x64xbf16>, vector<64x48xbf16>, vector<128x48xf32> -> vector<128x48xf32>
    %c0_44 = arith.constant 0 : index
    %c0_45 = arith.constant 0 : index
    %66 = vector.load %arg17[%c0_44, %c0_45] : memref<1x48xf32, #tpu.memory_space<vmem>>, vector<1x48xf32>
    %67 = vector.broadcast %66 : vector<1x48xf32> to vector<128x48xf32>
    %68 = arith.addf %65, %67 : vector<128x48xf32>
    %cst_46 = arith.constant 0.000000e+00 : f32
    %69 = vector.broadcast %cst_46 : f32 to vector<128x128xf32>
    %70 = arith.maximumf %34, %69 : vector<128x128xf32>
    %71 = arith.truncf %70 : vector<128x128xf32> to vector<128x128xbf16>
    %c0_47 = arith.constant 0 : index
    %c0_48 = arith.constant 0 : index
    %72 = vector.load %arg18[%c0_47, %c0_48] : memref<128x128xf32, #tpu.memory_space<vmem>>, vector<128x128xf32>
    %73 = arith.truncf %72 : vector<128x128xf32> to vector<128x128xbf16>
    %cst_49 = arith.constant dense<0.000000e+00> : vector<128x128xf32>
    %74 = tpu.matmul %71, %73, %cst_49 {dimension_numbers = #tpu.dot_dimension_numbers<[1], [0], [0], [1], [0, 0, 1, 1], [], []>} : vector<128x128xbf16>, vector<128x128xbf16>, vector<128x128xf32> -> vector<128x128xf32>
    %c0_50 = arith.constant 0 : index
    %c0_51 = arith.constant 0 : index
    %75 = vector.load %arg19[%c0_50, %c0_51] : memref<1x128xf32, #tpu.memory_space<vmem>>, vector<1x128xf32>
    %76 = vector.broadcast %75 : vector<1x128xf32> to vector<128x128xf32>
    %77 = arith.addf %74, %76 : vector<128x128xf32>
    %78 = tpu.iota {dimensions = array<i32: 1>} : vector<128x128xi32>
    %c5_i32 = arith.constant 5 : i32
    %79 = vector.broadcast %c5_i32 : i32 to vector<128x128xi32>
    %80 = arith.cmpi slt, %78, %79 : vector<128x128xi32>
    %cst_52 = arith.constant -1.000000e+30 : f32
    %81 = vector.broadcast %cst_52 : f32 to vector<128x128xf32>
    %82 = arith.select %80, %77, %81 : vector<128x128xi1>, vector<128x128xf32>
    %cst_53 = arith.constant dense<0xFF800000> : vector<128xf32>
    %83 = vector.multi_reduction <maximumf>, %82, %cst_53 [1] : vector<128x128xf32> to vector<128xf32>
    %84 = vector.shape_cast %83 : vector<128xf32> to vector<128x1xf32>
    %85 = vector.broadcast %84 : vector<128x1xf32> to vector<128x128xf32>
    %86 = arith.subf %82, %85 : vector<128x128xf32>
    %87 = math.exp %86 : vector<128x128xf32>
    %cst_54 = arith.constant 0.000000e+00 : f32
    %88 = vector.broadcast %cst_54 : f32 to vector<128x128xf32>
    %89 = arith.select %80, %87, %88 : vector<128x128xi1>, vector<128x128xf32>
    %cst_55 = arith.constant dense<0.000000e+00> : vector<128xf32>
    %90 = vector.multi_reduction <add>, %89, %cst_55 [1] : vector<128x128xf32> to vector<128xf32>
    %91 = vector.shape_cast %90 : vector<128xf32> to vector<128x1xf32>
    %92 = math.log %91 : vector<128x1xf32>
    %93 = arith.addf %84, %92 : vector<128x1xf32>
    %94 = vector.broadcast %93 : vector<128x1xf32> to vector<128x128xf32>
    %95 = arith.subf %77, %94 : vector<128x128xf32>
    %cst_56 = arith.constant 0.000000e+00 : f32
    %96 = vector.broadcast %cst_56 : f32 to vector<128x128xf32>
    %97 = arith.select %80, %95, %96 : vector<128x128xi1>, vector<128x128xf32>
    %98 = arith.mulf %34, %34 : vector<128x128xf32>
    %cst_57 = arith.constant dense<0.000000e+00> : vector<128xf32>
    %99 = vector.multi_reduction <add>, %98, %cst_57 [1] : vector<128x128xf32> to vector<128xf32>
    %100 = vector.shape_cast %99 : vector<128xf32> to vector<128x1xf32>
    %101 = arith.truncf %34 : vector<128x128xf32> to vector<128x128xbf16>
    %c0_58 = arith.constant 0 : index
    %c0_59 = arith.constant 0 : index
    %102 = vector.load %arg20[%c0_58, %c0_59] : memref<128x128xf32, #tpu.memory_space<vmem>>, vector<128x128xf32>
    %103 = arith.truncf %102 : vector<128x128xf32> to vector<128x128xbf16>
    %cst_60 = arith.constant dense<0.000000e+00> : vector<128x128xf32>
    %104 = tpu.matmul %101, %103, %cst_60 {dimension_numbers = #tpu.dot_dimension_numbers<[1], [0], [0], [1], [0, 0, 1, 1], [], []>} : vector<128x128xbf16>, vector<128x128xbf16>, vector<128x128xf32> -> vector<128x128xf32>
    %c0_61 = arith.constant 0 : index
    %c0_62 = arith.constant 0 : index
    %105 = vector.load %arg21[%c0_61, %c0_62] : memref<1x128xf32, #tpu.memory_space<vmem>>, vector<1x128xf32>
    %106 = vector.broadcast %100 : vector<128x1xf32> to vector<128x128xf32>
    %107 = vector.broadcast %105 : vector<1x128xf32> to vector<128x128xf32>
    %108 = arith.addf %106, %107 : vector<128x128xf32>
    %cst_63 = arith.constant 2.000000e+00 : f32
    %109 = vector.broadcast %cst_63 : f32 to vector<128x128xf32>
    %110 = arith.mulf %109, %104 : vector<128x128xf32>
    %111 = arith.subf %108, %110 : vector<128x128xf32>
    %cst_64 = arith.constant 0.000000e+00 : f32
    %112 = vector.broadcast %cst_64 : f32 to vector<128x128xf32>
    %113 = arith.maximumf %111, %112 : vector<128x128xf32>
    %cst_65 = arith.constant 1.000000e+00 : f32
    %114 = vector.broadcast %cst_65 : f32 to vector<128x128xf32>
    %115 = arith.divf %113, %114 : vector<128x128xf32>
    %cst_66 = arith.constant 1.000000e+00 : f32
    %116 = vector.broadcast %cst_66 : f32 to vector<128x128xf32>
    %117 = arith.addf %116, %115 : vector<128x128xf32>
    %cst_67 = arith.constant 1.000000e+00 : f32
    %118 = vector.broadcast %cst_67 : f32 to vector<128x128xf32>
    %119 = arith.divf %118, %117 : vector<128x128xf32>
    %cst_68 = arith.constant 0.000000e+00 : f32
    %120 = vector.broadcast %cst_68 : f32 to vector<128x128xf32>
    %121 = arith.select %80, %119, %120 : vector<128x128xi1>, vector<128x128xf32>
    %cst_69 = arith.constant dense<0.000000e+00> : vector<128xf32>
    %122 = vector.multi_reduction <add>, %121, %cst_69 [1] : vector<128x128xf32> to vector<128xf32>
    %123 = vector.shape_cast %122 : vector<128xf32> to vector<128x1xf32>
    %124 = vector.broadcast %123 : vector<128x1xf32> to vector<128x128xf32>
    %125 = arith.divf %121, %124 : vector<128x128xf32>
    %c0_70 = arith.constant 0 : index
    %c0_71 = arith.constant 0 : index
    %126 = vector.load %arg22[%c0_70, %c0_71] : memref<128x48xf32, #tpu.memory_space<vmem>>, vector<128x48xf32>
    tpu.vector_store %arg22[%c0_70, %c0_71], %68 {strides = array<i32>} : memref<128x48xf32, #tpu.memory_space<vmem>>, vector<128x48xf32>,
    %c0_72 = arith.constant 0 : index
    %c0_73 = arith.constant 0 : index
    %127 = vector.load %arg23[%c0_72, %c0_73] : memref<128x64xf32, #tpu.memory_space<vmem>>, vector<128x64xf32>
    tpu.vector_store %arg23[%c0_72, %c0_73], %9 {strides = array<i32>} : memref<128x64xf32, #tpu.memory_space<vmem>>, vector<128x64xf32>,
    %c0_74 = arith.constant 0 : index
    %c0_75 = arith.constant 0 : index
    %128 = vector.load %arg24[%c0_74, %c0_75] : memref<128x32xf32, #tpu.memory_space<vmem>>, vector<128x32xf32>
    tpu.vector_store %arg24[%c0_74, %c0_75], %18 {strides = array<i32>} : memref<128x32xf32, #tpu.memory_space<vmem>>, vector<128x32xf32>,
    %c0_76 = arith.constant 0 : index
    %c0_77 = arith.constant 0 : index
    %129 = vector.load %arg25[%c0_76, %c0_77] : memref<128x80xf32, #tpu.memory_space<vmem>>, vector<128x80xf32>
    tpu.vector_store %arg25[%c0_76, %c0_77], %27 {strides = array<i32>} : memref<128x80xf32, #tpu.memory_space<vmem>>, vector<128x80xf32>,
    %c0_78 = arith.constant 0 : index
    %c0_79 = arith.constant 0 : index
    %130 = vector.load %arg26[%c0_78, %c0_79] : memref<128x128xf32, #tpu.memory_space<vmem>>, vector<128x128xf32>
    tpu.vector_store %arg26[%c0_78, %c0_79], %34 {strides = array<i32>} : memref<128x128xf32, #tpu.memory_space<vmem>>, vector<128x128xf32>,
    %c0_80 = arith.constant 0 : index
    %c0_81 = arith.constant 0 : index
    %131 = vector.load %arg27[%c0_80, %c0_81] : memref<128x128xf32, #tpu.memory_space<vmem>>, vector<128x128xf32>
    tpu.vector_store %arg27[%c0_80, %c0_81], %125 {strides = array<i32>} : memref<128x128xf32, #tpu.memory_space<vmem>>, vector<128x128xf32>,
    %c0_82 = arith.constant 0 : index
    %c0_83 = arith.constant 0 : index
    %132 = vector.load %arg28[%c0_82, %c0_83] : memref<128x128xf32, #tpu.memory_space<vmem>>, vector<128x128xf32>
    tpu.vector_store %arg28[%c0_82, %c0_83], %97 {strides = array<i32>} : memref<128x128xf32, #tpu.memory_space<vmem>>, vector<128x128xf32>,
    return
  }
  func.func @transform_0(%arg0: i32) -> (i32, i32) {
    %c0_i32 = arith.constant 0 : i32
    %c0_i32_0 = arith.constant 0 : i32
    return %arg0, %c0_i32 : i32, i32
  }
  func.func @transform_1(%arg0: i32) -> (i32, i32) {
    %c0_i32 = arith.constant 0 : i32
    %c0_i32_0 = arith.constant 0 : i32
    %c0_i32_1 = arith.constant 0 : i32
    return %c0_i32, %c0_i32_0 : i32, i32
  }
  func.func @transform_2(%arg0: i32) -> (i32, i32) {
    %c0_i32 = arith.constant 0 : i32
    %c0_i32_0 = arith.constant 0 : i32
    %c0_i32_1 = arith.constant 0 : i32
    return %c0_i32, %c0_i32_0 : i32, i32
  }
  func.func @transform_3(%arg0: i32) -> (i32, i32) {
    %c0_i32 = arith.constant 0 : i32
    %c0_i32_0 = arith.constant 0 : i32
    %c0_i32_1 = arith.constant 0 : i32
    return %c0_i32, %c0_i32_0 : i32, i32
  }
  func.func @transform_4(%arg0: i32) -> (i32, i32) {
    %c0_i32 = arith.constant 0 : i32
    %c0_i32_0 = arith.constant 0 : i32
    %c0_i32_1 = arith.constant 0 : i32
    return %c0_i32, %c0_i32_0 : i32, i32
  }
  func.func @transform_5(%arg0: i32) -> (i32, i32) {
    %c0_i32 = arith.constant 0 : i32
    %c0_i32_0 = arith.constant 0 : i32
    %c0_i32_1 = arith.constant 0 : i32
    return %c0_i32, %c0_i32_0 : i32, i32
  }
  func.func @transform_6(%arg0: i32) -> (i32, i32) {
    %c0_i32 = arith.constant 0 : i32
    %c0_i32_0 = arith.constant 0 : i32
    %c0_i32_1 = arith.constant 0 : i32
    return %c0_i32, %c0_i32_0 : i32, i32
  }
  func.func @transform_7(%arg0: i32) -> (i32, i32) {
    %c0_i32 = arith.constant 0 : i32
    %c0_i32_0 = arith.constant 0 : i32
    %c0_i32_1 = arith.constant 0 : i32
    return %c0_i32, %c0_i32_0 : i32, i32
  }
  func.func @transform_8(%arg0: i32) -> (i32, i32) {
    %c0_i32 = arith.constant 0 : i32
    %c0_i32_0 = arith.constant 0 : i32
    %c0_i32_1 = arith.constant 0 : i32
    return %c0_i32, %c0_i32_0 : i32, i32
  }
  func.func @transform_9(%arg0: i32) -> (i32, i32) {
    %c0_i32 = arith.constant 0 : i32
    %c0_i32_0 = arith.constant 0 : i32
    %c0_i32_1 = arith.constant 0 : i32
    return %c0_i32, %c0_i32_0 : i32, i32
  }
  func.func @transform_10(%arg0: i32) -> (i32, i32) {
    %c0_i32 = arith.constant 0 : i32
    %c0_i32_0 = arith.constant 0 : i32
    %c0_i32_1 = arith.constant 0 : i32
    return %c0_i32, %c0_i32_0 : i32, i32
  }
  func.func @transform_11(%arg0: i32) -> (i32, i32) {
    %c0_i32 = arith.constant 0 : i32
    %c0_i32_0 = arith.constant 0 : i32
    %c0_i32_1 = arith.constant 0 : i32
    return %c0_i32, %c0_i32_0 : i32, i32
  }
  func.func @transform_12(%arg0: i32) -> (i32, i32) {
    %c0_i32 = arith.constant 0 : i32
    %c0_i32_0 = arith.constant 0 : i32
    %c0_i32_1 = arith.constant 0 : i32
    return %c0_i32, %c0_i32_0 : i32, i32
  }
  func.func @transform_13(%arg0: i32) -> (i32, i32) {
    %c0_i32 = arith.constant 0 : i32
    %c0_i32_0 = arith.constant 0 : i32
    %c0_i32_1 = arith.constant 0 : i32
    return %c0_i32, %c0_i32_0 : i32, i32
  }
  func.func @transform_14(%arg0: i32) -> (i32, i32) {
    %c0_i32 = arith.constant 0 : i32
    %c0_i32_0 = arith.constant 0 : i32
    %c0_i32_1 = arith.constant 0 : i32
    return %c0_i32, %c0_i32_0 : i32, i32
  }
  func.func @transform_15(%arg0: i32) -> (i32, i32) {
    %c0_i32 = arith.constant 0 : i32
    %c0_i32_0 = arith.constant 0 : i32
    %c0_i32_1 = arith.constant 0 : i32
    return %c0_i32, %c0_i32_0 : i32, i32
  }
  func.func @transform_16(%arg0: i32) -> (i32, i32) {
    %c0_i32 = arith.constant 0 : i32
    %c0_i32_0 = arith.constant 0 : i32
    %c0_i32_1 = arith.constant 0 : i32
    return %c0_i32, %c0_i32_0 : i32, i32
  }
  func.func @transform_17(%arg0: i32) -> (i32, i32) {
    %c0_i32 = arith.constant 0 : i32
    %c0_i32_0 = arith.constant 0 : i32
    %c0_i32_1 = arith.constant 0 : i32
    return %c0_i32, %c0_i32_0 : i32, i32
  }
  func.func @transform_18(%arg0: i32) -> (i32, i32) {
    %c0_i32 = arith.constant 0 : i32
    %c0_i32_0 = arith.constant 0 : i32
    %c0_i32_1 = arith.constant 0 : i32
    return %c0_i32, %c0_i32_0 : i32, i32
  }
  func.func @transform_19(%arg0: i32) -> (i32, i32) {
    %c0_i32 = arith.constant 0 : i32
    %c0_i32_0 = arith.constant 0 : i32
    %c0_i32_1 = arith.constant 0 : i32
    return %c0_i32, %c0_i32_0 : i32, i32
  }
  func.func @transform_20(%arg0: i32) -> (i32, i32) {
    %c0_i32 = arith.constant 0 : i32
    %c0_i32_0 = arith.constant 0 : i32
    %c0_i32_1 = arith.constant 0 : i32
    return %c0_i32, %c0_i32_0 : i32, i32
  }
  func.func @transform_21(%arg0: i32) -> (i32, i32) {
    %c0_i32 = arith.constant 0 : i32
    %c0_i32_0 = arith.constant 0 : i32
    return %arg0, %c0_i32 : i32, i32
  }
  func.func @transform_22(%arg0: i32) -> (i32, i32) {
    %c0_i32 = arith.constant 0 : i32
    %c0_i32_0 = arith.constant 0 : i32
    return %arg0, %c0_i32 : i32, i32
  }
  func.func @transform_23(%arg0: i32) -> (i32, i32) {
    %c0_i32 = arith.constant 0 : i32
    %c0_i32_0 = arith.constant 0 : i32
    return %arg0, %c0_i32 : i32, i32
  }
  func.func @transform_24(%arg0: i32) -> (i32, i32) {
    %c0_i32 = arith.constant 0 : i32
    %c0_i32_0 = arith.constant 0 : i32
    return %arg0, %c0_i32 : i32, i32
  }
  func.func @transform_25(%arg0: i32) -> (i32, i32) {
    %c0_i32 = arith.constant 0 : i32
    %c0_i32_0 = arith.constant 0 : i32
    return %arg0, %c0_i32 : i32, i32
  }
  func.func @transform_26(%arg0: i32) -> (i32, i32) {
    %c0_i32 = arith.constant 0 : i32
    %c0_i32_0 = arith.constant 0 : i32
    return %arg0, %c0_i32 : i32, i32
  }
  func.func @transform_27(%arg0: i32) -> (i32, i32) {
    %c0_i32 = arith.constant 0 : i32
    %c0_i32_0 = arith.constant 0 : i32
    return %arg0, %c0_i32 : i32, i32
  }
}

module attributes {stable_mosaic.version = 11 : i64} {
  func.func @_spmm_kernel(%arg0: i32, %arg1: i32, %arg2: memref<128x128xbf16, #tpu.memory_space<vmem>>, %arg3: memref<128x64xf32, #tpu.memory_space<vmem>>, %arg4: memref<128x64xf32, #tpu.memory_space<vmem>>, %arg5: memref<128x64xf32, #tpu.memory_space<vmem>>) attributes {dimension_semantics = [#tpu.dimension_semantics<parallel>, #tpu.dimension_semantics<arbitrary>], iteration_bounds = array<i64: 2, 2>, scalar_prefetch = 0 : i64, scratch_operands = 1 : i64, tpu.core_type = #tpu.core_type<tc>, window_params = [{transform_indices = @transform_0, window_bounds = array<i64: 128, 128>}, {transform_indices = @transform_1, window_bounds = array<i64: 128, 64>}, {transform_indices = @transform_2, window_bounds = array<i64: 128, 64>}]} {
    %c0_i32 = arith.constant 0 : i32
    %0 = arith.cmpi eq, %arg1, %c0_i32 : i32
    %1 = arith.extui %0 : i1 to i32
    %c0_i32_0 = arith.constant 0 : i32
    %2 = arith.cmpi ne, %1, %c0_i32_0 : i32
    scf.if %2 {
      %cst_9 = arith.constant 0.000000e+00 : f32
      %13 = vector.broadcast %cst_9 : f32 to vector<128x64xf32>
      %c0_10 = arith.constant 0 : index
      %c0_11 = arith.constant 0 : index
      %14 = vector.load %arg5[%c0_10, %c0_11] : memref<128x64xf32, #tpu.memory_space<vmem>>, vector<128x64xf32>
      tpu.vector_store %arg5[%c0_10, %c0_11], %13 {strides = array<i32>} : memref<128x64xf32, #tpu.memory_space<vmem>>, vector<128x64xf32>,
    } else {
    }
    %c0 = arith.constant 0 : index
    %c0_1 = arith.constant 0 : index
    %3 = vector.load %arg5[%c0, %c0_1] : memref<128x64xf32, #tpu.memory_space<vmem>>, vector<128x64xf32>
    %c0_2 = arith.constant 0 : index
    %c0_3 = arith.constant 0 : index
    %4 = vector.load %arg2[%c0_2, %c0_3] : memref<128x128xbf16, #tpu.memory_space<vmem>>, vector<128x128xbf16>
    %c0_4 = arith.constant 0 : index
    %c0_5 = arith.constant 0 : index
    %5 = vector.load %arg3[%c0_4, %c0_5] : memref<128x64xf32, #tpu.memory_space<vmem>>, vector<128x64xf32>
    %6 = arith.truncf %5 : vector<128x64xf32> to vector<128x64xbf16>
    %cst = arith.constant dense<0.000000e+00> : vector<128x64xf32>
    %7 = tpu.matmul %4, %6, %cst {dimension_numbers = #tpu.dot_dimension_numbers<[1], [0], [0], [1], [0, 0, 1, 1], [], []>} : vector<128x128xbf16>, vector<128x64xbf16>, vector<128x64xf32> -> vector<128x64xf32>
    %8 = arith.addf %3, %7 : vector<128x64xf32>
    %c0_6 = arith.constant 0 : index
    %c0_7 = arith.constant 0 : index
    %9 = vector.load %arg5[%c0_6, %c0_7] : memref<128x64xf32, #tpu.memory_space<vmem>>, vector<128x64xf32>
    tpu.vector_store %arg5[%c0_6, %c0_7], %8 {strides = array<i32>} : memref<128x64xf32, #tpu.memory_space<vmem>>, vector<128x64xf32>,
    %c1_i32 = arith.constant 1 : i32
    %10 = arith.cmpi eq, %arg1, %c1_i32 : i32
    %11 = arith.extui %10 : i1 to i32
    %c0_i32_8 = arith.constant 0 : i32
    %12 = arith.cmpi ne, %11, %c0_i32_8 : i32
    scf.if %12 {
      %c0_9 = arith.constant 0 : index
      %c0_10 = arith.constant 0 : index
      %13 = vector.load %arg5[%c0_9, %c0_10] : memref<128x64xf32, #tpu.memory_space<vmem>>, vector<128x64xf32>
      %cst_11 = arith.constant 0.000000e+00 : f32
      %14 = vector.broadcast %cst_11 : f32 to vector<128x64xf32>
      %15 = arith.maximumf %13, %14 : vector<128x64xf32>
      %c0_12 = arith.constant 0 : index
      %c0_13 = arith.constant 0 : index
      %16 = vector.load %arg4[%c0_12, %c0_13] : memref<128x64xf32, #tpu.memory_space<vmem>>, vector<128x64xf32>
      tpu.vector_store %arg4[%c0_12, %c0_13], %15 {strides = array<i32>} : memref<128x64xf32, #tpu.memory_space<vmem>>, vector<128x64xf32>,
    } else {
    }
    return
  }
  func.func @transform_0(%arg0: i32, %arg1: i32) -> (i32, i32) {
    %c0_i32 = arith.constant 0 : i32
    return %arg0, %arg1 : i32, i32
  }
  func.func @transform_1(%arg0: i32, %arg1: i32) -> (i32, i32) {
    %c0_i32 = arith.constant 0 : i32
    %c0_i32_0 = arith.constant 0 : i32
    return %arg1, %c0_i32 : i32, i32
  }
  func.func @transform_2(%arg0: i32, %arg1: i32) -> (i32, i32) {
    %c0_i32 = arith.constant 0 : i32
    %c0_i32_0 = arith.constant 0 : i32
    return %arg0, %c0_i32 : i32, i32
  }
}

module attributes {stable_mosaic.version = 11 : i64} {
  func.func @_linear_skip_kernel(%arg0: i32, %arg1: memref<128x64xf32, #tpu.memory_space<vmem>>, %arg2: memref<128x64xf32, #tpu.memory_space<vmem>>, %arg3: memref<64x32xf32, #tpu.memory_space<vmem>>, %arg4: memref<128x32xf32, #tpu.memory_space<vmem>>) attributes {dimension_semantics = [#tpu.dimension_semantics<parallel>], iteration_bounds = array<i64: 2>, scalar_prefetch = 0 : i64, scratch_operands = 0 : i64, tpu.core_type = #tpu.core_type<tc>, window_params = [{transform_indices = @transform_0, window_bounds = array<i64: 128, 64>}, {transform_indices = @transform_1, window_bounds = array<i64: 128, 64>}, {pipeline_mode = #tpu.pipeline_mode<synchronous>, transform_indices = @transform_2, window_bounds = array<i64: 64, 32>}, {transform_indices = @transform_3, window_bounds = array<i64: 128, 32>}]} {
    %c0 = arith.constant 0 : index
    %c0_0 = arith.constant 0 : index
    %0 = vector.load %arg1[%c0, %c0_0] : memref<128x64xf32, #tpu.memory_space<vmem>>, vector<128x64xf32>
    %c0_1 = arith.constant 0 : index
    %c0_2 = arith.constant 0 : index
    %1 = vector.load %arg2[%c0_1, %c0_2] : memref<128x64xf32, #tpu.memory_space<vmem>>, vector<128x64xf32>
    %2 = arith.addf %0, %1 : vector<128x64xf32>
    %3 = arith.truncf %2 : vector<128x64xf32> to vector<128x64xbf16>
    %c0_3 = arith.constant 0 : index
    %c0_4 = arith.constant 0 : index
    %4 = vector.load %arg3[%c0_3, %c0_4] : memref<64x32xf32, #tpu.memory_space<vmem>>, vector<64x32xf32>
    %5 = arith.truncf %4 : vector<64x32xf32> to vector<64x32xbf16>
    %cst = arith.constant dense<0.000000e+00> : vector<128x32xf32>
    %6 = tpu.matmul %3, %5, %cst {dimension_numbers = #tpu.dot_dimension_numbers<[1], [0], [0], [1], [0, 0, 1, 1], [], []>} : vector<128x64xbf16>, vector<64x32xbf16>, vector<128x32xf32> -> vector<128x32xf32>
    %c0_5 = arith.constant 0 : index
    %c0_6 = arith.constant 0 : index
    %7 = vector.load %arg4[%c0_5, %c0_6] : memref<128x32xf32, #tpu.memory_space<vmem>>, vector<128x32xf32>
    tpu.vector_store %arg4[%c0_5, %c0_6], %6 {strides = array<i32>} : memref<128x32xf32, #tpu.memory_space<vmem>>, vector<128x32xf32>,
    return
  }
  func.func @transform_0(%arg0: i32) -> (i32, i32) {
    %c0_i32 = arith.constant 0 : i32
    %c0_i32_0 = arith.constant 0 : i32
    return %arg0, %c0_i32 : i32, i32
  }
  func.func @transform_1(%arg0: i32) -> (i32, i32) {
    %c0_i32 = arith.constant 0 : i32
    %c0_i32_0 = arith.constant 0 : i32
    return %arg0, %c0_i32 : i32, i32
  }
  func.func @transform_2(%arg0: i32) -> (i32, i32) {
    %c0_i32 = arith.constant 0 : i32
    %c0_i32_0 = arith.constant 0 : i32
    %c0_i32_1 = arith.constant 0 : i32
    return %c0_i32, %c0_i32_0 : i32, i32
  }
  func.func @transform_3(%arg0: i32) -> (i32, i32) {
    %c0_i32 = arith.constant 0 : i32
    %c0_i32_0 = arith.constant 0 : i32
    return %arg0, %c0_i32 : i32, i32
  }
}

module attributes {stable_mosaic.version = 11 : i64} {
  func.func @_spmm_kernel(%arg0: i32, %arg1: i32, %arg2: memref<128x128xbf16, #tpu.memory_space<vmem>>, %arg3: memref<128x32xf32, #tpu.memory_space<vmem>>, %arg4: memref<128x32xf32, #tpu.memory_space<vmem>>, %arg5: memref<128x32xf32, #tpu.memory_space<vmem>>) attributes {dimension_semantics = [#tpu.dimension_semantics<parallel>, #tpu.dimension_semantics<arbitrary>], iteration_bounds = array<i64: 2, 2>, scalar_prefetch = 0 : i64, scratch_operands = 1 : i64, tpu.core_type = #tpu.core_type<tc>, window_params = [{transform_indices = @transform_0, window_bounds = array<i64: 128, 128>}, {transform_indices = @transform_1, window_bounds = array<i64: 128, 32>}, {transform_indices = @transform_2, window_bounds = array<i64: 128, 32>}]} {
    %c0_i32 = arith.constant 0 : i32
    %0 = arith.cmpi eq, %arg1, %c0_i32 : i32
    %1 = arith.extui %0 : i1 to i32
    %c0_i32_0 = arith.constant 0 : i32
    %2 = arith.cmpi ne, %1, %c0_i32_0 : i32
    scf.if %2 {
      %cst_9 = arith.constant 0.000000e+00 : f32
      %13 = vector.broadcast %cst_9 : f32 to vector<128x32xf32>
      %c0_10 = arith.constant 0 : index
      %c0_11 = arith.constant 0 : index
      %14 = vector.load %arg5[%c0_10, %c0_11] : memref<128x32xf32, #tpu.memory_space<vmem>>, vector<128x32xf32>
      tpu.vector_store %arg5[%c0_10, %c0_11], %13 {strides = array<i32>} : memref<128x32xf32, #tpu.memory_space<vmem>>, vector<128x32xf32>,
    } else {
    }
    %c0 = arith.constant 0 : index
    %c0_1 = arith.constant 0 : index
    %3 = vector.load %arg5[%c0, %c0_1] : memref<128x32xf32, #tpu.memory_space<vmem>>, vector<128x32xf32>
    %c0_2 = arith.constant 0 : index
    %c0_3 = arith.constant 0 : index
    %4 = vector.load %arg2[%c0_2, %c0_3] : memref<128x128xbf16, #tpu.memory_space<vmem>>, vector<128x128xbf16>
    %c0_4 = arith.constant 0 : index
    %c0_5 = arith.constant 0 : index
    %5 = vector.load %arg3[%c0_4, %c0_5] : memref<128x32xf32, #tpu.memory_space<vmem>>, vector<128x32xf32>
    %6 = arith.truncf %5 : vector<128x32xf32> to vector<128x32xbf16>
    %cst = arith.constant dense<0.000000e+00> : vector<128x32xf32>
    %7 = tpu.matmul %4, %6, %cst {dimension_numbers = #tpu.dot_dimension_numbers<[1], [0], [0], [1], [0, 0, 1, 1], [], []>} : vector<128x128xbf16>, vector<128x32xbf16>, vector<128x32xf32> -> vector<128x32xf32>
    %8 = arith.addf %3, %7 : vector<128x32xf32>
    %c0_6 = arith.constant 0 : index
    %c0_7 = arith.constant 0 : index
    %9 = vector.load %arg5[%c0_6, %c0_7] : memref<128x32xf32, #tpu.memory_space<vmem>>, vector<128x32xf32>
    tpu.vector_store %arg5[%c0_6, %c0_7], %8 {strides = array<i32>} : memref<128x32xf32, #tpu.memory_space<vmem>>, vector<128x32xf32>,
    %c1_i32 = arith.constant 1 : i32
    %10 = arith.cmpi eq, %arg1, %c1_i32 : i32
    %11 = arith.extui %10 : i1 to i32
    %c0_i32_8 = arith.constant 0 : i32
    %12 = arith.cmpi ne, %11, %c0_i32_8 : i32
    scf.if %12 {
      %c0_9 = arith.constant 0 : index
      %c0_10 = arith.constant 0 : index
      %13 = vector.load %arg5[%c0_9, %c0_10] : memref<128x32xf32, #tpu.memory_space<vmem>>, vector<128x32xf32>
      %cst_11 = arith.constant 0.000000e+00 : f32
      %14 = vector.broadcast %cst_11 : f32 to vector<128x32xf32>
      %15 = arith.maximumf %13, %14 : vector<128x32xf32>
      %c0_12 = arith.constant 0 : index
      %c0_13 = arith.constant 0 : index
      %16 = vector.load %arg4[%c0_12, %c0_13] : memref<128x32xf32, #tpu.memory_space<vmem>>, vector<128x32xf32>
      tpu.vector_store %arg4[%c0_12, %c0_13], %15 {strides = array<i32>} : memref<128x32xf32, #tpu.memory_space<vmem>>, vector<128x32xf32>,
    } else {
    }
    return
  }
  func.func @transform_0(%arg0: i32, %arg1: i32) -> (i32, i32) {
    %c0_i32 = arith.constant 0 : i32
    return %arg0, %arg1 : i32, i32
  }
  func.func @transform_1(%arg0: i32, %arg1: i32) -> (i32, i32) {
    %c0_i32 = arith.constant 0 : i32
    %c0_i32_0 = arith.constant 0 : i32
    return %arg1, %c0_i32 : i32, i32
  }
  func.func @transform_2(%arg0: i32, %arg1: i32) -> (i32, i32) {
    %c0_i32 = arith.constant 0 : i32
    %c0_i32_0 = arith.constant 0 : i32
    return %arg0, %c0_i32 : i32, i32
  }
}

module attributes {stable_mosaic.version = 11 : i64} {
  func.func @_linear_skip_kernel(%arg0: i32, %arg1: memref<128x32xf32, #tpu.memory_space<vmem>>, %arg2: memref<128x32xf32, #tpu.memory_space<vmem>>, %arg3: memref<32x80xf32, #tpu.memory_space<vmem>>, %arg4: memref<128x80xf32, #tpu.memory_space<vmem>>) attributes {dimension_semantics = [#tpu.dimension_semantics<parallel>], iteration_bounds = array<i64: 2>, scalar_prefetch = 0 : i64, scratch_operands = 0 : i64, tpu.core_type = #tpu.core_type<tc>, window_params = [{transform_indices = @transform_0, window_bounds = array<i64: 128, 32>}, {transform_indices = @transform_1, window_bounds = array<i64: 128, 32>}, {pipeline_mode = #tpu.pipeline_mode<synchronous>, transform_indices = @transform_2, window_bounds = array<i64: 32, 80>}, {transform_indices = @transform_3, window_bounds = array<i64: 128, 80>}]} {
    %c0 = arith.constant 0 : index
    %c0_0 = arith.constant 0 : index
    %0 = vector.load %arg1[%c0, %c0_0] : memref<128x32xf32, #tpu.memory_space<vmem>>, vector<128x32xf32>
    %c0_1 = arith.constant 0 : index
    %c0_2 = arith.constant 0 : index
    %1 = vector.load %arg2[%c0_1, %c0_2] : memref<128x32xf32, #tpu.memory_space<vmem>>, vector<128x32xf32>
    %2 = arith.addf %0, %1 : vector<128x32xf32>
    %3 = arith.truncf %2 : vector<128x32xf32> to vector<128x32xbf16>
    %c0_3 = arith.constant 0 : index
    %c0_4 = arith.constant 0 : index
    %4 = vector.load %arg3[%c0_3, %c0_4] : memref<32x80xf32, #tpu.memory_space<vmem>>, vector<32x80xf32>
    %5 = arith.truncf %4 : vector<32x80xf32> to vector<32x80xbf16>
    %cst = arith.constant dense<0.000000e+00> : vector<128x80xf32>
    %6 = tpu.matmul %3, %5, %cst {dimension_numbers = #tpu.dot_dimension_numbers<[1], [0], [0], [1], [0, 0, 1, 1], [], []>} : vector<128x32xbf16>, vector<32x80xbf16>, vector<128x80xf32> -> vector<128x80xf32>
    %c0_5 = arith.constant 0 : index
    %c0_6 = arith.constant 0 : index
    %7 = vector.load %arg4[%c0_5, %c0_6] : memref<128x80xf32, #tpu.memory_space<vmem>>, vector<128x80xf32>
    tpu.vector_store %arg4[%c0_5, %c0_6], %6 {strides = array<i32>} : memref<128x80xf32, #tpu.memory_space<vmem>>, vector<128x80xf32>,
    return
  }
  func.func @transform_0(%arg0: i32) -> (i32, i32) {
    %c0_i32 = arith.constant 0 : i32
    %c0_i32_0 = arith.constant 0 : i32
    return %arg0, %c0_i32 : i32, i32
  }
  func.func @transform_1(%arg0: i32) -> (i32, i32) {
    %c0_i32 = arith.constant 0 : i32
    %c0_i32_0 = arith.constant 0 : i32
    return %arg0, %c0_i32 : i32, i32
  }
  func.func @transform_2(%arg0: i32) -> (i32, i32) {
    %c0_i32 = arith.constant 0 : i32
    %c0_i32_0 = arith.constant 0 : i32
    %c0_i32_1 = arith.constant 0 : i32
    return %c0_i32, %c0_i32_0 : i32, i32
  }
  func.func @transform_3(%arg0: i32) -> (i32, i32) {
    %c0_i32 = arith.constant 0 : i32
    %c0_i32_0 = arith.constant 0 : i32
    return %arg0, %c0_i32 : i32, i32
  }
}

module attributes {stable_mosaic.version = 11 : i64} {
  func.func @_spmm_kernel(%arg0: i32, %arg1: i32, %arg2: memref<128x128xbf16, #tpu.memory_space<vmem>>, %arg3: memref<128x80xf32, #tpu.memory_space<vmem>>, %arg4: memref<128x80xf32, #tpu.memory_space<vmem>>, %arg5: memref<128x80xf32, #tpu.memory_space<vmem>>) attributes {dimension_semantics = [#tpu.dimension_semantics<parallel>, #tpu.dimension_semantics<arbitrary>], iteration_bounds = array<i64: 2, 2>, scalar_prefetch = 0 : i64, scratch_operands = 1 : i64, tpu.core_type = #tpu.core_type<tc>, window_params = [{transform_indices = @transform_0, window_bounds = array<i64: 128, 128>}, {transform_indices = @transform_1, window_bounds = array<i64: 128, 80>}, {transform_indices = @transform_2, window_bounds = array<i64: 128, 80>}]} {
    %c0_i32 = arith.constant 0 : i32
    %0 = arith.cmpi eq, %arg1, %c0_i32 : i32
    %1 = arith.extui %0 : i1 to i32
    %c0_i32_0 = arith.constant 0 : i32
    %2 = arith.cmpi ne, %1, %c0_i32_0 : i32
    scf.if %2 {
      %cst_9 = arith.constant 0.000000e+00 : f32
      %13 = vector.broadcast %cst_9 : f32 to vector<128x80xf32>
      %c0_10 = arith.constant 0 : index
      %c0_11 = arith.constant 0 : index
      %14 = vector.load %arg5[%c0_10, %c0_11] : memref<128x80xf32, #tpu.memory_space<vmem>>, vector<128x80xf32>
      tpu.vector_store %arg5[%c0_10, %c0_11], %13 {strides = array<i32>} : memref<128x80xf32, #tpu.memory_space<vmem>>, vector<128x80xf32>,
    } else {
    }
    %c0 = arith.constant 0 : index
    %c0_1 = arith.constant 0 : index
    %3 = vector.load %arg5[%c0, %c0_1] : memref<128x80xf32, #tpu.memory_space<vmem>>, vector<128x80xf32>
    %c0_2 = arith.constant 0 : index
    %c0_3 = arith.constant 0 : index
    %4 = vector.load %arg2[%c0_2, %c0_3] : memref<128x128xbf16, #tpu.memory_space<vmem>>, vector<128x128xbf16>
    %c0_4 = arith.constant 0 : index
    %c0_5 = arith.constant 0 : index
    %5 = vector.load %arg3[%c0_4, %c0_5] : memref<128x80xf32, #tpu.memory_space<vmem>>, vector<128x80xf32>
    %6 = arith.truncf %5 : vector<128x80xf32> to vector<128x80xbf16>
    %cst = arith.constant dense<0.000000e+00> : vector<128x80xf32>
    %7 = tpu.matmul %4, %6, %cst {dimension_numbers = #tpu.dot_dimension_numbers<[1], [0], [0], [1], [0, 0, 1, 1], [], []>} : vector<128x128xbf16>, vector<128x80xbf16>, vector<128x80xf32> -> vector<128x80xf32>
    %8 = arith.addf %3, %7 : vector<128x80xf32>
    %c0_6 = arith.constant 0 : index
    %c0_7 = arith.constant 0 : index
    %9 = vector.load %arg5[%c0_6, %c0_7] : memref<128x80xf32, #tpu.memory_space<vmem>>, vector<128x80xf32>
    tpu.vector_store %arg5[%c0_6, %c0_7], %8 {strides = array<i32>} : memref<128x80xf32, #tpu.memory_space<vmem>>, vector<128x80xf32>,
    %c1_i32 = arith.constant 1 : i32
    %10 = arith.cmpi eq, %arg1, %c1_i32 : i32
    %11 = arith.extui %10 : i1 to i32
    %c0_i32_8 = arith.constant 0 : i32
    %12 = arith.cmpi ne, %11, %c0_i32_8 : i32
    scf.if %12 {
      %c0_9 = arith.constant 0 : index
      %c0_10 = arith.constant 0 : index
      %13 = vector.load %arg5[%c0_9, %c0_10] : memref<128x80xf32, #tpu.memory_space<vmem>>, vector<128x80xf32>
      %cst_11 = arith.constant 0.000000e+00 : f32
      %14 = vector.broadcast %cst_11 : f32 to vector<128x80xf32>
      %15 = arith.maximumf %13, %14 : vector<128x80xf32>
      %c0_12 = arith.constant 0 : index
      %c0_13 = arith.constant 0 : index
      %16 = vector.load %arg4[%c0_12, %c0_13] : memref<128x80xf32, #tpu.memory_space<vmem>>, vector<128x80xf32>
      tpu.vector_store %arg4[%c0_12, %c0_13], %15 {strides = array<i32>} : memref<128x80xf32, #tpu.memory_space<vmem>>, vector<128x80xf32>,
    } else {
    }
    return
  }
  func.func @transform_0(%arg0: i32, %arg1: i32) -> (i32, i32) {
    %c0_i32 = arith.constant 0 : i32
    return %arg0, %arg1 : i32, i32
  }
  func.func @transform_1(%arg0: i32, %arg1: i32) -> (i32, i32) {
    %c0_i32 = arith.constant 0 : i32
    %c0_i32_0 = arith.constant 0 : i32
    return %arg1, %c0_i32 : i32, i32
  }
  func.func @transform_2(%arg0: i32, %arg1: i32) -> (i32, i32) {
    %c0_i32 = arith.constant 0 : i32
    %c0_i32_0 = arith.constant 0 : i32
    return %arg0, %c0_i32 : i32, i32
  }
}

module attributes {stable_mosaic.version = 11 : i64} {
  func.func @_linear_skip_kernel(%arg0: i32, %arg1: memref<128x80xf32, #tpu.memory_space<vmem>>, %arg2: memref<128x80xf32, #tpu.memory_space<vmem>>, %arg3: memref<80x128xf32, #tpu.memory_space<vmem>>, %arg4: memref<128x128xf32, #tpu.memory_space<vmem>>) attributes {dimension_semantics = [#tpu.dimension_semantics<parallel>], iteration_bounds = array<i64: 2>, scalar_prefetch = 0 : i64, scratch_operands = 0 : i64, tpu.core_type = #tpu.core_type<tc>, window_params = [{transform_indices = @transform_0, window_bounds = array<i64: 128, 80>}, {transform_indices = @transform_1, window_bounds = array<i64: 128, 80>}, {pipeline_mode = #tpu.pipeline_mode<synchronous>, transform_indices = @transform_2, window_bounds = array<i64: 80, 128>}, {transform_indices = @transform_3, window_bounds = array<i64: 128, 128>}]} {
    %c0 = arith.constant 0 : index
    %c0_0 = arith.constant 0 : index
    %0 = vector.load %arg1[%c0, %c0_0] : memref<128x80xf32, #tpu.memory_space<vmem>>, vector<128x80xf32>
    %c0_1 = arith.constant 0 : index
    %c0_2 = arith.constant 0 : index
    %1 = vector.load %arg2[%c0_1, %c0_2] : memref<128x80xf32, #tpu.memory_space<vmem>>, vector<128x80xf32>
    %2 = arith.addf %0, %1 : vector<128x80xf32>
    %3 = arith.truncf %2 : vector<128x80xf32> to vector<128x80xbf16>
    %c0_3 = arith.constant 0 : index
    %c0_4 = arith.constant 0 : index
    %4 = vector.load %arg3[%c0_3, %c0_4] : memref<80x128xf32, #tpu.memory_space<vmem>>, vector<80x128xf32>
    %5 = arith.truncf %4 : vector<80x128xf32> to vector<80x128xbf16>
    %cst = arith.constant dense<0.000000e+00> : vector<128x128xf32>
    %6 = tpu.matmul %3, %5, %cst {dimension_numbers = #tpu.dot_dimension_numbers<[1], [0], [0], [1], [0, 0, 1, 1], [], []>} : vector<128x80xbf16>, vector<80x128xbf16>, vector<128x128xf32> -> vector<128x128xf32>
    %c0_5 = arith.constant 0 : index
    %c0_6 = arith.constant 0 : index
    %7 = vector.load %arg4[%c0_5, %c0_6] : memref<128x128xf32, #tpu.memory_space<vmem>>, vector<128x128xf32>
    tpu.vector_store %arg4[%c0_5, %c0_6], %6 {strides = array<i32>} : memref<128x128xf32, #tpu.memory_space<vmem>>, vector<128x128xf32>,
    return
  }
  func.func @transform_0(%arg0: i32) -> (i32, i32) {
    %c0_i32 = arith.constant 0 : i32
    %c0_i32_0 = arith.constant 0 : i32
    return %arg0, %c0_i32 : i32, i32
  }
  func.func @transform_1(%arg0: i32) -> (i32, i32) {
    %c0_i32 = arith.constant 0 : i32
    %c0_i32_0 = arith.constant 0 : i32
    return %arg0, %c0_i32 : i32, i32
  }
  func.func @transform_2(%arg0: i32) -> (i32, i32) {
    %c0_i32 = arith.constant 0 : i32
    %c0_i32_0 = arith.constant 0 : i32
    %c0_i32_1 = arith.constant 0 : i32
    return %c0_i32, %c0_i32_0 : i32, i32
  }
  func.func @transform_3(%arg0: i32) -> (i32, i32) {
    %c0_i32 = arith.constant 0 : i32
    %c0_i32_0 = arith.constant 0 : i32
    return %arg0, %c0_i32 : i32, i32
  }
}

module attributes {stable_mosaic.version = 11 : i64} {
  func.func @_spmm_kernel(%arg0: i32, %arg1: i32, %arg2: memref<128x128xbf16, #tpu.memory_space<vmem>>, %arg3: memref<128x128xf32, #tpu.memory_space<vmem>>, %arg4: memref<128x128xf32, #tpu.memory_space<vmem>>, %arg5: memref<128x128xf32, #tpu.memory_space<vmem>>) attributes {dimension_semantics = [#tpu.dimension_semantics<parallel>, #tpu.dimension_semantics<arbitrary>], iteration_bounds = array<i64: 2, 2>, scalar_prefetch = 0 : i64, scratch_operands = 1 : i64, tpu.core_type = #tpu.core_type<tc>, window_params = [{transform_indices = @transform_0, window_bounds = array<i64: 128, 128>}, {transform_indices = @transform_1, window_bounds = array<i64: 128, 128>}, {transform_indices = @transform_2, window_bounds = array<i64: 128, 128>}]} {
    %c0_i32 = arith.constant 0 : i32
    %0 = arith.cmpi eq, %arg1, %c0_i32 : i32
    %1 = arith.extui %0 : i1 to i32
    %c0_i32_0 = arith.constant 0 : i32
    %2 = arith.cmpi ne, %1, %c0_i32_0 : i32
    scf.if %2 {
      %cst_9 = arith.constant 0.000000e+00 : f32
      %13 = vector.broadcast %cst_9 : f32 to vector<128x128xf32>
      %c0_10 = arith.constant 0 : index
      %c0_11 = arith.constant 0 : index
      %14 = vector.load %arg5[%c0_10, %c0_11] : memref<128x128xf32, #tpu.memory_space<vmem>>, vector<128x128xf32>
      tpu.vector_store %arg5[%c0_10, %c0_11], %13 {strides = array<i32>} : memref<128x128xf32, #tpu.memory_space<vmem>>, vector<128x128xf32>,
    } else {
    }
    %c0 = arith.constant 0 : index
    %c0_1 = arith.constant 0 : index
    %3 = vector.load %arg5[%c0, %c0_1] : memref<128x128xf32, #tpu.memory_space<vmem>>, vector<128x128xf32>
    %c0_2 = arith.constant 0 : index
    %c0_3 = arith.constant 0 : index
    %4 = vector.load %arg2[%c0_2, %c0_3] : memref<128x128xbf16, #tpu.memory_space<vmem>>, vector<128x128xbf16>
    %c0_4 = arith.constant 0 : index
    %c0_5 = arith.constant 0 : index
    %5 = vector.load %arg3[%c0_4, %c0_5] : memref<128x128xf32, #tpu.memory_space<vmem>>, vector<128x128xf32>
    %6 = arith.truncf %5 : vector<128x128xf32> to vector<128x128xbf16>
    %cst = arith.constant dense<0.000000e+00> : vector<128x128xf32>
    %7 = tpu.matmul %4, %6, %cst {dimension_numbers = #tpu.dot_dimension_numbers<[1], [0], [0], [1], [0, 0, 1, 1], [], []>} : vector<128x128xbf16>, vector<128x128xbf16>, vector<128x128xf32> -> vector<128x128xf32>
    %8 = arith.addf %3, %7 : vector<128x128xf32>
    %c0_6 = arith.constant 0 : index
    %c0_7 = arith.constant 0 : index
    %9 = vector.load %arg5[%c0_6, %c0_7] : memref<128x128xf32, #tpu.memory_space<vmem>>, vector<128x128xf32>
    tpu.vector_store %arg5[%c0_6, %c0_7], %8 {strides = array<i32>} : memref<128x128xf32, #tpu.memory_space<vmem>>, vector<128x128xf32>,
    %c1_i32 = arith.constant 1 : i32
    %10 = arith.cmpi eq, %arg1, %c1_i32 : i32
    %11 = arith.extui %10 : i1 to i32
    %c0_i32_8 = arith.constant 0 : i32
    %12 = arith.cmpi ne, %11, %c0_i32_8 : i32
    scf.if %12 {
      %c0_9 = arith.constant 0 : index
      %c0_10 = arith.constant 0 : index
      %13 = vector.load %arg5[%c0_9, %c0_10] : memref<128x128xf32, #tpu.memory_space<vmem>>, vector<128x128xf32>
      %cst_11 = arith.constant 0.000000e+00 : f32
      %14 = vector.broadcast %cst_11 : f32 to vector<128x128xf32>
      %15 = arith.maximumf %13, %14 : vector<128x128xf32>
      %c0_12 = arith.constant 0 : index
      %c0_13 = arith.constant 0 : index
      %16 = vector.load %arg4[%c0_12, %c0_13] : memref<128x128xf32, #tpu.memory_space<vmem>>, vector<128x128xf32>
      tpu.vector_store %arg4[%c0_12, %c0_13], %15 {strides = array<i32>} : memref<128x128xf32, #tpu.memory_space<vmem>>, vector<128x128xf32>,
    } else {
    }
    return
  }
  func.func @transform_0(%arg0: i32, %arg1: i32) -> (i32, i32) {
    %c0_i32 = arith.constant 0 : i32
    return %arg0, %arg1 : i32, i32
  }
  func.func @transform_1(%arg0: i32, %arg1: i32) -> (i32, i32) {
    %c0_i32 = arith.constant 0 : i32
    %c0_i32_0 = arith.constant 0 : i32
    return %arg1, %c0_i32 : i32, i32
  }
  func.func @transform_2(%arg0: i32, %arg1: i32) -> (i32, i32) {
    %c0_i32 = arith.constant 0 : i32
    %c0_i32_0 = arith.constant 0 : i32
    return %arg0, %c0_i32 : i32, i32
  }
}

module attributes {stable_mosaic.version = 11 : i64} {
  func.func @_linear_skip_kernel(%arg0: i32, %arg1: memref<128x128xf32, #tpu.memory_space<vmem>>, %arg2: memref<128x128xf32, #tpu.memory_space<vmem>>, %arg3: memref<128x128xf32, #tpu.memory_space<vmem>>, %arg4: memref<128x128xf32, #tpu.memory_space<vmem>>) attributes {dimension_semantics = [#tpu.dimension_semantics<parallel>], iteration_bounds = array<i64: 2>, scalar_prefetch = 0 : i64, scratch_operands = 0 : i64, tpu.core_type = #tpu.core_type<tc>, window_params = [{transform_indices = @transform_0, window_bounds = array<i64: 128, 128>}, {transform_indices = @transform_1, window_bounds = array<i64: 128, 128>}, {pipeline_mode = #tpu.pipeline_mode<synchronous>, transform_indices = @transform_2, window_bounds = array<i64: 128, 128>}, {transform_indices = @transform_3, window_bounds = array<i64: 128, 128>}]} {
    %c0 = arith.constant 0 : index
    %c0_0 = arith.constant 0 : index
    %0 = vector.load %arg1[%c0, %c0_0] : memref<128x128xf32, #tpu.memory_space<vmem>>, vector<128x128xf32>
    %c0_1 = arith.constant 0 : index
    %c0_2 = arith.constant 0 : index
    %1 = vector.load %arg2[%c0_1, %c0_2] : memref<128x128xf32, #tpu.memory_space<vmem>>, vector<128x128xf32>
    %2 = arith.addf %0, %1 : vector<128x128xf32>
    %3 = arith.truncf %2 : vector<128x128xf32> to vector<128x128xbf16>
    %c0_3 = arith.constant 0 : index
    %c0_4 = arith.constant 0 : index
    %4 = vector.load %arg3[%c0_3, %c0_4] : memref<128x128xf32, #tpu.memory_space<vmem>>, vector<128x128xf32>
    %5 = arith.truncf %4 : vector<128x128xf32> to vector<128x128xbf16>
    %cst = arith.constant dense<0.000000e+00> : vector<128x128xf32>
    %6 = tpu.matmul %3, %5, %cst {dimension_numbers = #tpu.dot_dimension_numbers<[1], [0], [0], [1], [0, 0, 1, 1], [], []>} : vector<128x128xbf16>, vector<128x128xbf16>, vector<128x128xf32> -> vector<128x128xf32>
    %c0_5 = arith.constant 0 : index
    %c0_6 = arith.constant 0 : index
    %7 = vector.load %arg4[%c0_5, %c0_6] : memref<128x128xf32, #tpu.memory_space<vmem>>, vector<128x128xf32>
    tpu.vector_store %arg4[%c0_5, %c0_6], %6 {strides = array<i32>} : memref<128x128xf32, #tpu.memory_space<vmem>>, vector<128x128xf32>,
    return
  }
  func.func @transform_0(%arg0: i32) -> (i32, i32) {
    %c0_i32 = arith.constant 0 : i32
    %c0_i32_0 = arith.constant 0 : i32
    return %arg0, %c0_i32 : i32, i32
  }
  func.func @transform_1(%arg0: i32) -> (i32, i32) {
    %c0_i32 = arith.constant 0 : i32
    %c0_i32_0 = arith.constant 0 : i32
    return %arg0, %c0_i32 : i32, i32
  }
  func.func @transform_2(%arg0: i32) -> (i32, i32) {
    %c0_i32 = arith.constant 0 : i32
    %c0_i32_0 = arith.constant 0 : i32
    %c0_i32_1 = arith.constant 0 : i32
    return %c0_i32, %c0_i32_0 : i32, i32
  }
  func.func @transform_3(%arg0: i32) -> (i32, i32) {
    %c0_i32 = arith.constant 0 : i32
    %c0_i32_0 = arith.constant 0 : i32
    return %arg0, %c0_i32 : i32, i32
  }
}

module attributes {stable_mosaic.version = 11 : i64} {
  func.func @_spmm_kernel(%arg0: i32, %arg1: i32, %arg2: memref<128x128xbf16, #tpu.memory_space<vmem>>, %arg3: memref<128x128xf32, #tpu.memory_space<vmem>>, %arg4: memref<128x128xf32, #tpu.memory_space<vmem>>, %arg5: memref<128x128xf32, #tpu.memory_space<vmem>>) attributes {dimension_semantics = [#tpu.dimension_semantics<parallel>, #tpu.dimension_semantics<arbitrary>], iteration_bounds = array<i64: 2, 2>, scalar_prefetch = 0 : i64, scratch_operands = 1 : i64, tpu.core_type = #tpu.core_type<tc>, window_params = [{transform_indices = @transform_0, window_bounds = array<i64: 128, 128>}, {transform_indices = @transform_1, window_bounds = array<i64: 128, 128>}, {transform_indices = @transform_2, window_bounds = array<i64: 128, 128>}]} {
    %c0_i32 = arith.constant 0 : i32
    %0 = arith.cmpi eq, %arg1, %c0_i32 : i32
    %1 = arith.extui %0 : i1 to i32
    %c0_i32_0 = arith.constant 0 : i32
    %2 = arith.cmpi ne, %1, %c0_i32_0 : i32
    scf.if %2 {
      %cst_9 = arith.constant 0.000000e+00 : f32
      %13 = vector.broadcast %cst_9 : f32 to vector<128x128xf32>
      %c0_10 = arith.constant 0 : index
      %c0_11 = arith.constant 0 : index
      %14 = vector.load %arg5[%c0_10, %c0_11] : memref<128x128xf32, #tpu.memory_space<vmem>>, vector<128x128xf32>
      tpu.vector_store %arg5[%c0_10, %c0_11], %13 {strides = array<i32>} : memref<128x128xf32, #tpu.memory_space<vmem>>, vector<128x128xf32>,
    } else {
    }
    %c0 = arith.constant 0 : index
    %c0_1 = arith.constant 0 : index
    %3 = vector.load %arg5[%c0, %c0_1] : memref<128x128xf32, #tpu.memory_space<vmem>>, vector<128x128xf32>
    %c0_2 = arith.constant 0 : index
    %c0_3 = arith.constant 0 : index
    %4 = vector.load %arg2[%c0_2, %c0_3] : memref<128x128xbf16, #tpu.memory_space<vmem>>, vector<128x128xbf16>
    %c0_4 = arith.constant 0 : index
    %c0_5 = arith.constant 0 : index
    %5 = vector.load %arg3[%c0_4, %c0_5] : memref<128x128xf32, #tpu.memory_space<vmem>>, vector<128x128xf32>
    %6 = arith.truncf %5 : vector<128x128xf32> to vector<128x128xbf16>
    %cst = arith.constant dense<0.000000e+00> : vector<128x128xf32>
    %7 = tpu.matmul %4, %6, %cst {dimension_numbers = #tpu.dot_dimension_numbers<[1], [0], [0], [1], [0, 0, 1, 1], [], []>} : vector<128x128xbf16>, vector<128x128xbf16>, vector<128x128xf32> -> vector<128x128xf32>
    %8 = arith.addf %3, %7 : vector<128x128xf32>
    %c0_6 = arith.constant 0 : index
    %c0_7 = arith.constant 0 : index
    %9 = vector.load %arg5[%c0_6, %c0_7] : memref<128x128xf32, #tpu.memory_space<vmem>>, vector<128x128xf32>
    tpu.vector_store %arg5[%c0_6, %c0_7], %8 {strides = array<i32>} : memref<128x128xf32, #tpu.memory_space<vmem>>, vector<128x128xf32>,
    %c1_i32 = arith.constant 1 : i32
    %10 = arith.cmpi eq, %arg1, %c1_i32 : i32
    %11 = arith.extui %10 : i1 to i32
    %c0_i32_8 = arith.constant 0 : i32
    %12 = arith.cmpi ne, %11, %c0_i32_8 : i32
    scf.if %12 {
      %c0_9 = arith.constant 0 : index
      %c0_10 = arith.constant 0 : index
      %13 = vector.load %arg5[%c0_9, %c0_10] : memref<128x128xf32, #tpu.memory_space<vmem>>, vector<128x128xf32>
      %14 = tpu.iota {dimensions = array<i32: 1>} : vector<128x128xi32>
      %c5_i32 = arith.constant 5 : i32
      %15 = vector.broadcast %c5_i32 : i32 to vector<128x128xi32>
      %16 = arith.cmpi slt, %14, %15 : vector<128x128xi32>
      %cst_11 = arith.constant -1.000000e+30 : f32
      %17 = vector.broadcast %cst_11 : f32 to vector<128x128xf32>
      %18 = arith.select %16, %13, %17 : vector<128x128xi1>, vector<128x128xf32>
      %cst_12 = arith.constant dense<0xFF800000> : vector<128xf32>
      %19 = vector.multi_reduction <maximumf>, %18, %cst_12 [1] : vector<128x128xf32> to vector<128xf32>
      %20 = vector.shape_cast %19 : vector<128xf32> to vector<128x1xf32>
      %21 = vector.broadcast %20 : vector<128x1xf32> to vector<128x128xf32>
      %22 = arith.subf %18, %21 : vector<128x128xf32>
      %23 = math.exp %22 : vector<128x128xf32>
      %cst_13 = arith.constant 0.000000e+00 : f32
      %24 = vector.broadcast %cst_13 : f32 to vector<128x128xf32>
      %25 = arith.select %16, %23, %24 : vector<128x128xi1>, vector<128x128xf32>
      %cst_14 = arith.constant dense<0.000000e+00> : vector<128xf32>
      %26 = vector.multi_reduction <add>, %25, %cst_14 [1] : vector<128x128xf32> to vector<128xf32>
      %27 = vector.shape_cast %26 : vector<128xf32> to vector<128x1xf32>
      %28 = math.log %27 : vector<128x1xf32>
      %29 = arith.addf %20, %28 : vector<128x1xf32>
      %30 = vector.broadcast %29 : vector<128x1xf32> to vector<128x128xf32>
      %31 = arith.subf %13, %30 : vector<128x128xf32>
      %cst_15 = arith.constant 0.000000e+00 : f32
      %32 = vector.broadcast %cst_15 : f32 to vector<128x128xf32>
      %33 = arith.select %16, %31, %32 : vector<128x128xi1>, vector<128x128xf32>
      %c0_16 = arith.constant 0 : index
      %c0_17 = arith.constant 0 : index
      %34 = vector.load %arg4[%c0_16, %c0_17] : memref<128x128xf32, #tpu.memory_space<vmem>>, vector<128x128xf32>
      tpu.vector_store %arg4[%c0_16, %c0_17], %33 {strides = array<i32>} : memref<128x128xf32, #tpu.memory_space<vmem>>, vector<128x128xf32>,
    } else {
    }
    return
  }
  func.func @transform_0(%arg0: i32, %arg1: i32) -> (i32, i32) {
    %c0_i32 = arith.constant 0 : i32
    return %arg0, %arg1 : i32, i32
  }
  func.func @transform_1(%arg0: i32, %arg1: i32) -> (i32, i32) {
    %c0_i32 = arith.constant 0 : i32
    %c0_i32_0 = arith.constant 0 : i32
    return %arg1, %c0_i32 : i32, i32
  }
  func.func @transform_2(%arg0: i32, %arg1: i32) -> (i32, i32) {
    %c0_i32 = arith.constant 0 : i32
    %c0_i32_0 = arith.constant 0 : i32
    return %arg0, %c0_i32 : i32, i32
  }
}

</mosaic_0001>

<bundles_post_ra>
// kernel: tsdcn_forward.12
= control target key start
LH: loop header
LB: loop body
LE: loop exit
PB: predicated region body
PF: predicated region fallthrough
CT: control target
= control target key end

     0   :  { %s465_s9 = smov 0   ;;  %s567_s0 = inlined_call_operand.vmem [shape: f32[256,48], index: 0, kind: input, shape index: {}]   ;;  %s568_s1 = inlined_call_operand.vmem [shape: f32[48,64], index: 1, kind: input, shape index: {}]   ;;  %s569_s2 = inlined_call_operand.vmem [shape: f32[256,64], index: 2, kind: output, shape index: {}]  }
   0x1 LB: > { %s376_s10 = sadd.s32 4294967295, %s448_s9   ;;  %p380_p0 = scmp.ge.s32.totalorder %s448_s9, 1  ;;  %s448_s9 = sphi %s465_s9, %s12_s9  }
   0x2   : > { %p113_p1 = scmp.lt.s32.totalorder %s448_s9, 3 }
   0x4   : > { %p114_p2 = pnand %p380_p0, %p113_p1 }
   0x5   : > { %v172_v0 = vld [vmem:[%s568_s1] sm:$0xff] (!%p114_p2)  ;;  %v173_v1 = vld [vmem:[%s568_s1 + $0x8] sm:$0xff] (!%p114_p2)  ;;  %v174_v2 = vld [vmem:[%s568_s1 + $0x10] sm:$0xff] (!%p114_p2)  ;;  %s381_s17 = sshll.u32 (!%p114_p2), %s376_s10, 4  ;;  %vm181_vm0 = vcmask (!%p114_p2), 392192   ;;  %vm303_vm1 = vcmask (!%p114_p2), 523264  }
   0x6   : > { %117 = sbr.rel (%p114_p2) target bundleno = 245 (0xf5), region = 28  ;;  %v178_v3 = vpack.c.bf16 (!%p114_p2), %v173_v1, %v172_v0  ;;  %v175_v4 = vld [vmem:[%s568_s1 + $0x18] sm:$0xff] (!%p114_p2)  ;;  %p136_p3 = scmp.lt.s32.totalorder (!%p114_p2), %s381_s17, 31  ;;  %v176_v6 = vld [vmem:[%s568_s1 + $0x20] sm:$0xff] (!%p114_p2)  ;;  %v177_v7 = vld [vmem:[%s568_s1 + $0x28] sm:$0xff] (!%p114_p2) }
   0x7   : > { %v179_v5 = vpack.c.bf16 (!%p114_p2), %v175_v4, %v174_v2  ;;  %v180_v8 = vpack.c.bf16 (!%p114_p2), %v177_v7, %v176_v6 }
   0x8   : > { %406 = vmatprep.subr.bf16.mxu0 (!%p114_p2), %v178_v3  ;;  %428 = vmatprep.subr.bf16.mxu1 (!%p114_p2), %v178_v3 }
   0x9   : > { %407 = vmatpush3.bf16.msra.mxu0 (!%p114_p2), %v178_v3  ;;  %431 = vmatpush3.bf16.msra.mxu1 (!%p114_p2), %v178_v3 }
   0xa   : > { %408 = vmatprep.subr.bf16.mxu0 (!%p114_p2), %v179_v5  ;;  %429 = vmatprep.subr.bf16.mxu1 (!%p114_p2), %v179_v5 }
   0xd   : > { %s571_s17 = smov (!%p136_p3, %s381_s17), 31  ;;  %409 = vmatpush3.bf16.msra.mxu0 %v179_v5  ;;  %432 = vmatpush3.bf16.msra.mxu1 %v179_v5 }
   0xe   : > { %s382_s24 = sshll.u32 %s571_s17, 3  ;;  %410 = vmatprep.subr.bf16.mxu0 %v180_v8  ;;  %430 = vmatprep.subr.bf16.mxu1 %v180_v8 }
   0xf   : > { %s499_s27 = scalar_lea.vmem %s567_s0, %s382_s24  ;;  %s530_s30 = scalar_lea.vmem %s569_s2, %s382_s24 }
  0x10   : > { %v148_v9 = vld [vmem:[%s499_s27] sm:$0xff]  ;;  %v149_v10 = vld [vmem:[%s499_s27 + $0x8] sm:$0xff]  ;;  %v150_v14 = vld [vmem:[%s499_s27 + $0x10] sm:$0xff] }
  0x11   : > { %v156_v11 = vld [vmem:[%s499_s27 + $0x40] sm:$0xff]  ;;  %v164_v12 = vpack.c.bf16 %v149_v10, %v148_v9  ;;  %v157_v13 = vld [vmem:[%s499_s27 + $0x48] sm:$0xff]  ;;  %v151_v15 = vld [vmem:[%s499_s27 + $0x18] sm:$0xff]  ;;  %411 = vmatpush3.bf16.msra.mxu0 %v180_v8  ;;  %433 = vmatpush3.bf16.msra.mxu1 %v180_v8 }
  0x12   : > { %v168_v16 = vpack.c.bf16 %v157_v13, %v156_v11  ;;  %v158_v17 = vld [vmem:[%s499_s27 + $0x50] sm:$0xff]  ;;  %v159_v18 = vld [vmem:[%s499_s27 + $0x58] sm:$0xff]  ;;  %v152_v19 = vld [vmem:[%s499_s27 + $0x20] sm:$0xff]  ;;  %v165_v23 = vpack.c.bf16 %v151_v15, %v150_v14 }
  0x13   : > { %412 = vmatprep.mubr.msk.bf16.mxu0 %vm181_vm0, %v164_v12  ;;  %v153_v20 = vld [vmem:[%s499_s27 + $0x28] sm:$0xff]  ;;  %v160_v21 = vld [vmem:[%s499_s27 + $0x60] sm:$0xff]  ;;  %v169_v24 = vpack.c.bf16 %v159_v18, %v158_v17  ;;  %v154_v27 = vld [vmem:[%s499_s27 + $0x30] sm:$0xff] }
  0x14   : > { %v161_v22 = vld [vmem:[%s499_s27 + $0x68] sm:$0xff]  ;;  %420 = vmatprep.mubr.msk.bf16.mxu1 %vm181_vm0, %v168_v16  ;;  %v166_v25 = vpack.c.bf16 %v153_v20, %v152_v19  ;;  %413 = vmatmul.mubr.msk.bf16.vlgmr.msra.gmra.mrb[0].mxu0 %vm181_vm0, %v165_v23  ;;  %v155_v28 = vld [vmem:[%s499_s27 + $0x38] sm:$0xff]  ;;  %v162_v29 = vld [vmem:[%s499_s27 + $0x70] sm:$0xff] }
  0x15   : > { %v170_v26 = vpack.c.bf16 %v161_v22, %v160_v21  ;;  %421 = vmatmul.mubr.msk.bf16.vlgmr.msra.gmra.mrb[0].mxu1 %vm181_vm0, %v169_v24  ;;  %v163_v30 = vld [vmem:[%s499_s27 + $0x78] sm:$0xff]  ;;  %v167_v31 = vpack.c.bf16 %v155_v28, %v154_v27 }
  0x16   : > { %416 = vmatprep.mubr.msk.bf16.mxu0 %vm181_vm0, %v166_v25  ;;  %v171_v32 = vpack.c.bf16 %v163_v30, %v162_v29 }
  0x17   : > { %424 = vmatprep.mubr.msk.bf16.mxu1 %vm181_vm0, %v170_v26 }
  0x1c   : > { %417 = vmatmul.mubr.msk.bf16.gmra.mrb[4].mxu0 %vm181_vm0, %v167_v31 }
  0x1d   : > { %425 = vmatmul.mubr.msk.bf16.gmra.mrb[4].mxu1 %vm181_vm0, %v171_v32 }
  0xe7   : > { %v414_v33 = vpop.f32.mrb[0].mxu0 }
  0xe8   : > { %v422_v34 = vpop.f32.mrb[0].mxu1  ;;  %306 = vst.msk [vmem:[%s530_s30 + $0x10] sm:$0xff] %vm303_vm1, %v414_v33  ;;  %v240_v35 = vpop.f32.mrb[1].mxu0 }
  0xe9   : > { %314 = vst.msk [vmem:[%s530_s30 + $0x50] sm:$0xff] %vm303_vm1, %v422_v34  ;;  %v272_v36 = vpop.f32.mrb[1].mxu1  ;;  %304 = vst.msk [vmem:[%s530_s30] sm:$0xff] %vm303_vm1, %v240_v35  ;;  %v415_v37 = vpop.f32.mrb[2].mxu0 }
  0xea   : > { %312 = vst.msk [vmem:[%s530_s30 + $0x40] sm:$0xff] %vm303_vm1, %v272_v36  ;;  %v423_v38 = vpop.f32.mrb[2].mxu1  ;;  %307 = vst.msk [vmem:[%s530_s30 + $0x18] sm:$0xff] %vm303_vm1, %v415_v37  ;;  %v243_v39 = vpop.f32.mrb[3].mxu0 }
  0xeb   : > { %315 = vst.msk [vmem:[%s530_s30 + $0x58] sm:$0xff] %vm303_vm1, %v423_v38  ;;  %v275_v40 = vpop.f32.mrb[3].mxu1  ;;  %305 = vst.msk [vmem:[%s530_s30 + $0x8] sm:$0xff] %vm303_vm1, %v243_v39 }
  0xec   : > { %313 = vst.msk [vmem:[%s530_s30 + $0x48] sm:$0xff] %vm303_vm1, %v275_v40 }
  0xef   : > { %v418_v41 = vpop.f32.mrb[4].mxu0 }
  0xf0   : > { %v426_v42 = vpop.f32.mrb[4].mxu1  ;;  %310 = vst.msk [vmem:[%s530_s30 + $0x30] sm:$0xff] %vm303_vm1, %v418_v41  ;;  %v256_v43 = vpop.f32.mrb[5].mxu0 }
  0xf1   : > { %318 = vst.msk [vmem:[%s530_s30 + $0x70] sm:$0xff] %vm303_vm1, %v426_v42  ;;  %v288_v44 = vpop.f32.mrb[5].mxu1  ;;  %308 = vst.msk [vmem:[%s530_s30 + $0x20] sm:$0xff] %vm303_vm1, %v256_v43  ;;  %v419_v45 = vpop.f32.mrb[6].mxu0 }
  0xf2   : > { %316 = vst.msk [vmem:[%s530_s30 + $0x60] sm:$0xff] %vm303_vm1, %v288_v44  ;;  %v427_v46 = vpop.f32.mrb[6].mxu1  ;;  %311 = vst.msk [vmem:[%s530_s30 + $0x38] sm:$0xff] %vm303_vm1, %v419_v45  ;;  %v259_v47 = vpop.f32.mrb[7].mxu0 }
  0xf3   : > { %319 = vst.msk [vmem:[%s530_s30 + $0x78] sm:$0xff] %vm303_vm1, %v427_v46  ;;  %v291_v48 = vpop.f32.mrb[7].mxu1  ;;  %309 = vst.msk [vmem:[%s530_s30 + $0x28] sm:$0xff] %vm303_vm1, %v259_v47 }
  0xf4   : > { %317 = vst.msk [vmem:[%s530_s30 + $0x68] sm:$0xff] %vm303_vm1, %v291_v48 }
  0xf5 PF: > { %s12_s9 = sadd.s32 1, %s448_s9  }
  0xf6   : > { %p9_p4 = scmp.ge.s32.totalorder %s12_s9, 4  }
  0xf8   :  { %11 = sbr.rel (!%p9_p4) target bundleno = 1 (0x1), region = 58 }

// kernel: tsdcn_forward.13
= control target key start
LH: loop header
LB: loop body
LE: loop exit
PB: predicated region body
PF: predicated region fallthrough
CT: control target
= control target key end

     0   :  { %s910_s9 = smov 0   ;;  %s912_s10 = smov 0   ;;  %s1116_s0 = inlined_call_operand.vmem [shape: bf16[256,256], index: 0, kind: input, shape index: {}]   ;;  %s1117_s1 = inlined_call_operand.vmem [shape: f32[256,64], index: 1, kind: input, shape index: {}]   ;;  %s1118_s2 = inlined_call_operand.vmem [shape: f32[256,64], index: 2, kind: output, shape index: {}]  }
   0x1   :  { %s914_s11 = smov 0   ;;  %s916_s12 = smov 0  }
   0x2   :  { %s918_s13 = smov 0   ;;  %s920_s14 = smov 0  }
   0x3   :  { %s922_s15 = smov 0  }
   0x4 LB: > { %s21_s16 = sadd.s32 1, %s884_s13  ;;  %s24_s17 = sadd.s32 1, %s888_s14  ;;  %s892_s15 = sphi %s922_s15, %s12_s15   ;;  %s888_s14 = sphi %s920_s14, %s1124_s14   ;;  %s884_s13 = sphi %s918_s13, %s1123_s13   ;;  %s880_s12 = sphi %s916_s12, %s1122_s12   ;;  %s876_s11 = sphi %s914_s11, %s1121_s11   ;;  %s872_s10 = sphi %s912_s10, %s1120_s10   ;;  %s868_s9 = sphi %s910_s9, %s1119_s9  }
   0x5   : > { %p22_p0 = scmp.ge.s32.totalorder %s21_s16, 2  ;;  %p40_p1 = scmp.ne.s32.totalorder %s872_s10, %s868_s9 }
   0x6   : > { %p41_p2 = scmp.eq.s32.totalorder %s892_s15, 0  ;;  %s33_s21 = sadd.s32 1, %s872_s10 }
   0x7   : > { %s1126_s16 = smov (%p22_p0, %s21_s16), 0  ;;  %s1128_s17 = smov (!%p22_p0, %s24_s17), %s888_s14 }
   0x8   : > { %p42_p3 = por %p41_p2, %p40_p1  ;;  %p26_p4 = scmp.ge.s32.totalorder %s1128_s17, 2 }
   0x9   : > { %s29_s18 = ssub.s32 %s884_s13, %s1126_s16  ;;  %p685_p6 = scmp.ge.s32.totalorder %s892_s15, 4 }
   0xa   : > { %s1130_s17 = smov (%p26_p4, %s1128_s17), 0 }
   0xb   : > { %s28_s19 = ssub.s32 %s888_s14, %s1130_s17  ;;  %118 = sbr.rel (%p685_p6) target bundleno = 34 (0x22), region = 16 }
   0xc   : > { %s30_s20 = sor.u32 %s29_s18, %s28_s19 }
   0xd   : > { %p31_p5 = scmp.eq.s32.totalorder %s30_s20, 0 }
   0xf   : > { %s961_s22 = scalar_select %p31_p5, %s872_s10, %s33_s21  }
  0x12   : > { %121 = sbr.rel (!%p42_p3) target bundleno = 34 (0x22), region = 20  ;;  %s123_s23 = sand.u32 (%p42_p3), 1, %s872_s10  }
  0x13   : > { %s708_s24 = sshll.u32 (%p42_p3), %s888_s14, 5  ;;  %s686_s25 = sshll.u32 (%p42_p3), %s123_s23, 6 }
  0x14   : > { %s128_s26 = sadd.s32 (%p42_p3), %s884_s13, %s708_s24  ;;  %s125_s3 = scalar_lea.vmem (%p42_p3), [#allocation3], %s686_s25 }
  0x15   : > { %s689_s27 = sshll.u32 (%p42_p3), %s128_s26, 2 }
  0x16   : > { %s970_s30 = scalar_lea.vmem (%p42_p3), %s1116_s0, %s689_s27 }
  0x17   : > { %v146_v0 = vld [vmem:[%s970_s30] sm:$0xf] (%p42_p3)  ;;  %v148_v1 = vld [vmem:[%s970_s30 + $0x8] sm:$0xf] (%p42_p3)  ;;  %v150_v2 = vld [vmem:[%s970_s30 + $0x10] sm:$0xf] (%p42_p3) }
  0x18   : > { %147 = vst [vmem:[%s125_s3] sm:$0xf] (%p42_p3), %v146_v0  ;;  %149 = vst [vmem:[%s125_s3 + $0x4] sm:$0xf] (%p42_p3), %v148_v1  ;;  %v152_v3 = vld [vmem:[%s970_s30 + $0x18] sm:$0xf] (%p42_p3) }
  0x19   : > { %151 = vst [vmem:[%s125_s3 + $0x8] sm:$0xf] %v150_v2  ;;  %v154_v4 = vld [vmem:[%s970_s30 + $0x20] sm:$0xf]  ;;  %v156_v5 = vld [vmem:[%s970_s30 + $0x28] sm:$0xf] }
  0x1a   : > { %153 = vst [vmem:[%s125_s3 + $0xc] sm:$0xf] %v152_v3  ;;  %155 = vst [vmem:[%s125_s3 + $0x10] sm:$0xf] %v154_v4  ;;  %v158_v6 = vld [vmem:[%s970_s30 + $0x30] sm:$0xf] }
  0x1b   : > { %157 = vst [vmem:[%s125_s3 + $0x14] sm:$0xf] %v156_v5  ;;  %v160_v7 = vld [vmem:[%s970_s30 + $0x38] sm:$0xf]  ;;  %v162_v8 = vld [vmem:[%s970_s30 + $0x40] sm:$0xf] }
  0x1c   : > { %159 = vst [vmem:[%s125_s3 + $0x18] sm:$0xf] %v158_v6  ;;  %161 = vst [vmem:[%s125_s3 + $0x1c] sm:$0xf] %v160_v7  ;;  %v164_v9 = vld [vmem:[%s970_s30 + $0x48] sm:$0xf] }
  0x1d   : > { %163 = vst [vmem:[%s125_s3 + $0x20] sm:$0xf] %v162_v8  ;;  %v166_v10 = vld [vmem:[%s970_s30 + $0x50] sm:$0xf]  ;;  %v168_v11 = vld [vmem:[%s970_s30 + $0x58] sm:$0xf] }
  0x1e   : > { %165 = vst [vmem:[%s125_s3 + $0x24] sm:$0xf] %v164_v9  ;;  %167 = vst [vmem:[%s125_s3 + $0x28] sm:$0xf] %v166_v10  ;;  %v170_v12 = vld [vmem:[%s970_s30 + $0x60] sm:$0xf] }
  0x1f   : > { %169 = vst [vmem:[%s125_s3 + $0x2c] sm:$0xf] %v168_v11  ;;  %v172_v13 = vld [vmem:[%s970_s30 + $0x68] sm:$0xf]  ;;  %v174_v14 = vld [vmem:[%s970_s30 + $0x70] sm:$0xf] }
  0x20   : > { %171 = vst [vmem:[%s125_s3 + $0x30] sm:$0xf] %v170_v12  ;;  %173 = vst [vmem:[%s125_s3 + $0x34] sm:$0xf] %v172_v13  ;;  %v176_v15 = vld [vmem:[%s970_s30 + $0x78] sm:$0xf] }
  0x21   : > { %175 = vst [vmem:[%s125_s3 + $0x38] sm:$0xf] %v174_v14  ;;  %177 = vst [vmem:[%s125_s3 + $0x3c] sm:$0xf] %v176_v15 }
  0x22 PF: > { %p690_p7 = scmp.ge.s32.totalorder %s892_s15, 1  ;;  %p240_p8 = scmp.lt.s32.totalorder %s892_s15, 5 }
  0x24   : > { %p241_p9 = pnand %p690_p7, %p240_p8 }
  0x25   : > { %s247_s4 = sand.u32 (!%p241_p9), 1, %s868_s9   ;;  %s692_s5 = sshll.u32 (!%p241_p9), %s876_s11, 4 }
  0x26   : > { %244 = sbr.rel (%p241_p9) target bundleno = 327 (0x147), region = 65  ;;  %s691_s6 = sshll.u32 (!%p241_p9), %s247_s4, 6 }
  0x27   : > { %p275_p10 = scmp.lt.s32.totalorder (!%p241_p9), %s692_s5, 31  ;;  %s694_s7 = sshll.u32 (!%p241_p9), %s880_s12, 4 }
  0x28   : > { %p281_p11 = scmp.lt.s32.totalorder (!%p241_p9), %s694_s7, 31  ;;  %s1003_s9 = scalar_lea.vmem (!%p241_p9), [#allocation3], %s691_s6 }
  0x29   : > { %p696_p12 = scmp.ne.s32.totalorder (!%p241_p9), %s876_s11, 0 }
  0x2d   : > { %s1132_s5 = smov (!%p275_p10, %s692_s5), 31  ;;  %s1134_s7 = smov (!%p281_p11, %s694_s7), 31 }
  0x2e   : > { %s693_s8 = sshll.u32 %s1132_s5, 3  ;;  %s695_s21 = sshll.u32 %s1134_s7, 3  ;;  %vm291_vm0 = vcmask (!%p696_p12), 523264   ;;  %v894_v16 = vmov (!%p696_p12), 0.0  }
  0x2f   : > { %s996_s20 = scalar_lea.vmem %s1117_s1, %s693_s8  ;;  %s1001_s25 = scalar_lea.vmem %s1118_s2, %s695_s21  ;;  %292 = vst.msk [vmem:[#allocation2] sm:$0xff] (!%p696_p12), %vm291_vm0, %v894_v16  ;;  %293 = vst.msk [vmem:[#allocation2 + $0x8] sm:$0xff] (!%p696_p12), %vm291_vm0, %v894_v16 }
  0x30   : > { %290 = sbr.rel (%p696_p12) target bundleno = 55 (0x37), region = 73  ;;  %294 = vst.msk [vmem:[#allocation2 + $0x10] sm:$0xff] (!%p696_p12), %vm291_vm0, %v894_v16  ;;  %295 = vst.msk [vmem:[#allocation2 + $0x18] sm:$0xff] (!%p696_p12), %vm291_vm0, %v894_v16 }
  0x31   : > { %296 = vst.msk [vmem:[#allocation2 + $0x20] sm:$0xff] (!%p696_p12), %vm291_vm0, %v894_v16  ;;  %297 = vst.msk [vmem:[#allocation2 + $0x28] sm:$0xff] (!%p696_p12), %vm291_vm0, %v894_v16 }
  0x32   : > { %298 = vst.msk [vmem:[#allocation2 + $0x30] sm:$0xff] (!%p696_p12), %vm291_vm0, %v894_v16  ;;  %299 = vst.msk [vmem:[#allocation2 + $0x38] sm:$0xff] (!%p696_p12), %vm291_vm0, %v894_v16 }
  0x33   : > { %300 = vst.msk [vmem:[#allocation2 + $0x40] sm:$0xff] (!%p696_p12), %vm291_vm0, %v894_v16  ;;  %301 = vst.msk [vmem:[#allocation2 + $0x48] sm:$0xff] (!%p696_p12), %vm291_vm0, %v894_v16 }
  0x34   : > { %302 = vst.msk [vmem:[#allocation2 + $0x50] sm:$0xff] (!%p696_p12), %vm291_vm0, %v894_v16  ;;  %303 = vst.msk [vmem:[#allocation2 + $0x58] sm:$0xff] (!%p696_p12), %vm291_vm0, %v894_v16 }
  0x35   : > { %304 = vst.msk [vmem:[#allocation2 + $0x60] sm:$0xff] (!%p696_p12), %vm291_vm0, %v894_v16  ;;  %305 = vst.msk [vmem:[#allocation2 + $0x68] sm:$0xff] (!%p696_p12), %vm291_vm0, %v894_v16 }
  0x36   : > { %306 = vst.msk [vmem:[#allocation2 + $0x70] sm:$0xff] (!%p696_p12), %vm291_vm0, %v894_v16  ;;  %307 = vst.msk [vmem:[#allocation2 + $0x78] sm:$0xff] (!%p696_p12), %vm291_vm0, %v894_v16 }
  0x37 PF: > { %v340_v17 = vld [vmem:[%s996_s20] sm:$0xff]  ;;  %v341_v18 = vld [vmem:[%s996_s20 + $0x8] sm:$0xff]  ;;  %v342_v19 = vld [vmem:[%s996_s20 + $0x10] sm:$0xff]  ;;  %vm525_vm1 = vcmask 523264   ;;  %p705_p13 = scmp.ne.s32.totalorder %s876_s11, 1 }
  0x38   : > { %v356_v20 = vpack.c.bf16 %v341_v18, %v340_v17  ;;  %v343_v21 = vld [vmem:[%s996_s20 + $0x18] sm:$0xff]  ;;  %v344_v23 = vld [vmem:[%s996_s20 + $0x20] sm:$0xff]  ;;  %v345_v24 = vld [vmem:[%s996_s20 + $0x28] sm:$0xff] }
  0x39   : > { %v357_v22 = vpack.c.bf16 %v343_v21, %v342_v19  ;;  %v346_v25 = vld [vmem:[%s996_s20 + $0x30] sm:$0xff]  ;;  %v358_v26 = vpack.c.bf16 %v345_v24, %v344_v23  ;;  %v347_v27 = vld [vmem:[%s996_s20 + $0x38] sm:$0xff]  ;;  %v830_v28 = vld [vmem:[%s1003_s9] sm:$0xff]  }
  0x3a   : > { %725 = vmatprep.subr.bf16.mxu0 %v356_v20  ;;  %757 = vmatprep.subr.bf16.mxu1 %v356_v20  ;;  %v831_v29 = vld [vmem:[%s1003_s9 + $0x20] sm:$0xff]   ;;  %v359_v30 = vpack.c.bf16 %v347_v27, %v346_v25  ;;  %v349_v32 = vld [vmem:[%s996_s20 + $0x48] sm:$0xff]  ;;  %v350_v34 = vld [vmem:[%s996_s20 + $0x50] sm:$0xff] }
  0x3b   : > { %726 = vmatpush3.bf16.msra.mxu0 %v356_v20  ;;  %765 = vmatpush3.bf16.msra.mxu1 %v356_v20  ;;  %v348_v31 = vld [vmem:[%s996_s20 + $0x40] sm:$0xff]  ;;  %v351_v35 = vld [vmem:[%s996_s20 + $0x58] sm:$0xff]  ;;  %v353_v38 = vld [vmem:[%s996_s20 + $0x68] sm:$0xff] }
  0x3c   : > { %727 = vmatprep.subr.bf16.mxu0 %v357_v22  ;;  %758 = vmatprep.subr.bf16.mxu1 %v357_v22  ;;  %v360_v33 = vpack.c.bf16 %v349_v32, %v348_v31  ;;  %v361_v36 = vpack.c.bf16 %v351_v35, %v350_v34  ;;  %v352_v37 = vld [vmem:[%s996_s20 + $0x60] sm:$0xff]  ;;  %v354_v40 = vld [vmem:[%s996_s20 + $0x70] sm:$0xff]  ;;  %v355_v41 = vld [vmem:[%s996_s20 + $0x78] sm:$0xff] }
  0x3d   : > { %741 = vmatprep.mubr.bf16.mxu0 %v830_v28  ;;  %749 = vmatprep.mubr.bf16.mxu1 %v831_v29  ;;  %v362_v39 = vpack.c.bf16 %v353_v38, %v352_v37  ;;  %v363_v42 = vpack.c.bf16 %v355_v41, %v354_v40  ;;  %v832_v43 = vld [vmem:[%s1003_s9 + $0x8] sm:$0xff]   ;;  %v834_v45 = vld [vmem:[%s1003_s9 + $0x10] sm:$0xff]   ;;  %v836_v47 = vld [vmem:[%s1003_s9 + $0x18] sm:$0xff]  }
  0x3e   : > { %v833_v44 = vld [vmem:[%s1003_s9 + $0x28] sm:$0xff]   ;;  %v835_v46 = vld [vmem:[%s1003_s9 + $0x30] sm:$0xff]   ;;  %v837_v48 = vld [vmem:[%s1003_s9 + $0x38] sm:$0xff]  }
  0x3f   : > { %728 = vmatpush3.bf16.msra.mxu0 %v357_v22  ;;  %766 = vmatpush3.bf16.msra.mxu1 %v357_v22  ;;  %v310_v49 = vld [vmem:[#allocation2 + $0x10] sm:$0xff]  ;;  %v308_v51 = vld [vmem:[#allocation2] sm:$0xff]  ;;  %v311_v55 = vld [vmem:[#allocation2 + $0x18] sm:$0xff] }
  0x40   : > { %729 = vmatprep.subr.bf16.mxu0 %v358_v26  ;;  %759 = vmatprep.subr.bf16.mxu1 %v358_v26  ;;  %v318_v50 = vld [vmem:[#allocation2 + $0x50] sm:$0xff]  ;;  %v316_v52 = vld [vmem:[#allocation2 + $0x40] sm:$0xff]  ;;  %v319_v56 = vld [vmem:[#allocation2 + $0x58] sm:$0xff] }
  0x41   : > { %v309_v61 = vld [vmem:[#allocation2 + $0x8] sm:$0xff]  ;;  %v314_v9 = vld [vmem:[#allocation2 + $0x30] sm:$0xff]  ;;  %v312_v11 = vld [vmem:[#allocation2 + $0x20] sm:$0xff] }
  0x42   : > { %v317_v62 = vld [vmem:[#allocation2 + $0x48] sm:$0xff]  ;;  %v322_v10 = vld [vmem:[#allocation2 + $0x70] sm:$0xff]  ;;  %v320_v12 = vld [vmem:[#allocation2 + $0x60] sm:$0xff] }
  0x43   : > { %730 = vmatpush3.bf16.msra.mxu0 %v358_v26  ;;  %767 = vmatpush3.bf16.msra.mxu1 %v358_v26  ;;  %v315_v15 = vld [vmem:[#allocation2 + $0x38] sm:$0xff]  ;;  %v313_v21 = vld [vmem:[#allocation2 + $0x28] sm:$0xff] }
  0x44   : > { %731 = vmatprep.subr.bf16.mxu0 %v359_v30  ;;  %760 = vmatprep.subr.bf16.mxu1 %v359_v30  ;;  %v323_v16 = vld [vmem:[#allocation2 + $0x78] sm:$0xff]  ;;  %v321_v22 = vld [vmem:[#allocation2 + $0x68] sm:$0xff] }
  0x47   : > { %732 = vmatpush3.bf16.msra.mxu0 %v359_v30  ;;  %768 = vmatpush3.bf16.msra.mxu1 %v359_v30 }
  0x48   : > { %733 = vmatprep.subr.bf16.mxu0 %v360_v33  ;;  %761 = vmatprep.subr.bf16.mxu1 %v360_v33 }
  0x4b   : > { %734 = vmatpush3.bf16.msra.mxu0 %v360_v33  ;;  %769 = vmatpush3.bf16.msra.mxu1 %v360_v33 }
  0x4c   : > { %735 = vmatprep.subr.bf16.mxu0 %v361_v36  ;;  %762 = vmatprep.subr.bf16.mxu1 %v361_v36 }
  0x4f   : > { %736 = vmatpush3.bf16.msra.mxu0 %v361_v36  ;;  %770 = vmatpush3.bf16.msra.mxu1 %v361_v36 }
  0x50   : > { %737 = vmatprep.subr.bf16.mxu0 %v362_v39  ;;  %763 = vmatprep.subr.bf16.mxu1 %v362_v39 }
  0x53   : > { %738 = vmatpush3.bf16.msra.mxu0 %v362_v39  ;;  %771 = vmatpush3.bf16.msra.mxu1 %v362_v39 }
  0x54   : > { %739 = vmatprep.subr.bf16.mxu0 %v363_v42  ;;  %764 = vmatprep.subr.bf16.mxu1 %v363_v42 }
  0x57   : > { %740 = vmatpush3.bf16.msra.mxu0 %v363_v42  ;;  %772 = vmatpush3.bf16.msra.mxu1 %v363_v42 }
  0x5a   : > { %742 = vmatmul.mubr.bf16.vlgmr.msra.gmra.mrb[0].mxu0 %v832_v43  ;;  %750 = vmatmul.mubr.bf16.vlgmr.msra.gmra.mrb[0].mxu1 %v833_v44 }
  0x5b   : > { %745 = vmatprep.mubr.bf16.mxu0 %v834_v45  ;;  %753 = vmatprep.mubr.bf16.mxu1 %v835_v46 }
  0x62   : > { %746 = vmatmul.mubr.bf16.gmra.mrb[4].mxu0 %v836_v47  ;;  %754 = vmatmul.mubr.bf16.gmra.mrb[4].mxu1 %v837_v48 }
 0x12d   : > { %v743_v53 = vpop.f32.mrb[0].mxu0  ;;  %v751_v54 = vpop.f32.mrb[0].mxu1 }
 0x12e   : > { %v511_v57 = vadd.f32 %v743_v53, %v310_v49  ;;  %v519_v58 = vadd.f32 %v751_v54, %v318_v50  ;;  %v446_v59 = vpop.f32.mrb[1].mxu0  ;;  %v478_v60 = vpop.f32.mrb[1].mxu1 }
 0x12f   : > { %v509_v63 = vadd.f32 %v446_v59, %v308_v51  ;;  %v517_v0 = vadd.f32 %v478_v60, %v316_v52  ;;  %v744_v1 = vpop.f32.mrb[2].mxu0  ;;  %v752_v2 = vpop.f32.mrb[2].mxu1 }
 0x130   : > { %528 = vst.msk [vmem:[#allocation2 + $0x10] sm:$0xff] %vm525_vm1, %v511_v57  ;;  %536 = vst.msk [vmem:[#allocation2 + $0x50] sm:$0xff] %vm525_vm1, %v519_v58  ;;  %v512_v3 = vadd.f32 %v744_v1, %v311_v55  ;;  %v520_v4 = vadd.f32 %v752_v2, %v319_v56  ;;  %v449_v5 = vpop.f32.mrb[3].mxu0  ;;  %v481_v6 = vpop.f32.mrb[3].mxu1 }
 0x131   : > { %526 = vst.msk [vmem:[#allocation2] sm:$0xff] %vm525_vm1, %v509_v63  ;;  %534 = vst.msk [vmem:[#allocation2 + $0x40] sm:$0xff] %vm525_vm1, %v517_v0  ;;  %v510_v7 = vadd.f32 %v449_v5, %v309_v61  ;;  %v518_v8 = vadd.f32 %v481_v6, %v317_v62 }
 0x132   : > { %529 = vst.msk [vmem:[#allocation2 + $0x18] sm:$0xff] %vm525_vm1, %v512_v3  ;;  %537 = vst.msk [vmem:[#allocation2 + $0x58] sm:$0xff] %vm525_vm1, %v520_v4 }
 0x133   : > { %527 = vst.msk [vmem:[#allocation2 + $0x8] sm:$0xff] %vm525_vm1, %v510_v7  ;;  %535 = vst.msk [vmem:[#allocation2 + $0x48] sm:$0xff] %vm525_vm1, %v518_v8 }
 0x135   : > { %v747_v13 = vpop.f32.mrb[4].mxu0  ;;  %v755_v14 = vpop.f32.mrb[4].mxu1  ;;  %545 = sbr.rel (%p705_p13) target bundleno = 327 (0x147), region = 77 }
 0x136   : > { %v515_v17 = vadd.f32 %v747_v13, %v314_v9  ;;  %v523_v18 = vadd.f32 %v755_v14, %v322_v10  ;;  %v462_v19 = vpop.f32.mrb[5].mxu0  ;;  %v494_v20 = vpop.f32.mrb[5].mxu1 }
 0x137   : > { %v513_v23 = vadd.f32 %v462_v19, %v312_v11  ;;  %v521_v24 = vadd.f32 %v494_v20, %v320_v12  ;;  %v748_v25 = vpop.f32.mrb[6].mxu0  ;;  %v756_v26 = vpop.f32.mrb[6].mxu1  ;;  %v548_v35 = vld [vmem:[#allocation2 + $0x10] sm:$0xff] (!%p705_p13) }
 0x138   : > { %532 = vst.msk [vmem:[#allocation2 + $0x30] sm:$0xff] %vm525_vm1, %v515_v17  ;;  %540 = vst.msk [vmem:[#allocation2 + $0x70] sm:$0xff] %vm525_vm1, %v523_v18  ;;  %v516_v27 = vadd.f32 %v748_v25, %v315_v15  ;;  %v524_v28 = vadd.f32 %v756_v26, %v323_v16  ;;  %v465_v29 = vpop.f32.mrb[7].mxu0  ;;  %v497_v30 = vpop.f32.mrb[7].mxu1  ;;  %v546_v33 = vld [vmem:[#allocation2] sm:$0xff] (!%p705_p13)  ;;  %v564_v38 = vmax.f32 (!%p705_p13), %v548_v35, 0.0 }
 0x139   : > { %530 = vst.msk [vmem:[#allocation2 + $0x20] sm:$0xff] %vm525_vm1, %v513_v23  ;;  %538 = vst.msk [vmem:[#allocation2 + $0x60] sm:$0xff] %vm525_vm1, %v521_v24  ;;  %v514_v31 = vadd.f32 %v465_v29, %v313_v21  ;;  %v522_v32 = vadd.f32 %v497_v30, %v321_v22  ;;  %v562_v36 = vmax.f32 (!%p705_p13), %v546_v33, 0.0  ;;  %v549_v39 = vld [vmem:[#allocation2 + $0x18] sm:$0xff] (!%p705_p13)  ;;  %v554_v47 = vld [vmem:[#allocation2 + $0x40] sm:$0xff] (!%p705_p13) }
 0x13a   : > { %533 = vst.msk [vmem:[#allocation2 + $0x38] sm:$0xff] %vm525_vm1, %v516_v27  ;;  %541 = vst.msk [vmem:[#allocation2 + $0x78] sm:$0xff] %vm525_vm1, %v524_v28  ;;  %v547_v34 = vld [vmem:[#allocation2 + $0x8] sm:$0xff] (!%p705_p13)  ;;  %v565_v42 = vmax.f32 (!%p705_p13), %v549_v39, 0.0  ;;  %v570_v50 = vmax.f32 (!%p705_p13), %v554_v47, 0.0  ;;  %v556_v52 = vld [vmem:[#allocation2 + $0x50] sm:$0xff] (!%p705_p13) }
 0x13b   : > { %531 = vst.msk [vmem:[#allocation2 + $0x28] sm:$0xff] %vm525_vm1, %v514_v31  ;;  %539 = vst.msk [vmem:[#allocation2 + $0x68] sm:$0xff] %vm525_vm1, %v522_v32  ;;  %v563_v37 = vmax.f32 (!%p705_p13), %v547_v34, 0.0  ;;  %v555_v51 = vld [vmem:[#allocation2 + $0x48] sm:$0xff] (!%p705_p13)  ;;  %v557_v53 = vld [vmem:[#allocation2 + $0x58] sm:$0xff] (!%p705_p13)  ;;  %v572_v55 = vmax.f32 (!%p705_p13), %v556_v52, 0.0 }
 0x13c   : > { %578 = vst.msk [vmem:[%s1001_s25] sm:$0xff] %vm525_vm1, %v562_v36  ;;  %580 = vst.msk [vmem:[%s1001_s25 + $0x10] sm:$0xff] %vm525_vm1, %v564_v38  ;;  %v571_v54 = vmax.f32 %v555_v51, 0.0  ;;  %v573_v56 = vmax.f32 %v557_v53, 0.0 }
 0x13d   : > { %579 = vst.msk [vmem:[%s1001_s25 + $0x8] sm:$0xff] %vm525_vm1, %v563_v37  ;;  %581 = vst.msk [vmem:[%s1001_s25 + $0x18] sm:$0xff] %vm525_vm1, %v565_v42 }
 0x13e   : > { %586 = vst.msk [vmem:[%s1001_s25 + $0x40] sm:$0xff] %vm525_vm1, %v570_v50  ;;  %587 = vst.msk [vmem:[%s1001_s25 + $0x48] sm:$0xff] %vm525_vm1, %v571_v54 }
 0x13f   : > { %v552_v45 = vld [vmem:[#allocation2 + $0x30] sm:$0xff]  ;;  %588 = vst.msk [vmem:[%s1001_s25 + $0x50] sm:$0xff] %vm525_vm1, %v572_v55  ;;  %589 = vst.msk [vmem:[%s1001_s25 + $0x58] sm:$0xff] %vm525_vm1, %v573_v56 }
 0x140   : > { %v550_v40 = vld [vmem:[#allocation2 + $0x20] sm:$0xff]  ;;  %v568_v48 = vmax.f32 %v552_v45, 0.0  ;;  %v560_v59 = vld [vmem:[#allocation2 + $0x70] sm:$0xff] }
 0x141   : > { %v566_v43 = vmax.f32 %v550_v40, 0.0  ;;  %v553_v46 = vld [vmem:[#allocation2 + $0x38] sm:$0xff]  ;;  %v558_v57 = vld [vmem:[#allocation2 + $0x60] sm:$0xff]  ;;  %v576_v62 = vmax.f32 %v560_v59, 0.0 }
 0x142   : > { %v551_v41 = vld [vmem:[#allocation2 + $0x28] sm:$0xff]  ;;  %v569_v49 = vmax.f32 %v553_v46, 0.0  ;;  %584 = vst.msk [vmem:[%s1001_s25 + $0x30] sm:$0xff] %vm525_vm1, %v568_v48  ;;  %v574_v60 = vmax.f32 %v558_v57, 0.0  ;;  %v561_v63 = vld [vmem:[#allocation2 + $0x78] sm:$0xff] }
 0x143   : > { %v567_v44 = vmax.f32 %v551_v41, 0.0  ;;  %582 = vst.msk [vmem:[%s1001_s25 + $0x20] sm:$0xff] %vm525_vm1, %v566_v43  ;;  %v559_v58 = vld [vmem:[#allocation2 + $0x68] sm:$0xff]  ;;  %v577_v0 = vmax.f32 %v561_v63, 0.0  ;;  %592 = vst.msk [vmem:[%s1001_s25 + $0x70] sm:$0xff] %vm525_vm1, %v576_v62 }
 0x144   : > { %585 = vst.msk [vmem:[%s1001_s25 + $0x38] sm:$0xff] %vm525_vm1, %v569_v49  ;;  %v575_v61 = vmax.f32 %v559_v58, 0.0  ;;  %590 = vst.msk [vmem:[%s1001_s25 + $0x60] sm:$0xff] %vm525_vm1, %v574_v60 }
 0x145   : > { %583 = vst.msk [vmem:[%s1001_s25 + $0x28] sm:$0xff] %vm525_vm1, %v567_v44  ;;  %593 = vst.msk [vmem:[%s1001_s25 + $0x78] sm:$0xff] %vm525_vm1, %v577_v0 }
 0x146   : > { %591 = vst.msk [vmem:[%s1001_s25 + $0x68] sm:$0xff] %vm525_vm1, %v575_v61 }
 0x147 PF: > { %s12_s15 = sadd.s32 1, %s892_s15   ;;  %s1119_s9 = smov %s872_s10 }
 0x148   : > { %p9_p0 = scmp.ge.s32.totalorder %s12_s15, 6   ;;  %s1120_s10 = smov %s961_s22 }
 0x149   : > { %s1121_s11 = smov %s884_s13  ;;  %s1122_s12 = smov %s888_s14 }
 0x14a   : > { %s1123_s13 = smov %s1126_s16  ;;  %s1124_s14 = smov %s1130_s17 }
 0x14b   :  { %11 = sbr.rel (!%p9_p0) target bundleno = 4 (0x4), region = 115 }

// kernel: tsdcn_forward.14
= control target key start
LH: loop header
LB: loop body
LE: loop exit
PB: predicated region body
PF: predicated region fallthrough
CT: control target
= control target key end

     0   :  { %s573_s12 = smov 0   ;;  %s700_s0 = inlined_call_operand.vmem [shape: f32[256,64], index: 0, kind: input, shape index: {}]   ;;  %s701_s1 = inlined_call_operand.vmem [shape: f32[256,64], index: 1, kind: input, shape index: {}]   ;;  %s702_s2 = inlined_call_operand.vmem [shape: f32[64,32], index: 2, kind: input, shape index: {}]   ;;  %s703_s3 = inlined_call_operand.vmem [shape: f32[256,32], index: 3, kind: output, shape index: {}]  }
   0x1 LB: > { %s472_s13 = sadd.s32 4294967295, %s551_s12   ;;  %p476_p0 = scmp.ge.s32.totalorder %s551_s12, 1  ;;  %s551_s12 = sphi %s573_s12, %s13_s12  }
   0x2   : > { %p149_p1 = scmp.lt.s32.totalorder %s551_s12, 3 }
   0x4   : > { %p150_p2 = pnand %p476_p0, %p149_p1 }
   0x5   : > { %v253_v0 = vld [vmem:[%s702_s2] sm:$0xff] (!%p150_p2)  ;;  %v254_v1 = vld [vmem:[%s702_s2 + $0x8] sm:$0xff] (!%p150_p2)  ;;  %v255_v2 = vld [vmem:[%s702_s2 + $0x10] sm:$0xff] (!%p150_p2)  ;;  %s477_s20 = sshll.u32 (!%p150_p2), %s472_s13, 4  ;;  %vm265_vm0 = vcmask (!%p150_p2), 523264   ;;  %vm387_vm1 = vcmask (!%p150_p2), 261120  }
   0x6   : > { %153 = sbr.rel (%p150_p2) target bundleno = 250 (0xfa), region = 32  ;;  %v261_v3 = vpack.c.bf16 (!%p150_p2), %v254_v1, %v253_v0  ;;  %v256_v4 = vld [vmem:[%s702_s2 + $0x18] sm:$0xff] (!%p150_p2)  ;;  %p179_p3 = scmp.lt.s32.totalorder (!%p150_p2), %s477_s20, 31  ;;  %v257_v6 = vld [vmem:[%s702_s2 + $0x20] sm:$0xff] (!%p150_p2)  ;;  %v258_v7 = vld [vmem:[%s702_s2 + $0x28] sm:$0xff] (!%p150_p2) }
   0x7   : > { %v262_v5 = vpack.c.bf16 (!%p150_p2), %v256_v4, %v255_v2  ;;  %v263_v8 = vpack.c.bf16 (!%p150_p2), %v258_v7, %v257_v6  ;;  %v259_v9 = vld [vmem:[%s702_s2 + $0x30] sm:$0xff] (!%p150_p2)  ;;  %v260_v10 = vld [vmem:[%s702_s2 + $0x38] sm:$0xff] (!%p150_p2) }
   0x8   : > { %505 = vmatprep.subr.bf16.mxu0 (!%p150_p2), %v261_v3  ;;  %529 = vmatprep.subr.bf16.mxu1 (!%p150_p2), %v261_v3  ;;  %v264_v18 = vpack.c.bf16 (!%p150_p2), %v260_v10, %v259_v9 }
   0x9   : > { %506 = vmatpush3.bf16.msra.mxu0 (!%p150_p2), %v261_v3  ;;  %533 = vmatpush3.bf16.msra.mxu1 (!%p150_p2), %v261_v3 }
   0xa   : > { %507 = vmatprep.subr.bf16.mxu0 (!%p150_p2), %v262_v5  ;;  %530 = vmatprep.subr.bf16.mxu1 (!%p150_p2), %v262_v5 }
   0xd   : > { %s705_s20 = smov (!%p179_p3, %s477_s20), 31  ;;  %508 = vmatpush3.bf16.msra.mxu0 %v262_v5  ;;  %534 = vmatpush3.bf16.msra.mxu1 %v262_v5 }
   0xe   : > { %s599_s27 = sshll.u32 %s705_s20, 3  ;;  %509 = vmatprep.subr.bf16.mxu0 %v263_v8  ;;  %531 = vmatprep.subr.bf16.mxu1 %v263_v8 }
   0xf   : > { %s611_s7 = scalar_lea.vmem %s700_s0, %s599_s27  ;;  %s617_s10 = scalar_lea.vmem %s701_s1, %s599_s27 }
  0x10   : > { %v197_v11 = vld [vmem:[%s611_s7] sm:$0xff]  ;;  %v198_v12 = vld [vmem:[%s611_s7 + $0x8] sm:$0xff]  ;;  %v199_v22 = vld [vmem:[%s611_s7 + $0x10] sm:$0xff]  ;;  %s663_s14 = scalar_lea.vmem %s703_s3, %s599_s27 }
  0x11   : > { %v213_v13 = vld [vmem:[%s617_s10] sm:$0xff]  ;;  %v214_v14 = vld [vmem:[%s617_s10 + $0x8] sm:$0xff]  ;;  %v200_v25 = vld [vmem:[%s611_s7 + $0x18] sm:$0xff]  ;;  %510 = vmatpush3.bf16.msra.mxu0 %v263_v8  ;;  %535 = vmatpush3.bf16.msra.mxu1 %v263_v8 }
  0x12   : > { %v229_v15 = vadd.f32 %v213_v13, %v197_v11  ;;  %v205_v16 = vld [vmem:[%s611_s7 + $0x40] sm:$0xff]  ;;  %v206_v17 = vld [vmem:[%s611_s7 + $0x48] sm:$0xff]  ;;  %v230_v19 = vadd.f32 %v214_v14, %v198_v12  ;;  %v215_v26 = vld [vmem:[%s617_s10 + $0x10] sm:$0xff]  ;;  %511 = vmatprep.subr.bf16.mxu0 %v264_v18  ;;  %532 = vmatprep.subr.bf16.mxu1 %v264_v18 }
  0x13   : > { %v221_v20 = vld [vmem:[%s617_s10 + $0x40] sm:$0xff]  ;;  %v222_v21 = vld [vmem:[%s617_s10 + $0x48] sm:$0xff]  ;;  %v216_v27 = vld [vmem:[%s617_s10 + $0x18] sm:$0xff]  ;;  %v231_v29 = vadd.f32 %v215_v26, %v199_v22 }
  0x14   : > { %v237_v23 = vadd.f32 %v221_v20, %v205_v16  ;;  %v238_v24 = vadd.f32 %v222_v21, %v206_v17  ;;  %v245_v28 = vpack.c.bf16 %v230_v19, %v229_v15  ;;  %v232_v30 = vadd.f32 %v216_v27, %v200_v25  ;;  %v207_v31 = vld [vmem:[%s611_s7 + $0x50] sm:$0xff]  ;;  %v208_v32 = vld [vmem:[%s611_s7 + $0x58] sm:$0xff]  ;;  %v201_v37 = vld [vmem:[%s611_s7 + $0x20] sm:$0xff] }
  0x15   : > { %v223_v33 = vld [vmem:[%s617_s10 + $0x50] sm:$0xff]  ;;  %v224_v35 = vld [vmem:[%s617_s10 + $0x58] sm:$0xff]  ;;  %v202_v38 = vld [vmem:[%s611_s7 + $0x28] sm:$0xff]  ;;  %512 = vmatpush3.bf16.msra.mxu0 %v264_v18  ;;  %536 = vmatpush3.bf16.msra.mxu1 %v264_v18 }
  0x16   : > { %v249_v34 = vpack.c.bf16 %v238_v24, %v237_v23  ;;  %v239_v36 = vadd.f32 %v223_v33, %v207_v31  ;;  %v240_v39 = vadd.f32 %v224_v35, %v208_v32  ;;  %v217_v40 = vld [vmem:[%s617_s10 + $0x20] sm:$0xff]  ;;  %v218_v41 = vld [vmem:[%s617_s10 + $0x28] sm:$0xff]  ;;  %513 = vmatprep.mubr.msk.bf16.mxu0 %vm265_vm0, %v245_v28  ;;  %v246_v48 = vpack.c.bf16 %v232_v30, %v231_v29  ;;  %v203_v52 = vld [vmem:[%s611_s7 + $0x30] sm:$0xff] }
  0x17   : > { %v209_v42 = vld [vmem:[%s611_s7 + $0x60] sm:$0xff]  ;;  %v233_v43 = vadd.f32 %v217_v40, %v201_v37  ;;  %v234_v44 = vadd.f32 %v218_v41, %v202_v38  ;;  %v210_v45 = vld [vmem:[%s611_s7 + $0x68] sm:$0xff]  ;;  %v204_v53 = vld [vmem:[%s611_s7 + $0x38] sm:$0xff] }
  0x18   : > { %521 = vmatprep.mubr.msk.bf16.mxu1 %vm265_vm0, %v249_v34  ;;  %v225_v46 = vld [vmem:[%s617_s10 + $0x60] sm:$0xff]  ;;  %v226_v47 = vld [vmem:[%s617_s10 + $0x68] sm:$0xff]  ;;  %v250_v49 = vpack.c.bf16 %v240_v39, %v239_v36  ;;  %v219_v54 = vld [vmem:[%s617_s10 + $0x30] sm:$0xff]  ;;  %514 = vmatmul.mubr.msk.bf16.vlgmr.msra.gmra.mrb[0].mxu0 %vm265_vm0, %v246_v48 }
  0x19   : > { %v241_v50 = vadd.f32 %v225_v46, %v209_v42  ;;  %v242_v51 = vadd.f32 %v226_v47, %v210_v45  ;;  %v247_v55 = vpack.c.bf16 %v234_v44, %v233_v43  ;;  %v220_v56 = vld [vmem:[%s617_s10 + $0x38] sm:$0xff]  ;;  %v211_v57 = vld [vmem:[%s611_s7 + $0x70] sm:$0xff]  ;;  %v235_v62 = vadd.f32 %v219_v54, %v203_v52 }
  0x1a   : > { %v212_v58 = vld [vmem:[%s611_s7 + $0x78] sm:$0xff]  ;;  %v227_v60 = vld [vmem:[%s617_s10 + $0x70] sm:$0xff]  ;;  %522 = vmatmul.mubr.msk.bf16.vlgmr.msra.gmra.mrb[0].mxu1 %vm265_vm0, %v250_v49  ;;  %v236_v63 = vadd.f32 %v220_v56, %v204_v53 }
  0x1b   : > { %v251_v59 = vpack.c.bf16 %v242_v51, %v241_v50  ;;  %v228_v61 = vld [vmem:[%s617_s10 + $0x78] sm:$0xff]  ;;  %v243_v0 = vadd.f32 %v227_v60, %v211_v57  ;;  %517 = vmatprep.mubr.msk.bf16.mxu0 %vm265_vm0, %v247_v55 }
  0x1c   : > { %v244_v1 = vadd.f32 %v228_v61, %v212_v58  ;;  %v248_v2 = vpack.c.bf16 %v236_v63, %v235_v62 }
  0x1d   : > { %525 = vmatprep.mubr.msk.bf16.mxu1 %vm265_vm0, %v251_v59 }
  0x1e   : > { %v252_v3 = vpack.c.bf16 %v244_v1, %v243_v0 }
  0x20   : > { %518 = vmatmul.mubr.msk.bf16.gmra.mrb[4].mxu0 %vm265_vm0, %v248_v2 }
  0x22   : > { %526 = vmatmul.mubr.msk.bf16.gmra.mrb[4].mxu1 %vm265_vm0, %v252_v3 }
  0xeb   : > { %v515_v4 = vpop.f32.mrb[0].mxu0 }
  0xec   : > { %390 = vst.msk [vmem:[%s663_s14 + $0x10] sm:$0xff] %vm387_vm1, %v515_v4  ;;  %v324_v6 = vpop.f32.mrb[1].mxu0 }
  0xed   : > { %v523_v5 = vpop.f32.mrb[0].mxu1  ;;  %388 = vst.msk [vmem:[%s663_s14] sm:$0xff] %vm387_vm1, %v324_v6  ;;  %v516_v8 = vpop.f32.mrb[2].mxu0 }
  0xee   : > { %398 = vst.msk [vmem:[%s663_s14 + $0x50] sm:$0xff] %vm387_vm1, %v523_v5  ;;  %v356_v7 = vpop.f32.mrb[1].mxu1  ;;  %391 = vst.msk [vmem:[%s663_s14 + $0x18] sm:$0xff] %vm387_vm1, %v516_v8  ;;  %v327_v10 = vpop.f32.mrb[3].mxu0 }
  0xef   : > { %396 = vst.msk [vmem:[%s663_s14 + $0x40] sm:$0xff] %vm387_vm1, %v356_v7  ;;  %v524_v9 = vpop.f32.mrb[2].mxu1  ;;  %389 = vst.msk [vmem:[%s663_s14 + $0x8] sm:$0xff] %vm387_vm1, %v327_v10 }
  0xf0   : > { %399 = vst.msk [vmem:[%s663_s14 + $0x58] sm:$0xff] %vm387_vm1, %v524_v9  ;;  %v359_v11 = vpop.f32.mrb[3].mxu1 }
  0xf1   : > { %397 = vst.msk [vmem:[%s663_s14 + $0x48] sm:$0xff] %vm387_vm1, %v359_v11 }
  0xf3   : > { %v519_v12 = vpop.f32.mrb[4].mxu0 }
  0xf4   : > { %394 = vst.msk [vmem:[%s663_s14 + $0x30] sm:$0xff] %vm387_vm1, %v519_v12  ;;  %v340_v14 = vpop.f32.mrb[5].mxu0 }
  0xf5   : > { %v527_v13 = vpop.f32.mrb[4].mxu1  ;;  %392 = vst.msk [vmem:[%s663_s14 + $0x20] sm:$0xff] %vm387_vm1, %v340_v14  ;;  %v520_v16 = vpop.f32.mrb[6].mxu0 }
  0xf6   : > { %402 = vst.msk [vmem:[%s663_s14 + $0x70] sm:$0xff] %vm387_vm1, %v527_v13  ;;  %v372_v15 = vpop.f32.mrb[5].mxu1  ;;  %395 = vst.msk [vmem:[%s663_s14 + $0x38] sm:$0xff] %vm387_vm1, %v520_v16  ;;  %v343_v18 = vpop.f32.mrb[7].mxu0 }
  0xf7   : > { %400 = vst.msk [vmem:[%s663_s14 + $0x60] sm:$0xff] %vm387_vm1, %v372_v15  ;;  %v528_v17 = vpop.f32.mrb[6].mxu1  ;;  %393 = vst.msk [vmem:[%s663_s14 + $0x28] sm:$0xff] %vm387_vm1, %v343_v18 }
  0xf8   : > { %403 = vst.msk [vmem:[%s663_s14 + $0x78] sm:$0xff] %vm387_vm1, %v528_v17  ;;  %v375_v19 = vpop.f32.mrb[7].mxu1 }
  0xf9   : > { %401 = vst.msk [vmem:[%s663_s14 + $0x68] sm:$0xff] %vm387_vm1, %v375_v19 }
  0xfa PF: > { %s13_s12 = sadd.s32 1, %s551_s12  }
  0xfb   : > { %p10_p4 = scmp.ge.s32.totalorder %s13_s12, 4  }
  0xfd   :  { %12 = sbr.rel (!%p10_p4) target bundleno = 1 (0x1), region = 65 }

// kernel: tsdcn_forward.15
= control target key start
LH: loop header
LB: loop body
LE: loop exit
PB: predicated region body
PF: predicated region fallthrough
CT: control target
= control target key end

     0   :  { %s910_s9 = smov 0   ;;  %s912_s10 = smov 0   ;;  %s1116_s0 = inlined_call_operand.vmem [shape: bf16[256,256], index: 0, kind: input, shape index: {}]   ;;  %s1117_s1 = inlined_call_operand.vmem [shape: f32[256,32], index: 1, kind: input, shape index: {}]   ;;  %s1118_s2 = inlined_call_operand.vmem [shape: f32[256,32], index: 2, kind: output, shape index: {}]  }
   0x1   :  { %s914_s11 = smov 0   ;;  %s916_s12 = smov 0  }
   0x2   :  { %s918_s13 = smov 0   ;;  %s920_s14 = smov 0  }
   0x3   :  { %s922_s15 = smov 0  }
   0x4 LB: > { %s21_s16 = sadd.s32 1, %s884_s13  ;;  %s24_s17 = sadd.s32 1, %s888_s14  ;;  %s892_s15 = sphi %s922_s15, %s12_s15   ;;  %s888_s14 = sphi %s920_s14, %s1124_s14   ;;  %s884_s13 = sphi %s918_s13, %s1123_s13   ;;  %s880_s12 = sphi %s916_s12, %s1122_s12   ;;  %s876_s11 = sphi %s914_s11, %s1121_s11   ;;  %s872_s10 = sphi %s912_s10, %s1120_s10   ;;  %s868_s9 = sphi %s910_s9, %s1119_s9  }
   0x5   : > { %p22_p0 = scmp.ge.s32.totalorder %s21_s16, 2  ;;  %p40_p1 = scmp.ne.s32.totalorder %s872_s10, %s868_s9 }
   0x6   : > { %p41_p2 = scmp.eq.s32.totalorder %s892_s15, 0  ;;  %s33_s21 = sadd.s32 1, %s872_s10 }
   0x7   : > { %s1126_s16 = smov (%p22_p0, %s21_s16), 0  ;;  %s1128_s17 = smov (!%p22_p0, %s24_s17), %s888_s14 }
   0x8   : > { %p42_p3 = por %p41_p2, %p40_p1  ;;  %p26_p4 = scmp.ge.s32.totalorder %s1128_s17, 2 }
   0x9   : > { %s29_s18 = ssub.s32 %s884_s13, %s1126_s16  ;;  %p685_p6 = scmp.ge.s32.totalorder %s892_s15, 4 }
   0xa   : > { %s1130_s17 = smov (%p26_p4, %s1128_s17), 0 }
   0xb   : > { %s28_s19 = ssub.s32 %s888_s14, %s1130_s17  ;;  %118 = sbr.rel (%p685_p6) target bundleno = 34 (0x22), region = 16 }
   0xc   : > { %s30_s20 = sor.u32 %s29_s18, %s28_s19 }
   0xd   : > { %p31_p5 = scmp.eq.s32.totalorder %s30_s20, 0 }
   0xf   : > { %s961_s22 = scalar_select %p31_p5, %s872_s10, %s33_s21  }
  0x12   : > { %121 = sbr.rel (!%p42_p3) target bundleno = 34 (0x22), region = 20  ;;  %s123_s23 = sand.u32 (%p42_p3), 1, %s872_s10  }
  0x13   : > { %s708_s24 = sshll.u32 (%p42_p3), %s888_s14, 5  ;;  %s686_s25 = sshll.u32 (%p42_p3), %s123_s23, 6 }
  0x14   : > { %s128_s26 = sadd.s32 (%p42_p3), %s884_s13, %s708_s24  ;;  %s125_s3 = scalar_lea.vmem (%p42_p3), [#allocation3], %s686_s25 }
  0x15   : > { %s689_s27 = sshll.u32 (%p42_p3), %s128_s26, 2 }
  0x16   : > { %s970_s30 = scalar_lea.vmem (%p42_p3), %s1116_s0, %s689_s27 }
  0x17   : > { %v146_v0 = vld [vmem:[%s970_s30] sm:$0xf] (%p42_p3)  ;;  %v148_v1 = vld [vmem:[%s970_s30 + $0x8] sm:$0xf] (%p42_p3)  ;;  %v150_v2 = vld [vmem:[%s970_s30 + $0x10] sm:$0xf] (%p42_p3) }
  0x18   : > { %147 = vst [vmem:[%s125_s3] sm:$0xf] (%p42_p3), %v146_v0  ;;  %149 = vst [vmem:[%s125_s3 + $0x4] sm:$0xf] (%p42_p3), %v148_v1  ;;  %v152_v3 = vld [vmem:[%s970_s30 + $0x18] sm:$0xf] (%p42_p3) }
  0x19   : > { %151 = vst [vmem:[%s125_s3 + $0x8] sm:$0xf] %v150_v2  ;;  %v154_v4 = vld [vmem:[%s970_s30 + $0x20] sm:$0xf]  ;;  %v156_v5 = vld [vmem:[%s970_s30 + $0x28] sm:$0xf] }
  0x1a   : > { %153 = vst [vmem:[%s125_s3 + $0xc] sm:$0xf] %v152_v3  ;;  %155 = vst [vmem:[%s125_s3 + $0x10] sm:$0xf] %v154_v4  ;;  %v158_v6 = vld [vmem:[%s970_s30 + $0x30] sm:$0xf] }
  0x1b   : > { %157 = vst [vmem:[%s125_s3 + $0x14] sm:$0xf] %v156_v5  ;;  %v160_v7 = vld [vmem:[%s970_s30 + $0x38] sm:$0xf]  ;;  %v162_v8 = vld [vmem:[%s970_s30 + $0x40] sm:$0xf] }
  0x1c   : > { %159 = vst [vmem:[%s125_s3 + $0x18] sm:$0xf] %v158_v6  ;;  %161 = vst [vmem:[%s125_s3 + $0x1c] sm:$0xf] %v160_v7  ;;  %v164_v9 = vld [vmem:[%s970_s30 + $0x48] sm:$0xf] }
  0x1d   : > { %163 = vst [vmem:[%s125_s3 + $0x20] sm:$0xf] %v162_v8  ;;  %v166_v10 = vld [vmem:[%s970_s30 + $0x50] sm:$0xf]  ;;  %v168_v11 = vld [vmem:[%s970_s30 + $0x58] sm:$0xf] }
  0x1e   : > { %165 = vst [vmem:[%s125_s3 + $0x24] sm:$0xf] %v164_v9  ;;  %167 = vst [vmem:[%s125_s3 + $0x28] sm:$0xf] %v166_v10  ;;  %v170_v12 = vld [vmem:[%s970_s30 + $0x60] sm:$0xf] }
  0x1f   : > { %169 = vst [vmem:[%s125_s3 + $0x2c] sm:$0xf] %v168_v11  ;;  %v172_v13 = vld [vmem:[%s970_s30 + $0x68] sm:$0xf]  ;;  %v174_v14 = vld [vmem:[%s970_s30 + $0x70] sm:$0xf] }
  0x20   : > { %171 = vst [vmem:[%s125_s3 + $0x30] sm:$0xf] %v170_v12  ;;  %173 = vst [vmem:[%s125_s3 + $0x34] sm:$0xf] %v172_v13  ;;  %v176_v15 = vld [vmem:[%s970_s30 + $0x78] sm:$0xf] }
  0x21   : > { %175 = vst [vmem:[%s125_s3 + $0x38] sm:$0xf] %v174_v14  ;;  %177 = vst [vmem:[%s125_s3 + $0x3c] sm:$0xf] %v176_v15 }
  0x22 PF: > { %p690_p7 = scmp.ge.s32.totalorder %s892_s15, 1  ;;  %p240_p8 = scmp.lt.s32.totalorder %s892_s15, 5 }
  0x24   : > { %p241_p9 = pnand %p690_p7, %p240_p8 }
  0x25   : > { %s247_s4 = sand.u32 (!%p241_p9), 1, %s868_s9   ;;  %s692_s5 = sshll.u32 (!%p241_p9), %s876_s11, 4 }
  0x26   : > { %244 = sbr.rel (%p241_p9) target bundleno = 327 (0x147), region = 65  ;;  %s691_s6 = sshll.u32 (!%p241_p9), %s247_s4, 6 }
  0x27   : > { %p275_p10 = scmp.lt.s32.totalorder (!%p241_p9), %s692_s5, 31  ;;  %s694_s7 = sshll.u32 (!%p241_p9), %s880_s12, 4 }
  0x28   : > { %p281_p11 = scmp.lt.s32.totalorder (!%p241_p9), %s694_s7, 31  ;;  %s1003_s9 = scalar_lea.vmem (!%p241_p9), [#allocation3], %s691_s6 }
  0x29   : > { %p696_p12 = scmp.ne.s32.totalorder (!%p241_p9), %s876_s11, 0 }
  0x2d   : > { %s1132_s5 = smov (!%p275_p10, %s692_s5), 31  ;;  %s1134_s7 = smov (!%p281_p11, %s694_s7), 31 }
  0x2e   : > { %s693_s8 = sshll.u32 %s1132_s5, 3  ;;  %s695_s21 = sshll.u32 %s1134_s7, 3  ;;  %vm291_vm0 = vcmask (!%p696_p12), 261120   ;;  %v894_v16 = vmov (!%p696_p12), 0.0  }
  0x2f   : > { %s996_s20 = scalar_lea.vmem %s1117_s1, %s693_s8  ;;  %s1001_s25 = scalar_lea.vmem %s1118_s2, %s695_s21  ;;  %292 = vst.msk [vmem:[#allocation2] sm:$0xff] (!%p696_p12), %vm291_vm0, %v894_v16  ;;  %293 = vst.msk [vmem:[#allocation2 + $0x8] sm:$0xff] (!%p696_p12), %vm291_vm0, %v894_v16 }
  0x30   : > { %290 = sbr.rel (%p696_p12) target bundleno = 55 (0x37), region = 73  ;;  %294 = vst.msk [vmem:[#allocation2 + $0x10] sm:$0xff] (!%p696_p12), %vm291_vm0, %v894_v16  ;;  %295 = vst.msk [vmem:[#allocation2 + $0x18] sm:$0xff] (!%p696_p12), %vm291_vm0, %v894_v16 }
  0x31   : > { %296 = vst.msk [vmem:[#allocation2 + $0x20] sm:$0xff] (!%p696_p12), %vm291_vm0, %v894_v16  ;;  %297 = vst.msk [vmem:[#allocation2 + $0x28] sm:$0xff] (!%p696_p12), %vm291_vm0, %v894_v16 }
  0x32   : > { %298 = vst.msk [vmem:[#allocation2 + $0x30] sm:$0xff] (!%p696_p12), %vm291_vm0, %v894_v16  ;;  %299 = vst.msk [vmem:[#allocation2 + $0x38] sm:$0xff] (!%p696_p12), %vm291_vm0, %v894_v16 }
  0x33   : > { %300 = vst.msk [vmem:[#allocation2 + $0x40] sm:$0xff] (!%p696_p12), %vm291_vm0, %v894_v16  ;;  %301 = vst.msk [vmem:[#allocation2 + $0x48] sm:$0xff] (!%p696_p12), %vm291_vm0, %v894_v16 }
  0x34   : > { %302 = vst.msk [vmem:[#allocation2 + $0x50] sm:$0xff] (!%p696_p12), %vm291_vm0, %v894_v16  ;;  %303 = vst.msk [vmem:[#allocation2 + $0x58] sm:$0xff] (!%p696_p12), %vm291_vm0, %v894_v16 }
  0x35   : > { %304 = vst.msk [vmem:[#allocation2 + $0x60] sm:$0xff] (!%p696_p12), %vm291_vm0, %v894_v16  ;;  %305 = vst.msk [vmem:[#allocation2 + $0x68] sm:$0xff] (!%p696_p12), %vm291_vm0, %v894_v16 }
  0x36   : > { %306 = vst.msk [vmem:[#allocation2 + $0x70] sm:$0xff] (!%p696_p12), %vm291_vm0, %v894_v16  ;;  %307 = vst.msk [vmem:[#allocation2 + $0x78] sm:$0xff] (!%p696_p12), %vm291_vm0, %v894_v16 }
  0x37 PF: > { %v340_v17 = vld [vmem:[%s996_s20] sm:$0xff]  ;;  %v341_v18 = vld [vmem:[%s996_s20 + $0x8] sm:$0xff]  ;;  %v342_v19 = vld [vmem:[%s996_s20 + $0x10] sm:$0xff]  ;;  %vm525_vm1 = vcmask 261120   ;;  %p705_p13 = scmp.ne.s32.totalorder %s876_s11, 1 }
  0x38   : > { %v356_v20 = vpack.c.bf16 %v341_v18, %v340_v17  ;;  %v343_v21 = vld [vmem:[%s996_s20 + $0x18] sm:$0xff]  ;;  %v344_v23 = vld [vmem:[%s996_s20 + $0x20] sm:$0xff]  ;;  %v345_v24 = vld [vmem:[%s996_s20 + $0x28] sm:$0xff] }
  0x39   : > { %v357_v22 = vpack.c.bf16 %v343_v21, %v342_v19  ;;  %v346_v25 = vld [vmem:[%s996_s20 + $0x30] sm:$0xff]  ;;  %v358_v26 = vpack.c.bf16 %v345_v24, %v344_v23  ;;  %v347_v27 = vld [vmem:[%s996_s20 + $0x38] sm:$0xff]  ;;  %v830_v28 = vld [vmem:[%s1003_s9] sm:$0xff]  }
  0x3a   : > { %725 = vmatprep.subr.bf16.mxu0 %v356_v20  ;;  %757 = vmatprep.subr.bf16.mxu1 %v356_v20  ;;  %v831_v29 = vld [vmem:[%s1003_s9 + $0x20] sm:$0xff]   ;;  %v359_v30 = vpack.c.bf16 %v347_v27, %v346_v25  ;;  %v349_v32 = vld [vmem:[%s996_s20 + $0x48] sm:$0xff]  ;;  %v350_v34 = vld [vmem:[%s996_s20 + $0x50] sm:$0xff] }
  0x3b   : > { %726 = vmatpush3.bf16.msra.mxu0 %v356_v20  ;;  %765 = vmatpush3.bf16.msra.mxu1 %v356_v20  ;;  %v348_v31 = vld [vmem:[%s996_s20 + $0x40] sm:$0xff]  ;;  %v351_v35 = vld [vmem:[%s996_s20 + $0x58] sm:$0xff]  ;;  %v353_v38 = vld [vmem:[%s996_s20 + $0x68] sm:$0xff] }
  0x3c   : > { %727 = vmatprep.subr.bf16.mxu0 %v357_v22  ;;  %758 = vmatprep.subr.bf16.mxu1 %v357_v22  ;;  %v360_v33 = vpack.c.bf16 %v349_v32, %v348_v31  ;;  %v361_v36 = vpack.c.bf16 %v351_v35, %v350_v34  ;;  %v352_v37 = vld [vmem:[%s996_s20 + $0x60] sm:$0xff]  ;;  %v354_v40 = vld [vmem:[%s996_s20 + $0x70] sm:$0xff]  ;;  %v355_v41 = vld [vmem:[%s996_s20 + $0x78] sm:$0xff] }
  0x3d   : > { %741 = vmatprep.mubr.bf16.mxu0 %v830_v28  ;;  %749 = vmatprep.mubr.bf16.mxu1 %v831_v29  ;;  %v362_v39 = vpack.c.bf16 %v353_v38, %v352_v37  ;;  %v363_v42 = vpack.c.bf16 %v355_v41, %v354_v40  ;;  %v832_v43 = vld [vmem:[%s1003_s9 + $0x8] sm:$0xff]   ;;  %v834_v45 = vld [vmem:[%s1003_s9 + $0x10] sm:$0xff]   ;;  %v836_v47 = vld [vmem:[%s1003_s9 + $0x18] sm:$0xff]  }
  0x3e   : > { %v833_v44 = vld [vmem:[%s1003_s9 + $0x28] sm:$0xff]   ;;  %v835_v46 = vld [vmem:[%s1003_s9 + $0x30] sm:$0xff]   ;;  %v837_v48 = vld [vmem:[%s1003_s9 + $0x38] sm:$0xff]  }
  0x3f   : > { %728 = vmatpush3.bf16.msra.mxu0 %v357_v22  ;;  %766 = vmatpush3.bf16.msra.mxu1 %v357_v22  ;;  %v310_v49 = vld [vmem:[#allocation2 + $0x10] sm:$0xff]  ;;  %v308_v51 = vld [vmem:[#allocation2] sm:$0xff]  ;;  %v311_v55 = vld [vmem:[#allocation2 + $0x18] sm:$0xff] }
  0x40   : > { %729 = vmatprep.subr.bf16.mxu0 %v358_v26  ;;  %759 = vmatprep.subr.bf16.mxu1 %v358_v26  ;;  %v318_v50 = vld [vmem:[#allocation2 + $0x50] sm:$0xff]  ;;  %v316_v52 = vld [vmem:[#allocation2 + $0x40] sm:$0xff]  ;;  %v319_v56 = vld [vmem:[#allocation2 + $0x58] sm:$0xff] }
  0x41   : > { %v309_v61 = vld [vmem:[#allocation2 + $0x8] sm:$0xff]  ;;  %v314_v9 = vld [vmem:[#allocation2 + $0x30] sm:$0xff]  ;;  %v312_v11 = vld [vmem:[#allocation2 + $0x20] sm:$0xff] }
  0x42   : > { %v317_v62 = vld [vmem:[#allocation2 + $0x48] sm:$0xff]  ;;  %v322_v10 = vld [vmem:[#allocation2 + $0x70] sm:$0xff]  ;;  %v320_v12 = vld [vmem:[#allocation2 + $0x60] sm:$0xff] }
  0x43   : > { %730 = vmatpush3.bf16.msra.mxu0 %v358_v26  ;;  %767 = vmatpush3.bf16.msra.mxu1 %v358_v26  ;;  %v315_v15 = vld [vmem:[#allocation2 + $0x38] sm:$0xff]  ;;  %v313_v21 = vld [vmem:[#allocation2 + $0x28] sm:$0xff] }
  0x44   : > { %731 = vmatprep.subr.bf16.mxu0 %v359_v30  ;;  %760 = vmatprep.subr.bf16.mxu1 %v359_v30  ;;  %v323_v16 = vld [vmem:[#allocation2 + $0x78] sm:$0xff]  ;;  %v321_v22 = vld [vmem:[#allocation2 + $0x68] sm:$0xff] }
  0x47   : > { %732 = vmatpush3.bf16.msra.mxu0 %v359_v30  ;;  %768 = vmatpush3.bf16.msra.mxu1 %v359_v30 }
  0x48   : > { %733 = vmatprep.subr.bf16.mxu0 %v360_v33  ;;  %761 = vmatprep.subr.bf16.mxu1 %v360_v33 }
  0x4b   : > { %734 = vmatpush3.bf16.msra.mxu0 %v360_v33  ;;  %769 = vmatpush3.bf16.msra.mxu1 %v360_v33 }
  0x4c   : > { %735 = vmatprep.subr.bf16.mxu0 %v361_v36  ;;  %762 = vmatprep.subr.bf16.mxu1 %v361_v36 }
  0x4f   : > { %736 = vmatpush3.bf16.msra.mxu0 %v361_v36  ;;  %770 = vmatpush3.bf16.msra.mxu1 %v361_v36 }
  0x50   : > { %737 = vmatprep.subr.bf16.mxu0 %v362_v39  ;;  %763 = vmatprep.subr.bf16.mxu1 %v362_v39 }
  0x53   : > { %738 = vmatpush3.bf16.msra.mxu0 %v362_v39  ;;  %771 = vmatpush3.bf16.msra.mxu1 %v362_v39 }
  0x54   : > { %739 = vmatprep.subr.bf16.mxu0 %v363_v42  ;;  %764 = vmatprep.subr.bf16.mxu1 %v363_v42 }
  0x57   : > { %740 = vmatpush3.bf16.msra.mxu0 %v363_v42  ;;  %772 = vmatpush3.bf16.msra.mxu1 %v363_v42 }
  0x5a   : > { %742 = vmatmul.mubr.bf16.vlgmr.msra.gmra.mrb[0].mxu0 %v832_v43  ;;  %750 = vmatmul.mubr.bf16.vlgmr.msra.gmra.mrb[0].mxu1 %v833_v44 }
  0x5b   : > { %745 = vmatprep.mubr.bf16.mxu0 %v834_v45  ;;  %753 = vmatprep.mubr.bf16.mxu1 %v835_v46 }
  0x62   : > { %746 = vmatmul.mubr.bf16.gmra.mrb[4].mxu0 %v836_v47  ;;  %754 = vmatmul.mubr.bf16.gmra.mrb[4].mxu1 %v837_v48 }
 0x12d   : > { %v743_v53 = vpop.f32.mrb[0].mxu0  ;;  %v751_v54 = vpop.f32.mrb[0].mxu1 }
 0x12e   : > { %v511_v57 = vadd.f32 %v743_v53, %v310_v49  ;;  %v519_v58 = vadd.f32 %v751_v54, %v318_v50  ;;  %v446_v59 = vpop.f32.mrb[1].mxu0  ;;  %v478_v60 = vpop.f32.mrb[1].mxu1 }
 0x12f   : > { %v509_v63 = vadd.f32 %v446_v59, %v308_v51  ;;  %v517_v0 = vadd.f32 %v478_v60, %v316_v52  ;;  %v744_v1 = vpop.f32.mrb[2].mxu0  ;;  %v752_v2 = vpop.f32.mrb[2].mxu1 }
 0x130   : > { %528 = vst.msk [vmem:[#allocation2 + $0x10] sm:$0xff] %vm525_vm1, %v511_v57  ;;  %536 = vst.msk [vmem:[#allocation2 + $0x50] sm:$0xff] %vm525_vm1, %v519_v58  ;;  %v512_v3 = vadd.f32 %v744_v1, %v311_v55  ;;  %v520_v4 = vadd.f32 %v752_v2, %v319_v56  ;;  %v449_v5 = vpop.f32.mrb[3].mxu0  ;;  %v481_v6 = vpop.f32.mrb[3].mxu1 }
 0x131   : > { %526 = vst.msk [vmem:[#allocation2] sm:$0xff] %vm525_vm1, %v509_v63  ;;  %534 = vst.msk [vmem:[#allocation2 + $0x40] sm:$0xff] %vm525_vm1, %v517_v0  ;;  %v510_v7 = vadd.f32 %v449_v5, %v309_v61  ;;  %v518_v8 = vadd.f32 %v481_v6, %v317_v62 }
 0x132   : > { %529 = vst.msk [vmem:[#allocation2 + $0x18] sm:$0xff] %vm525_vm1, %v512_v3  ;;  %537 = vst.msk [vmem:[#allocation2 + $0x58] sm:$0xff] %vm525_vm1, %v520_v4 }
 0x133   : > { %527 = vst.msk [vmem:[#allocation2 + $0x8] sm:$0xff] %vm525_vm1, %v510_v7  ;;  %535 = vst.msk [vmem:[#allocation2 + $0x48] sm:$0xff] %vm525_vm1, %v518_v8 }
 0x135   : > { %v747_v13 = vpop.f32.mrb[4].mxu0  ;;  %v755_v14 = vpop.f32.mrb[4].mxu1  ;;  %545 = sbr.rel (%p705_p13) target bundleno = 327 (0x147), region = 77 }
 0x136   : > { %v515_v17 = vadd.f32 %v747_v13, %v314_v9  ;;  %v523_v18 = vadd.f32 %v755_v14, %v322_v10  ;;  %v462_v19 = vpop.f32.mrb[5].mxu0  ;;  %v494_v20 = vpop.f32.mrb[5].mxu1 }
 0x137   : > { %v513_v23 = vadd.f32 %v462_v19, %v312_v11  ;;  %v521_v24 = vadd.f32 %v494_v20, %v320_v12  ;;  %v748_v25 = vpop.f32.mrb[6].mxu0  ;;  %v756_v26 = vpop.f32.mrb[6].mxu1  ;;  %v548_v35 = vld [vmem:[#allocation2 + $0x10] sm:$0xff] (!%p705_p13) }
 0x138   : > { %532 = vst.msk [vmem:[#allocation2 + $0x30] sm:$0xff] %vm525_vm1, %v515_v17  ;;  %540 = vst.msk [vmem:[#allocation2 + $0x70] sm:$0xff] %vm525_vm1, %v523_v18  ;;  %v516_v27 = vadd.f32 %v748_v25, %v315_v15  ;;  %v524_v28 = vadd.f32 %v756_v26, %v323_v16  ;;  %v465_v29 = vpop.f32.mrb[7].mxu0  ;;  %v497_v30 = vpop.f32.mrb[7].mxu1  ;;  %v546_v33 = vld [vmem:[#allocation2] sm:$0xff] (!%p705_p13)  ;;  %v564_v38 = vmax.f32 (!%p705_p13), %v548_v35, 0.0 }
 0x139   : > { %530 = vst.msk [vmem:[#allocation2 + $0x20] sm:$0xff] %vm525_vm1, %v513_v23  ;;  %538 = vst.msk [vmem:[#allocation2 + $0x60] sm:$0xff] %vm525_vm1, %v521_v24  ;;  %v514_v31 = vadd.f32 %v465_v29, %v313_v21  ;;  %v522_v32 = vadd.f32 %v497_v30, %v321_v22  ;;  %v562_v36 = vmax.f32 (!%p705_p13), %v546_v33, 0.0  ;;  %v549_v39 = vld [vmem:[#allocation2 + $0x18] sm:$0xff] (!%p705_p13)  ;;  %v554_v47 = vld [vmem:[#allocation2 + $0x40] sm:$0xff] (!%p705_p13) }
 0x13a   : > { %533 = vst.msk [vmem:[#allocation2 + $0x38] sm:$0xff] %vm525_vm1, %v516_v27  ;;  %541 = vst.msk [vmem:[#allocation2 + $0x78] sm:$0xff] %vm525_vm1, %v524_v28  ;;  %v547_v34 = vld [vmem:[#allocation2 + $0x8] sm:$0xff] (!%p705_p13)  ;;  %v565_v42 = vmax.f32 (!%p705_p13), %v549_v39, 0.0  ;;  %v570_v50 = vmax.f32 (!%p705_p13), %v554_v47, 0.0  ;;  %v556_v52 = vld [vmem:[#allocation2 + $0x50] sm:$0xff] (!%p705_p13) }
 0x13b   : > { %531 = vst.msk [vmem:[#allocation2 + $0x28] sm:$0xff] %vm525_vm1, %v514_v31  ;;  %539 = vst.msk [vmem:[#allocation2 + $0x68] sm:$0xff] %vm525_vm1, %v522_v32  ;;  %v563_v37 = vmax.f32 (!%p705_p13), %v547_v34, 0.0  ;;  %v555_v51 = vld [vmem:[#allocation2 + $0x48] sm:$0xff] (!%p705_p13)  ;;  %v557_v53 = vld [vmem:[#allocation2 + $0x58] sm:$0xff] (!%p705_p13)  ;;  %v572_v55 = vmax.f32 (!%p705_p13), %v556_v52, 0.0 }
 0x13c   : > { %578 = vst.msk [vmem:[%s1001_s25] sm:$0xff] %vm525_vm1, %v562_v36  ;;  %580 = vst.msk [vmem:[%s1001_s25 + $0x10] sm:$0xff] %vm525_vm1, %v564_v38  ;;  %v571_v54 = vmax.f32 %v555_v51, 0.0  ;;  %v573_v56 = vmax.f32 %v557_v53, 0.0 }
 0x13d   : > { %579 = vst.msk [vmem:[%s1001_s25 + $0x8] sm:$0xff] %vm525_vm1, %v563_v37  ;;  %581 = vst.msk [vmem:[%s1001_s25 + $0x18] sm:$0xff] %vm525_vm1, %v565_v42 }
 0x13e   : > { %586 = vst.msk [vmem:[%s1001_s25 + $0x40] sm:$0xff] %vm525_vm1, %v570_v50  ;;  %587 = vst.msk [vmem:[%s1001_s25 + $0x48] sm:$0xff] %vm525_vm1, %v571_v54 }
 0x13f   : > { %v552_v45 = vld [vmem:[#allocation2 + $0x30] sm:$0xff]  ;;  %588 = vst.msk [vmem:[%s1001_s25 + $0x50] sm:$0xff] %vm525_vm1, %v572_v55  ;;  %589 = vst.msk [vmem:[%s1001_s25 + $0x58] sm:$0xff] %vm525_vm1, %v573_v56 }
 0x140   : > { %v550_v40 = vld [vmem:[#allocation2 + $0x20] sm:$0xff]  ;;  %v568_v48 = vmax.f32 %v552_v45, 0.0  ;;  %v560_v59 = vld [vmem:[#allocation2 + $0x70] sm:$0xff] }
 0x141   : > { %v566_v43 = vmax.f32 %v550_v40, 0.0  ;;  %v553_v46 = vld [vmem:[#allocation2 + $0x38] sm:$0xff]  ;;  %v558_v57 = vld [vmem:[#allocation2 + $0x60] sm:$0xff]  ;;  %v576_v62 = vmax.f32 %v560_v59, 0.0 }
 0x142   : > { %v551_v41 = vld [vmem:[#allocation2 + $0x28] sm:$0xff]  ;;  %v569_v49 = vmax.f32 %v553_v46, 0.0  ;;  %584 = vst.msk [vmem:[%s1001_s25 + $0x30] sm:$0xff] %vm525_vm1, %v568_v48  ;;  %v574_v60 = vmax.f32 %v558_v57, 0.0  ;;  %v561_v63 = vld [vmem:[#allocation2 + $0x78] sm:$0xff] }
 0x143   : > { %v567_v44 = vmax.f32 %v551_v41, 0.0  ;;  %582 = vst.msk [vmem:[%s1001_s25 + $0x20] sm:$0xff] %vm525_vm1, %v566_v43  ;;  %v559_v58 = vld [vmem:[#allocation2 + $0x68] sm:$0xff]  ;;  %v577_v0 = vmax.f32 %v561_v63, 0.0  ;;  %592 = vst.msk [vmem:[%s1001_s25 + $0x70] sm:$0xff] %vm525_vm1, %v576_v62 }
 0x144   : > { %585 = vst.msk [vmem:[%s1001_s25 + $0x38] sm:$0xff] %vm525_vm1, %v569_v49  ;;  %v575_v61 = vmax.f32 %v559_v58, 0.0  ;;  %590 = vst.msk [vmem:[%s1001_s25 + $0x60] sm:$0xff] %vm525_vm1, %v574_v60 }
 0x145   : > { %583 = vst.msk [vmem:[%s1001_s25 + $0x28] sm:$0xff] %vm525_vm1, %v567_v44  ;;  %593 = vst.msk [vmem:[%s1001_s25 + $0x78] sm:$0xff] %vm525_vm1, %v577_v0 }
 0x146   : > { %591 = vst.msk [vmem:[%s1001_s25 + $0x68] sm:$0xff] %vm525_vm1, %v575_v61 }
 0x147 PF: > { %s12_s15 = sadd.s32 1, %s892_s15   ;;  %s1119_s9 = smov %s872_s10 }
 0x148   : > { %p9_p0 = scmp.ge.s32.totalorder %s12_s15, 6   ;;  %s1120_s10 = smov %s961_s22 }
 0x149   : > { %s1121_s11 = smov %s884_s13  ;;  %s1122_s12 = smov %s888_s14 }
 0x14a   : > { %s1123_s13 = smov %s1126_s16  ;;  %s1124_s14 = smov %s1130_s17 }
 0x14b   :  { %11 = sbr.rel (!%p9_p0) target bundleno = 4 (0x4), region = 115 }

// kernel: tsdcn_forward.16
= control target key start
LH: loop header
LB: loop body
LE: loop exit
PB: predicated region body
PF: predicated region fallthrough
CT: control target
= control target key end

     0   :  { %s557_s12 = smov 0   ;;  %s672_s0 = inlined_call_operand.vmem [shape: f32[256,32], index: 0, kind: input, shape index: {}]   ;;  %s673_s1 = inlined_call_operand.vmem [shape: f32[256,32], index: 1, kind: input, shape index: {}]   ;;  %s674_s2 = inlined_call_operand.vmem [shape: f32[32,80], index: 2, kind: input, shape index: {}]   ;;  %s675_s3 = inlined_call_operand.vmem [shape: f32[256,80], index: 3, kind: output, shape index: {}]  }
   0x1 LB: > { %s466_s13 = sadd.s32 4294967295, %s535_s12   ;;  %p470_p0 = scmp.ge.s32.totalorder %s535_s12, 1  ;;  %s535_s12 = sphi %s557_s12, %s13_s12  }
   0x2   : > { %p149_p1 = scmp.lt.s32.totalorder %s535_s12, 3 }
   0x4   : > { %p150_p2 = pnand %p470_p0, %p149_p1 }
   0x5   : > { %v253_v0 = vld [vmem:[%s674_s2] sm:$0xff] (!%p150_p2)  ;;  %v254_v1 = vld [vmem:[%s674_s2 + $0x8] sm:$0xff] (!%p150_p2)  ;;  %v255_v2 = vld [vmem:[%s674_s2 + $0x10] sm:$0xff] (!%p150_p2)  ;;  %s471_s20 = sshll.u32 (!%p150_p2), %s466_s13, 4  ;;  %vm259_vm0 = vcmask (!%p150_p2), 261120   ;;  %vm381_vm1 = vcmask (!%p150_p2), 654336  }
   0x6   : > { %153 = sbr.rel (%p150_p2) target bundleno = 250 (0xfa), region = 32  ;;  %v257_v3 = vpack.c.bf16 (!%p150_p2), %v254_v1, %v253_v0  ;;  %v256_v4 = vld [vmem:[%s674_s2 + $0x18] sm:$0xff] (!%p150_p2)  ;;  %p179_p3 = scmp.lt.s32.totalorder (!%p150_p2), %s471_s20, 31 }
   0x7   : > { %v258_v5 = vpack.c.bf16 (!%p150_p2), %v256_v4, %v255_v2 }
   0x8   : > { %497 = vmatprep.subr.bf16.mxu0 (!%p150_p2), %v257_v3  ;;  %517 = vmatprep.subr.bf16.mxu1 (!%p150_p2), %v257_v3 }
   0x9   : > { %498 = vmatpush3.bf16.msra.mxu0 (!%p150_p2), %v257_v3  ;;  %519 = vmatpush3.bf16.msra.mxu1 (!%p150_p2), %v257_v3 }
   0xa   : > { %499 = vmatprep.subr.bf16.mxu0 (!%p150_p2), %v258_v5  ;;  %518 = vmatprep.subr.bf16.mxu1 (!%p150_p2), %v258_v5 }
   0xd   : > { %s677_s20 = smov (!%p179_p3, %s471_s20), 31  ;;  %500 = vmatpush3.bf16.msra.mxu0 %v258_v5  ;;  %520 = vmatpush3.bf16.msra.mxu1 %v258_v5 }
   0xe   : > { %s577_s23 = sshll.u32 %s677_s20, 3 }
   0xf   : > { %s583_s26 = scalar_lea.vmem %s672_s0, %s577_s23  ;;  %s589_s29 = scalar_lea.vmem %s673_s1, %s577_s23 }
  0x10   : > { %v197_v6 = vld [vmem:[%s583_s26] sm:$0xff]  ;;  %v198_v7 = vld [vmem:[%s583_s26 + $0x8] sm:$0xff]  ;;  %v199_v16 = vld [vmem:[%s583_s26 + $0x10] sm:$0xff]  ;;  %s635_s5 = scalar_lea.vmem %s675_s3, %s577_s23 }
  0x11   : > { %v213_v8 = vld [vmem:[%s589_s29] sm:$0xff]  ;;  %v214_v9 = vld [vmem:[%s589_s29 + $0x8] sm:$0xff]  ;;  %v200_v19 = vld [vmem:[%s583_s26 + $0x18] sm:$0xff] }
  0x12   : > { %v229_v10 = vadd.f32 %v213_v8, %v197_v6  ;;  %v205_v11 = vld [vmem:[%s583_s26 + $0x40] sm:$0xff]  ;;  %v206_v12 = vld [vmem:[%s583_s26 + $0x48] sm:$0xff]  ;;  %v230_v13 = vadd.f32 %v214_v9, %v198_v7  ;;  %v215_v20 = vld [vmem:[%s589_s29 + $0x10] sm:$0xff] }
  0x13   : > { %v221_v14 = vld [vmem:[%s589_s29 + $0x40] sm:$0xff]  ;;  %v222_v15 = vld [vmem:[%s589_s29 + $0x48] sm:$0xff]  ;;  %v216_v21 = vld [vmem:[%s589_s29 + $0x18] sm:$0xff]  ;;  %v231_v23 = vadd.f32 %v215_v20, %v199_v16 }
  0x14   : > { %v237_v17 = vadd.f32 %v221_v14, %v205_v11  ;;  %v238_v18 = vadd.f32 %v222_v15, %v206_v12  ;;  %v245_v22 = vpack.c.bf16 %v230_v13, %v229_v10  ;;  %v232_v24 = vadd.f32 %v216_v21, %v200_v19  ;;  %v207_v25 = vld [vmem:[%s583_s26 + $0x50] sm:$0xff]  ;;  %v208_v26 = vld [vmem:[%s583_s26 + $0x58] sm:$0xff]  ;;  %v201_v31 = vld [vmem:[%s583_s26 + $0x20] sm:$0xff] }
  0x15   : > { %v223_v27 = vld [vmem:[%s589_s29 + $0x50] sm:$0xff]  ;;  %v224_v29 = vld [vmem:[%s589_s29 + $0x58] sm:$0xff]  ;;  %v202_v32 = vld [vmem:[%s583_s26 + $0x28] sm:$0xff] }
  0x16   : > { %v249_v28 = vpack.c.bf16 %v238_v18, %v237_v17  ;;  %v239_v30 = vadd.f32 %v223_v27, %v207_v25  ;;  %501 = vmatprep.mubr.msk.bf16.mxu0 %vm259_vm0, %v245_v22  ;;  %v246_v33 = vpack.c.bf16 %v232_v24, %v231_v23  ;;  %v240_v34 = vadd.f32 %v224_v29, %v208_v26  ;;  %v217_v35 = vld [vmem:[%s589_s29 + $0x20] sm:$0xff]  ;;  %v218_v36 = vld [vmem:[%s589_s29 + $0x28] sm:$0xff]  ;;  %v203_v46 = vld [vmem:[%s583_s26 + $0x30] sm:$0xff] }
  0x17   : > { %v209_v37 = vld [vmem:[%s583_s26 + $0x60] sm:$0xff]  ;;  %v233_v38 = vadd.f32 %v217_v35, %v201_v31  ;;  %v234_v39 = vadd.f32 %v218_v36, %v202_v32  ;;  %v210_v40 = vld [vmem:[%s583_s26 + $0x68] sm:$0xff]  ;;  %v204_v47 = vld [vmem:[%s583_s26 + $0x38] sm:$0xff] }
  0x18   : > { %509 = vmatprep.mubr.msk.bf16.mxu1 %vm259_vm0, %v249_v28  ;;  %v225_v41 = vld [vmem:[%s589_s29 + $0x60] sm:$0xff]  ;;  %v226_v42 = vld [vmem:[%s589_s29 + $0x68] sm:$0xff]  ;;  %502 = vmatmul.mubr.msk.bf16.vlgmr.msra.gmra.mrb[0].mxu0 %vm259_vm0, %v246_v33  ;;  %v250_v43 = vpack.c.bf16 %v240_v34, %v239_v30  ;;  %v219_v48 = vld [vmem:[%s589_s29 + $0x30] sm:$0xff] }
  0x19   : > { %v241_v44 = vadd.f32 %v225_v41, %v209_v37  ;;  %v242_v45 = vadd.f32 %v226_v42, %v210_v40  ;;  %v247_v49 = vpack.c.bf16 %v234_v39, %v233_v38  ;;  %v220_v50 = vld [vmem:[%s589_s29 + $0x38] sm:$0xff]  ;;  %v235_v51 = vadd.f32 %v219_v48, %v203_v46  ;;  %v211_v52 = vld [vmem:[%s583_s26 + $0x70] sm:$0xff] }
  0x1a   : > { %v212_v53 = vld [vmem:[%s583_s26 + $0x78] sm:$0xff]  ;;  %510 = vmatmul.mubr.msk.bf16.vlgmr.msra.gmra.mrb[0].mxu1 %vm259_vm0, %v250_v43  ;;  %v236_v55 = vadd.f32 %v220_v50, %v204_v47  ;;  %v227_v56 = vld [vmem:[%s589_s29 + $0x70] sm:$0xff] }
  0x1b   : > { %v251_v54 = vpack.c.bf16 %v242_v45, %v241_v44  ;;  %v228_v57 = vld [vmem:[%s589_s29 + $0x78] sm:$0xff]  ;;  %505 = vmatprep.mubr.msk.bf16.mxu0 %vm259_vm0, %v247_v49  ;;  %v243_v58 = vadd.f32 %v227_v56, %v211_v52 }
  0x1c   : > { %v244_v59 = vadd.f32 %v228_v57, %v212_v53  ;;  %v248_v60 = vpack.c.bf16 %v236_v55, %v235_v51 }
  0x1d   : > { %513 = vmatprep.mubr.msk.bf16.mxu1 %vm259_vm0, %v251_v54 }
  0x1e   : > { %v252_v61 = vpack.c.bf16 %v244_v59, %v243_v58 }
  0x20   : > { %506 = vmatmul.mubr.msk.bf16.gmra.mrb[4].mxu0 %vm259_vm0, %v248_v60 }
  0x22   : > { %514 = vmatmul.mubr.msk.bf16.gmra.mrb[4].mxu1 %vm259_vm0, %v252_v61 }
  0xeb   : > { %v503_v62 = vpop.f32.mrb[0].mxu0 }
  0xec   : > { %384 = vst.msk [vmem:[%s635_s5 + $0x10] sm:$0xff] %vm381_vm1, %v503_v62  ;;  %v318_v63 = vpop.f32.mrb[1].mxu0 }
  0xed   : > { %v511_v0 = vpop.f32.mrb[0].mxu1  ;;  %382 = vst.msk [vmem:[%s635_s5] sm:$0xff] %vm381_vm1, %v318_v63  ;;  %v504_v1 = vpop.f32.mrb[2].mxu0 }
  0xee   : > { %392 = vst.msk [vmem:[%s635_s5 + $0x50] sm:$0xff] %vm381_vm1, %v511_v0  ;;  %v350_v2 = vpop.f32.mrb[1].mxu1  ;;  %385 = vst.msk [vmem:[%s635_s5 + $0x18] sm:$0xff] %vm381_vm1, %v504_v1  ;;  %v321_v3 = vpop.f32.mrb[3].mxu0 }
  0xef   : > { %390 = vst.msk [vmem:[%s635_s5 + $0x40] sm:$0xff] %vm381_vm1, %v350_v2  ;;  %v512_v4 = vpop.f32.mrb[2].mxu1  ;;  %383 = vst.msk [vmem:[%s635_s5 + $0x8] sm:$0xff] %vm381_vm1, %v321_v3 }
  0xf0   : > { %393 = vst.msk [vmem:[%s635_s5 + $0x58] sm:$0xff] %vm381_vm1, %v512_v4  ;;  %v353_v5 = vpop.f32.mrb[3].mxu1 }
  0xf1   : > { %391 = vst.msk [vmem:[%s635_s5 + $0x48] sm:$0xff] %vm381_vm1, %v353_v5 }
  0xf3   : > { %v507_v6 = vpop.f32.mrb[4].mxu0 }
  0xf4   : > { %388 = vst.msk [vmem:[%s635_s5 + $0x30] sm:$0xff] %vm381_vm1, %v507_v6  ;;  %v334_v7 = vpop.f32.mrb[5].mxu0 }
  0xf5   : > { %v515_v8 = vpop.f32.mrb[4].mxu1  ;;  %386 = vst.msk [vmem:[%s635_s5 + $0x20] sm:$0xff] %vm381_vm1, %v334_v7  ;;  %v508_v9 = vpop.f32.mrb[6].mxu0 }
  0xf6   : > { %396 = vst.msk [vmem:[%s635_s5 + $0x70] sm:$0xff] %vm381_vm1, %v515_v8  ;;  %v366_v10 = vpop.f32.mrb[5].mxu1  ;;  %389 = vst.msk [vmem:[%s635_s5 + $0x38] sm:$0xff] %vm381_vm1, %v508_v9  ;;  %v337_v11 = vpop.f32.mrb[7].mxu0 }
  0xf7   : > { %394 = vst.msk [vmem:[%s635_s5 + $0x60] sm:$0xff] %vm381_vm1, %v366_v10  ;;  %v516_v12 = vpop.f32.mrb[6].mxu1  ;;  %387 = vst.msk [vmem:[%s635_s5 + $0x28] sm:$0xff] %vm381_vm1, %v337_v11 }
  0xf8   : > { %397 = vst.msk [vmem:[%s635_s5 + $0x78] sm:$0xff] %vm381_vm1, %v516_v12  ;;  %v369_v13 = vpop.f32.mrb[7].mxu1 }
  0xf9   : > { %395 = vst.msk [vmem:[%s635_s5 + $0x68] sm:$0xff] %vm381_vm1, %v369_v13 }
  0xfa PF: > { %s13_s12 = sadd.s32 1, %s535_s12  }
  0xfb   : > { %p10_p4 = scmp.ge.s32.totalorder %s13_s12, 4  }
  0xfd   :  { %12 = sbr.rel (!%p10_p4) target bundleno = 1 (0x1), region = 65 }

// kernel: tsdcn_forward.18
= control target key start
LH: loop header
LB: loop body
LE: loop exit
PB: predicated region body
PF: predicated region fallthrough
CT: control target
= control target key end

     0   :  { %s580_s12 = smov 0   ;;  %s697_s0 = inlined_call_operand.vmem [shape: f32[256,80], index: 0, kind: input, shape index: {}]   ;;  %s698_s1 = inlined_call_operand.vmem [shape: f32[256,80], index: 1, kind: input, shape index: {}]   ;;  %s699_s2 = inlined_call_operand.vmem [shape: f32[80,128], index: 2, kind: input, shape index: {}]   ;;  %s700_s3 = inlined_call_operand.vmem [shape: f32[256,128], index: 3, kind: output, shape index: {}]  }
   0x1 LB: > { %s474_s13 = sadd.s32 4294967295, %s558_s12   ;;  %p478_p0 = scmp.ge.s32.totalorder %s558_s12, 1  ;;  %s558_s12 = sphi %s580_s12, %s13_s12  }
   0x2   : > { %p149_p1 = scmp.lt.s32.totalorder %s558_s12, 3 }
   0x4   : > { %p150_p2 = pnand %p478_p0, %p149_p1 }
   0x5   : > { %v253_v0 = vld [vmem:[%s699_s2] sm:$0xff] (!%p150_p2)  ;;  %v254_v1 = vld [vmem:[%s699_s2 + $0x8] sm:$0xff] (!%p150_p2)  ;;  %v255_v2 = vld [vmem:[%s699_s2 + $0x10] sm:$0xff] (!%p150_p2)  ;;  %s479_s20 = sshll.u32 (!%p150_p2), %s474_s13, 4  ;;  %vm268_vm0 = vcmask (!%p150_p2), 654336  }
   0x6   : > { %153 = sbr.rel (%p150_p2) target bundleno = 252 (0xfc), region = 32  ;;  %v263_v3 = vpack.c.bf16 (!%p150_p2), %v254_v1, %v253_v0  ;;  %v256_v4 = vld [vmem:[%s699_s2 + $0x18] sm:$0xff] (!%p150_p2)  ;;  %p179_p3 = scmp.lt.s32.totalorder (!%p150_p2), %s479_s20, 31  ;;  %v257_v6 = vld [vmem:[%s699_s2 + $0x20] sm:$0xff] (!%p150_p2)  ;;  %v258_v7 = vld [vmem:[%s699_s2 + $0x28] sm:$0xff] (!%p150_p2) }
   0x7   : > { %v264_v5 = vpack.c.bf16 (!%p150_p2), %v256_v4, %v255_v2  ;;  %v265_v8 = vpack.c.bf16 (!%p150_p2), %v258_v7, %v257_v6  ;;  %v259_v9 = vld [vmem:[%s699_s2 + $0x30] sm:$0xff] (!%p150_p2)  ;;  %v260_v10 = vld [vmem:[%s699_s2 + $0x38] sm:$0xff] (!%p150_p2)  ;;  %v261_v14 = vld [vmem:[%s699_s2 + $0x40] sm:$0xff] (!%p150_p2) }
   0x8   : > { %508 = vmatprep.subr.bf16.mxu0 (!%p150_p2), %v263_v3  ;;  %534 = vmatprep.subr.bf16.mxu1 (!%p150_p2), %v263_v3  ;;  %v262_v15 = vld [vmem:[%s699_s2 + $0x48] sm:$0xff] (!%p150_p2)  ;;  %v266_v20 = vpack.c.bf16 (!%p150_p2), %v260_v10, %v259_v9 }
   0x9   : > { %509 = vmatpush3.bf16.msra.mxu0 (!%p150_p2), %v263_v3  ;;  %539 = vmatpush3.bf16.msra.mxu1 (!%p150_p2), %v263_v3  ;;  %v267_v38 = vpack.c.bf16 (!%p150_p2), %v262_v15, %v261_v14 }
   0xa   : > { %510 = vmatprep.subr.bf16.mxu0 (!%p150_p2), %v264_v5  ;;  %535 = vmatprep.subr.bf16.mxu1 (!%p150_p2), %v264_v5 }
   0xd   : > { %s702_s20 = smov (!%p179_p3, %s479_s20), 31  ;;  %511 = vmatpush3.bf16.msra.mxu0 %v264_v5  ;;  %540 = vmatpush3.bf16.msra.mxu1 %v264_v5 }
   0xe   : > { %s606_s27 = sshll.u32 %s702_s20, 3  ;;  %512 = vmatprep.subr.bf16.mxu0 %v265_v8  ;;  %536 = vmatprep.subr.bf16.mxu1 %v265_v8 }
   0xf   : > { %s618_s7 = scalar_lea.vmem %s697_s0, %s606_s27  ;;  %s624_s10 = scalar_lea.vmem %s698_s1, %s606_s27 }
  0x10   : > { %v197_v11 = vld [vmem:[%s618_s7] sm:$0xff]  ;;  %v198_v12 = vld [vmem:[%s618_s7 + $0x8] sm:$0xff]  ;;  %v199_v24 = vld [vmem:[%s618_s7 + $0x10] sm:$0xff]  ;;  %s676_s18 = scalar_lea.vmem %s700_s3, %s606_s27 }
  0x11   : > { %v213_v13 = vld [vmem:[%s624_s10] sm:$0xff]  ;;  %v214_v16 = vld [vmem:[%s624_s10 + $0x8] sm:$0xff]  ;;  %v200_v27 = vld [vmem:[%s618_s7 + $0x18] sm:$0xff]  ;;  %513 = vmatpush3.bf16.msra.mxu0 %v265_v8  ;;  %541 = vmatpush3.bf16.msra.mxu1 %v265_v8 }
  0x12   : > { %v229_v17 = vadd.f32 %v213_v13, %v197_v11  ;;  %v205_v18 = vld [vmem:[%s618_s7 + $0x40] sm:$0xff]  ;;  %v206_v19 = vld [vmem:[%s618_s7 + $0x48] sm:$0xff]  ;;  %v230_v21 = vadd.f32 %v214_v16, %v198_v12  ;;  %v215_v28 = vld [vmem:[%s624_s10 + $0x10] sm:$0xff]  ;;  %514 = vmatprep.subr.bf16.mxu0 %v266_v20  ;;  %537 = vmatprep.subr.bf16.mxu1 %v266_v20 }
  0x13   : > { %v221_v22 = vld [vmem:[%s624_s10 + $0x40] sm:$0xff]  ;;  %v222_v23 = vld [vmem:[%s624_s10 + $0x48] sm:$0xff]  ;;  %v216_v29 = vld [vmem:[%s624_s10 + $0x18] sm:$0xff]  ;;  %v231_v42 = vadd.f32 %v215_v28, %v199_v24 }
  0x14   : > { %v237_v25 = vadd.f32 %v221_v22, %v205_v18  ;;  %v238_v26 = vadd.f32 %v222_v23, %v206_v19  ;;  %v245_v30 = vpack.c.bf16 %v230_v21, %v229_v17  ;;  %v207_v31 = vld [vmem:[%s618_s7 + $0x50] sm:$0xff]  ;;  %v208_v32 = vld [vmem:[%s618_s7 + $0x58] sm:$0xff]  ;;  %v201_v36 = vld [vmem:[%s618_s7 + $0x20] sm:$0xff]  ;;  %v232_v46 = vadd.f32 %v216_v29, %v200_v27 }
  0x15   : > { %v223_v33 = vld [vmem:[%s624_s10 + $0x50] sm:$0xff]  ;;  %v224_v35 = vld [vmem:[%s624_s10 + $0x58] sm:$0xff]  ;;  %v202_v37 = vld [vmem:[%s618_s7 + $0x28] sm:$0xff]  ;;  %515 = vmatpush3.bf16.msra.mxu0 %v266_v20  ;;  %542 = vmatpush3.bf16.msra.mxu1 %v266_v20 }
  0x16   : > { %v249_v34 = vpack.c.bf16 %v238_v26, %v237_v25  ;;  %v217_v39 = vld [vmem:[%s624_s10 + $0x20] sm:$0xff]  ;;  %v218_v40 = vld [vmem:[%s624_s10 + $0x28] sm:$0xff]  ;;  %518 = vmatprep.mubr.msk.bf16.mxu0 %vm268_vm0, %v245_v30  ;;  %v239_v47 = vadd.f32 %v223_v33, %v207_v31  ;;  %v240_v48 = vadd.f32 %v224_v35, %v208_v32  ;;  %516 = vmatprep.subr.bf16.mxu0 %v267_v38  ;;  %v203_v53 = vld [vmem:[%s618_s7 + $0x30] sm:$0xff] }
  0x17   : > { %v209_v41 = vld [vmem:[%s618_s7 + $0x60] sm:$0xff]  ;;  %v210_v43 = vld [vmem:[%s618_s7 + $0x68] sm:$0xff]  ;;  %v233_v49 = vadd.f32 %v217_v39, %v201_v36  ;;  %v234_v50 = vadd.f32 %v218_v40, %v202_v37  ;;  %538 = vmatprep.subr.bf16.mxu1 %v267_v38  ;;  %v204_v54 = vld [vmem:[%s618_s7 + $0x38] sm:$0xff]  ;;  %v246_v55 = vpack.c.bf16 %v232_v46, %v231_v42 }
  0x18   : > { %526 = vmatprep.mubr.msk.bf16.mxu1 %vm268_vm0, %v249_v34  ;;  %v225_v44 = vld [vmem:[%s624_s10 + $0x60] sm:$0xff]  ;;  %v226_v45 = vld [vmem:[%s624_s10 + $0x68] sm:$0xff]  ;;  %v250_v56 = vpack.c.bf16 %v240_v48, %v239_v47  ;;  %v219_v57 = vld [vmem:[%s624_s10 + $0x30] sm:$0xff] }
  0x19   : > { %v241_v51 = vadd.f32 %v225_v44, %v209_v41  ;;  %v242_v52 = vadd.f32 %v226_v45, %v210_v43  ;;  %v220_v58 = vld [vmem:[%s624_s10 + $0x38] sm:$0xff]  ;;  %v211_v59 = vld [vmem:[%s618_s7 + $0x70] sm:$0xff]  ;;  %517 = vmatpush3.bf16.msra.mxu0 %v267_v38  ;;  %543 = vmatpush3.bf16.msra.mxu1 %v267_v38  ;;  %v247_v60 = vpack.c.bf16 %v234_v50, %v233_v49 }
  0x1a   : > { %v212_v62 = vld [vmem:[%s618_s7 + $0x78] sm:$0xff]  ;;  %v227_v63 = vld [vmem:[%s624_s10 + $0x70] sm:$0xff]  ;;  %v235_v1 = vadd.f32 %v219_v57, %v203_v53  ;;  %v236_v2 = vadd.f32 %v220_v58, %v204_v54 }
  0x1b   : > { %v251_v61 = vpack.c.bf16 %v242_v52, %v241_v51  ;;  %v228_v0 = vld [vmem:[%s624_s10 + $0x78] sm:$0xff]  ;;  %v243_v3 = vadd.f32 %v227_v63, %v211_v59 }
  0x1c   : > { %519 = vmatmul.mubr.msk.bf16.vlgmr.msra.gmra.mrb[0].mxu0 %vm268_vm0, %v246_v55  ;;  %527 = vmatmul.mubr.msk.bf16.vlgmr.msra.gmra.mrb[0].mxu1 %vm268_vm0, %v250_v56  ;;  %v244_v4 = vadd.f32 %v228_v0, %v212_v62  ;;  %v248_v5 = vpack.c.bf16 %v236_v2, %v235_v1 }
  0x1d   : > { %522 = vmatprep.mubr.msk.bf16.mxu0 %vm268_vm0, %v247_v60  ;;  %530 = vmatprep.mubr.msk.bf16.mxu1 %vm268_vm0, %v251_v61 }
  0x1e   : > { %v252_v6 = vpack.c.bf16 %v244_v4, %v243_v3 }
  0x24   : > { %523 = vmatmul.mubr.msk.bf16.gmra.mrb[4].mxu0 %vm268_vm0, %v248_v5  ;;  %531 = vmatmul.mubr.msk.bf16.gmra.mrb[4].mxu1 %vm268_vm0, %v252_v6 }
  0xef   : > { %v520_v7 = vpop.f32.mrb[0].mxu0  ;;  %v528_v8 = vpop.f32.mrb[0].mxu1 }
  0xf0   : > { %392 = vst [vmem:[%s676_s18 + $0x10] sm:$0xff] %v520_v7  ;;  %400 = vst [vmem:[%s676_s18 + $0x50] sm:$0xff] %v528_v8  ;;  %v327_v9 = vpop.f32.mrb[1].mxu0  ;;  %v359_v10 = vpop.f32.mrb[1].mxu1 }
  0xf1   : > { %390 = vst [vmem:[%s676_s18] sm:$0xff] %v327_v9  ;;  %398 = vst [vmem:[%s676_s18 + $0x40] sm:$0xff] %v359_v10  ;;  %v521_v11 = vpop.f32.mrb[2].mxu0  ;;  %v529_v12 = vpop.f32.mrb[2].mxu1 }
  0xf2   : > { %393 = vst [vmem:[%s676_s18 + $0x18] sm:$0xff] %v521_v11  ;;  %401 = vst [vmem:[%s676_s18 + $0x58] sm:$0xff] %v529_v12  ;;  %v330_v13 = vpop.f32.mrb[3].mxu0  ;;  %v362_v14 = vpop.f32.mrb[3].mxu1 }
  0xf3   : > { %391 = vst [vmem:[%s676_s18 + $0x8] sm:$0xff] %v330_v13  ;;  %399 = vst [vmem:[%s676_s18 + $0x48] sm:$0xff] %v362_v14 }
  0xf7   : > { %v524_v15 = vpop.f32.mrb[4].mxu0  ;;  %v532_v16 = vpop.f32.mrb[4].mxu1 }
  0xf8   : > { %396 = vst [vmem:[%s676_s18 + $0x30] sm:$0xff] %v524_v15  ;;  %404 = vst [vmem:[%s676_s18 + $0x70] sm:$0xff] %v532_v16  ;;  %v343_v17 = vpop.f32.mrb[5].mxu0  ;;  %v375_v18 = vpop.f32.mrb[5].mxu1 }
  0xf9   : > { %394 = vst [vmem:[%s676_s18 + $0x20] sm:$0xff] %v343_v17  ;;  %402 = vst [vmem:[%s676_s18 + $0x60] sm:$0xff] %v375_v18  ;;  %v525_v19 = vpop.f32.mrb[6].mxu0  ;;  %v533_v20 = vpop.f32.mrb[6].mxu1 }
  0xfa   : > { %397 = vst [vmem:[%s676_s18 + $0x38] sm:$0xff] %v525_v19  ;;  %405 = vst [vmem:[%s676_s18 + $0x78] sm:$0xff] %v533_v20  ;;  %v346_v21 = vpop.f32.mrb[7].mxu0  ;;  %v378_v22 = vpop.f32.mrb[7].mxu1 }
  0xfb   : > { %395 = vst [vmem:[%s676_s18 + $0x28] sm:$0xff] %v346_v21  ;;  %403 = vst [vmem:[%s676_s18 + $0x68] sm:$0xff] %v378_v22 }
  0xfc PF: > { %s13_s12 = sadd.s32 1, %s558_s12  }
  0xfd   : > { %p10_p4 = scmp.ge.s32.totalorder %s13_s12, 4  }
  0xff   :  { %12 = sbr.rel (!%p10_p4) target bundleno = 1 (0x1), region = 65 }

// kernel: tsdcn_forward.11
= control target key start
LH: loop header
LB: loop body
LE: loop exit
PB: predicated region body
PF: predicated region fallthrough
CT: control target
= control target key end

     0   :  { %s5336_s0 = inlined_call_operand.vmem [shape: f32[256,48], index: 0, kind: input, shape index: {}]   ;;  %s5337_s1 = inlined_call_operand.vmem [shape: f32[48,64], index: 1, kind: input, shape index: {}]   ;;  %s5338_s2 = inlined_call_operand.vmem [shape: f32[1,64], index: 2, kind: input, shape index: {}]   ;;  %s5339_s3 = inlined_call_operand.vmem [shape: f32[64,32], index: 3, kind: input, shape index: {}]   ;;  %s5340_s4 = inlined_call_operand.vmem [shape: f32[1,32], index: 4, kind: input, shape index: {}]   ;;  %s5341_s5 = inlined_call_operand.vmem [shape: f32[32,80], index: 5, kind: input, shape index: {}]   ;;  %s5342_s6 = inlined_call_operand.vmem [shape: f32[1,80], index: 6, kind: input, shape index: {}]   ;;  %s5343_s7 = inlined_call_operand.vmem [shape: f32[80,128], index: 7, kind: input, shape index: {}]   ;;  %s5344_s8 = inlined_call_operand.vmem [shape: f32[1,128], index: 8, kind: input, shape index: {}]   ;;  %s5345_s9 = inlined_call_operand.vmem [shape: f32[128,80], index: 9, kind: input, shape index: {}]   ;;  %s5346_s10 = inlined_call_operand.vmem [shape: f32[1,80], index: 10, kind: input, shape index: {}]   ;;  %s5347_s11 = inlined_call_operand.vmem [shape: f32[80,32], index: 11, kind: input, shape index: {}]   ;;  %s5348_s12 = inlined_call_operand.vmem [shape: f32[1,32], index: 12, kind: input, shape index: {}]   ;;  %s5349_s13 = inlined_call_operand.vmem [shape: f32[32,64], index: 13, kind: input, shape index: {}]   ;;  %s5350_s14 = inlined_call_operand.vmem [shape: f32[1,64], index: 14, kind: input, shape index: {}]   ;;  %s5351_s15 = inlined_call_operand.vmem [shape: f32[64,48], index: 15, kind: input, shape index: {}]   ;;  %s5352_s16 = inlined_call_operand.vmem [shape: f32[1,48], index: 16, kind: input, shape index: {}]   ;;  %s5353_s17 = inlined_call_operand.vmem [shape: f32[128,128], index: 17, kind: input, shape index: {}]   ;;  %s5354_s18 = inlined_call_operand.vmem [shape: f32[1,128], index: 18, kind: input, shape index: {}]   ;;  %s5355_s19 = inlined_call_operand.vmem [shape: f32[128,128], index: 19, kind: input, shape index: {}]   ;;  %s5356_s20 = inlined_call_operand.vmem [shape: f32[1,128], index: 20, kind: input, shape index: {}]   ;;  %s5357_s21 = inlined_call_operand.vmem [shape: f32[256,48], index: 21, kind: output, shape index: {0}]   ;;  %s5358_s22 = inlined_call_operand.vmem [shape: f32[256,64], index: 22, kind: output, shape index: {1}]   ;;  %s5359_s23 = inlined_call_operand.vmem [shape: f32[256,32], index: 23, kind: output, shape index: {2}]   ;;  %s5360_s24 = inlined_call_operand.vmem [shape: f32[256,80], index: 24, kind: output, shape index: {3}]   ;;  %s5361_s25 = inlined_call_operand.vmem [shape: f32[256,128], index: 25, kind: output, shape index: {4}]   ;;  %s5362_s26 = inlined_call_operand.vmem [shape: f32[256,128], index: 26, kind: output, shape index: {5}]   ;;  %s5363_s27 = inlined_call_operand.vmem [shape: f32[256,128], index: 27, kind: output, shape index: {6}]  }
   0x1   :  { %5376 = sst [smem:[#allocation5_spill]] %s5336_s0 }
   0x2   :  { %5377 = sst [smem:[#allocation6_spill]] %s5337_s1 }
   0x3   :  { %5378 = sst [smem:[#allocation7_spill]] %s5338_s2 }
   0x4   :  { %5379 = sst [smem:[#allocation8_spill]] %s5339_s3 }
   0x5   :  { %5380 = sst [smem:[#allocation9_spill]] %s5340_s4 }
   0x6   :  { %5381 = sst [smem:[#allocation10_spill]] %s5341_s5 }
   0x7   :  { %5382 = sst [smem:[#allocation11_spill]] %s5342_s6 }
   0x8   :  { %5383 = sst [smem:[#allocation12_spill]] %s5343_s7  ;;  %s4060_s7 = smov 0  }
   0x9   :  { %5384 = sst [smem:[#allocation13_spill]] %s5344_s8 }
   0xa   :  { %5385 = sst [smem:[#allocation14_spill]] %s5345_s9 }
   0xb   :  { %5386 = sst [smem:[#allocation15_spill]] %s5346_s10 }
   0xc   :  { %5387 = sst [smem:[#allocation16_spill]] %s5347_s11 }
   0xd LB: > { %s3300_s4 = sadd.s32 4294967295, %s3918_s7   ;;  %p3304_p0 = scmp.ge.s32.totalorder %s3918_s7, 1  ;;  %s3918_s7 = sphi %s4060_s7, %s38_s7  }
   0xe   : > { %p751_p1 = scmp.lt.s32.totalorder %s3918_s7, 3 }
  0x10   : > { %p752_p2 = pnand %p3304_p0, %p751_p1 }
  0x12   : > { %755 = sbr.rel (%p752_p2) target bundleno = 2049 (0x801), region = 104 }
  0x19   : > { %s5388_s9 = sld [smem:[#allocation6_spill]]  ;;  %s3305_s29 = sshll.u32 %s3300_s4, 4  ;;  %vm942_vm0 = vcmask 392192   ;;  %vm1107_vm1 = vcmask 523264   ;;  %vm1266_vm2 = vcmask 261120   ;;  %vm1434_vm3 = vcmask 654336  }
  0x1a   : > { %p854_p3 = scmp.lt.s32.totalorder %s3305_s29, 31  ;;  %s5389_s28 = sld [smem:[#allocation8_spill]] }
  0x1b   : > { %s5390_s30 = sld [smem:[#allocation5_spill]]  ;;  %s5392_s8 = sld [smem:[#allocation7_spill]] }
  0x1c   : > { %s5407_s29 = smov (!%p854_p3, %s3305_s29), 31  ;;  %s5393_s1 = sld [smem:[#allocation12_spill]] }
  0x1d   : > { %s4098_s2 = sshll.u32 %s5407_s29, 3  ;;  %s5394_s29 = sld [smem:[#allocation9_spill]] }
  0x1e   : > { %s4164_s4 = scalar_lea.vmem %s5358_s22, %s4098_s2  ;;  %s4255_s10 = scalar_lea.vmem %s5359_s23, %s4098_s2 }
  0x1f   : > { %v926_v0 = vld [vmem:[%s5388_s9] sm:$0xff]  ;;  %v927_v1 = vld [vmem:[%s5388_s9 + $0x8] sm:$0xff]  ;;  %v928_v2 = vld [vmem:[%s5388_s9 + $0x10] sm:$0xff]  ;;  %s5396_s6 = sld [smem:[#allocation11_spill]]  ;;  %s5399_s0 = sld [smem:[#allocation15_spill]] }
  0x20   : > { %v932_v3 = vpack.c.bf16 %v927_v1, %v926_v0  ;;  %v929_v4 = vld [vmem:[%s5388_s9 + $0x18] sm:$0xff]  ;;  %v930_v5 = vld [vmem:[%s5388_s9 + $0x20] sm:$0xff]  ;;  %v931_v6 = vld [vmem:[%s5388_s9 + $0x28] sm:$0xff] }
  0x21   : > { %v933_v7 = vpack.c.bf16 %v929_v4, %v928_v2  ;;  %v1088_v8 = vld [vmem:[%s5389_s28] sm:$0xff]  ;;  %v1089_v9 = vld [vmem:[%s5389_s28 + $0x8] sm:$0xff]  ;;  %v1090_v10 = vld [vmem:[%s5389_s28 + $0x10] sm:$0xff]  ;;  %v934_v14 = vpack.c.bf16 %v931_v6, %v930_v5  ;;  %s4104_s5 = scalar_lea.vmem %s5390_s30, %s4098_s2 }
  0x22   : > { %3518 = vmatprep.subr.bf16.mxu0 %v932_v3  ;;  %v1096_v11 = vpack.c.bf16 %v1089_v9, %v1088_v8  ;;  %v1091_v12 = vld [vmem:[%s5389_s28 + $0x18] sm:$0xff]  ;;  %v902_v15 = vld [vmem:[%s4104_s5] sm:$0xff]  ;;  %v903_v16 = vld [vmem:[%s4104_s5 + $0x8] sm:$0xff] }
  0x23   : > { %3519 = vmatpush3.bf16.msra.mxu0 %v932_v3  ;;  %v1097_v13 = vpack.c.bf16 %v1091_v12, %v1090_v10  ;;  %v918_v17 = vpack.c.bf16 %v903_v16, %v902_v15  ;;  %v904_v18 = vld [vmem:[%s4104_s5 + $0x10] sm:$0xff]  ;;  %v905_v19 = vld [vmem:[%s4104_s5 + $0x18] sm:$0xff]  ;;  %v906_v20 = vld [vmem:[%s4104_s5 + $0x20] sm:$0xff] }
  0x24   : > { %3520 = vmatprep.subr.bf16.mxu0 %v933_v7  ;;  %3540 = vmatprep.subr.bf16.mxu1 %v1096_v11  ;;  %v907_v21 = vld [vmem:[%s4104_s5 + $0x28] sm:$0xff]  ;;  %v919_v22 = vpack.c.bf16 %v905_v19, %v904_v18  ;;  %v908_v24 = vld [vmem:[%s4104_s5 + $0x30] sm:$0xff]  ;;  %v909_v25 = vld [vmem:[%s4104_s5 + $0x38] sm:$0xff] }
  0x25   : > { %3541 = vmatpush3.bf16.msra.mxu1 %v1096_v11  ;;  %3524 = vmatprep.mubr.msk.bf16.mxu0 %vm942_vm0, %v918_v17  ;;  %v920_v23 = vpack.c.bf16 %v907_v21, %v906_v20  ;;  %v910_v26 = vld [vmem:[%s4104_s5 + $0x40] sm:$0xff]  ;;  %v911_v27 = vld [vmem:[%s4104_s5 + $0x48] sm:$0xff]  ;;  %v921_v28 = vpack.c.bf16 %v909_v25, %v908_v24  ;;  %v912_v30 = vld [vmem:[%s4104_s5 + $0x50] sm:$0xff] }
  0x26   : > { %3542 = vmatprep.subr.bf16.mxu1 %v1097_v13  ;;  %v922_v29 = vpack.c.bf16 %v911_v27, %v910_v26  ;;  %v913_v31 = vld [vmem:[%s4104_s5 + $0x58] sm:$0xff]  ;;  %v914_v32 = vld [vmem:[%s4104_s5 + $0x60] sm:$0xff]  ;;  %v915_v33 = vld [vmem:[%s4104_s5 + $0x68] sm:$0xff] }
  0x27   : > { %3521 = vmatpush3.bf16.msra.mxu0 %v933_v7  ;;  %v923_v34 = vpack.c.bf16 %v913_v31, %v912_v30  ;;  %v924_v35 = vpack.c.bf16 %v915_v33, %v914_v32  ;;  %v916_v36 = vld [vmem:[%s4104_s5 + $0x70] sm:$0xff]  ;;  %v917_v37 = vld [vmem:[%s4104_s5 + $0x78] sm:$0xff]  ;;  %v1092_v39 = vld [vmem:[%s5389_s28 + $0x20] sm:$0xff]  ;;  %s5391_s5 = sld [smem:[#allocation10_spill]] }
  0x28   : > { %3522 = vmatprep.subr.bf16.mxu0 %v934_v14  ;;  %v925_v38 = vpack.c.bf16 %v917_v37, %v916_v36  ;;  %v1093_v40 = vld [vmem:[%s5389_s28 + $0x28] sm:$0xff]  ;;  %v1094_v42 = vld [vmem:[%s5389_s28 + $0x30] sm:$0xff]  ;;  %v1095_v43 = vld [vmem:[%s5389_s28 + $0x38] sm:$0xff] }
  0x29   : > { %3543 = vmatpush3.bf16.msra.mxu1 %v1097_v13  ;;  %v1098_v41 = vpack.c.bf16 %v1093_v40, %v1092_v39  ;;  %v1099_v44 = vpack.c.bf16 %v1095_v43, %v1094_v42  ;;  %v4157_v51 = vld [vmem:[%s5392_s8] ss:$0 sm:$0xff]  ;;  %s4364_s8 = scalar_lea.vmem %s5360_s24, %s4098_s2 }
  0x2b   : > { %3523 = vmatpush3.bf16.msra.mxu0 %v934_v14  ;;  %3544 = vmatprep.subr.bf16.mxu1 %v1098_v41 }
  0x2d   : > { %3545 = vmatpush3.bf16.msra.mxu1 %v1098_v41  ;;  %v1253_v45 = vld [vmem:[%s5391_s5] sm:$0xff]  ;;  %v1254_v46 = vld [vmem:[%s5391_s5 + $0x8] sm:$0xff]  ;;  %v1255_v47 = vld [vmem:[%s5391_s5 + $0x10] sm:$0xff] }
  0x2e   : > { %3525 = vmatmul.mubr.msk.bf16.vlgmr.msra.gmra.mrb[0].mxu0 %vm942_vm0, %v919_v22  ;;  %3546 = vmatprep.subr.bf16.mxu1 %v1099_v44  ;;  %v1257_v48 = vpack.c.bf16 %v1254_v46, %v1253_v45  ;;  %v1256_v49 = vld [vmem:[%s5391_s5 + $0x18] sm:$0xff]  ;;  %v1413_v45 = vld [vmem:[%s5393_s1 + $0x8] sm:$0xff]  ;;  %v1414_v46 = vld [vmem:[%s5393_s1 + $0x10] sm:$0xff]  ;;  %s5397_s5 = sld [smem:[#allocation13_spill]] }
  0x2f   : > { %3528 = vmatprep.mubr.msk.bf16.mxu0 %vm942_vm0, %v920_v23  ;;  %v1258_v50 = vpack.c.bf16 %v1256_v49, %v1255_v47 }
  0x30   : > { %3564 = vmatprep.subr.bf16.mxu0 %v1257_v48 }
  0x31   : > { %3547 = vmatpush3.bf16.msra.mxu1 %v1099_v44  ;;  %3565 = vmatpush3.bf16.msra.mxu0 %v1257_v48  ;;  %v1412_v44 = vld [vmem:[%s5393_s1] sm:$0xff]  ;;  %v1415_v48 = vld [vmem:[%s5393_s1 + $0x18] sm:$0xff] }
  0x32   : > { %3566 = vmatprep.subr.bf16.mxu0 %v1258_v50  ;;  %v1422_v47 = vpack.c.bf16 %v1413_v45, %v1412_v44  ;;  %v1423_v49 = vpack.c.bf16 %v1415_v48, %v1414_v46 }
  0x34   : > { %3584 = vmatprep.subr.bf16.mxu1 %v1422_v47 }
  0x35   : > { %3567 = vmatpush3.bf16.msra.mxu0 %v1258_v50  ;;  %v1416_v50 = vld [vmem:[%s5393_s1 + $0x20] sm:$0xff] }
  0x36   : > { %3529 = vmatmul.mubr.msk.bf16.gmra.mrb[4].mxu0 %vm942_vm0, %v921_v28 }
  0x37   : > { %3532 = vmatprep.mubr.msk.bf16.mxu0 %vm942_vm0, %v922_v29 }
  0x3e   : > { %3533 = vmatmul.mubr.msk.bf16.gmra.mrb[8].mxu0 %vm942_vm0, %v923_v34 }
  0x3f   : > { %3536 = vmatprep.mubr.msk.bf16.mxu0 %vm942_vm0, %v924_v35 }
  0x46   : > { %3537 = vmatmul.mubr.msk.bf16.gmra.mrb[12].mxu0 %vm942_vm0, %v925_v38 }
 0x101   : > { %v3526_v52 = vpop.f32.mrb[0].mxu0 }
 0x102   : > { %v1010_v53 = vadd.f32 %v3526_v52, %v4157_v51  ;;  %v1001_v54 = vpop.f32.mrb[1].mxu0 }
 0x103   : > { %v1002_v55 = vadd.f32 %v4157_v51, %v1001_v54  ;;  %v3527_v56 = vpop.f32.mrb[2].mxu0  ;;  %v1419_v54 = vld [vmem:[%s5393_s1 + $0x38] sm:$0xff] }
 0x104   : > { %v1066_v57 = vmax.f32 %v1010_v53, 0.0  ;;  %v1013_v58 = vadd.f32 %v3527_v56, %v4157_v51  ;;  %v1004_v59 = vpop.f32.mrb[3].mxu0  ;;  %v1418_v53 = vld [vmem:[%s5393_s1 + $0x30] sm:$0xff]  ;;  %v4248_v56 = vld [vmem:[%s5394_s29] ss:$0 sm:$0xff]  ;;  %s5395_s29 = sld [smem:[#allocation14_spill]] }
 0x105   : > { %v1064_v60 = vmax.f32 %v1002_v55, 0.0  ;;  %v1005_v61 = vadd.f32 %v4157_v51, %v1004_v59  ;;  %v1425_v55 = vpack.c.bf16 %v1419_v54, %v1418_v53 }
 0x106   : > { %2946 = vst.msk [vmem:[%s4164_s4 + $0x10] sm:$0xff] %vm1107_vm1, %v1066_v57  ;;  %v1067_v62 = vmax.f32 %v1013_v58, 0.0 }
 0x107   : > { %2944 = vst.msk [vmem:[%s4164_s4] sm:$0xff] %vm1107_vm1, %v1064_v60  ;;  %v1065_v63 = vmax.f32 %v1005_v61, 0.0 }
 0x108   : > { %v1081_v0 = vpack.c.bf16 %v1067_v62, %v1066_v57  ;;  %2947 = vst.msk [vmem:[%s4164_s4 + $0x18] sm:$0xff] %vm1107_vm1, %v1067_v62 }
 0x109   : > { %2945 = vst.msk [vmem:[%s4164_s4 + $0x8] sm:$0xff] %vm1107_vm1, %v1065_v63  ;;  %v3530_v1 = vpop.f32.mrb[4].mxu0  ;;  %v1080_v2 = vpack.c.bf16 %v1065_v63, %v1064_v60 }
 0x10a   : > { %v1026_v3 = vadd.f32 %v3530_v1, %v4157_v51  ;;  %v1017_v4 = vpop.f32.mrb[5].mxu0  ;;  %v1565_v53 = vld [vmem:[%s5395_s29 + $0x8] sm:$0xff]  ;;  %v1566_v54 = vld [vmem:[%s5395_s29 + $0x10] sm:$0xff] }
 0x10b   : > { %v1018_v5 = vadd.f32 %v4157_v51, %v1017_v4  ;;  %v3531_v6 = vpop.f32.mrb[6].mxu0  ;;  %3548 = vmatprep.mubr.msk.bf16.mxu1 %vm1107_vm1, %v1080_v2 }
 0x10c   : > { %v1070_v7 = vmax.f32 %v1026_v3, 0.0  ;;  %v1029_v8 = vadd.f32 %v3531_v6, %v4157_v51  ;;  %v1020_v9 = vpop.f32.mrb[7].mxu0  ;;  %3549 = vmatmul.mubr.msk.bf16.vlgmr.msra.gmra.mrb[0].mxu1 %vm1107_vm1, %v1081_v0 }
 0x10d   : > { %v1068_v10 = vmax.f32 %v1018_v5, 0.0  ;;  %v1021_v11 = vadd.f32 %v4157_v51, %v1020_v9  ;;  %3585 = vmatpush3.bf16.msra.mxu1 %v1422_v47 }
 0x10e   : > { %2950 = vst.msk [vmem:[%s4164_s4 + $0x30] sm:$0xff] %vm1107_vm1, %v1070_v7  ;;  %v1071_v12 = vmax.f32 %v1029_v8, 0.0  ;;  %3586 = vmatprep.subr.bf16.mxu1 %v1423_v49 }
 0x10f   : > { %2948 = vst.msk [vmem:[%s4164_s4 + $0x20] sm:$0xff] %vm1107_vm1, %v1068_v10  ;;  %v1069_v13 = vmax.f32 %v1021_v11, 0.0 }
 0x110   : > { %v1083_v14 = vpack.c.bf16 %v1071_v12, %v1070_v7  ;;  %2951 = vst.msk [vmem:[%s4164_s4 + $0x38] sm:$0xff] %vm1107_vm1, %v1071_v12 }
 0x111   : > { %v1082_v15 = vpack.c.bf16 %v1069_v13, %v1068_v10  ;;  %2949 = vst.msk [vmem:[%s4164_s4 + $0x28] sm:$0xff] %vm1107_vm1, %v1069_v13  ;;  %v3534_v16 = vpop.f32.mrb[8].mxu0  ;;  %3587 = vmatpush3.bf16.msra.mxu1 %v1423_v49  ;;  %v1420_v49 = vld [vmem:[%s5393_s1 + $0x40] sm:$0xff] }
 0x112   : > { %v1042_v17 = vadd.f32 %v3534_v16, %v4157_v51  ;;  %v1033_v18 = vpop.f32.mrb[9].mxu0 }
 0x113   : > { %v1034_v19 = vadd.f32 %v4157_v51, %v1033_v18  ;;  %v3535_v20 = vpop.f32.mrb[10].mxu0  ;;  %3552 = vmatprep.mubr.msk.bf16.mxu1 %vm1107_vm1, %v1082_v15 }
 0x114   : > { %v1074_v21 = vmax.f32 %v1042_v17, 0.0  ;;  %v1045_v22 = vadd.f32 %v3535_v20, %v4157_v51  ;;  %v1036_v23 = vpop.f32.mrb[11].mxu0  ;;  %3553 = vmatmul.mubr.msk.bf16.gmra.mrb[4].mxu1 %vm1107_vm1, %v1083_v14 }
 0x115   : > { %v1072_v24 = vmax.f32 %v1034_v19, 0.0  ;;  %v1037_v25 = vadd.f32 %v4157_v51, %v1036_v23 }
 0x116   : > { %2954 = vst.msk [vmem:[%s4164_s4 + $0x50] sm:$0xff] %vm1107_vm1, %v1074_v21  ;;  %v1075_v26 = vmax.f32 %v1045_v22, 0.0 }
 0x117   : > { %2952 = vst.msk [vmem:[%s4164_s4 + $0x40] sm:$0xff] %vm1107_vm1, %v1072_v24  ;;  %v1073_v27 = vmax.f32 %v1037_v25, 0.0 }
 0x118   : > { %v1085_v28 = vpack.c.bf16 %v1075_v26, %v1074_v21  ;;  %2955 = vst.msk [vmem:[%s4164_s4 + $0x58] sm:$0xff] %vm1107_vm1, %v1075_v26 }
 0x119   : > { %v1084_v29 = vpack.c.bf16 %v1073_v27, %v1072_v24  ;;  %2953 = vst.msk [vmem:[%s4164_s4 + $0x48] sm:$0xff] %vm1107_vm1, %v1073_v27  ;;  %v3538_v30 = vpop.f32.mrb[12].mxu0 }
 0x11a   : > { %v1058_v31 = vadd.f32 %v3538_v30, %v4157_v51  ;;  %v1049_v32 = vpop.f32.mrb[13].mxu0 }
 0x11b   : > { %v1050_v33 = vadd.f32 %v4157_v51, %v1049_v32  ;;  %v3539_v34 = vpop.f32.mrb[14].mxu0  ;;  %3556 = vmatprep.mubr.msk.bf16.mxu1 %vm1107_vm1, %v1084_v29 }
 0x11c   : > { %v1078_v35 = vmax.f32 %v1058_v31, 0.0  ;;  %v1061_v36 = vadd.f32 %v3539_v34, %v4157_v51  ;;  %v1052_v37 = vpop.f32.mrb[15].mxu0  ;;  %3557 = vmatmul.mubr.msk.bf16.gmra.mrb[8].mxu1 %vm1107_vm1, %v1085_v28 }
 0x11d   : > { %v1076_v38 = vmax.f32 %v1050_v33, 0.0  ;;  %v1053_v39 = vadd.f32 %v4157_v51, %v1052_v37  ;;  %v1417_v51 = vld [vmem:[%s5393_s1 + $0x28] sm:$0xff] }
 0x11e   : > { %2958 = vst.msk [vmem:[%s4164_s4 + $0x70] sm:$0xff] %vm1107_vm1, %v1078_v35  ;;  %v1079_v40 = vmax.f32 %v1061_v36, 0.0  ;;  %v1424_v52 = vpack.c.bf16 %v1417_v51, %v1416_v50  ;;  %v1421_v50 = vld [vmem:[%s5393_s1 + $0x48] sm:$0xff]  ;;  %s5214_s1 = scalar_lea.vmem %s5363_s27, %s4098_s2 }
 0x11f   : > { %2956 = vst.msk [vmem:[%s4164_s4 + $0x60] sm:$0xff] %vm1107_vm1, %v1076_v38  ;;  %v1077_v41 = vmax.f32 %v1053_v39, 0.0  ;;  %v1426_v51 = vpack.c.bf16 %v1421_v50, %v1420_v49 }
 0x120   : > { %v1087_v42 = vpack.c.bf16 %v1079_v40, %v1078_v35  ;;  %2959 = vst.msk [vmem:[%s4164_s4 + $0x78] sm:$0xff] %vm1107_vm1, %v1079_v40  ;;  %3588 = vmatprep.subr.bf16.mxu1 %v1424_v52 }
 0x121   : > { %v1086_v43 = vpack.c.bf16 %v1077_v41, %v1076_v38  ;;  %2957 = vst.msk [vmem:[%s4164_s4 + $0x68] sm:$0xff] %vm1107_vm1, %v1077_v41  ;;  %3589 = vmatpush3.bf16.msra.mxu1 %v1424_v52  ;;  %v1564_v52 = vld [vmem:[%s5395_s29] sm:$0xff]  ;;  %s4442_s4 = scalar_lea.vmem %s5361_s25, %s4098_s2 }
 0x122   : > { %3590 = vmatprep.subr.bf16.mxu1 %v1425_v55 }
 0x123   : > { %3560 = vmatprep.mubr.msk.bf16.mxu1 %vm1107_vm1, %v1086_v43 }
 0x124   : > { %3561 = vmatmul.mubr.msk.bf16.gmra.mrb[12].mxu1 %vm1107_vm1, %v1087_v42 }
 0x125   : > { %3591 = vmatpush3.bf16.msra.mxu1 %v1425_v55  ;;  %v1580_v55 = vpack.c.bf16 %v1565_v53, %v1564_v52 }
 0x126   : > { %3592 = vmatprep.subr.bf16.mxu1 %v1426_v51 }
 0x127   : > { %3610 = vmatprep.subr.bf16.mxu0 %v1580_v55 }
 0x129   : > { %3593 = vmatpush3.bf16.msra.mxu1 %v1426_v51 }
 0x1df   : > { %v3550_v57 = vpop.f32.mrb[0].mxu1 }
 0x1e0   : > { %v1175_v58 = vadd.f32 %v3550_v57, %v4248_v56  ;;  %v1166_v59 = vpop.f32.mrb[1].mxu1 }
 0x1e1   : > { %v1167_v60 = vadd.f32 %v4248_v56, %v1166_v59  ;;  %v3551_v61 = vpop.f32.mrb[2].mxu1  ;;  %v1569_v59 = vld [vmem:[%s5395_s29 + $0x28] sm:$0xff] }
 0x1e2   : > { %v1231_v62 = vmax.f32 %v1175_v58, 0.0  ;;  %v1178_v63 = vadd.f32 %v3551_v61, %v4248_v56  ;;  %v1169_v0 = vpop.f32.mrb[3].mxu1  ;;  %v1568_v58 = vld [vmem:[%s5395_s29 + $0x20] sm:$0xff]  ;;  %v1570_v61 = vld [vmem:[%s5395_s29 + $0x30] sm:$0xff] }
 0x1e3   : > { %v1229_v1 = vmax.f32 %v1167_v60, 0.0  ;;  %v1170_v2 = vadd.f32 %v4248_v56, %v1169_v0  ;;  %v1582_v60 = vpack.c.bf16 %v1569_v59, %v1568_v58  ;;  %v1572_v0 = vld [vmem:[%s5395_s29 + $0x40] sm:$0xff] }
 0x1e4   : > { %2962 = vst.msk [vmem:[%s4255_s10 + $0x10] sm:$0xff] %vm1266_vm2, %v1231_v62  ;;  %v1232_v3 = vmax.f32 %v1178_v63, 0.0 }
 0x1e5   : > { %2960 = vst.msk [vmem:[%s4255_s10] sm:$0xff] %vm1266_vm2, %v1229_v1  ;;  %v1230_v4 = vmax.f32 %v1170_v2, 0.0 }
 0x1e6   : > { %v1246_v5 = vpack.c.bf16 %v1232_v3, %v1231_v62  ;;  %2963 = vst.msk [vmem:[%s4255_s10 + $0x18] sm:$0xff] %vm1266_vm2, %v1232_v3  ;;  %v1571_v62 = vld [vmem:[%s5395_s29 + $0x38] sm:$0xff]  ;;  %v1574_v3 = vld [vmem:[%s5395_s29 + $0x50] sm:$0xff] }
 0x1e7   : > { %v1245_v6 = vpack.c.bf16 %v1230_v4, %v1229_v1  ;;  %2961 = vst.msk [vmem:[%s4255_s10 + $0x8] sm:$0xff] %vm1266_vm2, %v1230_v4  ;;  %v3554_v7 = vpop.f32.mrb[4].mxu1  ;;  %v1583_v63 = vpack.c.bf16 %v1571_v62, %v1570_v61  ;;  %v1573_v1 = vld [vmem:[%s5395_s29 + $0x48] sm:$0xff]  ;;  %v1575_v4 = vld [vmem:[%s5395_s29 + $0x58] sm:$0xff] }
 0x1e8   : > { %v1191_v8 = vadd.f32 %v3554_v7, %v4248_v56  ;;  %v1182_v9 = vpop.f32.mrb[5].mxu1  ;;  %v1584_v2 = vpack.c.bf16 %v1573_v1, %v1572_v0  ;;  %v1577_v0 = vld [vmem:[%s5395_s29 + $0x68] sm:$0xff] }
 0x1e9   : > { %v1183_v10 = vadd.f32 %v4248_v56, %v1182_v9  ;;  %v3555_v11 = vpop.f32.mrb[6].mxu1  ;;  %3568 = vmatprep.mubr.msk.bf16.mxu0 %vm1266_vm2, %v1245_v6  ;;  %v4357_v6 = vld [vmem:[%s5396_s6] ss:$0 sm:$0xff]  ;;  %s5398_s6 = sld [smem:[#allocation16_spill]] }
 0x1ea   : > { %v1235_v12 = vmax.f32 %v1191_v8, 0.0  ;;  %v1194_v13 = vadd.f32 %v3555_v11, %v4248_v56  ;;  %v1185_v14 = vpop.f32.mrb[7].mxu1  ;;  %3569 = vmatmul.mubr.msk.bf16.vlgmr.msra.gmra.mrb[16].mxu0 %vm1266_vm2, %v1246_v5  ;;  %v1585_v5 = vpack.c.bf16 %v1575_v4, %v1574_v3  ;;  %v1579_v3 = vld [vmem:[%s5395_s29 + $0x78] sm:$0xff] }
 0x1eb   : > { %v1233_v15 = vmax.f32 %v1183_v10, 0.0  ;;  %v1186_v16 = vadd.f32 %v4248_v56, %v1185_v14  ;;  %3611 = vmatpush3.bf16.msra.mxu0 %v1580_v55 }
 0x1ec   : > { %2966 = vst.msk [vmem:[%s4255_s10 + $0x30] sm:$0xff] %vm1266_vm2, %v1235_v12  ;;  %v1236_v17 = vmax.f32 %v1194_v13, 0.0 }
 0x1ed   : > { %2964 = vst.msk [vmem:[%s4255_s10 + $0x20] sm:$0xff] %vm1266_vm2, %v1233_v15  ;;  %v1234_v18 = vmax.f32 %v1186_v16, 0.0 }
 0x1ee   : > { %v1248_v19 = vpack.c.bf16 %v1236_v17, %v1235_v12  ;;  %2967 = vst.msk [vmem:[%s4255_s10 + $0x38] sm:$0xff] %vm1266_vm2, %v1236_v17 }
 0x1ef   : > { %v1247_v20 = vpack.c.bf16 %v1234_v18, %v1233_v15  ;;  %2965 = vst.msk [vmem:[%s4255_s10 + $0x28] sm:$0xff] %vm1266_vm2, %v1234_v18  ;;  %v3558_v21 = vpop.f32.mrb[8].mxu1 }
 0x1f0   : > { %v1207_v22 = vadd.f32 %v3558_v21, %v4248_v56  ;;  %v1198_v23 = vpop.f32.mrb[9].mxu1 }
 0x1f1   : > { %v1199_v24 = vadd.f32 %v4248_v56, %v1198_v23  ;;  %v3559_v25 = vpop.f32.mrb[10].mxu1  ;;  %3572 = vmatprep.mubr.msk.bf16.mxu0 %vm1266_vm2, %v1247_v20 }
 0x1f2   : > { %v1239_v26 = vmax.f32 %v1207_v22, 0.0  ;;  %v1210_v27 = vadd.f32 %v3559_v25, %v4248_v56  ;;  %v1201_v28 = vpop.f32.mrb[11].mxu1  ;;  %3573 = vmatmul.mubr.msk.bf16.gmra.mrb[20].mxu0 %vm1266_vm2, %v1248_v19 }
 0x1f3   : > { %v1237_v29 = vmax.f32 %v1199_v24, 0.0  ;;  %v1202_v30 = vadd.f32 %v4248_v56, %v1201_v28 }
 0x1f4   : > { %2970 = vst.msk [vmem:[%s4255_s10 + $0x50] sm:$0xff] %vm1266_vm2, %v1239_v26  ;;  %v1240_v31 = vmax.f32 %v1210_v27, 0.0 }
 0x1f5   : > { %2968 = vst.msk [vmem:[%s4255_s10 + $0x40] sm:$0xff] %vm1266_vm2, %v1237_v29  ;;  %v1238_v32 = vmax.f32 %v1202_v30, 0.0 }
 0x1f6   : > { %v1250_v33 = vpack.c.bf16 %v1240_v31, %v1239_v26  ;;  %2971 = vst.msk [vmem:[%s4255_s10 + $0x58] sm:$0xff] %vm1266_vm2, %v1240_v31 }
 0x1f7   : > { %v1249_v34 = vpack.c.bf16 %v1238_v32, %v1237_v29  ;;  %2969 = vst.msk [vmem:[%s4255_s10 + $0x48] sm:$0xff] %vm1266_vm2, %v1238_v32  ;;  %v3562_v35 = vpop.f32.mrb[12].mxu1 }
 0x1f8   : > { %v1223_v36 = vadd.f32 %v3562_v35, %v4248_v56  ;;  %v1214_v37 = vpop.f32.mrb[13].mxu1 }
 0x1f9   : > { %v1215_v38 = vadd.f32 %v4248_v56, %v1214_v37  ;;  %v3563_v39 = vpop.f32.mrb[14].mxu1  ;;  %3576 = vmatprep.mubr.msk.bf16.mxu0 %vm1266_vm2, %v1249_v34 }
 0x1fa   : > { %v1243_v40 = vmax.f32 %v1223_v36, 0.0  ;;  %v1226_v41 = vadd.f32 %v3563_v39, %v4248_v56  ;;  %v1217_v42 = vpop.f32.mrb[15].mxu1  ;;  %3577 = vmatmul.mubr.msk.bf16.gmra.mrb[24].mxu0 %vm1266_vm2, %v1250_v33 }
 0x1fb   : > { %v1241_v43 = vmax.f32 %v1215_v38, 0.0  ;;  %v1218_v44 = vadd.f32 %v4248_v56, %v1217_v42  ;;  %v1567_v56 = vld [vmem:[%s5395_s29 + $0x18] sm:$0xff] }
 0x1fc   : > { %2974 = vst.msk [vmem:[%s4255_s10 + $0x70] sm:$0xff] %vm1266_vm2, %v1243_v40  ;;  %v1244_v45 = vmax.f32 %v1226_v41, 0.0  ;;  %v1581_v57 = vpack.c.bf16 %v1567_v56, %v1566_v54 }
 0x1fd   : > { %2972 = vst.msk [vmem:[%s4255_s10 + $0x60] sm:$0xff] %vm1266_vm2, %v1241_v43  ;;  %v1242_v46 = vmax.f32 %v1218_v44, 0.0 }
 0x1fe   : > { %v1252_v47 = vpack.c.bf16 %v1244_v45, %v1243_v40  ;;  %2975 = vst.msk [vmem:[%s4255_s10 + $0x78] sm:$0xff] %vm1266_vm2, %v1244_v45  ;;  %3612 = vmatprep.subr.bf16.mxu0 %v1581_v57 }
 0x1ff   : > { %v1251_v48 = vpack.c.bf16 %v1242_v46, %v1241_v43  ;;  %2973 = vst.msk [vmem:[%s4255_s10 + $0x68] sm:$0xff] %vm1266_vm2, %v1242_v46  ;;  %3613 = vmatpush3.bf16.msra.mxu0 %v1581_v57  ;;  %s5056_s10 = scalar_lea.vmem %s5357_s21, %s4098_s2 }
 0x200   : > { %3614 = vmatprep.subr.bf16.mxu0 %v1582_v60 }
 0x201   : > { %3580 = vmatprep.mubr.msk.bf16.mxu0 %vm1266_vm2, %v1251_v48 }
 0x202   : > { %3581 = vmatmul.mubr.msk.bf16.gmra.mrb[28].mxu0 %vm1266_vm2, %v1252_v47 }
 0x203   : > { %3615 = vmatpush3.bf16.msra.mxu0 %v1582_v60 }
 0x204   : > { %3616 = vmatprep.subr.bf16.mxu0 %v1583_v63 }
 0x207   : > { %3617 = vmatpush3.bf16.msra.mxu0 %v1583_v63  ;;  %v1576_v63 = vld [vmem:[%s5395_s29 + $0x60] sm:$0xff] }
 0x208   : > { %3618 = vmatprep.subr.bf16.mxu0 %v1584_v2  ;;  %v1586_v1 = vpack.c.bf16 %v1577_v0, %v1576_v63 }
 0x20b   : > { %3619 = vmatpush3.bf16.msra.mxu0 %v1584_v2  ;;  %v1578_v2 = vld [vmem:[%s5395_s29 + $0x70] sm:$0xff] }
 0x20c   : > { %3620 = vmatprep.subr.bf16.mxu0 %v1585_v5  ;;  %v1587_v4 = vpack.c.bf16 %v1579_v3, %v1578_v2 }
 0x20f   : > { %3621 = vmatpush3.bf16.msra.mxu0 %v1585_v5  ;;  %v4436_v5 = vld [vmem:[%s5397_s5] ss:$0 sm:$0xff] }
 0x210   : > { %3622 = vmatprep.subr.bf16.mxu0 %v1586_v1 }
 0x213   : > { %3623 = vmatpush3.bf16.msra.mxu0 %v1586_v1 }
 0x214   : > { %3624 = vmatprep.subr.bf16.mxu0 %v1587_v4 }
 0x217   : > { %3625 = vmatpush3.bf16.msra.mxu0 %v1587_v4 }
 0x2bd   : > { %v3570_v7 = vpop.f32.mrb[16].mxu0 }
 0x2be   : > { %v1334_v8 = vadd.f32 %v3570_v7, %v4357_v6  ;;  %v1325_v9 = vpop.f32.mrb[17].mxu0 }
 0x2bf   : > { %v1326_v10 = vadd.f32 %v4357_v6, %v1325_v9  ;;  %v3571_v11 = vpop.f32.mrb[18].mxu0 }
 0x2c0   : > { %v1390_v12 = vmax.f32 %v1334_v8, 0.0  ;;  %v1337_v13 = vadd.f32 %v3571_v11, %v4357_v6  ;;  %v1328_v14 = vpop.f32.mrb[19].mxu0 }
 0x2c1   : > { %v1388_v15 = vmax.f32 %v1326_v10, 0.0  ;;  %v1329_v16 = vadd.f32 %v4357_v6, %v1328_v14 }
 0x2c2   : > { %2978 = vst.msk [vmem:[%s4364_s8 + $0x10] sm:$0xff] %vm1434_vm3, %v1390_v12  ;;  %v1391_v17 = vmax.f32 %v1337_v13, 0.0 }
 0x2c3   : > { %2976 = vst.msk [vmem:[%s4364_s8] sm:$0xff] %vm1434_vm3, %v1388_v15  ;;  %v1389_v18 = vmax.f32 %v1329_v16, 0.0 }
 0x2c4   : > { %v1405_v19 = vpack.c.bf16 %v1391_v17, %v1390_v12  ;;  %2979 = vst.msk [vmem:[%s4364_s8 + $0x18] sm:$0xff] %vm1434_vm3, %v1391_v17 }
 0x2c5   : > { %v1404_v20 = vpack.c.bf16 %v1389_v18, %v1388_v15  ;;  %2977 = vst.msk [vmem:[%s4364_s8 + $0x8] sm:$0xff] %vm1434_vm3, %v1389_v18  ;;  %v3574_v21 = vpop.f32.mrb[20].mxu0 }
 0x2c6   : > { %v1350_v22 = vadd.f32 %v3574_v21, %v4357_v6  ;;  %v1341_v23 = vpop.f32.mrb[21].mxu0 }
 0x2c7   : > { %v1342_v24 = vadd.f32 %v4357_v6, %v1341_v23  ;;  %v3575_v25 = vpop.f32.mrb[22].mxu0  ;;  %3594 = vmatprep.mubr.msk.bf16.mxu1 %vm1434_vm3, %v1404_v20 }
 0x2c8   : > { %v1394_v26 = vmax.f32 %v1350_v22, 0.0  ;;  %v1353_v27 = vadd.f32 %v3575_v25, %v4357_v6  ;;  %v1344_v28 = vpop.f32.mrb[23].mxu0  ;;  %3595 = vmatmul.mubr.msk.bf16.vlgmr.msra.gmra.mrb[16].mxu1 %vm1434_vm3, %v1405_v19 }
 0x2c9   : > { %v1392_v29 = vmax.f32 %v1342_v24, 0.0  ;;  %v1345_v30 = vadd.f32 %v4357_v6, %v1344_v28 }
 0x2ca   : > { %2982 = vst.msk [vmem:[%s4364_s8 + $0x30] sm:$0xff] %vm1434_vm3, %v1394_v26  ;;  %v1395_v31 = vmax.f32 %v1353_v27, 0.0 }
 0x2cb   : > { %2980 = vst.msk [vmem:[%s4364_s8 + $0x20] sm:$0xff] %vm1434_vm3, %v1392_v29  ;;  %v1393_v32 = vmax.f32 %v1345_v30, 0.0 }
 0x2cc   : > { %v1407_v33 = vpack.c.bf16 %v1395_v31, %v1394_v26  ;;  %2983 = vst.msk [vmem:[%s4364_s8 + $0x38] sm:$0xff] %vm1434_vm3, %v1395_v31 }
 0x2cd   : > { %v1406_v34 = vpack.c.bf16 %v1393_v32, %v1392_v29  ;;  %2981 = vst.msk [vmem:[%s4364_s8 + $0x28] sm:$0xff] %vm1434_vm3, %v1393_v32  ;;  %v3578_v35 = vpop.f32.mrb[24].mxu0 }
 0x2ce   : > { %v1366_v36 = vadd.f32 %v3578_v35, %v4357_v6  ;;  %v1357_v37 = vpop.f32.mrb[25].mxu0 }
 0x2cf   : > { %v1358_v38 = vadd.f32 %v4357_v6, %v1357_v37  ;;  %v3579_v39 = vpop.f32.mrb[26].mxu0  ;;  %3598 = vmatprep.mubr.msk.bf16.mxu1 %vm1434_vm3, %v1406_v34 }
 0x2d0   : > { %v1398_v40 = vmax.f32 %v1366_v36, 0.0  ;;  %v1369_v41 = vadd.f32 %v3579_v39, %v4357_v6  ;;  %v1360_v42 = vpop.f32.mrb[27].mxu0  ;;  %3599 = vmatmul.mubr.msk.bf16.gmra.mrb[20].mxu1 %vm1434_vm3, %v1407_v33 }
 0x2d1   : > { %v1396_v43 = vmax.f32 %v1358_v38, 0.0  ;;  %v1361_v44 = vadd.f32 %v4357_v6, %v1360_v42 }
 0x2d2   : > { %2986 = vst.msk [vmem:[%s4364_s8 + $0x50] sm:$0xff] %vm1434_vm3, %v1398_v40  ;;  %v1399_v45 = vmax.f32 %v1369_v41, 0.0 }
 0x2d3   : > { %2984 = vst.msk [vmem:[%s4364_s8 + $0x40] sm:$0xff] %vm1434_vm3, %v1396_v43  ;;  %v1397_v46 = vmax.f32 %v1361_v44, 0.0 }
 0x2d4   : > { %v1409_v47 = vpack.c.bf16 %v1399_v45, %v1398_v40  ;;  %2987 = vst.msk [vmem:[%s4364_s8 + $0x58] sm:$0xff] %vm1434_vm3, %v1399_v45 }
 0x2d5   : > { %v1408_v48 = vpack.c.bf16 %v1397_v46, %v1396_v43  ;;  %2985 = vst.msk [vmem:[%s4364_s8 + $0x48] sm:$0xff] %vm1434_vm3, %v1397_v46  ;;  %v3582_v49 = vpop.f32.mrb[28].mxu0 }
 0x2d6   : > { %v1382_v50 = vadd.f32 %v3582_v49, %v4357_v6  ;;  %v1373_v51 = vpop.f32.mrb[29].mxu0 }
 0x2d7   : > { %v1374_v52 = vadd.f32 %v4357_v6, %v1373_v51  ;;  %v3583_v53 = vpop.f32.mrb[30].mxu0  ;;  %3602 = vmatprep.mubr.msk.bf16.mxu1 %vm1434_vm3, %v1408_v48 }
 0x2d8   : > { %v1402_v54 = vmax.f32 %v1382_v50, 0.0  ;;  %v1385_v55 = vadd.f32 %v3583_v53, %v4357_v6  ;;  %v1376_v56 = vpop.f32.mrb[31].mxu0  ;;  %3603 = vmatmul.mubr.msk.bf16.gmra.mrb[24].mxu1 %vm1434_vm3, %v1409_v47 }
 0x2d9   : > { %v1400_v57 = vmax.f32 %v1374_v52, 0.0  ;;  %v1377_v58 = vadd.f32 %v4357_v6, %v1376_v56 }
 0x2da   : > { %2990 = vst.msk [vmem:[%s4364_s8 + $0x70] sm:$0xff] %vm1434_vm3, %v1402_v54  ;;  %v1403_v59 = vmax.f32 %v1385_v55, 0.0 }
 0x2db   : > { %2988 = vst.msk [vmem:[%s4364_s8 + $0x60] sm:$0xff] %vm1434_vm3, %v1400_v57  ;;  %v1401_v60 = vmax.f32 %v1377_v58, 0.0 }
 0x2dc   : > { %v1411_v61 = vpack.c.bf16 %v1403_v59, %v1402_v54  ;;  %2991 = vst.msk [vmem:[%s4364_s8 + $0x78] sm:$0xff] %vm1434_vm3, %v1403_v59 }
 0x2dd   : > { %v1410_v62 = vpack.c.bf16 %v1401_v60, %v1400_v57  ;;  %2989 = vst.msk [vmem:[%s4364_s8 + $0x68] sm:$0xff] %vm1434_vm3, %v1401_v60 }
 0x2df   : > { %3606 = vmatprep.mubr.msk.bf16.mxu1 %vm1434_vm3, %v1410_v62 }
 0x2e0   : > { %3607 = vmatmul.mubr.msk.bf16.gmra.mrb[28].mxu1 %vm1434_vm3, %v1411_v61 }
 0x39b   : > { %v3596_v6 = vpop.f32.mrb[16].mxu1 }
 0x39c   : > { %v1502_v7 = vadd.f32 %v3596_v6, %v4436_v5  ;;  %v1493_v8 = vpop.f32.mrb[17].mxu1 }
 0x39d   : > { %v1494_v9 = vadd.f32 %v4436_v5, %v1493_v8  ;;  %v3597_v10 = vpop.f32.mrb[18].mxu1 }
 0x39e   : > { %2994 = vst [vmem:[%s4442_s4 + $0x10] sm:$0xff] %v1502_v7  ;;  %v1505_v11 = vadd.f32 %v3597_v10, %v4436_v5  ;;  %v1496_v12 = vpop.f32.mrb[19].mxu1  ;;  %v2562_v13 = vmul.f32 %v1502_v7, %v1502_v7  ;;  %v2183_v15 = vmax.f32 %v1502_v7, 0.0 }
 0x39f   : > { %2992 = vst [vmem:[%s4442_s4] sm:$0xff] %v1494_v9  ;;  %v1497_v14 = vadd.f32 %v4436_v5, %v1496_v12  ;;  %v2181_v20 = vmax.f32 %v1494_v9, 0.0  ;;  %v2560_v23 = vmul.f32 %v1494_v9, %v1494_v9 }
 0x3a0   : > { %v4450_v16 = vpack.c.bf16 %v1505_v11, %v1502_v7  ;;  %v2184_v17 = vmax.f32 %v1505_v11, 0.0  ;;  %2995 = vst [vmem:[%s4442_s4 + $0x18] sm:$0xff] %v1505_v11  ;;  %2580 = vadd.xlane.f32.xlu0 %v2562_v13  ;;  %v2563_v18 = vmul.f32 %v1505_v11, %v1505_v11 }
 0x3a1   : > { %2993 = vst [vmem:[%s4442_s4 + $0x8] sm:$0xff] %v1497_v14  ;;  %v4454_v19 = vpack.c.bf16 %v1497_v14, %v1494_v9  ;;  %v2182_v21 = vmax.f32 %v1497_v14, 0.0  ;;  %v2561_v28 = vmul.f32 %v1497_v14, %v1497_v14 }
 0x3a2   : > { %v4456_v22 = vpack.c.bf16 %v2184_v17, %v2183_v15  ;;  %2582 = vadd.xlane.f32.xlu1 %v2563_v18 }
 0x3a3   : > { %v3600_v24 = vpop.f32.mrb[20].mxu1  ;;  %3626 = vmatprep.mubr.bf16.mxu0 %v4454_v19  ;;  %v4459_v25 = vpack.c.bf16 %v2182_v21, %v2181_v20 }
 0x3a4   : > { %v1518_v26 = vadd.f32 %v3600_v24, %v4436_v5  ;;  %v1509_v27 = vpop.f32.mrb[21].mxu1  ;;  %2576 = vadd.xlane.f32.xlu0 %v2560_v23  ;;  %3627 = vmatmul.mubr.bf16.vlgmr.msra.gmra.mrb[32].mxu0 %v4450_v16  ;;  %v1716_v23 = vld [vmem:[%s5398_s6] sm:$0xff]  ;;  %v1717_v24 = vld [vmem:[%s5398_s6 + $0x8] sm:$0xff] }
 0x3a5   : > { %v1510_v29 = vadd.f32 %v4436_v5, %v1509_v27  ;;  %v3601_v30 = vpop.f32.mrb[22].mxu1  ;;  %v1726_v27 = vpack.c.bf16 %v1717_v24, %v1716_v23 }
 0x3a6   : > { %2998 = vst [vmem:[%s4442_s4 + $0x30] sm:$0xff] %v1518_v26  ;;  %v1521_v31 = vadd.f32 %v3601_v30, %v4436_v5  ;;  %v1512_v32 = vpop.f32.mrb[23].mxu1  ;;  %2578 = vadd.xlane.f32.xlu1 %v2561_v28  ;;  %v2566_v33 = vmul.f32 %v1518_v26, %v1518_v26  ;;  %v2187_v37 = vmax.f32 %v1518_v26, 0.0  ;;  %v1719_v28 = vld [vmem:[%s5398_s6 + $0x18] sm:$0xff]  ;;  %v1720_v30 = vld [vmem:[%s5398_s6 + $0x20] sm:$0xff] }
 0x3a7   : > { %2996 = vst [vmem:[%s4442_s4 + $0x20] sm:$0xff] %v1510_v29  ;;  %v1513_v34 = vadd.f32 %v4436_v5, %v1512_v32  ;;  %v2185_v40 = vmax.f32 %v1510_v29, 0.0  ;;  %v2564_v42 = vmul.f32 %v1510_v29, %v1510_v29  ;;  %3642 = vmatprep.subr.bf16.mxu1 %v1726_v27 }
 0x3a8   : > { %2999 = vst [vmem:[%s4442_s4 + $0x38] sm:$0xff] %v1521_v31  ;;  %2588 = vadd.xlane.f32.xlu0 %v2566_v33  ;;  %v2567_v35 = vmul.f32 %v1521_v31, %v1521_v31  ;;  %v4469_v36 = vpack.c.bf16 %v1521_v31, %v1518_v26  ;;  %v2188_v38 = vmax.f32 %v1521_v31, 0.0  ;;  %v1718_v26 = vld [vmem:[%s5398_s6 + $0x10] sm:$0xff]  ;;  %v1721_v31 = vld [vmem:[%s5398_s6 + $0x28] sm:$0xff]  ;;  %3643 = vmatpush3.bf16.msra.mxu1 %v1726_v27 }
 0x3a9   : > { %2997 = vst [vmem:[%s4442_s4 + $0x28] sm:$0xff] %v1513_v34  ;;  %v4472_v39 = vpack.c.bf16 %v1513_v34, %v1510_v29  ;;  %v2186_v41 = vmax.f32 %v1513_v34, 0.0  ;;  %v2565_v48 = vmul.f32 %v1513_v34, %v1513_v34  ;;  %v1727_v29 = vpack.c.bf16 %v1719_v28, %v1718_v26  ;;  %v1722_v33 = vld [vmem:[%s5398_s6 + $0x30] sm:$0xff]  ;;  %v1723_v34 = vld [vmem:[%s5398_s6 + $0x38] sm:$0xff] }
 0x3aa   : > { %2590 = vadd.xlane.f32.xlu1 %v2567_v35  ;;  %v4474_v43 = vpack.c.bf16 %v2188_v38, %v2187_v37  ;;  %v1728_v32 = vpack.c.bf16 %v1721_v31, %v1720_v30  ;;  %v1729_v35 = vpack.c.bf16 %v1723_v34, %v1722_v33  ;;  %v1724_v37 = vld [vmem:[%s5398_s6 + $0x40] sm:$0xff]  ;;  %v1725_v38 = vld [vmem:[%s5398_s6 + $0x48] sm:$0xff] }
 0x3ab   : > { %v3604_v44 = vpop.f32.mrb[24].mxu1  ;;  %3630 = vmatprep.mubr.bf16.mxu0 %v4472_v39  ;;  %v4477_v45 = vpack.c.bf16 %v2186_v41, %v2185_v40  ;;  %3644 = vmatprep.subr.bf16.mxu1 %v1727_v29  ;;  %v1730_v40 = vpack.c.bf16 %v1725_v38, %v1724_v37  ;;  %v1883_v41 = vld [vmem:[%s5349_s13] sm:$0xff] }
 0x3ac   : > { %v1534_v46 = vadd.f32 %v3604_v44, %v4436_v5  ;;  %v1525_v47 = vpop.f32.mrb[25].mxu1  ;;  %2584 = vadd.xlane.f32.xlu0 %v2564_v42  ;;  %3631 = vmatmul.mubr.bf16.gmra.mrb[36].mxu0 %v4469_v36  ;;  %v1884_v42 = vld [vmem:[%s5349_s13 + $0x8] sm:$0xff]  ;;  %v1885_v44 = vld [vmem:[%s5349_s13 + $0x10] sm:$0xff] }
 0x3ad   : > { %v1526_v49 = vadd.f32 %v4436_v5, %v1525_v47  ;;  %v3605_v50 = vpop.f32.mrb[26].mxu1  ;;  %3645 = vmatpush3.bf16.msra.mxu1 %v1727_v29  ;;  %v1886_v47 = vld [vmem:[%s5349_s13 + $0x18] sm:$0xff] }
 0x3ae   : > { %3002 = vst [vmem:[%s4442_s4 + $0x50] sm:$0xff] %v1534_v46  ;;  %v1537_v51 = vadd.f32 %v3605_v50, %v4436_v5  ;;  %v1528_v52 = vpop.f32.mrb[27].mxu1  ;;  %2586 = vadd.xlane.f32.xlu1 %v2565_v48  ;;  %v2570_v53 = vmul.f32 %v1534_v46, %v1534_v46  ;;  %v2191_v57 = vmax.f32 %v1534_v46, 0.0  ;;  %3646 = vmatprep.subr.bf16.mxu1 %v1728_v32 }
 0x3af   : > { %3000 = vst [vmem:[%s4442_s4 + $0x40] sm:$0xff] %v1526_v49  ;;  %v1529_v54 = vadd.f32 %v4436_v5, %v1528_v52  ;;  %v2189_v60 = vmax.f32 %v1526_v49, 0.0  ;;  %v2568_v62 = vmul.f32 %v1526_v49, %v1526_v49  ;;  %v1888_v48 = vpack.c.bf16 %v1886_v47, %v1885_v44 }
 0x3b0   : > { %3003 = vst [vmem:[%s4442_s4 + $0x58] sm:$0xff] %v1537_v51  ;;  %2596 = vadd.xlane.f32.xlu0 %v2570_v53  ;;  %v2571_v55 = vmul.f32 %v1537_v51, %v1537_v51  ;;  %v4487_v56 = vpack.c.bf16 %v1537_v51, %v1534_v46  ;;  %v2192_v58 = vmax.f32 %v1537_v51, 0.0  ;;  %v1887_v46 = vpack.c.bf16 %v1884_v42, %v1883_v41 }
 0x3b1   : > { %3001 = vst [vmem:[%s4442_s4 + $0x48] sm:$0xff] %v1529_v54  ;;  %v4490_v59 = vpack.c.bf16 %v1529_v54, %v1526_v49  ;;  %v2190_v61 = vmax.f32 %v1529_v54, 0.0  ;;  %v2569_v4 = vmul.f32 %v1529_v54, %v1529_v54  ;;  %3647 = vmatpush3.bf16.msra.mxu1 %v1728_v32  ;;  %v3357_v49 = vld [vmem:[%s5399_s0] ss:$0 sm:$0xff] }
 0x3b2   : > { %2598 = vadd.xlane.f32.xlu1 %v2571_v55  ;;  %v4492_v63 = vpack.c.bf16 %v2192_v58, %v2191_v57  ;;  %3648 = vmatprep.subr.bf16.mxu1 %v1729_v35 }
 0x3b3   : > { %v3608_v0 = vpop.f32.mrb[28].mxu1  ;;  %3634 = vmatprep.mubr.bf16.mxu0 %v4490_v59  ;;  %v4495_v1 = vpack.c.bf16 %v2190_v61, %v2189_v60  ;;  %3668 = vmatprep.subr.bf16.mxu0 %v1887_v46 }
 0x3b4   : > { %v4498_v2 = vadd.f32 %v3608_v0, %v4436_v5  ;;  %v1541_v3 = vpop.f32.mrb[29].mxu1  ;;  %2592 = vadd.xlane.f32.xlu0 %v2568_v62  ;;  %3635 = vmatmul.mubr.bf16.gmra.mrb[40].mxu0 %v4487_v56 }
 0x3b5   : > { %v1542_v6 = vadd.f32 %v4436_v5, %v1541_v3  ;;  %v3609_v7 = vpop.f32.mrb[30].mxu1  ;;  %3649 = vmatpush3.bf16.msra.mxu1 %v1729_v35  ;;  %3669 = vmatpush3.bf16.msra.mxu0 %v1887_v46 }
 0x3b6   : > { %3006 = vst [vmem:[%s4442_s4 + $0x70] sm:$0xff] %v4498_v2  ;;  %v4505_v8 = vadd.f32 %v3609_v7, %v4436_v5  ;;  %v1544_v9 = vpop.f32.mrb[31].mxu1  ;;  %2594 = vadd.xlane.f32.xlu1 %v2569_v4  ;;  %v2195_v13 = vmax.f32 %v4498_v2, 0.0  ;;  %3650 = vmatprep.subr.bf16.mxu1 %v1730_v40 }
 0x3b7   : > { %3004 = vst [vmem:[%s4442_s4 + $0x60] sm:$0xff] %v1542_v6  ;;  %v1545_v10 = vadd.f32 %v4436_v5, %v1544_v9  ;;  %v2572_v11 = vmul.f32 %v1542_v6, %v1542_v6  ;;  %v2193_v18 = vmax.f32 %v1542_v6, 0.0  ;;  %3670 = vmatprep.subr.bf16.mxu0 %v1888_v48 }
 0x3b8   : > { %3007 = vst [vmem:[%s4442_s4 + $0x78] sm:$0xff] %v4505_v8  ;;  %v4513_v12 = vpack.c.bf16 %v4505_v8, %v4498_v2  ;;  %v2196_v14 = vmax.f32 %v4505_v8, 0.0 }
 0x3b9   : > { %3005 = vst [vmem:[%s4442_s4 + $0x68] sm:$0xff] %v1545_v10  ;;  %2600 = vadd.xlane.f32.xlu0 %v2572_v11  ;;  %v2573_v15 = vmul.f32 %v1545_v10, %v1545_v10  ;;  %v4518_v17 = vpack.c.bf16 %v1545_v10, %v1542_v6  ;;  %v2194_v20 = vmax.f32 %v1545_v10, 0.0  ;;  %3651 = vmatpush3.bf16.msra.mxu1 %v1730_v40  ;;  %s5299_s4 = scalar_lea.vmem %s5362_s26, %s4098_s2 }
 0x3ba   : > { %v4520_v21 = vpack.c.bf16 %v2196_v14, %v2195_v13  ;;  %3671 = vmatpush3.bf16.msra.mxu0 %v1888_v48 }
 0x3bb   : > { %2602 = vadd.xlane.f32.xlu1 %v2573_v15  ;;  %3638 = vmatprep.mubr.bf16.mxu0 %v4518_v17  ;;  %v4523_v5 = vpack.c.bf16 %v2194_v20, %v2193_v18 }
 0x3bc   : > { %3639 = vmatmul.mubr.bf16.gmra.mrb[44].mxu0 %v4513_v12 }
 0x477   : > { %v3628_v50 = vpop.f32.mrb[32].mxu0 }
 0x478   : > { %v1638_v51 = vadd.f32 %v3628_v50, %v3357_v49  ;;  %v1629_v52 = vpop.f32.mrb[33].mxu0 }
 0x479   : > { %v1630_v53 = vadd.f32 %v3357_v49, %v1629_v52  ;;  %v3629_v54 = vpop.f32.mrb[34].mxu0 }
 0x47a   : > { %v1641_v55 = vadd.f32 %v3629_v54, %v3357_v49  ;;  %v1632_v57 = vpop.f32.mrb[35].mxu0  ;;  %v1694_v60 = vmax.f32 %v1638_v51, 0.0 }
 0x47b   : > { %v1633_v58 = vadd.f32 %v3357_v49, %v1632_v57  ;;  %v1692_v62 = vmax.f32 %v1630_v53, 0.0 }
 0x47c   : > { %v1695_v61 = vmax.f32 %v1641_v55, 0.0 }
 0x47d   : > { %v1693_v0 = vmax.f32 %v1633_v58, 0.0 }
 0x47e   : > { %v1709_v3 = vpack.c.bf16 %v1695_v61, %v1694_v60 }
 0x47f   : > { %v1708_v4 = vpack.c.bf16 %v1693_v0, %v1692_v62  ;;  %v3632_v6 = vpop.f32.mrb[36].mxu0  ;;  %v2205_v0 = vld [vmem:[%s5353_s17] sm:$0xff] }
 0x480   : > { %v1654_v7 = vadd.f32 %v3632_v6, %v3357_v49  ;;  %v1645_v9 = vpop.f32.mrb[37].mxu0  ;;  %v2042_v6 = vld [vmem:[%s5351_s15 + $0x8] sm:$0xff] }
 0x481   : > { %v1646_v10 = vadd.f32 %v3357_v49, %v1645_v9  ;;  %v3633_v11 = vpop.f32.mrb[38].mxu0  ;;  %3652 = vmatprep.mubr.msk.bf16.mxu1 %vm1434_vm3, %v1708_v4 }
 0x482   : > { %v1657_v13 = vadd.f32 %v3633_v11, %v3357_v49  ;;  %v1648_v14 = vpop.f32.mrb[39].mxu0  ;;  %3653 = vmatmul.mubr.msk.bf16.vlgmr.msra.gmra.mrb[32].mxu1 %vm1434_vm3, %v1709_v3  ;;  %v1698_v18 = vmax.f32 %v1654_v7, 0.0  ;;  %v2206_v3 = vld [vmem:[%s5353_s17 + $0x8] sm:$0xff]  ;;  %v2043_v7 = vld [vmem:[%s5351_s15 + $0x10] sm:$0xff] }
 0x483   : > { %v1649_v15 = vadd.f32 %v3357_v49, %v1648_v14  ;;  %v1696_v23 = vmax.f32 %v1646_v10, 0.0  ;;  %v2221_v4 = vpack.c.bf16 %v2206_v3, %v2205_v0  ;;  %v2044_v10 = vld [vmem:[%s5351_s15 + $0x18] sm:$0xff]  ;;  %v2046_v14 = vld [vmem:[%s5351_s15 + $0x28] sm:$0xff] }
 0x484   : > { %v1699_v20 = vmax.f32 %v1657_v13, 0.0  ;;  %v2050_v11 = vpack.c.bf16 %v2044_v10, %v2043_v7  ;;  %v2045_v13 = vld [vmem:[%s5351_s15 + $0x20] sm:$0xff]  ;;  %v2212_v0 = vld [vmem:[%s5353_s17 + $0x38] sm:$0xff] }
 0x485   : > { %v1697_v24 = vmax.f32 %v1649_v15, 0.0  ;;  %3712 = vmatprep.subr.bf16.mxu0 %v2221_v4  ;;  %v2051_v15 = vpack.c.bf16 %v2046_v14, %v2045_v13  ;;  %v2213_v13 = vld [vmem:[%s5353_s17 + $0x40] sm:$0xff]  ;;  %v2214_v14 = vld [vmem:[%s5353_s17 + $0x48] sm:$0xff] }
 0x486   : > { %v1711_v26 = vpack.c.bf16 %v1699_v20, %v1698_v18  ;;  %v4606_v18 = vld [vmem:[%s5348_s12] ss:$0 sm:$0xff] }
 0x487   : > { %v1710_v27 = vpack.c.bf16 %v1697_v24, %v1696_v23  ;;  %v3636_v28 = vpop.f32.mrb[40].mxu0 }
 0x488   : > { %v1670_v29 = vadd.f32 %v3636_v28, %v3357_v49  ;;  %v1661_v30 = vpop.f32.mrb[41].mxu0 }
 0x489   : > { %v1662_v31 = vadd.f32 %v3357_v49, %v1661_v30  ;;  %v3637_v32 = vpop.f32.mrb[42].mxu0  ;;  %3656 = vmatprep.mubr.msk.bf16.mxu1 %vm1434_vm3, %v1710_v27 }
 0x48a   : > { %v1673_v33 = vadd.f32 %v3637_v32, %v3357_v49  ;;  %v1664_v34 = vpop.f32.mrb[43].mxu0  ;;  %3657 = vmatmul.mubr.msk.bf16.gmra.mrb[36].mxu1 %vm1434_vm3, %v1711_v26  ;;  %v1702_v37 = vmax.f32 %v1670_v29, 0.0 }
 0x48b   : > { %v1665_v35 = vadd.f32 %v3357_v49, %v1664_v34  ;;  %v1700_v40 = vmax.f32 %v1662_v31, 0.0 }
 0x48c   : > { %v1703_v38 = vmax.f32 %v1673_v33, 0.0 }
 0x48d   : > { %v1701_v41 = vmax.f32 %v1665_v35, 0.0  ;;  %v2207_v35 = vld [vmem:[%s5353_s17 + $0x10] sm:$0xff] }
 0x48e   : > { %v1713_v42 = vpack.c.bf16 %v1703_v38, %v1702_v37  ;;  %v2208_v37 = vld [vmem:[%s5353_s17 + $0x18] sm:$0xff] }
 0x48f   : > { %v1712_v44 = vpack.c.bf16 %v1701_v41, %v1700_v40  ;;  %v3640_v46 = vpop.f32.mrb[44].mxu0 }
 0x490   : > { %v1686_v47 = vadd.f32 %v3640_v46, %v3357_v49  ;;  %v1677_v48 = vpop.f32.mrb[45].mxu0  ;;  %v2222_v46 = vpack.c.bf16 %v2208_v37, %v2207_v35 }
 0x491   : > { %v1678_v50 = vadd.f32 %v3357_v49, %v1677_v48  ;;  %v3641_v51 = vpop.f32.mrb[46].mxu0  ;;  %3660 = vmatprep.mubr.msk.bf16.mxu1 %vm1434_vm3, %v1712_v44 }
 0x492   : > { %v1689_v52 = vadd.f32 %v3641_v51, %v3357_v49  ;;  %v1680_v53 = vpop.f32.mrb[47].mxu0  ;;  %3661 = vmatmul.mubr.msk.bf16.gmra.mrb[40].mxu1 %vm1434_vm3, %v1713_v42  ;;  %v1706_v55 = vmax.f32 %v1686_v47, 0.0  ;;  %v2210_v51 = vld [vmem:[%s5353_s17 + $0x28] sm:$0xff] }
 0x493   : > { %v1681_v54 = vadd.f32 %v3357_v49, %v1680_v53  ;;  %v1704_v58 = vmax.f32 %v1678_v50, 0.0  ;;  %v2041_v49 = vld [vmem:[%s5351_s15] sm:$0xff] }
 0x494   : > { %v1707_v57 = vmax.f32 %v1689_v52, 0.0  ;;  %v2049_v9 = vpack.c.bf16 %v2042_v6, %v2041_v49  ;;  %v2209_v50 = vld [vmem:[%s5353_s17 + $0x20] sm:$0xff] }
 0x495   : > { %v1705_v60 = vmax.f32 %v1681_v54, 0.0 }
 0x496   : > { %v1715_v61 = vpack.c.bf16 %v1707_v57, %v1706_v55  ;;  %3688 = vmatprep.subr.bf16.mxu1 %v2049_v9 }
 0x497   : > { %v1714_v62 = vpack.c.bf16 %v1705_v60, %v1704_v58  ;;  %3689 = vmatpush3.bf16.msra.mxu1 %v2049_v9  ;;  %v2223_v58 = vpack.c.bf16 %v2210_v51, %v2209_v50 }
 0x498   : > { %3690 = vmatprep.subr.bf16.mxu1 %v2050_v11 }
 0x499   : > { %3664 = vmatprep.mubr.msk.bf16.mxu1 %vm1434_vm3, %v1714_v62  ;;  %v2211_v62 = vld [vmem:[%s5353_s17 + $0x30] sm:$0xff] }
 0x49a   : > { %3665 = vmatmul.mubr.msk.bf16.gmra.mrb[44].mxu1 %vm1434_vm3, %v1715_v61  ;;  %v2224_v9 = vpack.c.bf16 %v2212_v0, %v2211_v62 }
 0x49b   : > { %3691 = vmatpush3.bf16.msra.mxu1 %v2050_v11 }
 0x49c   : > { %3692 = vmatprep.subr.bf16.mxu1 %v2051_v15 }
 0x49f   : > { %3693 = vmatpush3.bf16.msra.mxu1 %v2051_v15 }
 0x555   : > { %v3654_v20 = vpop.f32.mrb[32].mxu1 }
 0x556   : > { %v1805_v23 = vadd.f32 %v3654_v20, %v4606_v18  ;;  %v1796_v24 = vpop.f32.mrb[33].mxu1 }
 0x557   : > { %v1797_v26 = vadd.f32 %v4606_v18, %v1796_v24  ;;  %v3655_v27 = vpop.f32.mrb[34].mxu1 }
 0x558   : > { %v1808_v28 = vadd.f32 %v3655_v27, %v4606_v18  ;;  %v1799_v29 = vpop.f32.mrb[35].mxu1  ;;  %v1861_v31 = vmax.f32 %v1805_v23, 0.0  ;;  %v2225_v27 = vpack.c.bf16 %v2214_v14, %v2213_v13  ;;  %v2610_v13 = vld [vmem:[%s5355_s19 + $0x10] sm:$0xff]  ;;  %v2611_v14 = vld [vmem:[%s5355_s19 + $0x18] sm:$0xff] }
 0x559   : > { %v1800_v30 = vadd.f32 %v4606_v18, %v1799_v29  ;;  %v1859_v33 = vmax.f32 %v1797_v26, 0.0 }
 0x55a   : > { %v1862_v32 = vmax.f32 %v1808_v28, 0.0 }
 0x55b   : > { %v1860_v34 = vmax.f32 %v1800_v30, 0.0  ;;  %v2215_v30 = vld [vmem:[%s5353_s17 + $0x50] sm:$0xff] }
 0x55c   : > { %v1876_v38 = vpack.c.bf16 %v1862_v32, %v1861_v31  ;;  %v2216_v31 = vld [vmem:[%s5353_s17 + $0x58] sm:$0xff] }
 0x55d   : > { %v1875_v40 = vpack.c.bf16 %v1860_v34, %v1859_v33  ;;  %v3658_v41 = vpop.f32.mrb[36].mxu1 }
 0x55e   : > { %v1821_v42 = vadd.f32 %v3658_v41, %v4606_v18  ;;  %v1812_v44 = vpop.f32.mrb[37].mxu1 }
 0x55f   : > { %v1813_v47 = vadd.f32 %v4606_v18, %v1812_v44  ;;  %v3659_v48 = vpop.f32.mrb[38].mxu1  ;;  %3672 = vmatprep.mubr.msk.bf16.mxu0 %vm1266_vm2, %v1875_v40  ;;  %v2218_v44 = vld [vmem:[%s5353_s17 + $0x68] sm:$0xff] }
 0x560   : > { %v1824_v52 = vadd.f32 %v3659_v48, %v4606_v18  ;;  %v1815_v53 = vpop.f32.mrb[39].mxu1  ;;  %3673 = vmatmul.mubr.msk.bf16.vlgmr.msra.gmra.mrb[48].mxu0 %vm1266_vm2, %v1876_v38  ;;  %v1865_v55 = vmax.f32 %v1821_v42, 0.0  ;;  %v2226_v38 = vpack.c.bf16 %v2216_v31, %v2215_v30  ;;  %v2217_v42 = vld [vmem:[%s5353_s17 + $0x60] sm:$0xff]  ;;  %v2613_v31 = vld [vmem:[%s5355_s19 + $0x28] sm:$0xff] }
 0x561   : > { %v1816_v54 = vadd.f32 %v4606_v18, %v1815_v53  ;;  %3713 = vmatpush3.bf16.msra.mxu0 %v2221_v4  ;;  %v1863_v60 = vmax.f32 %v1813_v47, 0.0  ;;  %v2612_v30 = vld [vmem:[%s5355_s19 + $0x20] sm:$0xff] }
 0x562   : > { %v1866_v57 = vmax.f32 %v1824_v52, 0.0  ;;  %3714 = vmatprep.subr.bf16.mxu0 %v2222_v46  ;;  %v2227_v52 = vpack.c.bf16 %v2218_v44, %v2217_v42  ;;  %v2614_v42 = vld [vmem:[%s5355_s19 + $0x30] sm:$0xff]  ;;  %v2615_v44 = vld [vmem:[%s5355_s19 + $0x38] sm:$0xff] }
 0x563   : > { %v1864_v61 = vmax.f32 %v1816_v54, 0.0 }
 0x564   : > { %v1878_v3 = vpack.c.bf16 %v1866_v57, %v1865_v55  ;;  %v2219_v55 = vld [vmem:[%s5353_s17 + $0x70] sm:$0xff]  ;;  %v2220_v57 = vld [vmem:[%s5353_s17 + $0x78] sm:$0xff] }
 0x565   : > { %v1877_v49 = vpack.c.bf16 %v1864_v61, %v1863_v60  ;;  %v3662_v6 = vpop.f32.mrb[40].mxu1  ;;  %3715 = vmatpush3.bf16.msra.mxu0 %v2222_v46 }
 0x566   : > { %v1837_v4 = vadd.f32 %v3662_v6, %v4606_v18  ;;  %v1828_v7 = vpop.f32.mrb[41].mxu1  ;;  %3716 = vmatprep.subr.bf16.mxu0 %v2223_v58 }
 0x567   : > { %v1829_v10 = vadd.f32 %v4606_v18, %v1828_v7  ;;  %v3663_v11 = vpop.f32.mrb[42].mxu1  ;;  %3676 = vmatprep.mubr.msk.bf16.mxu0 %vm1266_vm2, %v1877_v49 }
 0x568   : > { %v1840_v15 = vadd.f32 %v3663_v11, %v4606_v18  ;;  %v1831_v20 = vpop.f32.mrb[43].mxu1  ;;  %3677 = vmatmul.mubr.msk.bf16.gmra.mrb[52].mxu0 %vm1266_vm2, %v1878_v3  ;;  %v1869_v24 = vmax.f32 %v1837_v4, 0.0 }
 0x569   : > { %v1832_v23 = vadd.f32 %v4606_v18, %v1831_v20  ;;  %3717 = vmatpush3.bf16.msra.mxu0 %v2223_v58  ;;  %v1867_v28 = vmax.f32 %v1829_v10, 0.0 }
 0x56a   : > { %v1870_v26 = vmax.f32 %v1840_v15, 0.0  ;;  %3718 = vmatprep.subr.bf16.mxu0 %v2224_v9 }
 0x56b   : > { %v1868_v29 = vmax.f32 %v1832_v23, 0.0 }
 0x56c   : > { %v1880_v32 = vpack.c.bf16 %v1870_v26, %v1869_v24 }
 0x56d   : > { %v1879_v33 = vpack.c.bf16 %v1868_v29, %v1867_v28  ;;  %v3666_v34 = vpop.f32.mrb[44].mxu1  ;;  %3719 = vmatpush3.bf16.msra.mxu0 %v2224_v9 }
 0x56e   : > { %v1853_v35 = vadd.f32 %v3666_v34, %v4606_v18  ;;  %v1844_v37 = vpop.f32.mrb[45].mxu1  ;;  %3720 = vmatprep.subr.bf16.mxu0 %v2225_v27 }
 0x56f   : > { %v1845_v40 = vadd.f32 %v4606_v18, %v1844_v37  ;;  %v3667_v41 = vpop.f32.mrb[46].mxu1  ;;  %3680 = vmatprep.mubr.msk.bf16.mxu0 %vm1266_vm2, %v1879_v33 }
 0x570   : > { %v1856_v46 = vadd.f32 %v3667_v41, %v4606_v18  ;;  %v1847_v47 = vpop.f32.mrb[47].mxu1  ;;  %3681 = vmatmul.mubr.msk.bf16.gmra.mrb[56].mxu0 %vm1266_vm2, %v1880_v32  ;;  %v1873_v50 = vmax.f32 %v1853_v35, 0.0 }
 0x571   : > { %v1848_v48 = vadd.f32 %v4606_v18, %v1847_v47  ;;  %3721 = vmatpush3.bf16.msra.mxu0 %v2225_v27  ;;  %v1871_v53 = vmax.f32 %v1845_v40, 0.0  ;;  %v2228_v18 = vpack.c.bf16 %v2220_v57, %v2219_v55  ;;  %v2625_v27 = vpack.c.bf16 %v2611_v14, %v2610_v13  ;;  %v2616_v55 = vld [vmem:[%s5355_s19 + $0x40] sm:$0xff]  ;;  %v2617_v57 = vld [vmem:[%s5355_s19 + $0x48] sm:$0xff] }
 0x572   : > { %v1874_v51 = vmax.f32 %v1856_v46, 0.0  ;;  %3722 = vmatprep.subr.bf16.mxu0 %v2226_v38 }
 0x573   : > { %v1872_v54 = vmax.f32 %v1848_v48, 0.0 }
 0x574   : > { %v1882_v58 = vpack.c.bf16 %v1874_v51, %v1873_v50 }
 0x575   : > { %v1881_v60 = vpack.c.bf16 %v1872_v54, %v1871_v53  ;;  %3723 = vmatpush3.bf16.msra.mxu0 %v2226_v38  ;;  %v2626_v38 = vpack.c.bf16 %v2613_v31, %v2612_v30  ;;  %v2622_v31 = vld [vmem:[%s5355_s19 + $0x70] sm:$0xff] }
 0x576   : > { %3724 = vmatprep.subr.bf16.mxu0 %v2227_v52 }
 0x577   : > { %3684 = vmatprep.mubr.msk.bf16.mxu0 %vm1266_vm2, %v1881_v60 }
 0x578   : > { %3685 = vmatmul.mubr.msk.bf16.gmra.mrb[60].mxu0 %vm1266_vm2, %v1882_v58 }
 0x579   : > { %3725 = vmatpush3.bf16.msra.mxu0 %v2227_v52  ;;  %3728 = vmatprep.mubr.bf16.mxu0 %v4459_v25  ;;  %v2047_v25 = vld [vmem:[%s5351_s15 + $0x30] sm:$0xff]  ;;  %v2627_v52 = vpack.c.bf16 %v2615_v44, %v2614_v42 }
 0x57a   : > { %3726 = vmatprep.subr.bf16.mxu0 %v2228_v18 }
 0x57d   : > { %3727 = vmatpush3.bf16.msra.mxu0 %v2228_v18 }
 0x580   : > { %3729 = vmatmul.mubr.bf16.vlgmr.msra.gmra.mrb[64].mxu0 %v4456_v22  ;;  %v2048_v22 = vld [vmem:[%s5351_s15 + $0x38] sm:$0xff] }
 0x581   : > { %3732 = vmatprep.mubr.bf16.mxu0 %v4477_v45  ;;  %v2052_v61 = vpack.c.bf16 %v2048_v22, %v2047_v25  ;;  %v2609_v45 = vld [vmem:[%s5355_s19 + $0x8] sm:$0xff] }
 0x583   : > { %3694 = vmatprep.subr.bf16.mxu1 %v2052_v61 }
 0x584   : > { %3695 = vmatpush3.bf16.msra.mxu1 %v2052_v61  ;;  %v2628_v61 = vpack.c.bf16 %v2617_v57, %v2616_v55 }
 0x588   : > { %3733 = vmatmul.mubr.bf16.gmra.mrb[68].mxu0 %v4474_v43  ;;  %v2608_v43 = vld [vmem:[%s5355_s19] sm:$0xff] }
 0x589   : > { %3736 = vmatprep.mubr.bf16.mxu0 %v4495_v1  ;;  %v4697_v1 = vld [vmem:[%s5350_s14] ss:$0 sm:$0xff] }
 0x590   : > { %3737 = vmatmul.mubr.bf16.gmra.mrb[72].mxu0 %v4492_v63  ;;  %v2624_v63 = vpack.c.bf16 %v2609_v45, %v2608_v43 }
 0x591   : > { %3740 = vmatprep.mubr.bf16.mxu0 %v4523_v5 }
 0x592   : > { %3744 = vmatprep.subr.bf16.mxu1 %v2624_v63 }
 0x598   : > { %3741 = vmatmul.mubr.bf16.gmra.mrb[76].mxu0 %v4520_v21 }
 0x633   : > { %v3674_v21 = vpop.f32.mrb[48].mxu0 }
 0x634   : > { %v1963_v5 = vadd.f32 %v3674_v21, %v4697_v1  ;;  %v1954_v62 = vpop.f32.mrb[49].mxu0  ;;  %v2619_v21 = vld [vmem:[%s5355_s19 + $0x58] sm:$0xff] }
 0x635   : > { %v1955_v0 = vadd.f32 %v4697_v1, %v1954_v62  ;;  %v3675_v3 = vpop.f32.mrb[50].mxu0 }
 0x636   : > { %v1966_v49 = vadd.f32 %v3675_v3, %v4697_v1  ;;  %v1957_v6 = vpop.f32.mrb[51].mxu0  ;;  %v2019_v7 = vmax.f32 %v1963_v5, 0.0  ;;  %v2333_v3 = vlaneseq }
 0x637   : > { %v1958_v4 = vadd.f32 %v4697_v1, %v1957_v6  ;;  %v2017_v10 = vmax.f32 %v1955_v0, 0.0 }
 0x638   : > { %v2020_v9 = vmax.f32 %v1966_v49, 0.0 }
 0x639   : > { %v2018_v11 = vmax.f32 %v1958_v4, 0.0 }
 0x63a   : > { %v2034_v15 = vpack.c.bf16 %v2020_v9, %v2019_v7 }
 0x63b   : > { %v2033_v20 = vpack.c.bf16 %v2018_v11, %v2017_v10  ;;  %v3678_v23 = vpop.f32.mrb[52].mxu0  ;;  %v2620_v10 = vld [vmem:[%s5355_s19 + $0x60] sm:$0xff]  ;;  %v2621_v11 = vld [vmem:[%s5355_s19 + $0x68] sm:$0xff] }
 0x63c   : > { %v1979_v24 = vadd.f32 %v3678_v23, %v4697_v1  ;;  %v1970_v26 = vpop.f32.mrb[53].mxu0 }
 0x63d   : > { %v1971_v28 = vadd.f32 %v4697_v1, %v1970_v26  ;;  %v3679_v29 = vpop.f32.mrb[54].mxu0  ;;  %3696 = vmatprep.mubr.msk.bf16.mxu1 %vm1107_vm1, %v2033_v20  ;;  %v4757_v20 = vand.u32 127, %v2333_v3  ;;  %v2630_v26 = vpack.c.bf16 %v2621_v11, %v2620_v10 }
 0x63e   : > { %v1982_v32 = vadd.f32 %v3679_v29, %v4697_v1  ;;  %v1973_v33 = vpop.f32.mrb[55].mxu0  ;;  %3697 = vmatmul.mubr.msk.bf16.vlgmr.msra.gmra.mrb[48].mxu1 %vm1107_vm1, %v2034_v15  ;;  %v2023_v35 = vmax.f32 %v1979_v24, 0.0  ;;  %v4762_v29 = vld [vmem:[%s5354_s18] ss:$0 sm:$0xff] }
 0x63f   : > { %v1974_v34 = vadd.f32 %v4697_v1, %v1973_v33  ;;  %3745 = vmatpush3.bf16.msra.mxu1 %v2624_v63  ;;  %v2021_v40 = vmax.f32 %v1971_v28, 0.0  ;;  %v2618_v63 = vld [vmem:[%s5355_s19 + $0x50] sm:$0xff]  ;;  %vm2335_vm4 = vcmp.lt.s32.totalorder %v4757_v20, 5 }
 0x640   : > { %v2024_v37 = vmax.f32 %v1982_v32, 0.0  ;;  %3746 = vmatprep.subr.bf16.mxu1 %v2625_v27  ;;  %v2629_v4 = vpack.c.bf16 %v2619_v21, %v2618_v63 }
 0x641   : > { %v2022_v41 = vmax.f32 %v1974_v34, 0.0 }
 0x642   : > { %v2036_v46 = vpack.c.bf16 %v2024_v37, %v2023_v35 }
 0x643   : > { %v2035_v47 = vpack.c.bf16 %v2022_v41, %v2021_v40  ;;  %3747 = vmatpush3.bf16.msra.mxu1 %v2625_v27  ;;  %v3682_v48 = vpop.f32.mrb[56].mxu0 }
 0x644   : > { %v1995_v50 = vadd.f32 %v3682_v48, %v4697_v1  ;;  %v1986_v51 = vpop.f32.mrb[57].mxu0  ;;  %3748 = vmatprep.subr.bf16.mxu1 %v2626_v38 }
 0x645   : > { %v1987_v53 = vadd.f32 %v4697_v1, %v1986_v51  ;;  %v3683_v54 = vpop.f32.mrb[58].mxu0  ;;  %3700 = vmatprep.mubr.msk.bf16.mxu1 %vm1107_vm1, %v2035_v47 }
 0x646   : > { %v1998_v58 = vadd.f32 %v3683_v54, %v4697_v1  ;;  %v1989_v60 = vpop.f32.mrb[59].mxu0  ;;  %3701 = vmatmul.mubr.msk.bf16.gmra.mrb[52].mxu1 %vm1107_vm1, %v2036_v46  ;;  %v2027_v25 = vmax.f32 %v1995_v50, 0.0 }
 0x647   : > { %v1990_v18 = vadd.f32 %v4697_v1, %v1989_v60  ;;  %3749 = vmatpush3.bf16.msra.mxu1 %v2626_v38  ;;  %v2025_v43 = vmax.f32 %v1987_v53, 0.0 }
 0x648   : > { %v2028_v22 = vmax.f32 %v1998_v58, 0.0  ;;  %3750 = vmatprep.subr.bf16.mxu1 %v2627_v52 }
 0x649   : > { %v2026_v45 = vmax.f32 %v1990_v18, 0.0 }
 0x64a   : > { %v2038_v5 = vpack.c.bf16 %v2028_v22, %v2027_v25 }
 0x64b   : > { %v2037_v62 = vpack.c.bf16 %v2026_v45, %v2025_v43  ;;  %3751 = vmatpush3.bf16.msra.mxu1 %v2627_v52  ;;  %v3686_v0 = vpop.f32.mrb[60].mxu0 }
 0x64c   : > { %v2011_v49 = vadd.f32 %v3686_v0, %v4697_v1  ;;  %v2002_v6 = vpop.f32.mrb[61].mxu0  ;;  %3752 = vmatprep.subr.bf16.mxu1 %v2628_v61 }
 0x64d   : > { %v2003_v7 = vadd.f32 %v4697_v1, %v2002_v6  ;;  %v3687_v9 = vpop.f32.mrb[62].mxu0  ;;  %3704 = vmatprep.mubr.msk.bf16.mxu1 %vm1107_vm1, %v2037_v62 }
 0x64e   : > { %v2014_v13 = vadd.f32 %v3687_v9, %v4697_v1  ;;  %v2005_v14 = vpop.f32.mrb[63].mxu0  ;;  %3705 = vmatmul.mubr.msk.bf16.gmra.mrb[56].mxu1 %vm1107_vm1, %v2038_v5  ;;  %v2031_v23 = vmax.f32 %v2011_v49, 0.0 }
 0x64f   : > { %v2006_v15 = vadd.f32 %v4697_v1, %v2005_v14  ;;  %3753 = vmatpush3.bf16.msra.mxu1 %v2628_v61  ;;  %v2029_v27 = vmax.f32 %v2003_v7, 0.0  ;;  %v2623_v1 = vld [vmem:[%s5355_s19 + $0x78] sm:$0xff] }
 0x650   : > { %v2032_v24 = vmax.f32 %v2014_v13, 0.0  ;;  %3754 = vmatprep.subr.bf16.mxu1 %v2629_v4  ;;  %v2631_v40 = vpack.c.bf16 %v2623_v1, %v2622_v31 }
 0x651   : > { %v2030_v28 = vmax.f32 %v2006_v15, 0.0  ;;  %v2574_v15 = vmul.f32 %v4498_v2, %v4498_v2 }
 0x652   : > { %v2040_v30 = vpack.c.bf16 %v2032_v24, %v2031_v23  ;;  %v2575_v23 = vmul.f32 %v4505_v8, %v4505_v8  ;;  %v4929_v24 = vpop.xlane.xlu1 %2582 }
 0x653   : > { %v2039_v32 = vpack.c.bf16 %v2030_v28, %v2029_v27  ;;  %3755 = vmatpush3.bf16.msra.mxu1 %v2629_v4  ;;  %v3730_v33 = vpop.f32.mrb[64].mxu0 }
 0x654   : > { %v4772_v34 = vadd.f32 %v3730_v33, %v4762_v29  ;;  %v2270_v35 = vpop.f32.mrb[65].mxu0  ;;  %3756 = vmatprep.subr.bf16.mxu1 %v2630_v26 }
 0x655   : > { %v4775_v37 = vadd.f32 %v4762_v29, %v2270_v35  ;;  %3708 = vmatprep.mubr.msk.bf16.mxu1 %vm1107_vm1, %v2039_v32  ;;  %v3731_v38 = vpop.f32.mrb[66].mxu0 }
 0x656   : > { %v4779_v41 = vadd.f32 %v3731_v38, %v4762_v29  ;;  %3709 = vmatmul.mubr.msk.bf16.gmra.mrb[60].mxu1 %vm1107_vm1, %v2040_v30  ;;  %v2273_v42 = vpop.f32.mrb[67].mxu0  ;;  %v4785_v44 = vsel %vm2335_vm4, %v4772_v34, -1e+30  ;;  %v4933_v27 = vpop.xlane.xlu1 %2578 }
 0x657   : > { %v4788_v46 = vadd.f32 %v4762_v29, %v2273_v42  ;;  %3757 = vmatpush3.bf16.msra.mxu1 %v2630_v26  ;;  %2356 = vmax.xlane.f32.xlu1 %v4785_v44  ;;  %v4794_v47 = vsel %vm2335_vm4, %v4775_v37, -1e+30  ;;  %v4931_v26 = vpop.xlane.xlu0 %2580 }
 0x658   : > { %3760 = vmatprep.mubr.bf16.mxu1 %v4454_v19  ;;  %2352 = vmax.xlane.f32.xlu0 %v4794_v47  ;;  %v4801_v48 = vsel %vm2335_vm4, %v4779_v41, -1e+30 }
 0x659   : > { %3758 = vmatprep.subr.bf16.mxu1 %v2631_v40  ;;  %v4807_v51 = vsel %vm2335_vm4, %v4788_v46, -1e+30 }
 0x65b   : > { %3759 = vmatpush3.bf16.msra.mxu1 %v2631_v40  ;;  %2358 = vmax.xlane.f32.xlu1 %v4801_v48  ;;  %v3734_v50 = vpop.f32.mrb[68].mxu0  ;;  %v4935_v28 = vpop.xlane.xlu0 %2576 }
 0x65c   : > { %v4810_v52 = vadd.f32 %v3734_v50, %v4762_v29  ;;  %v2286_v19 = vpop.f32.mrb[69].mxu0  ;;  %2354 = vmax.xlane.f32.xlu0 %v4807_v51 }
 0x65d   : > { %v3735_v53 = vpop.f32.mrb[70].mxu0  ;;  %v4823_v58 = vadd.f32 %v4762_v29, %v2286_v19 }
 0x65e   : > { %v4814_v54 = vadd.f32 %v3735_v53, %v4762_v29  ;;  %v2289_v55 = vpop.f32.mrb[71].mxu0  ;;  %3761 = vmatmul.mubr.bf16.vlgmr.msra.gmra.mrb[64].mxu1 %v4450_v16  ;;  %v4820_v57 = vsel %vm2335_vm4, %v4810_v52, -1e+30 }
 0x65f   : > { %3764 = vmatprep.mubr.bf16.mxu1 %v4472_v39  ;;  %v4827_v60 = vadd.f32 %v4762_v29, %v2289_v55  ;;  %v4839_v25 = vsel %vm2335_vm4, %v4823_v58, -1e+30  ;;  %v4939_v30 = vpop.xlane.xlu0 %2588 }
 0x660   : > { %2364 = vmax.xlane.f32.xlu0 %v4820_v57  ;;  %v4833_v18 = vsel %vm2335_vm4, %v4814_v54, -1e+30 }
 0x661   : > { %2366 = vmax.xlane.f32.xlu1 %v4833_v18  ;;  %v4848_v61 = vsel %vm2335_vm4, %v4827_v60, -1e+30 }
 0x663   : > { %v3738_v16 = vpop.f32.mrb[72].mxu0  ;;  %v4943_v2 = vpop.xlane.xlu0 %2584 }
 0x664   : > { %v4842_v39 = vadd.f32 %v3738_v16, %v4762_v29  ;;  %v2302_v22 = vpop.f32.mrb[73].mxu0  ;;  %2360 = vmax.xlane.f32.xlu0 %v4839_v25 }
 0x665   : > { %v3739_v43 = vpop.f32.mrb[74].mxu0  ;;  %2362 = vmax.xlane.f32.xlu1 %v4848_v61  ;;  %v4861_v5 = vadd.f32 %v4762_v29, %v2302_v22 }
 0x666   : > { %v4852_v45 = vadd.f32 %v3739_v43, %v4762_v29  ;;  %v2305_v63 = vpop.f32.mrb[75].mxu0  ;;  %3765 = vmatmul.mubr.bf16.gmra.mrb[68].mxu1 %v4469_v36  ;;  %v4858_v21 = vsel %vm2335_vm4, %v4842_v39, -1e+30 }
 0x667   : > { %3768 = vmatprep.mubr.bf16.mxu1 %v4490_v59  ;;  %v4865_v62 = vadd.f32 %v4762_v29, %v2305_v63  ;;  %v4877_v3 = vsel %vm2335_vm4, %v4861_v5, -1e+30  ;;  %v4947_v8 = vpop.xlane.xlu0 %2596 }
 0x668   : > { %2372 = vmax.xlane.f32.xlu0 %v4858_v21  ;;  %v4871_v0 = vsel %vm2335_vm4, %v4852_v45, -1e+30 }
 0x669   : > { %2374 = vmax.xlane.f32.xlu1 %v4871_v0  ;;  %v4886_v6 = vsel %vm2335_vm4, %v4865_v62, -1e+30 }
 0x66b   : > { %v3742_v36 = vpop.f32.mrb[76].mxu0  ;;  %v4951_v32 = vpop.xlane.xlu0 %2592 }
 0x66c   : > { %v4880_v59 = vadd.f32 %v3742_v36, %v4762_v29  ;;  %v2318_v49 = vpop.f32.mrb[77].mxu0  ;;  %2368 = vmax.xlane.f32.xlu0 %v4877_v3 }
 0x66d   : > { %v3743_v4 = vpop.f32.mrb[78].mxu0  ;;  %2370 = vmax.xlane.f32.xlu1 %v4886_v6  ;;  %v4899_v11 = vadd.f32 %v4762_v29, %v2318_v49 }
 0x66e   : > { %v4890_v7 = vadd.f32 %v3743_v4, %v4762_v29  ;;  %v2321_v9 = vpop.f32.mrb[79].mxu0  ;;  %3769 = vmatmul.mubr.bf16.gmra.mrb[72].mxu1 %v4487_v56  ;;  %v4896_v10 = vsel %vm2335_vm4, %v4880_v59, -1e+30 }
 0x66f   : > { %5400 = vst [vmem:[#allocation2_spill] sm:$0xff] %v4899_v11  ;;  %3772 = vmatprep.mubr.bf16.mxu1 %v4518_v17  ;;  %v4903_v13 = vadd.f32 %v4762_v29, %v2321_v9  ;;  %v4915_v56 = vsel %vm2335_vm4, %v4899_v11, -1e+30  ;;  %v4937_v29 = vpop.xlane.xlu1 %2590  ;;  %v4955_v35 = vpop.xlane.xlu0 %2600 }
 0x670   : > { %2380 = vmax.xlane.f32.xlu0 %v4896_v10  ;;  %v4909_v14 = vsel %vm2335_vm4, %v4890_v7, -1e+30 }
 0x671   : > { %5401 = vst [vmem:[#allocation3_spill] sm:$0xff] %v4903_v13  ;;  %2382 = vmax.xlane.f32.xlu1 %v4909_v14  ;;  %v4921_v17 = vsel %vm2335_vm4, %v4903_v13, -1e+30 }
 0x674   : > { %2376 = vmax.xlane.f32.xlu0 %v4915_v56 }
 0x675   : > { %2378 = vmax.xlane.f32.xlu1 %v4921_v17 }
 0x676   : > { %3773 = vmatmul.mubr.bf16.gmra.mrb[76].mxu1 %v4513_v12  ;;  %v4941_v12 = vpop.xlane.xlu1 %2586 }
 0x678   : > { %2604 = vadd.xlane.f32.xlu0 %v2574_v15 }
 0x679   : > { %2606 = vadd.xlane.f32.xlu1 %v2575_v23 }
 0x67a   : > { %v4945_v31 = vpop.xlane.xlu1 %2598 }
 0x67e   : > { %v4949_v1 = vpop.xlane.xlu1 %2594 }
 0x682   : > { %v4953_v33 = vpop.xlane.xlu1 %2602 }
 0x6e4   : > { %v4957_v38 = vpop.xlane.xlu1 %2356 }
 0x6e5   : > { %v2386_v40 = vsub.f32 %v4785_v44, %v4957_v38  ;;  %v4961_v42 = vpop.xlane.xlu0 %2352 }
 0x6e6   : > { %v2384_v50 = vsub.f32 %v4794_v47, %v4961_v42 }
 0x6e7   : > { %v2404_v19 = vmul.f32 1.442695, %v2386_v40 }
 0x6e8   : > { %v2400_v53 = vmul.f32 1.442695, %v2384_v50  ;;  %v4965_v55 = vpop.xlane.xlu1 %2358 }
 0x6e9   : > { %3784 = vpow2.f32 %v2404_v19  ;;  %v2387_v16 = vsub.f32 %v4801_v48, %v4965_v55  ;;  %v4969_v22 = vpop.xlane.xlu0 %2354 }
 0x6ea   : > { %v2385_v43 = vsub.f32 %v4807_v51, %v4969_v22  ;;  %3786 = vpow2.f32 %v2400_v53 }
 0x6eb   : > { %v2406_v44 = vmul.f32 1.442695, %v2387_v16 }
 0x6ec   : > { %v2402_v63 = vmul.f32 1.442695, %v2385_v43 }
 0x6ed   : > { %3788 = vpow2.f32 %v2406_v44  ;;  %v4973_v36 = vpop.xlane.xlu0 %2364 }
 0x6ee   : > { %v2390_v47 = vsub.f32 %v4820_v57, %v4973_v36  ;;  %v4977_v49 = vpop.xlane.xlu1 %2366  ;;  %3790 = vpow2.f32 %v2402_v63 }
 0x6ef   : > { %v2391_v48 = vsub.f32 %v4833_v18, %v4977_v49 }
 0x6f0   : > { %v2412_v4 = vmul.f32 1.442695, %v2390_v47 }
 0x6f1   : > { %v2414_v9 = vmul.f32 1.442695, %v2391_v48  ;;  %v4981_v15 = vpop.xlane.xlu0 %2360 }
 0x6f2   : > { %3792 = vpow2.f32 %v2412_v4  ;;  %v2388_v51 = vsub.f32 %v4839_v25, %v4981_v15  ;;  %v4985_v23 = vpop.xlane.xlu1 %2362 }
 0x6f3   : > { %v3785_v40 = vpop.eup %3784  ;;  %3794 = vpow2.f32 %v2414_v9  ;;  %v2389_v57 = vsub.f32 %v4848_v61, %v4985_v23 }
 0x6f4   : > { %v2408_v50 = vmul.f32 1.442695, %v2388_v51  ;;  %v2434_v19 = vsel %vm2335_vm4, %v3785_v40, 0.0  ;;  %v3787_v18 = vpop.eup %3786 }
 0x6f5   : > { %v2410_v53 = vmul.f32 1.442695, %v2389_v57  ;;  %2452 = vadd.xlane.f32.xlu0 %v2434_v19  ;;  %v4991_v16 = vpop.xlane.xlu0 %2372  ;;  %v2432_v48 = vsel %vm2335_vm4, %v3787_v18, 0.0 }
 0x6f6   : > { %3796 = vpow2.f32 %v2408_v50  ;;  %v2394_v25 = vsub.f32 %v4858_v21, %v4991_v16  ;;  %v4995_v43 = vpop.xlane.xlu1 %2374 }
 0x6f7   : > { %v3789_v44 = vpop.eup %3788  ;;  %3798 = vpow2.f32 %v2410_v53  ;;  %v2395_v61 = vsub.f32 %v4871_v0, %v4995_v43 }
 0x6f8   : > { %v2420_v63 = vmul.f32 1.442695, %v2394_v25  ;;  %v2435_v47 = vsel %vm2335_vm4, %v3789_v44, 0.0  ;;  %v3791_v4 = vpop.eup %3790 }
 0x6f9   : > { %v2422_v9 = vmul.f32 1.442695, %v2395_v61  ;;  %2454 = vadd.xlane.f32.xlu1 %v2435_v47  ;;  %2448 = vadd.xlane.f32.xlu0 %v2432_v48  ;;  %v5003_v51 = vpop.xlane.xlu0 %2368  ;;  %v2433_v19 = vsel %vm2335_vm4, %v3791_v4, 0.0 }
 0x6fa   : > { %3800 = vpow2.f32 %v2420_v63  ;;  %v2392_v21 = vsub.f32 %v4877_v3, %v5003_v51  ;;  %v5007_v40 = vpop.xlane.xlu1 %2370 }
 0x6fb   : > { %3802 = vpow2.f32 %v2422_v9  ;;  %v2393_v0 = vsub.f32 %v4886_v6, %v5007_v40 }
 0x6fc   : > { %v3793_v57 = vpop.eup %3792  ;;  %v2416_v50 = vmul.f32 1.442695, %v2392_v21 }
 0x6fd   : > { %v3795_v18 = vpop.eup %3794  ;;  %v2418_v53 = vmul.f32 1.442695, %v2393_v0  ;;  %2450 = vadd.xlane.f32.xlu1 %v2433_v19  ;;  %v5013_v25 = vpop.xlane.xlu0 %2380  ;;  %v2438_v44 = vsel %vm2335_vm4, %v3793_v57, 0.0 }
 0x6fe   : > { %3804 = vpow2.f32 %v2416_v50  ;;  %v2398_v3 = vsub.f32 %v4896_v10, %v5013_v25  ;;  %v5019_v61 = vpop.xlane.xlu1 %2382  ;;  %2460 = vadd.xlane.f32.xlu0 %v2438_v44  ;;  %v2439_v48 = vsel %vm2335_vm4, %v3795_v18, 0.0 }
 0x6ff   : > { %3806 = vpow2.f32 %v2418_v53  ;;  %v2399_v6 = vsub.f32 %v4909_v14, %v5019_v61 }
 0x700   : > { %v3797_v63 = vpop.eup %3796  ;;  %v2428_v47 = vmul.f32 1.442695, %v2398_v3 }
 0x701   : > { %v3799_v4 = vpop.eup %3798  ;;  %v2430_v9 = vmul.f32 1.442695, %v2399_v6  ;;  %2462 = vadd.xlane.f32.xlu1 %v2439_v48  ;;  %v5025_v21 = vpop.xlane.xlu0 %2376  ;;  %v2436_v10 = vsel %vm2335_vm4, %v3797_v63, 0.0 }
 0x702   : > { %3808 = vpow2.f32 %v2428_v47  ;;  %v2396_v0 = vsub.f32 %v4915_v56, %v5025_v21  ;;  %v5031_v57 = vpop.xlane.xlu1 %2378  ;;  %2456 = vadd.xlane.f32.xlu0 %v2436_v10  ;;  %v2437_v18 = vsel %vm2335_vm4, %v3799_v4, 0.0  ;;  %v3376_v10 = vld [vmem:[%s5352_s16] ss:$0 sm:$0xff] }
 0x703   : > { %5402 = vst [vmem:[#allocation4_spill] sm:$0xff] %v5031_v57  ;;  %3810 = vpow2.f32 %v2430_v9  ;;  %v2397_v14 = vsub.f32 %v4921_v17, %v5031_v57 }
 0x704   : > { %v3801_v50 = vpop.eup %3800  ;;  %v2424_v19 = vmul.f32 1.442695, %v2396_v0 }
 0x705   : > { %v3803_v53 = vpop.eup %3802  ;;  %v2426_v44 = vmul.f32 1.442695, %v2397_v14  ;;  %2458 = vadd.xlane.f32.xlu1 %v2437_v18  ;;  %v2442_v3 = vsel %vm2335_vm4, %v3801_v50, 0.0 }
 0x706   : > { %3812 = vpow2.f32 %v2424_v19  ;;  %2468 = vadd.xlane.f32.xlu0 %v2442_v3  ;;  %v2443_v6 = vsel %vm2335_vm4, %v3803_v53, 0.0 }
 0x707   : > { %3814 = vpow2.f32 %v2426_v44 }
 0x708   : > { %v3805_v56 = vpop.eup %3804 }
 0x709   : > { %v3807_v17 = vpop.eup %3806  ;;  %2470 = vadd.xlane.f32.xlu1 %v2443_v6  ;;  %v2440_v63 = vsel %vm2335_vm4, %v3805_v56, 0.0 }
 0x70a   : > { %2464 = vadd.xlane.f32.xlu0 %v2440_v63  ;;  %v2441_v48 = vsel %vm2335_vm4, %v3807_v17, 0.0 }
 0x70c   : > { %v3809_v47 = vpop.eup %3808 }
 0x70d   : > { %v3811_v4 = vpop.eup %3810  ;;  %2466 = vadd.xlane.f32.xlu1 %v2441_v48  ;;  %v2446_v9 = vsel %vm2335_vm4, %v3809_v47, 0.0 }
 0x70e   : > { %2476 = vadd.xlane.f32.xlu0 %v2446_v9  ;;  %v2447_v14 = vsel %vm2335_vm4, %v3811_v4, 0.0 }
 0x710   : > { %v3813_v0 = vpop.eup %3812 }
 0x711   : > { %v3815_v50 = vpop.eup %3814  ;;  %2478 = vadd.xlane.f32.xlu1 %v2447_v14  ;;  %v3698_v19 = vpop.f32.mrb[48].mxu1  ;;  %v2444_v18 = vsel %vm2335_vm4, %v3813_v0, 0.0 }
 0x712   : > { %v2127_v53 = vadd.f32 %v3698_v19, %v3376_v10  ;;  %2472 = vadd.xlane.f32.xlu0 %v2444_v18  ;;  %v2118_v44 = vpop.f32.mrb[49].mxu1  ;;  %v2445_v63 = vsel %vm2335_vm4, %v3815_v50, 0.0 }
 0x713   : > { %v2119_v3 = vadd.f32 %v3376_v10, %v2118_v44  ;;  %v3699_v56 = vpop.f32.mrb[50].mxu1 }
 0x714   : > { %2930 = vst.msk [vmem:[%s5056_s10 + $0x10] sm:$0xff] %vm942_vm0, %v2127_v53  ;;  %v2130_v6 = vadd.f32 %v3699_v56, %v3376_v10  ;;  %v2121_v17 = vpop.f32.mrb[51].mxu1 }
 0x715   : > { %2928 = vst.msk [vmem:[%s5056_s10] sm:$0xff] %vm942_vm0, %v2119_v3  ;;  %v2122_v47 = vadd.f32 %v3376_v10, %v2121_v17  ;;  %2474 = vadd.xlane.f32.xlu1 %v2445_v63 }
 0x716   : > { %2931 = vst.msk [vmem:[%s5056_s10 + $0x18] sm:$0xff] %vm942_vm0, %v2130_v6 }
 0x717   : > { %2929 = vst.msk [vmem:[%s5056_s10 + $0x8] sm:$0xff] %vm942_vm0, %v2122_v47 }
 0x719   : > { %v3702_v48 = vpop.f32.mrb[52].mxu1 }
 0x71a   : > { %v2143_v4 = vadd.f32 %v3702_v48, %v3376_v10  ;;  %v2134_v9 = vpop.f32.mrb[53].mxu1 }
 0x71b   : > { %v2135_v0 = vadd.f32 %v3376_v10, %v2134_v9  ;;  %v3703_v14 = vpop.f32.mrb[54].mxu1 }
 0x71c   : > { %2934 = vst.msk [vmem:[%s5056_s10 + $0x30] sm:$0xff] %vm942_vm0, %v2143_v4  ;;  %v2146_v50 = vadd.f32 %v3703_v14, %v3376_v10  ;;  %v2137_v19 = vpop.f32.mrb[55].mxu1 }
 0x71d   : > { %2932 = vst.msk [vmem:[%s5056_s10 + $0x20] sm:$0xff] %vm942_vm0, %v2135_v0  ;;  %v2138_v18 = vadd.f32 %v3376_v10, %v2137_v19 }
 0x71e   : > { %2935 = vst.msk [vmem:[%s5056_s10 + $0x38] sm:$0xff] %vm942_vm0, %v2146_v50 }
 0x71f   : > { %2933 = vst.msk [vmem:[%s5056_s10 + $0x28] sm:$0xff] %vm942_vm0, %v2138_v18 }
 0x721   : > { %v3706_v53 = vpop.f32.mrb[56].mxu1 }
 0x722   : > { %v2159_v44 = vadd.f32 %v3706_v53, %v3376_v10  ;;  %v2150_v3 = vpop.f32.mrb[57].mxu1  ;;  %v5095_v53 = vld [vmem:[%s5356_s20] ss:$0 sm:$0xff] }
 0x723   : > { %v2151_v56 = vadd.f32 %v3376_v10, %v2150_v3  ;;  %v3707_v6 = vpop.f32.mrb[58].mxu1  ;;  %v2738_v3 = vadd.f32 %v5095_v53, %v4931_v26 }
 0x724   : > { %2938 = vst.msk [vmem:[%s5056_s10 + $0x50] sm:$0xff] %vm942_vm0, %v2159_v44  ;;  %v2162_v17 = vadd.f32 %v3707_v6, %v3376_v10  ;;  %v2153_v63 = vpop.f32.mrb[59].mxu1 }
 0x725   : > { %2936 = vst.msk [vmem:[%s5056_s10 + $0x40] sm:$0xff] %vm942_vm0, %v2151_v56  ;;  %v2154_v47 = vadd.f32 %v3376_v10, %v2153_v63 }
 0x726   : > { %2939 = vst.msk [vmem:[%s5056_s10 + $0x58] sm:$0xff] %vm942_vm0, %v2162_v17  ;;  %v2736_v17 = vadd.f32 %v5095_v53, %v4935_v28 }
 0x727   : > { %2937 = vst.msk [vmem:[%s5056_s10 + $0x48] sm:$0xff] %vm942_vm0, %v2154_v47  ;;  %v2739_v47 = vadd.f32 %v5095_v53, %v4929_v24  ;;  %v2742_v24 = vadd.f32 %v5095_v53, %v4939_v30 }
 0x729   : > { %v3710_v48 = vpop.f32.mrb[60].mxu1 }
 0x72a   : > { %v2175_v4 = vadd.f32 %v3710_v48, %v3376_v10  ;;  %v2166_v9 = vpop.f32.mrb[61].mxu1 }
 0x72b   : > { %v2167_v0 = vadd.f32 %v3376_v10, %v2166_v9  ;;  %v3711_v14 = vpop.f32.mrb[62].mxu1 }
 0x72c   : > { %2942 = vst.msk [vmem:[%s5056_s10 + $0x70] sm:$0xff] %vm942_vm0, %v2175_v4  ;;  %v2178_v50 = vadd.f32 %v3711_v14, %v3376_v10  ;;  %v2169_v19 = vpop.f32.mrb[63].mxu1 }
 0x72d   : > { %2940 = vst.msk [vmem:[%s5056_s10 + $0x60] sm:$0xff] %vm942_vm0, %v2167_v0  ;;  %v2170_v18 = vadd.f32 %v3376_v10, %v2169_v19  ;;  %v2737_v0 = vadd.f32 %v5095_v53, %v4933_v27  ;;  %v2740_v27 = vadd.f32 %v5095_v53, %v4943_v2 }
 0x72e   : > { %2943 = vst.msk [vmem:[%s5056_s10 + $0x78] sm:$0xff] %vm942_vm0, %v2178_v50 }
 0x72f   : > { %2941 = vst.msk [vmem:[%s5056_s10 + $0x68] sm:$0xff] %vm942_vm0, %v2170_v18 }
 0x731   : > { %v3762_v44 = vpop.f32.mrb[64].mxu1 }
 0x732   : > { %v2754_v56 = vmul.f32 2.0, %v3762_v44  ;;  %v2666_v6 = vpop.f32.mrb[65].mxu1 }
 0x733   : > { %v2752_v63 = vmul.f32 2.0, %v2666_v6  ;;  %v3763_v10 = vpop.f32.mrb[66].mxu1 }
 0x734   : > { %v2770_v48 = vsub.f32 %v2738_v3, %v2754_v56  ;;  %v2755_v4 = vmul.f32 2.0, %v3763_v10  ;;  %v2669_v9 = vpop.f32.mrb[67].mxu1 }
 0x735   : > { %v2768_v14 = vsub.f32 %v2736_v17, %v2752_v63  ;;  %v2753_v50 = vmul.f32 2.0, %v2669_v9 }
 0x736   : > { %v2786_v19 = vmax.f32 %v2770_v48, 0.0  ;;  %v2771_v26 = vsub.f32 %v2739_v47, %v2755_v4  ;;  %v2743_v48 = vadd.f32 %v5095_v53, %v4937_v29  ;;  %v2746_v29 = vadd.f32 %v5095_v53, %v4947_v8 }
 0x737   : > { %v2784_v18 = vmax.f32 %v2768_v14, 0.0  ;;  %v2769_v44 = vsub.f32 %v2737_v0, %v2753_v50 }
 0x738   : > { %v2802_v13 = vadd.f32 1.0, %v2786_v19  ;;  %v2787_v57 = vmax.f32 %v2771_v26, 0.0 }
 0x739   : > { %v2800_v28 = vadd.f32 1.0, %v2784_v18  ;;  %v2785_v6 = vmax.f32 %v2769_v44, 0.0  ;;  %v3766_v11 = vpop.f32.mrb[68].mxu1 }
 0x73a   : > { %3816 = vrcp.f32 %v2802_v13  ;;  %v2803_v3 = vadd.f32 1.0, %v2787_v57  ;;  %v2758_v56 = vmul.f32 2.0, %v3766_v11  ;;  %v2682_v10 = vpop.f32.mrb[69].mxu1  ;;  %v2741_v13 = vadd.f32 %v5095_v53, %v4941_v12 }
 0x73b   : > { %3818 = vrcp.f32 %v2800_v28  ;;  %v2801_v17 = vadd.f32 1.0, %v2785_v6  ;;  %v2756_v63 = vmul.f32 2.0, %v2682_v10  ;;  %v3767_v47 = vpop.f32.mrb[70].mxu1  ;;  %v2744_v12 = vadd.f32 %v5095_v53, %v4951_v32 }
 0x73c   : > { %3820 = vrcp.f32 %v2803_v3  ;;  %v2774_v4 = vsub.f32 %v2742_v24, %v2758_v56  ;;  %v2759_v9 = vmul.f32 2.0, %v3767_v47  ;;  %v2685_v0 = vpop.f32.mrb[71].mxu1 }
 0x73d   : > { %v2772_v30 = vsub.f32 %v2740_v27, %v2756_v63  ;;  %v2757_v11 = vmul.f32 2.0, %v2685_v0  ;;  %3822 = vrcp.f32 %v2801_v17  ;;  %v2747_v63 = vadd.f32 %v5095_v53, %v4945_v31  ;;  %v2605_v31 = vpop.xlane.xlu0 %2604 }
 0x73e   : > { %v2790_v57 = vmax.f32 %v2774_v4, 0.0  ;;  %v2775_v14 = vsub.f32 %v2743_v48, %v2759_v9  ;;  %v2745_v9 = vadd.f32 %v5095_v53, %v4949_v1 }
 0x73f   : > { %v2788_v2 = vmax.f32 %v2772_v30, 0.0  ;;  %v2773_v50 = vsub.f32 %v2741_v13, %v2757_v11 }
 0x740   : > { %v2806_v19 = vadd.f32 1.0, %v2790_v57  ;;  %v2791_v26 = vmax.f32 %v2775_v14, 0.0 }
 0x741   : > { %v2804_v18 = vadd.f32 1.0, %v2788_v2  ;;  %v2789_v44 = vmax.f32 %v2773_v50, 0.0  ;;  %v3770_v28 = vpop.f32.mrb[72].mxu1 }
 0x742   : > { %3824 = vrcp.f32 %v2806_v19  ;;  %v2807_v6 = vadd.f32 1.0, %v2791_v26  ;;  %v2762_v24 = vmul.f32 2.0, %v3770_v28  ;;  %v2698_v3 = vpop.f32.mrb[73].mxu1 }
 0x743   : > { %3826 = vrcp.f32 %v2804_v18  ;;  %v2805_v56 = vadd.f32 1.0, %v2789_v44  ;;  %v2760_v10 = vmul.f32 2.0, %v2698_v3  ;;  %v3771_v27 = vpop.f32.mrb[74].mxu1  ;;  %v2748_v18 = vadd.f32 %v5095_v53, %v4955_v35  ;;  %v2607_v44 = vpop.xlane.xlu1 %2606 }
 0x744   : > { %v3817_v17 = vpop.eup %3816  ;;  %3828 = vrcp.f32 %v2807_v6  ;;  %v2778_v47 = vsub.f32 %v2746_v29, %v2762_v24  ;;  %v2763_v48 = vmul.f32 2.0, %v3771_v27  ;;  %v2701_v4 = vpop.f32.mrb[75].mxu1  ;;  %v2750_v3 = vadd.f32 %v5095_v53, %v2605_v31 }
 0x745   : > { %v3819_v8 = vpop.eup %3818  ;;  %v2776_v0 = vsub.f32 %v2744_v12, %v2760_v10  ;;  %v2761_v13 = vmul.f32 2.0, %v2701_v4  ;;  %v5125_v32 = vsel %vm2335_vm4, %v3817_v17, 0.0  ;;  %3830 = vrcp.f32 %v2805_v56 }
 0x746   : > { %v3821_v30 = vpop.eup %3820  ;;  %v2794_v11 = vmax.f32 %v2778_v47, 0.0  ;;  %v2779_v57 = vsub.f32 %v2747_v63, %v2763_v48  ;;  %2868 = vadd.xlane.f32.xlu0 %v5125_v32  ;;  %v5137_v24 = vsel %vm2335_vm4, %v3819_v8, 0.0  ;;  %v2751_v48 = vadd.f32 %v5095_v53, %v2607_v44 }
 0x747   : > { %v2792_v14 = vmax.f32 %v2776_v0, 0.0  ;;  %v2777_v2 = vsub.f32 %v2745_v9, %v2761_v13  ;;  %v5130_v50 = vsel %vm2335_vm4, %v3821_v30, 0.0  ;;  %v3823_v1 = vpop.eup %3822  ;;  %v2749_v13 = vadd.f32 %v5095_v53, %v4953_v33 }
 0x748   : > { %v2810_v19 = vadd.f32 1.0, %v2794_v11  ;;  %v2795_v26 = vmax.f32 %v2779_v57, 0.0  ;;  %2870 = vadd.xlane.f32.xlu1 %v5130_v50  ;;  %v5143_v63 = vsel %vm2335_vm4, %v3823_v1, 0.0 }
 0x749   : > { %v2808_v28 = vadd.f32 1.0, %v2792_v14  ;;  %v2793_v29 = vmax.f32 %v2777_v2, 0.0  ;;  %v3774_v6 = vpop.f32.mrb[76].mxu1 }
 0x74a   : > { %3832 = vrcp.f32 %v2810_v19  ;;  %v2811_v12 = vadd.f32 1.0, %v2795_v26  ;;  %v2766_v56 = vmul.f32 2.0, %v3774_v6  ;;  %2864 = vadd.xlane.f32.xlu0 %v5137_v24  ;;  %v2714_v10 = vpop.f32.mrb[77].mxu1 }
 0x74b   : > { %3834 = vrcp.f32 %v2808_v28  ;;  %v2809_v27 = vadd.f32 1.0, %v2793_v29  ;;  %v2764_v17 = vmul.f32 2.0, %v2714_v10  ;;  %v3775_v35 = vpop.f32.mrb[78].mxu1 }
 0x74c   : > { %v3825_v47 = vpop.eup %3824  ;;  %3836 = vrcp.f32 %v2811_v12  ;;  %v2782_v4 = vsub.f32 %v2750_v3, %v2766_v56  ;;  %v2767_v8 = vmul.f32 2.0, %v3775_v35  ;;  %2866 = vadd.xlane.f32.xlu1 %v5143_v63  ;;  %v2717_v9 = vpop.f32.mrb[79].mxu1 }
 0x74d   : > { %v3827_v0 = vpop.eup %3826  ;;  %v2780_v30 = vsub.f32 %v2748_v18, %v2764_v17  ;;  %v2765_v11 = vmul.f32 2.0, %v2717_v9  ;;  %v5151_v57 = vsel %vm2335_vm4, %v3825_v47, 0.0  ;;  %3838 = vrcp.f32 %v2809_v27 }
 0x74e   : > { %v3829_v31 = vpop.eup %3828  ;;  %v2798_v14 = vmax.f32 %v2782_v4, 0.0  ;;  %v2783_v2 = vsub.f32 %v2751_v48, %v2767_v8  ;;  %2876 = vadd.xlane.f32.xlu0 %v5151_v57  ;;  %v5161_v29 = vsel %vm2335_vm4, %v3827_v0, 0.0 }
 0x74f   : > { %v2796_v1 = vmax.f32 %v2780_v30, 0.0  ;;  %v2781_v19 = vsub.f32 %v2749_v13, %v2765_v11  ;;  %v5156_v26 = vsel %vm2335_vm4, %v3829_v31, 0.0  ;;  %v3831_v44 = vpop.eup %3830 }
 0x750   : > { %v2814_v33 = vadd.f32 1.0, %v2798_v14  ;;  %v2799_v53 = vmax.f32 %v2783_v2, 0.0  ;;  %2878 = vadd.xlane.f32.xlu1 %v5156_v26  ;;  %v5166_v12 = vsel %vm2335_vm4, %v3831_v44, 0.0 }
 0x751   : > { %v2812_v18 = vadd.f32 1.0, %v2796_v1  ;;  %v2797_v28 = vmax.f32 %v2781_v19, 0.0 }
 0x752   : > { %2872 = vadd.xlane.f32.xlu0 %v5161_v29  ;;  %v2815_v6 = vadd.f32 1.0, %v2799_v53 }
 0x753   : > { %3840 = vrcp.f32 %v2812_v18  ;;  %v2813_v3 = vadd.f32 1.0, %v2797_v28 }
 0x754   : > { %v3833_v56 = vpop.eup %3832  ;;  %3842 = vrcp.f32 %v2814_v33  ;;  %2874 = vadd.xlane.f32.xlu1 %v5166_v12 }
 0x755   : > { %v3835_v10 = vpop.eup %3834  ;;  %3844 = vrcp.f32 %v2813_v3  ;;  %v5171_v27 = vsel %vm2335_vm4, %v3833_v56, 0.0 }
 0x756   : > { %v3837_v17 = vpop.eup %3836  ;;  %2884 = vadd.xlane.f32.xlu0 %v5171_v27  ;;  %3846 = vrcp.f32 %v2815_v6  ;;  %v5181_v48 = vsel %vm2335_vm4, %v3835_v10, 0.0 }
 0x757   : > { %v5176_v35 = vsel %vm2335_vm4, %v3837_v17, 0.0  ;;  %v3839_v47 = vpop.eup %3838 }
 0x758   : > { %2886 = vadd.xlane.f32.xlu1 %v5176_v35  ;;  %v5186_v4 = vsel %vm2335_vm4, %v3839_v47, 0.0 }
 0x75a   : > { %2880 = vadd.xlane.f32.xlu0 %v5181_v48 }
 0x75c   : > { %2882 = vadd.xlane.f32.xlu1 %v5186_v4 }
 0x75d   : > { %v3841_v8 = vpop.eup %3840 }
 0x75e   : > { %v3843_v9 = vpop.eup %3842  ;;  %v5191_v0 = vsel %vm2335_vm4, %v3841_v8, 0.0 }
 0x75f   : > { %v3845_v13 = vpop.eup %3844  ;;  %2888 = vadd.xlane.f32.xlu0 %v5191_v0  ;;  %v5201_v31 = vsel %vm2335_vm4, %v3843_v9, 0.0 }
 0x760   : > { %v5196_v30 = vsel %vm2335_vm4, %v3845_v13, 0.0  ;;  %v3847_v11 = vpop.eup %3846 }
 0x761   : > { %2890 = vadd.xlane.f32.xlu1 %v5196_v30  ;;  %v5206_v14 = vsel %vm2335_vm4, %v3847_v11, 0.0 }
 0x763   : > { %2892 = vadd.xlane.f32.xlu0 %v5201_v31 }
 0x765   : > { %2894 = vadd.xlane.f32.xlu1 %v5206_v14 }
 0x782   : > { %v2453_v2 = vpop.xlane.xlu0 %2452 }
 0x783   : > { %3848 = vlog2.f32 %v2453_v2 }
 0x786   : > { %v2455_v1 = vpop.xlane.xlu1 %2454  ;;  %v2449_v19 = vpop.xlane.xlu0 %2448 }
 0x787   : > { %3850 = vlog2.f32 %v2455_v1 }
 0x788   : > { %3852 = vlog2.f32 %v2449_v19 }
 0x78a   : > { %v2451_v44 = vpop.xlane.xlu1 %2450 }
 0x78b   : > { %3854 = vlog2.f32 %v2451_v44  ;;  %v2461_v33 = vpop.xlane.xlu0 %2460 }
 0x78c   : > { %3856 = vlog2.f32 %v2461_v33 }
 0x78d   : > { %v3849_v53 = vpop.eup %3848 }
 0x78e   : > { %v2485_v18 = vmul.f32 0.6931472, %v3849_v53  ;;  %v2463_v28 = vpop.xlane.xlu1 %2462 }
 0x78f   : > { %3858 = vlog2.f32 %v2463_v28  ;;  %v2457_v6 = vpop.xlane.xlu0 %2456 }
 0x790   : > { %v2514_v3 = vadd.f32 %v2485_v18, %v4957_v38  ;;  %3860 = vlog2.f32 %v2457_v6 }
 0x791   : > { %v3851_v56 = vpop.eup %3850 }
 0x792   : > { %v3853_v10 = vpop.eup %3852  ;;  %v2530_v17 = vsub.f32 %v4772_v34, %v2514_v3  ;;  %v2487_v47 = vmul.f32 0.6931472, %v3851_v56  ;;  %v2459_v8 = vpop.xlane.xlu1 %2458 }
 0x793   : > { %v2481_v9 = vmul.f32 0.6931472, %v3853_v10  ;;  %3862 = vlog2.f32 %v2459_v8  ;;  %v2469_v13 = vpop.xlane.xlu0 %2468 }
 0x794   : > { %v2546_v11 = vsel %vm2335_vm4, %v2530_v17, 0.0  ;;  %v2515_v38 = vadd.f32 %v2487_v47, %v4965_v55  ;;  %3864 = vlog2.f32 %v2469_v13 }
 0x795   : > { %v3855_v2 = vpop.eup %3854  ;;  %3026 = vst [vmem:[%s5214_s1 + $0x10] sm:$0xff] %v2546_v11  ;;  %v2512_v1 = vadd.f32 %v2481_v9, %v4961_v42 }
 0x796   : > { %v3857_v19 = vpop.eup %3856  ;;  %v2531_v34 = vsub.f32 %v4779_v41, %v2515_v38  ;;  %v2483_v44 = vmul.f32 0.6931472, %v3855_v2  ;;  %v2471_v33 = vpop.xlane.xlu1 %2470 }
 0x797   : > { %v2528_v53 = vsub.f32 %v4775_v37, %v2512_v1  ;;  %v2493_v18 = vmul.f32 0.6931472, %v3857_v19  ;;  %3866 = vlog2.f32 %v2471_v33  ;;  %v2465_v28 = vpop.xlane.xlu0 %2464 }
 0x798   : > { %v2547_v55 = vsel %vm2335_vm4, %v2531_v34, 0.0  ;;  %v2513_v6 = vadd.f32 %v2483_v44, %v4969_v22  ;;  %3868 = vlog2.f32 %v2465_v28 }
 0x799   : > { %v3859_v3 = vpop.eup %3858  ;;  %3027 = vst [vmem:[%s5214_s1 + $0x18] sm:$0xff] %v2547_v55  ;;  %v2544_v42 = vsel %vm2335_vm4, %v2528_v53, 0.0  ;;  %v2518_v41 = vadd.f32 %v2493_v18, %v4973_v36 }
 0x79a   : > { %v3861_v56 = vpop.eup %3860  ;;  %3024 = vst [vmem:[%s5214_s1] sm:$0xff] %v2544_v42  ;;  %v2529_v37 = vsub.f32 %v4788_v46, %v2513_v6  ;;  %v2495_v10 = vmul.f32 0.6931472, %v3859_v3  ;;  %v2467_v17 = vpop.xlane.xlu1 %2466 }
 0x79b   : > { %v2534_v47 = vsub.f32 %v4810_v52, %v2518_v41  ;;  %v2489_v8 = vmul.f32 0.6931472, %v3861_v56  ;;  %3870 = vlog2.f32 %v2467_v17  ;;  %v2477_v22 = vpop.xlane.xlu0 %2476 }
 0x79c   : > { %v2545_v9 = vsel %vm2335_vm4, %v2529_v37, 0.0  ;;  %v2519_v13 = vadd.f32 %v2495_v10, %v4977_v49  ;;  %3872 = vlog2.f32 %v2477_v22 }
 0x79d   : > { %v3863_v11 = vpop.eup %3862  ;;  %3025 = vst [vmem:[%s5214_s1 + $0x8] sm:$0xff] %v2545_v9  ;;  %v2550_v36 = vsel %vm2335_vm4, %v2534_v47, 0.0  ;;  %v2516_v46 = vadd.f32 %v2489_v8, %v4981_v15 }
 0x79e   : > { %v3865_v38 = vpop.eup %3864  ;;  %3030 = vst [vmem:[%s5214_s1 + $0x30] sm:$0xff] %v2550_v36  ;;  %v2535_v52 = vsub.f32 %v4814_v54, %v2519_v13  ;;  %v2491_v2 = vmul.f32 0.6931472, %v3863_v11  ;;  %v2479_v1 = vpop.xlane.xlu1 %2478 }
 0x79f   : > { %v2532_v19 = vsub.f32 %v4823_v58, %v2516_v46  ;;  %v2501_v34 = vmul.f32 0.6931472, %v3865_v38  ;;  %3874 = vlog2.f32 %v2479_v1  ;;  %v2473_v49 = vpop.xlane.xlu0 %2472 }
 0x7a0   : > { %v2551_v44 = vsel %vm2335_vm4, %v2535_v52, 0.0  ;;  %v2517_v33 = vadd.f32 %v2491_v2, %v4985_v23  ;;  %3876 = vlog2.f32 %v2473_v49  ;;  %v5405_v49 = vld [vmem:[#allocation3_spill] sm:$0xff] }
 0x7a1   : > { %v3867_v15 = vpop.eup %3866  ;;  %3031 = vst [vmem:[%s5214_s1 + $0x38] sm:$0xff] %v2551_v44  ;;  %v2548_v53 = vsel %vm2335_vm4, %v2532_v19, 0.0  ;;  %v2522_v54 = vadd.f32 %v2501_v34, %v4991_v16  ;;  %v5404_v19 = vld [vmem:[#allocation4_spill] sm:$0xff] }
 0x7a2   : > { %v3869_v18 = vpop.eup %3868  ;;  %3028 = vst [vmem:[%s5214_s1 + $0x20] sm:$0xff] %v2548_v53  ;;  %v2533_v58 = vsub.f32 %v4827_v60, %v2517_v33  ;;  %v2503_v28 = vmul.f32 0.6931472, %v3867_v15  ;;  %v2475_v55 = vpop.xlane.xlu1 %2474 }
 0x7a3   : > { %v2538_v6 = vsub.f32 %v4842_v39, %v2522_v54  ;;  %v2497_v3 = vmul.f32 0.6931472, %v3869_v18  ;;  %3878 = vlog2.f32 %v2475_v55 }
 0x7a4   : > { %v2549_v23 = vsel %vm2335_vm4, %v2533_v58, 0.0  ;;  %v2523_v42 = vadd.f32 %v2503_v28, %v4995_v43 }
 0x7a5   : > { %v3871_v41 = vpop.eup %3870  ;;  %3029 = vst [vmem:[%s5214_s1 + $0x28] sm:$0xff] %v2549_v23  ;;  %v2554_v16 = vsel %vm2335_vm4, %v2538_v6, 0.0  ;;  %v2520_v60 = vadd.f32 %v2497_v3, %v5003_v51 }
 0x7a6   : > { %v3873_v56 = vpop.eup %3872  ;;  %3034 = vst [vmem:[%s5214_s1 + $0x50] sm:$0xff] %v2554_v16  ;;  %v2539_v39 = vsub.f32 %v4852_v45, %v2523_v42  ;;  %v2499_v37 = vmul.f32 0.6931472, %v3871_v41 }
 0x7a7   : > { %v2536_v10 = vsub.f32 %v4861_v5, %v2520_v60  ;;  %v2509_v17 = vmul.f32 0.6931472, %v3873_v56 }
 0x7a8   : > { %v2555_v43 = vsel %vm2335_vm4, %v2539_v39, 0.0  ;;  %v2521_v47 = vadd.f32 %v2499_v37, %v5007_v40 }
 0x7a9   : > { %v3875_v8 = vpop.eup %3874  ;;  %3035 = vst [vmem:[%s5214_s1 + $0x58] sm:$0xff] %v2555_v43  ;;  %v2552_v51 = vsel %vm2335_vm4, %v2536_v10, 0.0  ;;  %v2526_v22 = vadd.f32 %v2509_v17, %v5013_v25 }
 0x7aa   : > { %v3877_v9 = vpop.eup %3876  ;;  %3032 = vst [vmem:[%s5214_s1 + $0x40] sm:$0xff] %v2552_v51  ;;  %v2537_v45 = vsub.f32 %v4865_v62, %v2521_v47  ;;  %v2511_v5 = vmul.f32 0.6931472, %v3875_v8 }
 0x7ab   : > { %v2542_v13 = vsub.f32 %v4880_v59, %v2526_v22  ;;  %v2505_v11 = vmul.f32 0.6931472, %v3877_v9  ;;  %v5403_v59 = vld [vmem:[#allocation2_spill] sm:$0xff] }
 0x7ac   : > { %v2553_v40 = vsel %vm2335_vm4, %v2537_v45, 0.0  ;;  %v2527_v36 = vadd.f32 %v2511_v5, %v5019_v61 }
 0x7ad   : > { %v3879_v46 = vpop.eup %3878  ;;  %3033 = vst [vmem:[%s5214_s1 + $0x48] sm:$0xff] %v2553_v40  ;;  %v2558_v25 = vsel %vm2335_vm4, %v2542_v13, 0.0  ;;  %v2524_v38 = vadd.f32 %v2505_v11, %v5025_v21 }
 0x7ae   : > { %3038 = vst [vmem:[%s5214_s1 + $0x70] sm:$0xff] %v2558_v25  ;;  %v2543_v62 = vsub.f32 %v4890_v7, %v2527_v36  ;;  %v2507_v52 = vmul.f32 0.6931472, %v3879_v46 }
 0x7af   : > { %v2540_v2 = vsub.f32 %v5403_v59, %v2524_v38 }
 0x7b0   : > { %v2559_v1 = vsel %vm2335_vm4, %v2543_v62, 0.0  ;;  %v2525_v34 = vadd.f32 %v2507_v52, %v5404_v19 }
 0x7b1   : > { %3039 = vst [vmem:[%s5214_s1 + $0x78] sm:$0xff] %v2559_v1  ;;  %v2556_v61 = vsel %vm2335_vm4, %v2540_v2, 0.0 }
 0x7b2   : > { %3036 = vst [vmem:[%s5214_s1 + $0x60] sm:$0xff] %v2556_v61  ;;  %v2541_v44 = vsub.f32 %v5405_v49, %v2525_v34 }
 0x7b4   : > { %v2557_v21 = vsel %vm2335_vm4, %v2541_v44, 0.0 }
 0x7b5   : > { %3037 = vst [vmem:[%s5214_s1 + $0x68] sm:$0xff] %v2557_v21 }
 0x7d3   : > { %v2869_v7 = vpop.xlane.xlu0 %2868 }
 0x7d4   : > { %3880 = vrcp.f32 %v2869_v7 }
 0x7d5   : > { %v2871_v33 = vpop.xlane.xlu1 %2870 }
 0x7d6   : > { %3882 = vrcp.f32 %v2871_v33 }
 0x7d7   : > { %v2865_v15 = vpop.xlane.xlu0 %2864 }
 0x7d8   : > { %3884 = vrcp.f32 %v2865_v15 }
 0x7d9   : > { %v2867_v53 = vpop.xlane.xlu1 %2866 }
 0x7da   : > { %3886 = vrcp.f32 %v2867_v53 }
 0x7db   : > { %v2877_v54 = vpop.xlane.xlu0 %2876 }
 0x7dc   : > { %3888 = vrcp.f32 %v2877_v54 }
 0x7dd   : > { %v2879_v18 = vpop.xlane.xlu1 %2878 }
 0x7de   : > { %v3881_v58 = vpop.eup %3880  ;;  %3890 = vrcp.f32 %v2879_v18 }
 0x7df   : > { %v2901_v20 = vmul.f32 %v3881_v58, %v5125_v32  ;;  %v2873_v28 = vpop.xlane.xlu0 %2872 }
 0x7e0   : > { %v3883_v55 = vpop.eup %3882  ;;  %3892 = vrcp.f32 %v2873_v28 }
 0x7e1   : > { %3010 = vst [vmem:[%s5299_s4 + $0x10] sm:$0xff] %v2901_v20  ;;  %v2903_v6 = vmul.f32 %v3883_v55, %v5130_v50  ;;  %v2875_v3 = vpop.xlane.xlu1 %2874 }
 0x7e2   : > { %v3885_v23 = vpop.eup %3884  ;;  %3894 = vrcp.f32 %v2875_v3 }
 0x7e3   : > { %3011 = vst [vmem:[%s5299_s4 + $0x18] sm:$0xff] %v2903_v6  ;;  %v2897_v42 = vmul.f32 %v3885_v23, %v5137_v24  ;;  %v2885_v41 = vpop.xlane.xlu0 %2884 }
 0x7e4   : > { %v3887_v16 = vpop.eup %3886  ;;  %3896 = vrcp.f32 %v2885_v41 }
 0x7e5   : > { %3008 = vst [vmem:[%s5299_s4] sm:$0xff] %v2897_v42  ;;  %v2899_v32 = vmul.f32 %v3887_v16, %v5143_v63  ;;  %v2887_v60 = vpop.xlane.xlu1 %2886 }
 0x7e6   : > { %v3889_v56 = vpop.eup %3888  ;;  %3898 = vrcp.f32 %v2887_v60 }
 0x7e7   : > { %3009 = vst [vmem:[%s5299_s4 + $0x8] sm:$0xff] %v2899_v32  ;;  %v2909_v50 = vmul.f32 %v3889_v56, %v5151_v57  ;;  %v2881_v39 = vpop.xlane.xlu0 %2880 }
 0x7e8   : > { %v3891_v37 = vpop.eup %3890  ;;  %3900 = vrcp.f32 %v2881_v39 }
 0x7e9   : > { %3014 = vst [vmem:[%s5299_s4 + $0x30] sm:$0xff] %v2909_v50  ;;  %v2911_v24 = vmul.f32 %v3891_v37, %v5156_v26  ;;  %v2883_v10 = vpop.xlane.xlu1 %2882 }
 0x7ea   : > { %v3893_v17 = vpop.eup %3892  ;;  %3902 = vrcp.f32 %v2883_v10 }
 0x7eb   : > { %3015 = vst [vmem:[%s5299_s4 + $0x38] sm:$0xff] %v2911_v24  ;;  %v2905_v63 = vmul.f32 %v3893_v17, %v5161_v29 }
 0x7ec   : > { %v3895_v43 = vpop.eup %3894  ;;  %v2889_v47 = vpop.xlane.xlu0 %2888 }
 0x7ed   : > { %3012 = vst [vmem:[%s5299_s4 + $0x20] sm:$0xff] %v2905_v63  ;;  %v2907_v57 = vmul.f32 %v3895_v43, %v5166_v12  ;;  %3904 = vrcp.f32 %v2889_v47 }
 0x7ee   : > { %v3897_v8 = vpop.eup %3896  ;;  %v2891_v51 = vpop.xlane.xlu1 %2890 }
 0x7ef   : > { %3013 = vst [vmem:[%s5299_s4 + $0x28] sm:$0xff] %v2907_v57  ;;  %v2917_v26 = vmul.f32 %v3897_v8, %v5171_v27  ;;  %3906 = vrcp.f32 %v2891_v51 }
 0x7f0   : > { %v3899_v22 = vpop.eup %3898  ;;  %v2893_v9 = vpop.xlane.xlu0 %2892 }
 0x7f1   : > { %3018 = vst [vmem:[%s5299_s4 + $0x50] sm:$0xff] %v2917_v26  ;;  %v2919_v29 = vmul.f32 %v3899_v22, %v5176_v35  ;;  %3908 = vrcp.f32 %v2893_v9 }
 0x7f2   : > { %v3901_v45 = vpop.eup %3900  ;;  %v2895_v5 = vpop.xlane.xlu1 %2894 }
 0x7f3   : > { %3019 = vst [vmem:[%s5299_s4 + $0x58] sm:$0xff] %v2919_v29  ;;  %v2913_v12 = vmul.f32 %v3901_v45, %v5181_v48  ;;  %3910 = vrcp.f32 %v2895_v5 }
 0x7f4   : > { %v3903_v13 = vpop.eup %3902 }
 0x7f5   : > { %3016 = vst [vmem:[%s5299_s4 + $0x40] sm:$0xff] %v2913_v12  ;;  %v2915_v27 = vmul.f32 %v3903_v13, %v5186_v4 }
 0x7f7   : > { %v3905_v11 = vpop.eup %3904  ;;  %3017 = vst [vmem:[%s5299_s4 + $0x48] sm:$0xff] %v2915_v27 }
 0x7f8   : > { %v2921_v40 = vmul.f32 %v3905_v11, %v5191_v0 }
 0x7f9   : > { %v3907_v36 = vpop.eup %3906 }
 0x7fa   : > { %3020 = vst [vmem:[%s5299_s4 + $0x60] sm:$0xff] %v2921_v40  ;;  %v2923_v35 = vmul.f32 %v3907_v36, %v5196_v30 }
 0x7fb   : > { %v3909_v46 = vpop.eup %3908 }
 0x7fc   : > { %3021 = vst [vmem:[%s5299_s4 + $0x68] sm:$0xff] %v2923_v35  ;;  %v2925_v25 = vmul.f32 %v3909_v46, %v5201_v31 }
 0x7fd   : > { %v3911_v38 = vpop.eup %3910 }
 0x7fe   : > { %3022 = vst [vmem:[%s5299_s4 + $0x70] sm:$0xff] %v2925_v25  ;;  %v2927_v48 = vmul.f32 %v3911_v38, %v5206_v14 }
 0x800   : > { %3023 = vst [vmem:[%s5299_s4 + $0x78] sm:$0xff] %v2927_v48 }
 0x801 PF: > { %s38_s7 = sadd.s32 1, %s3918_s7  }
 0x802   : > { %p35_p4 = scmp.ge.s32.totalorder %s38_s7, 4  }
 0x804   :  { %37 = sbr.rel (!%p35_p4) target bundleno = 13 (0xd), region = 206 }

// kernel: tsdcn_forward.19
= control target key start
LH: loop header
LB: loop body
LE: loop exit
PB: predicated region body
PF: predicated region fallthrough
CT: control target
= control target key end

     0   :  { %s908_s9 = smov 0   ;;  %s910_s10 = smov 0   ;;  %s1066_s0 = inlined_call_operand.vmem [shape: bf16[256,256], index: 0, kind: input, shape index: {}]   ;;  %s1067_s1 = inlined_call_operand.vmem [shape: f32[256,128], index: 1, kind: input, shape index: {}]   ;;  %s1068_s2 = inlined_call_operand.vmem [shape: f32[256,128], index: 2, kind: output, shape index: {}]  }
   0x1   :  { %s912_s11 = smov 0   ;;  %s914_s12 = smov 0  }
   0x2   :  { %s916_s13 = smov 0   ;;  %s918_s14 = smov 0  }
   0x3   :  { %s920_s15 = smov 0  }
   0x4 LB: > { %s21_s16 = sadd.s32 1, %s882_s13  ;;  %s24_s17 = sadd.s32 1, %s886_s14  ;;  %s890_s15 = sphi %s920_s15, %s12_s15   ;;  %s886_s14 = sphi %s918_s14, %s1074_s14   ;;  %s882_s13 = sphi %s916_s13, %s1073_s13   ;;  %s878_s12 = sphi %s914_s12, %s1072_s12   ;;  %s874_s11 = sphi %s912_s11, %s1071_s11   ;;  %s870_s10 = sphi %s910_s10, %s1070_s10   ;;  %s866_s9 = sphi %s908_s9, %s1069_s9  }
   0x5   : > { %p22_p0 = scmp.ge.s32.totalorder %s21_s16, 2  ;;  %p40_p1 = scmp.ne.s32.totalorder %s870_s10, %s866_s9 }
   0x6   : > { %p41_p2 = scmp.eq.s32.totalorder %s890_s15, 0  ;;  %s33_s21 = sadd.s32 1, %s870_s10 }
   0x7   : > { %s1076_s16 = smov (%p22_p0, %s21_s16), 0  ;;  %s1078_s17 = smov (!%p22_p0, %s24_s17), %s886_s14 }
   0x8   : > { %p42_p3 = por %p41_p2, %p40_p1  ;;  %p26_p4 = scmp.ge.s32.totalorder %s1078_s17, 2 }
   0x9   : > { %s29_s18 = ssub.s32 %s882_s13, %s1076_s16  ;;  %p683_p6 = scmp.ge.s32.totalorder %s890_s15, 4 }
   0xa   : > { %s1080_s17 = smov (%p26_p4, %s1078_s17), 0 }
   0xb   : > { %s28_s19 = ssub.s32 %s886_s14, %s1080_s17  ;;  %118 = sbr.rel (%p683_p6) target bundleno = 34 (0x22), region = 16 }
   0xc   : > { %s30_s20 = sor.u32 %s29_s18, %s28_s19 }
   0xd   : > { %p31_p5 = scmp.eq.s32.totalorder %s30_s20, 0 }
   0xf   : > { %s959_s22 = scalar_select %p31_p5, %s870_s10, %s33_s21  }
  0x12   : > { %121 = sbr.rel (!%p42_p3) target bundleno = 34 (0x22), region = 20  ;;  %s123_s23 = sand.u32 (%p42_p3), 1, %s870_s10  }
  0x13   : > { %s706_s24 = sshll.u32 (%p42_p3), %s886_s14, 5  ;;  %s684_s25 = sshll.u32 (%p42_p3), %s123_s23, 6 }
  0x14   : > { %s128_s26 = sadd.s32 (%p42_p3), %s882_s13, %s706_s24  ;;  %s125_s3 = scalar_lea.vmem (%p42_p3), [#allocation3], %s684_s25 }
  0x15   : > { %s687_s27 = sshll.u32 (%p42_p3), %s128_s26, 2 }
  0x16   : > { %s968_s30 = scalar_lea.vmem (%p42_p3), %s1066_s0, %s687_s27 }
  0x17   : > { %v146_v0 = vld [vmem:[%s968_s30] sm:$0xf] (%p42_p3)  ;;  %v148_v1 = vld [vmem:[%s968_s30 + $0x8] sm:$0xf] (%p42_p3)  ;;  %v150_v2 = vld [vmem:[%s968_s30 + $0x10] sm:$0xf] (%p42_p3) }
  0x18   : > { %147 = vst [vmem:[%s125_s3] sm:$0xf] (%p42_p3), %v146_v0  ;;  %149 = vst [vmem:[%s125_s3 + $0x4] sm:$0xf] (%p42_p3), %v148_v1  ;;  %v152_v3 = vld [vmem:[%s968_s30 + $0x18] sm:$0xf] (%p42_p3) }
  0x19   : > { %151 = vst [vmem:[%s125_s3 + $0x8] sm:$0xf] %v150_v2  ;;  %v154_v4 = vld [vmem:[%s968_s30 + $0x20] sm:$0xf]  ;;  %v156_v5 = vld [vmem:[%s968_s30 + $0x28] sm:$0xf] }
  0x1a   : > { %153 = vst [vmem:[%s125_s3 + $0xc] sm:$0xf] %v152_v3  ;;  %155 = vst [vmem:[%s125_s3 + $0x10] sm:$0xf] %v154_v4  ;;  %v158_v6 = vld [vmem:[%s968_s30 + $0x30] sm:$0xf] }
  0x1b   : > { %157 = vst [vmem:[%s125_s3 + $0x14] sm:$0xf] %v156_v5  ;;  %v160_v7 = vld [vmem:[%s968_s30 + $0x38] sm:$0xf]  ;;  %v162_v8 = vld [vmem:[%s968_s30 + $0x40] sm:$0xf] }
  0x1c   : > { %159 = vst [vmem:[%s125_s3 + $0x18] sm:$0xf] %v158_v6  ;;  %161 = vst [vmem:[%s125_s3 + $0x1c] sm:$0xf] %v160_v7  ;;  %v164_v9 = vld [vmem:[%s968_s30 + $0x48] sm:$0xf] }
  0x1d   : > { %163 = vst [vmem:[%s125_s3 + $0x20] sm:$0xf] %v162_v8  ;;  %v166_v10 = vld [vmem:[%s968_s30 + $0x50] sm:$0xf]  ;;  %v168_v11 = vld [vmem:[%s968_s30 + $0x58] sm:$0xf] }
  0x1e   : > { %165 = vst [vmem:[%s125_s3 + $0x24] sm:$0xf] %v164_v9  ;;  %167 = vst [vmem:[%s125_s3 + $0x28] sm:$0xf] %v166_v10  ;;  %v170_v12 = vld [vmem:[%s968_s30 + $0x60] sm:$0xf] }
  0x1f   : > { %169 = vst [vmem:[%s125_s3 + $0x2c] sm:$0xf] %v168_v11  ;;  %v172_v13 = vld [vmem:[%s968_s30 + $0x68] sm:$0xf]  ;;  %v174_v14 = vld [vmem:[%s968_s30 + $0x70] sm:$0xf] }
  0x20   : > { %171 = vst [vmem:[%s125_s3 + $0x30] sm:$0xf] %v170_v12  ;;  %173 = vst [vmem:[%s125_s3 + $0x34] sm:$0xf] %v172_v13  ;;  %v176_v15 = vld [vmem:[%s968_s30 + $0x78] sm:$0xf] }
  0x21   : > { %175 = vst [vmem:[%s125_s3 + $0x38] sm:$0xf] %v174_v14  ;;  %177 = vst [vmem:[%s125_s3 + $0x3c] sm:$0xf] %v176_v15 }
  0x22 PF: > { %p688_p7 = scmp.ge.s32.totalorder %s890_s15, 1  ;;  %p240_p8 = scmp.lt.s32.totalorder %s890_s15, 5 }
  0x24   : > { %p241_p9 = pnand %p688_p7, %p240_p8 }
  0x25   : > { %s247_s4 = sand.u32 (!%p241_p9), 1, %s866_s9   ;;  %s690_s5 = sshll.u32 (!%p241_p9), %s874_s11, 4 }
  0x26   : > { %244 = sbr.rel (%p241_p9) target bundleno = 327 (0x147), region = 65  ;;  %s689_s6 = sshll.u32 (!%p241_p9), %s247_s4, 6 }
  0x27   : > { %p275_p10 = scmp.lt.s32.totalorder (!%p241_p9), %s690_s5, 31  ;;  %s692_s7 = sshll.u32 (!%p241_p9), %s878_s12, 4 }
  0x28   : > { %p281_p11 = scmp.lt.s32.totalorder (!%p241_p9), %s692_s7, 31  ;;  %s1001_s9 = scalar_lea.vmem (!%p241_p9), [#allocation3], %s689_s6 }
  0x29   : > { %p694_p12 = scmp.ne.s32.totalorder (!%p241_p9), %s874_s11, 0 }
  0x2d   : > { %s1082_s5 = smov (!%p275_p10, %s690_s5), 31  ;;  %s1084_s7 = smov (!%p281_p11, %s692_s7), 31 }
  0x2e   : > { %s691_s8 = sshll.u32 %s1082_s5, 3  ;;  %s693_s21 = sshll.u32 %s1084_s7, 3  ;;  %v892_v16 = vmov (!%p694_p12), 0.0  }
  0x2f   : > { %s994_s20 = scalar_lea.vmem %s1067_s1, %s691_s8  ;;  %s999_s25 = scalar_lea.vmem %s1068_s2, %s693_s21  ;;  %291 = vst [vmem:[#allocation2] sm:$0xff] (!%p694_p12), %v892_v16  ;;  %292 = vst [vmem:[#allocation2 + $0x8] sm:$0xff] (!%p694_p12), %v892_v16 }
  0x30   : > { %290 = sbr.rel (%p694_p12) target bundleno = 55 (0x37), region = 73  ;;  %293 = vst [vmem:[#allocation2 + $0x10] sm:$0xff] (!%p694_p12), %v892_v16  ;;  %294 = vst [vmem:[#allocation2 + $0x18] sm:$0xff] (!%p694_p12), %v892_v16 }
  0x31   : > { %295 = vst [vmem:[#allocation2 + $0x20] sm:$0xff] (!%p694_p12), %v892_v16  ;;  %296 = vst [vmem:[#allocation2 + $0x28] sm:$0xff] (!%p694_p12), %v892_v16 }
  0x32   : > { %297 = vst [vmem:[#allocation2 + $0x30] sm:$0xff] (!%p694_p12), %v892_v16  ;;  %298 = vst [vmem:[#allocation2 + $0x38] sm:$0xff] (!%p694_p12), %v892_v16 }
  0x33   : > { %299 = vst [vmem:[#allocation2 + $0x40] sm:$0xff] (!%p694_p12), %v892_v16  ;;  %300 = vst [vmem:[#allocation2 + $0x48] sm:$0xff] (!%p694_p12), %v892_v16 }
  0x34   : > { %301 = vst [vmem:[#allocation2 + $0x50] sm:$0xff] (!%p694_p12), %v892_v16  ;;  %302 = vst [vmem:[#allocation2 + $0x58] sm:$0xff] (!%p694_p12), %v892_v16 }
  0x35   : > { %303 = vst [vmem:[#allocation2 + $0x60] sm:$0xff] (!%p694_p12), %v892_v16  ;;  %304 = vst [vmem:[#allocation2 + $0x68] sm:$0xff] (!%p694_p12), %v892_v16 }
  0x36   : > { %305 = vst [vmem:[#allocation2 + $0x70] sm:$0xff] (!%p694_p12), %v892_v16  ;;  %306 = vst [vmem:[#allocation2 + $0x78] sm:$0xff] (!%p694_p12), %v892_v16 }
  0x37 PF: > { %v339_v17 = vld [vmem:[%s994_s20] sm:$0xff]  ;;  %v340_v18 = vld [vmem:[%s994_s20 + $0x8] sm:$0xff]  ;;  %v341_v19 = vld [vmem:[%s994_s20 + $0x10] sm:$0xff]  ;;  %p703_p13 = scmp.ne.s32.totalorder %s874_s11, 1 }
  0x38   : > { %v355_v20 = vpack.c.bf16 %v340_v18, %v339_v17  ;;  %v342_v21 = vld [vmem:[%s994_s20 + $0x18] sm:$0xff]  ;;  %v343_v23 = vld [vmem:[%s994_s20 + $0x20] sm:$0xff]  ;;  %v344_v24 = vld [vmem:[%s994_s20 + $0x28] sm:$0xff] }
  0x39   : > { %v356_v22 = vpack.c.bf16 %v342_v21, %v341_v19  ;;  %v345_v25 = vld [vmem:[%s994_s20 + $0x30] sm:$0xff]  ;;  %v357_v26 = vpack.c.bf16 %v344_v24, %v343_v23  ;;  %v346_v27 = vld [vmem:[%s994_s20 + $0x38] sm:$0xff]  ;;  %v828_v28 = vld [vmem:[%s1001_s9] sm:$0xff]  }
  0x3a   : > { %723 = vmatprep.subr.bf16.mxu0 %v355_v20  ;;  %755 = vmatprep.subr.bf16.mxu1 %v355_v20  ;;  %v829_v29 = vld [vmem:[%s1001_s9 + $0x20] sm:$0xff]   ;;  %v358_v30 = vpack.c.bf16 %v346_v27, %v345_v25  ;;  %v348_v32 = vld [vmem:[%s994_s20 + $0x48] sm:$0xff]  ;;  %v349_v34 = vld [vmem:[%s994_s20 + $0x50] sm:$0xff] }
  0x3b   : > { %724 = vmatpush3.bf16.msra.mxu0 %v355_v20  ;;  %763 = vmatpush3.bf16.msra.mxu1 %v355_v20  ;;  %v347_v31 = vld [vmem:[%s994_s20 + $0x40] sm:$0xff]  ;;  %v350_v35 = vld [vmem:[%s994_s20 + $0x58] sm:$0xff]  ;;  %v352_v38 = vld [vmem:[%s994_s20 + $0x68] sm:$0xff] }
  0x3c   : > { %725 = vmatprep.subr.bf16.mxu0 %v356_v22  ;;  %756 = vmatprep.subr.bf16.mxu1 %v356_v22  ;;  %v359_v33 = vpack.c.bf16 %v348_v32, %v347_v31  ;;  %v360_v36 = vpack.c.bf16 %v350_v35, %v349_v34  ;;  %v351_v37 = vld [vmem:[%s994_s20 + $0x60] sm:$0xff]  ;;  %v353_v40 = vld [vmem:[%s994_s20 + $0x70] sm:$0xff]  ;;  %v354_v41 = vld [vmem:[%s994_s20 + $0x78] sm:$0xff] }
  0x3d   : > { %739 = vmatprep.mubr.bf16.mxu0 %v828_v28  ;;  %747 = vmatprep.mubr.bf16.mxu1 %v829_v29  ;;  %v361_v39 = vpack.c.bf16 %v352_v38, %v351_v37  ;;  %v362_v42 = vpack.c.bf16 %v354_v41, %v353_v40  ;;  %v830_v43 = vld [vmem:[%s1001_s9 + $0x8] sm:$0xff]   ;;  %v832_v45 = vld [vmem:[%s1001_s9 + $0x10] sm:$0xff]   ;;  %v834_v47 = vld [vmem:[%s1001_s9 + $0x18] sm:$0xff]  }
  0x3e   : > { %v831_v44 = vld [vmem:[%s1001_s9 + $0x28] sm:$0xff]   ;;  %v833_v46 = vld [vmem:[%s1001_s9 + $0x30] sm:$0xff]   ;;  %v835_v48 = vld [vmem:[%s1001_s9 + $0x38] sm:$0xff]  }
  0x3f   : > { %726 = vmatpush3.bf16.msra.mxu0 %v356_v22  ;;  %764 = vmatpush3.bf16.msra.mxu1 %v356_v22  ;;  %v309_v49 = vld [vmem:[#allocation2 + $0x10] sm:$0xff]  ;;  %v307_v51 = vld [vmem:[#allocation2] sm:$0xff]  ;;  %v310_v55 = vld [vmem:[#allocation2 + $0x18] sm:$0xff] }
  0x40   : > { %727 = vmatprep.subr.bf16.mxu0 %v357_v26  ;;  %757 = vmatprep.subr.bf16.mxu1 %v357_v26  ;;  %v317_v50 = vld [vmem:[#allocation2 + $0x50] sm:$0xff]  ;;  %v315_v52 = vld [vmem:[#allocation2 + $0x40] sm:$0xff]  ;;  %v318_v56 = vld [vmem:[#allocation2 + $0x58] sm:$0xff] }
  0x41   : > { %v308_v61 = vld [vmem:[#allocation2 + $0x8] sm:$0xff]  ;;  %v313_v9 = vld [vmem:[#allocation2 + $0x30] sm:$0xff]  ;;  %v311_v11 = vld [vmem:[#allocation2 + $0x20] sm:$0xff] }
  0x42   : > { %v316_v62 = vld [vmem:[#allocation2 + $0x48] sm:$0xff]  ;;  %v321_v10 = vld [vmem:[#allocation2 + $0x70] sm:$0xff]  ;;  %v319_v12 = vld [vmem:[#allocation2 + $0x60] sm:$0xff] }
  0x43   : > { %728 = vmatpush3.bf16.msra.mxu0 %v357_v26  ;;  %765 = vmatpush3.bf16.msra.mxu1 %v357_v26  ;;  %v314_v15 = vld [vmem:[#allocation2 + $0x38] sm:$0xff]  ;;  %v312_v21 = vld [vmem:[#allocation2 + $0x28] sm:$0xff] }
  0x44   : > { %729 = vmatprep.subr.bf16.mxu0 %v358_v30  ;;  %758 = vmatprep.subr.bf16.mxu1 %v358_v30  ;;  %v322_v16 = vld [vmem:[#allocation2 + $0x78] sm:$0xff]  ;;  %v320_v22 = vld [vmem:[#allocation2 + $0x68] sm:$0xff] }
  0x47   : > { %730 = vmatpush3.bf16.msra.mxu0 %v358_v30  ;;  %766 = vmatpush3.bf16.msra.mxu1 %v358_v30 }
  0x48   : > { %731 = vmatprep.subr.bf16.mxu0 %v359_v33  ;;  %759 = vmatprep.subr.bf16.mxu1 %v359_v33 }
  0x4b   : > { %732 = vmatpush3.bf16.msra.mxu0 %v359_v33  ;;  %767 = vmatpush3.bf16.msra.mxu1 %v359_v33 }
  0x4c   : > { %733 = vmatprep.subr.bf16.mxu0 %v360_v36  ;;  %760 = vmatprep.subr.bf16.mxu1 %v360_v36 }
  0x4f   : > { %734 = vmatpush3.bf16.msra.mxu0 %v360_v36  ;;  %768 = vmatpush3.bf16.msra.mxu1 %v360_v36 }
  0x50   : > { %735 = vmatprep.subr.bf16.mxu0 %v361_v39  ;;  %761 = vmatprep.subr.bf16.mxu1 %v361_v39 }
  0x53   : > { %736 = vmatpush3.bf16.msra.mxu0 %v361_v39  ;;  %769 = vmatpush3.bf16.msra.mxu1 %v361_v39 }
  0x54   : > { %737 = vmatprep.subr.bf16.mxu0 %v362_v42  ;;  %762 = vmatprep.subr.bf16.mxu1 %v362_v42 }
  0x57   : > { %738 = vmatpush3.bf16.msra.mxu0 %v362_v42  ;;  %770 = vmatpush3.bf16.msra.mxu1 %v362_v42 }
  0x5a   : > { %740 = vmatmul.mubr.bf16.vlgmr.msra.gmra.mrb[0].mxu0 %v830_v43  ;;  %748 = vmatmul.mubr.bf16.vlgmr.msra.gmra.mrb[0].mxu1 %v831_v44 }
  0x5b   : > { %743 = vmatprep.mubr.bf16.mxu0 %v832_v45  ;;  %751 = vmatprep.mubr.bf16.mxu1 %v833_v46 }
  0x62   : > { %744 = vmatmul.mubr.bf16.gmra.mrb[4].mxu0 %v834_v47  ;;  %752 = vmatmul.mubr.bf16.gmra.mrb[4].mxu1 %v835_v48 }
 0x12d   : > { %v741_v53 = vpop.f32.mrb[0].mxu0  ;;  %v749_v54 = vpop.f32.mrb[0].mxu1 }
 0x12e   : > { %v510_v57 = vadd.f32 %v741_v53, %v309_v49  ;;  %v518_v58 = vadd.f32 %v749_v54, %v317_v50  ;;  %v445_v59 = vpop.f32.mrb[1].mxu0  ;;  %v477_v60 = vpop.f32.mrb[1].mxu1 }
 0x12f   : > { %v508_v63 = vadd.f32 %v445_v59, %v307_v51  ;;  %v516_v0 = vadd.f32 %v477_v60, %v315_v52  ;;  %v742_v1 = vpop.f32.mrb[2].mxu0  ;;  %v750_v2 = vpop.f32.mrb[2].mxu1 }
 0x130   : > { %526 = vst [vmem:[#allocation2 + $0x10] sm:$0xff] %v510_v57  ;;  %534 = vst [vmem:[#allocation2 + $0x50] sm:$0xff] %v518_v58  ;;  %v511_v3 = vadd.f32 %v742_v1, %v310_v55  ;;  %v519_v4 = vadd.f32 %v750_v2, %v318_v56  ;;  %v448_v5 = vpop.f32.mrb[3].mxu0  ;;  %v480_v6 = vpop.f32.mrb[3].mxu1 }
 0x131   : > { %524 = vst [vmem:[#allocation2] sm:$0xff] %v508_v63  ;;  %532 = vst [vmem:[#allocation2 + $0x40] sm:$0xff] %v516_v0  ;;  %v509_v7 = vadd.f32 %v448_v5, %v308_v61  ;;  %v517_v8 = vadd.f32 %v480_v6, %v316_v62 }
 0x132   : > { %527 = vst [vmem:[#allocation2 + $0x18] sm:$0xff] %v511_v3  ;;  %535 = vst [vmem:[#allocation2 + $0x58] sm:$0xff] %v519_v4 }
 0x133   : > { %525 = vst [vmem:[#allocation2 + $0x8] sm:$0xff] %v509_v7  ;;  %533 = vst [vmem:[#allocation2 + $0x48] sm:$0xff] %v517_v8 }
 0x135   : > { %v745_v13 = vpop.f32.mrb[4].mxu0  ;;  %v753_v14 = vpop.f32.mrb[4].mxu1  ;;  %543 = sbr.rel (%p703_p13) target bundleno = 327 (0x147), region = 77 }
 0x136   : > { %v514_v17 = vadd.f32 %v745_v13, %v313_v9  ;;  %v522_v18 = vadd.f32 %v753_v14, %v321_v10  ;;  %v461_v19 = vpop.f32.mrb[5].mxu0  ;;  %v493_v20 = vpop.f32.mrb[5].mxu1 }
 0x137   : > { %v512_v23 = vadd.f32 %v461_v19, %v311_v11  ;;  %v520_v24 = vadd.f32 %v493_v20, %v319_v12  ;;  %v746_v25 = vpop.f32.mrb[6].mxu0  ;;  %v754_v26 = vpop.f32.mrb[6].mxu1  ;;  %v546_v35 = vld [vmem:[#allocation2 + $0x10] sm:$0xff] (!%p703_p13) }
 0x138   : > { %530 = vst [vmem:[#allocation2 + $0x30] sm:$0xff] %v514_v17  ;;  %538 = vst [vmem:[#allocation2 + $0x70] sm:$0xff] %v522_v18  ;;  %v515_v27 = vadd.f32 %v746_v25, %v314_v15  ;;  %v523_v28 = vadd.f32 %v754_v26, %v322_v16  ;;  %v464_v29 = vpop.f32.mrb[7].mxu0  ;;  %v496_v30 = vpop.f32.mrb[7].mxu1  ;;  %v544_v33 = vld [vmem:[#allocation2] sm:$0xff] (!%p703_p13)  ;;  %v562_v38 = vmax.f32 (!%p703_p13), %v546_v35, 0.0 }
 0x139   : > { %528 = vst [vmem:[#allocation2 + $0x20] sm:$0xff] %v512_v23  ;;  %536 = vst [vmem:[#allocation2 + $0x60] sm:$0xff] %v520_v24  ;;  %v513_v31 = vadd.f32 %v464_v29, %v312_v21  ;;  %v521_v32 = vadd.f32 %v496_v30, %v320_v22  ;;  %v560_v36 = vmax.f32 (!%p703_p13), %v544_v33, 0.0  ;;  %v547_v39 = vld [vmem:[#allocation2 + $0x18] sm:$0xff] (!%p703_p13)  ;;  %v552_v47 = vld [vmem:[#allocation2 + $0x40] sm:$0xff] (!%p703_p13) }
 0x13a   : > { %531 = vst [vmem:[#allocation2 + $0x38] sm:$0xff] %v515_v27  ;;  %539 = vst [vmem:[#allocation2 + $0x78] sm:$0xff] %v523_v28  ;;  %v545_v34 = vld [vmem:[#allocation2 + $0x8] sm:$0xff] (!%p703_p13)  ;;  %v563_v42 = vmax.f32 (!%p703_p13), %v547_v39, 0.0  ;;  %v568_v50 = vmax.f32 (!%p703_p13), %v552_v47, 0.0  ;;  %v554_v52 = vld [vmem:[#allocation2 + $0x50] sm:$0xff] (!%p703_p13) }
 0x13b   : > { %529 = vst [vmem:[#allocation2 + $0x28] sm:$0xff] %v513_v31  ;;  %537 = vst [vmem:[#allocation2 + $0x68] sm:$0xff] %v521_v32  ;;  %v561_v37 = vmax.f32 (!%p703_p13), %v545_v34, 0.0  ;;  %v553_v51 = vld [vmem:[#allocation2 + $0x48] sm:$0xff] (!%p703_p13)  ;;  %v555_v53 = vld [vmem:[#allocation2 + $0x58] sm:$0xff] (!%p703_p13)  ;;  %v570_v55 = vmax.f32 (!%p703_p13), %v554_v52, 0.0 }
 0x13c   : > { %576 = vst [vmem:[%s999_s25] sm:$0xff] %v560_v36  ;;  %578 = vst [vmem:[%s999_s25 + $0x10] sm:$0xff] %v562_v38  ;;  %v569_v54 = vmax.f32 %v553_v51, 0.0  ;;  %v571_v56 = vmax.f32 %v555_v53, 0.0 }
 0x13d   : > { %577 = vst [vmem:[%s999_s25 + $0x8] sm:$0xff] %v561_v37  ;;  %579 = vst [vmem:[%s999_s25 + $0x18] sm:$0xff] %v563_v42 }
 0x13e   : > { %584 = vst [vmem:[%s999_s25 + $0x40] sm:$0xff] %v568_v50  ;;  %585 = vst [vmem:[%s999_s25 + $0x48] sm:$0xff] %v569_v54 }
 0x13f   : > { %v550_v45 = vld [vmem:[#allocation2 + $0x30] sm:$0xff]  ;;  %586 = vst [vmem:[%s999_s25 + $0x50] sm:$0xff] %v570_v55  ;;  %587 = vst [vmem:[%s999_s25 + $0x58] sm:$0xff] %v571_v56 }
 0x140   : > { %v548_v40 = vld [vmem:[#allocation2 + $0x20] sm:$0xff]  ;;  %v566_v48 = vmax.f32 %v550_v45, 0.0  ;;  %v558_v59 = vld [vmem:[#allocation2 + $0x70] sm:$0xff] }
 0x141   : > { %v564_v43 = vmax.f32 %v548_v40, 0.0  ;;  %v551_v46 = vld [vmem:[#allocation2 + $0x38] sm:$0xff]  ;;  %v556_v57 = vld [vmem:[#allocation2 + $0x60] sm:$0xff]  ;;  %v574_v62 = vmax.f32 %v558_v59, 0.0 }
 0x142   : > { %v549_v41 = vld [vmem:[#allocation2 + $0x28] sm:$0xff]  ;;  %v567_v49 = vmax.f32 %v551_v46, 0.0  ;;  %582 = vst [vmem:[%s999_s25 + $0x30] sm:$0xff] %v566_v48  ;;  %v572_v60 = vmax.f32 %v556_v57, 0.0  ;;  %v559_v63 = vld [vmem:[#allocation2 + $0x78] sm:$0xff] }
 0x143   : > { %v565_v44 = vmax.f32 %v549_v41, 0.0  ;;  %580 = vst [vmem:[%s999_s25 + $0x20] sm:$0xff] %v564_v43  ;;  %v557_v58 = vld [vmem:[#allocation2 + $0x68] sm:$0xff]  ;;  %v575_v0 = vmax.f32 %v559_v63, 0.0  ;;  %590 = vst [vmem:[%s999_s25 + $0x70] sm:$0xff] %v574_v62 }
 0x144   : > { %583 = vst [vmem:[%s999_s25 + $0x38] sm:$0xff] %v567_v49  ;;  %v573_v61 = vmax.f32 %v557_v58, 0.0  ;;  %588 = vst [vmem:[%s999_s25 + $0x60] sm:$0xff] %v572_v60 }
 0x145   : > { %581 = vst [vmem:[%s999_s25 + $0x28] sm:$0xff] %v565_v44  ;;  %591 = vst [vmem:[%s999_s25 + $0x78] sm:$0xff] %v575_v0 }
 0x146   : > { %589 = vst [vmem:[%s999_s25 + $0x68] sm:$0xff] %v573_v61 }
 0x147 PF: > { %s12_s15 = sadd.s32 1, %s890_s15   ;;  %s1069_s9 = smov %s870_s10 }
 0x148   : > { %p9_p0 = scmp.ge.s32.totalorder %s12_s15, 6   ;;  %s1070_s10 = smov %s959_s22 }
 0x149   : > { %s1071_s11 = smov %s882_s13  ;;  %s1072_s12 = smov %s886_s14 }
 0x14a   : > { %s1073_s13 = smov %s1076_s16  ;;  %s1074_s14 = smov %s1080_s17 }
 0x14b   :  { %11 = sbr.rel (!%p9_p0) target bundleno = 4 (0x4), region = 115 }

// kernel: tsdcn_forward.17
= control target key start
LH: loop header
LB: loop body
LE: loop exit
PB: predicated region body
PF: predicated region fallthrough
CT: control target
= control target key end

     0   :  { %s910_s9 = smov 0   ;;  %s912_s10 = smov 0   ;;  %s1116_s0 = inlined_call_operand.vmem [shape: bf16[256,256], index: 0, kind: input, shape index: {}]   ;;  %s1117_s1 = inlined_call_operand.vmem [shape: f32[256,80], index: 1, kind: input, shape index: {}]   ;;  %s1118_s2 = inlined_call_operand.vmem [shape: f32[256,80], index: 2, kind: output, shape index: {}]  }
   0x1   :  { %s914_s11 = smov 0   ;;  %s916_s12 = smov 0  }
   0x2   :  { %s918_s13 = smov 0   ;;  %s920_s14 = smov 0  }
   0x3   :  { %s922_s15 = smov 0  }
   0x4 LB: > { %s21_s16 = sadd.s32 1, %s884_s13  ;;  %s24_s17 = sadd.s32 1, %s888_s14  ;;  %s892_s15 = sphi %s922_s15, %s12_s15   ;;  %s888_s14 = sphi %s920_s14, %s1124_s14   ;;  %s884_s13 = sphi %s918_s13, %s1123_s13   ;;  %s880_s12 = sphi %s916_s12, %s1122_s12   ;;  %s876_s11 = sphi %s914_s11, %s1121_s11   ;;  %s872_s10 = sphi %s912_s10, %s1120_s10   ;;  %s868_s9 = sphi %s910_s9, %s1119_s9  }
   0x5   : > { %p22_p0 = scmp.ge.s32.totalorder %s21_s16, 2  ;;  %p40_p1 = scmp.ne.s32.totalorder %s872_s10, %s868_s9 }
   0x6   : > { %p41_p2 = scmp.eq.s32.totalorder %s892_s15, 0  ;;  %s33_s21 = sadd.s32 1, %s872_s10 }
   0x7   : > { %s1126_s16 = smov (%p22_p0, %s21_s16), 0  ;;  %s1128_s17 = smov (!%p22_p0, %s24_s17), %s888_s14 }
   0x8   : > { %p42_p3 = por %p41_p2, %p40_p1  ;;  %p26_p4 = scmp.ge.s32.totalorder %s1128_s17, 2 }
   0x9   : > { %s29_s18 = ssub.s32 %s884_s13, %s1126_s16  ;;  %p685_p6 = scmp.ge.s32.totalorder %s892_s15, 4 }
   0xa   : > { %s1130_s17 = smov (%p26_p4, %s1128_s17), 0 }
   0xb   : > { %s28_s19 = ssub.s32 %s888_s14, %s1130_s17  ;;  %118 = sbr.rel (%p685_p6) target bundleno = 34 (0x22), region = 16 }
   0xc   : > { %s30_s20 = sor.u32 %s29_s18, %s28_s19 }
   0xd   : > { %p31_p5 = scmp.eq.s32.totalorder %s30_s20, 0 }
   0xf   : > { %s961_s22 = scalar_select %p31_p5, %s872_s10, %s33_s21  }
  0x12   : > { %121 = sbr.rel (!%p42_p3) target bundleno = 34 (0x22), region = 20  ;;  %s123_s23 = sand.u32 (%p42_p3), 1, %s872_s10  }
  0x13   : > { %s708_s24 = sshll.u32 (%p42_p3), %s888_s14, 5  ;;  %s686_s25 = sshll.u32 (%p42_p3), %s123_s23, 6 }
  0x14   : > { %s128_s26 = sadd.s32 (%p42_p3), %s884_s13, %s708_s24  ;;  %s125_s3 = scalar_lea.vmem (%p42_p3), [#allocation3], %s686_s25 }
  0x15   : > { %s689_s27 = sshll.u32 (%p42_p3), %s128_s26, 2 }
  0x16   : > { %s970_s30 = scalar_lea.vmem (%p42_p3), %s1116_s0, %s689_s27 }
  0x17   : > { %v146_v0 = vld [vmem:[%s970_s30] sm:$0xf] (%p42_p3)  ;;  %v148_v1 = vld [vmem:[%s970_s30 + $0x8] sm:$0xf] (%p42_p3)  ;;  %v150_v2 = vld [vmem:[%s970_s30 + $0x10] sm:$0xf] (%p42_p3) }
  0x18   : > { %147 = vst [vmem:[%s125_s3] sm:$0xf] (%p42_p3), %v146_v0  ;;  %149 = vst [vmem:[%s125_s3 + $0x4] sm:$0xf] (%p42_p3), %v148_v1  ;;  %v152_v3 = vld [vmem:[%s970_s30 + $0x18] sm:$0xf] (%p42_p3) }
  0x19   : > { %151 = vst [vmem:[%s125_s3 + $0x8] sm:$0xf] %v150_v2  ;;  %v154_v4 = vld [vmem:[%s970_s30 + $0x20] sm:$0xf]  ;;  %v156_v5 = vld [vmem:[%s970_s30 + $0x28] sm:$0xf] }
  0x1a   : > { %153 = vst [vmem:[%s125_s3 + $0xc] sm:$0xf] %v152_v3  ;;  %155 = vst [vmem:[%s125_s3 + $0x10] sm:$0xf] %v154_v4  ;;  %v158_v6 = vld [vmem:[%s970_s30 + $0x30] sm:$0xf] }
  0x1b   : > { %157 = vst [vmem:[%s125_s3 + $0x14] sm:$0xf] %v156_v5  ;;  %v160_v7 = vld [vmem:[%s970_s30 + $0x38] sm:$0xf]  ;;  %v162_v8 = vld [vmem:[%s970_s30 + $0x40] sm:$0xf] }
  0x1c   : > { %159 = vst [vmem:[%s125_s3 + $0x18] sm:$0xf] %v158_v6  ;;  %161 = vst [vmem:[%s125_s3 + $0x1c] sm:$0xf] %v160_v7  ;;  %v164_v9 = vld [vmem:[%s970_s30 + $0x48] sm:$0xf] }
  0x1d   : > { %163 = vst [vmem:[%s125_s3 + $0x20] sm:$0xf] %v162_v8  ;;  %v166_v10 = vld [vmem:[%s970_s30 + $0x50] sm:$0xf]  ;;  %v168_v11 = vld [vmem:[%s970_s30 + $0x58] sm:$0xf] }
  0x1e   : > { %165 = vst [vmem:[%s125_s3 + $0x24] sm:$0xf] %v164_v9  ;;  %167 = vst [vmem:[%s125_s3 + $0x28] sm:$0xf] %v166_v10  ;;  %v170_v12 = vld [vmem:[%s970_s30 + $0x60] sm:$0xf] }
  0x1f   : > { %169 = vst [vmem:[%s125_s3 + $0x2c] sm:$0xf] %v168_v11  ;;  %v172_v13 = vld [vmem:[%s970_s30 + $0x68] sm:$0xf]  ;;  %v174_v14 = vld [vmem:[%s970_s30 + $0x70] sm:$0xf] }
  0x20   : > { %171 = vst [vmem:[%s125_s3 + $0x30] sm:$0xf] %v170_v12  ;;  %173 = vst [vmem:[%s125_s3 + $0x34] sm:$0xf] %v172_v13  ;;  %v176_v15 = vld [vmem:[%s970_s30 + $0x78] sm:$0xf] }
  0x21   : > { %175 = vst [vmem:[%s125_s3 + $0x38] sm:$0xf] %v174_v14  ;;  %177 = vst [vmem:[%s125_s3 + $0x3c] sm:$0xf] %v176_v15 }
  0x22 PF: > { %p690_p7 = scmp.ge.s32.totalorder %s892_s15, 1  ;;  %p240_p8 = scmp.lt.s32.totalorder %s892_s15, 5 }
  0x24   : > { %p241_p9 = pnand %p690_p7, %p240_p8 }
  0x25   : > { %s247_s4 = sand.u32 (!%p241_p9), 1, %s868_s9   ;;  %s692_s5 = sshll.u32 (!%p241_p9), %s876_s11, 4 }
  0x26   : > { %244 = sbr.rel (%p241_p9) target bundleno = 327 (0x147), region = 65  ;;  %s691_s6 = sshll.u32 (!%p241_p9), %s247_s4, 6 }
  0x27   : > { %p275_p10 = scmp.lt.s32.totalorder (!%p241_p9), %s692_s5, 31  ;;  %s694_s7 = sshll.u32 (!%p241_p9), %s880_s12, 4 }
  0x28   : > { %p281_p11 = scmp.lt.s32.totalorder (!%p241_p9), %s694_s7, 31  ;;  %s1003_s9 = scalar_lea.vmem (!%p241_p9), [#allocation3], %s691_s6 }
  0x29   : > { %p696_p12 = scmp.ne.s32.totalorder (!%p241_p9), %s876_s11, 0 }
  0x2d   : > { %s1132_s5 = smov (!%p275_p10, %s692_s5), 31  ;;  %s1134_s7 = smov (!%p281_p11, %s694_s7), 31 }
  0x2e   : > { %s693_s8 = sshll.u32 %s1132_s5, 3  ;;  %s695_s21 = sshll.u32 %s1134_s7, 3  ;;  %vm291_vm0 = vcmask (!%p696_p12), 654336   ;;  %v894_v16 = vmov (!%p696_p12), 0.0  }
  0x2f   : > { %s996_s20 = scalar_lea.vmem %s1117_s1, %s693_s8  ;;  %s1001_s25 = scalar_lea.vmem %s1118_s2, %s695_s21  ;;  %292 = vst.msk [vmem:[#allocation2] sm:$0xff] (!%p696_p12), %vm291_vm0, %v894_v16  ;;  %293 = vst.msk [vmem:[#allocation2 + $0x8] sm:$0xff] (!%p696_p12), %vm291_vm0, %v894_v16 }
  0x30   : > { %290 = sbr.rel (%p696_p12) target bundleno = 55 (0x37), region = 73  ;;  %294 = vst.msk [vmem:[#allocation2 + $0x10] sm:$0xff] (!%p696_p12), %vm291_vm0, %v894_v16  ;;  %295 = vst.msk [vmem:[#allocation2 + $0x18] sm:$0xff] (!%p696_p12), %vm291_vm0, %v894_v16 }
  0x31   : > { %296 = vst.msk [vmem:[#allocation2 + $0x20] sm:$0xff] (!%p696_p12), %vm291_vm0, %v894_v16  ;;  %297 = vst.msk [vmem:[#allocation2 + $0x28] sm:$0xff] (!%p696_p12), %vm291_vm0, %v894_v16 }
  0x32   : > { %298 = vst.msk [vmem:[#allocation2 + $0x30] sm:$0xff] (!%p696_p12), %vm291_vm0, %v894_v16  ;;  %299 = vst.msk [vmem:[#allocation2 + $0x38] sm:$0xff] (!%p696_p12), %vm291_vm0, %v894_v16 }
  0x33   : > { %300 = vst.msk [vmem:[#allocation2 + $0x40] sm:$0xff] (!%p696_p12), %vm291_vm0, %v894_v16  ;;  %301 = vst.msk [vmem:[#allocation2 + $0x48] sm:$0xff] (!%p696_p12), %vm291_vm0, %v894_v16 }
  0x34   : > { %302 = vst.msk [vmem:[#allocation2 + $0x50] sm:$0xff] (!%p696_p12), %vm291_vm0, %v894_v16  ;;  %303 = vst.msk [vmem:[#allocation2 + $0x58] sm:$0xff] (!%p696_p12), %vm291_vm0, %v894_v16 }
  0x35   : > { %304 = vst.msk [vmem:[#allocation2 + $0x60] sm:$0xff] (!%p696_p12), %vm291_vm0, %v894_v16  ;;  %305 = vst.msk [vmem:[#allocation2 + $0x68] sm:$0xff] (!%p696_p12), %vm291_vm0, %v894_v16 }
  0x36   : > { %306 = vst.msk [vmem:[#allocation2 + $0x70] sm:$0xff] (!%p696_p12), %vm291_vm0, %v894_v16  ;;  %307 = vst.msk [vmem:[#allocation2 + $0x78] sm:$0xff] (!%p696_p12), %vm291_vm0, %v894_v16 }
  0x37 PF: > { %v340_v17 = vld [vmem:[%s996_s20] sm:$0xff]  ;;  %v341_v18 = vld [vmem:[%s996_s20 + $0x8] sm:$0xff]  ;;  %v342_v19 = vld [vmem:[%s996_s20 + $0x10] sm:$0xff]  ;;  %vm525_vm1 = vcmask 654336   ;;  %p705_p13 = scmp.ne.s32.totalorder %s876_s11, 1 }
  0x38   : > { %v356_v20 = vpack.c.bf16 %v341_v18, %v340_v17  ;;  %v343_v21 = vld [vmem:[%s996_s20 + $0x18] sm:$0xff]  ;;  %v344_v23 = vld [vmem:[%s996_s20 + $0x20] sm:$0xff]  ;;  %v345_v24 = vld [vmem:[%s996_s20 + $0x28] sm:$0xff] }
  0x39   : > { %v357_v22 = vpack.c.bf16 %v343_v21, %v342_v19  ;;  %v346_v25 = vld [vmem:[%s996_s20 + $0x30] sm:$0xff]  ;;  %v358_v26 = vpack.c.bf16 %v345_v24, %v344_v23  ;;  %v347_v27 = vld [vmem:[%s996_s20 + $0x38] sm:$0xff]  ;;  %v830_v28 = vld [vmem:[%s1003_s9] sm:$0xff]  }
  0x3a   : > { %725 = vmatprep.subr.bf16.mxu0 %v356_v20  ;;  %757 = vmatprep.subr.bf16.mxu1 %v356_v20  ;;  %v831_v29 = vld [vmem:[%s1003_s9 + $0x20] sm:$0xff]   ;;  %v359_v30 = vpack.c.bf16 %v347_v27, %v346_v25  ;;  %v349_v32 = vld [vmem:[%s996_s20 + $0x48] sm:$0xff]  ;;  %v350_v34 = vld [vmem:[%s996_s20 + $0x50] sm:$0xff] }
  0x3b   : > { %726 = vmatpush3.bf16.msra.mxu0 %v356_v20  ;;  %765 = vmatpush3.bf16.msra.mxu1 %v356_v20  ;;  %v348_v31 = vld [vmem:[%s996_s20 + $0x40] sm:$0xff]  ;;  %v351_v35 = vld [vmem:[%s996_s20 + $0x58] sm:$0xff]  ;;  %v353_v38 = vld [vmem:[%s996_s20 + $0x68] sm:$0xff] }
  0x3c   : > { %727 = vmatprep.subr.bf16.mxu0 %v357_v22  ;;  %758 = vmatprep.subr.bf16.mxu1 %v357_v22  ;;  %v360_v33 = vpack.c.bf16 %v349_v32, %v348_v31  ;;  %v361_v36 = vpack.c.bf16 %v351_v35, %v350_v34  ;;  %v352_v37 = vld [vmem:[%s996_s20 + $0x60] sm:$0xff]  ;;  %v354_v40 = vld [vmem:[%s996_s20 + $0x70] sm:$0xff]  ;;  %v355_v41 = vld [vmem:[%s996_s20 + $0x78] sm:$0xff] }
  0x3d   : > { %741 = vmatprep.mubr.bf16.mxu0 %v830_v28  ;;  %749 = vmatprep.mubr.bf16.mxu1 %v831_v29  ;;  %v362_v39 = vpack.c.bf16 %v353_v38, %v352_v37  ;;  %v363_v42 = vpack.c.bf16 %v355_v41, %v354_v40  ;;  %v832_v43 = vld [vmem:[%s1003_s9 + $0x8] sm:$0xff]   ;;  %v834_v45 = vld [vmem:[%s1003_s9 + $0x10] sm:$0xff]   ;;  %v836_v47 = vld [vmem:[%s1003_s9 + $0x18] sm:$0xff]  }
  0x3e   : > { %v833_v44 = vld [vmem:[%s1003_s9 + $0x28] sm:$0xff]   ;;  %v835_v46 = vld [vmem:[%s1003_s9 + $0x30] sm:$0xff]   ;;  %v837_v48 = vld [vmem:[%s1003_s9 + $0x38] sm:$0xff]  }
  0x3f   : > { %728 = vmatpush3.bf16.msra.mxu0 %v357_v22  ;;  %766 = vmatpush3.bf16.msra.mxu1 %v357_v22  ;;  %v310_v49 = vld [vmem:[#allocation2 + $0x10] sm:$0xff]  ;;  %v308_v51 = vld [vmem:[#allocation2] sm:$0xff]  ;;  %v311_v55 = vld [vmem:[#allocation2 + $0x18] sm:$0xff] }
  0x40   : > { %729 = vmatprep.subr.bf16.mxu0 %v358_v26  ;;  %759 = vmatprep.subr.bf16.mxu1 %v358_v26  ;;  %v318_v50 = vld [vmem:[#allocation2 + $0x50] sm:$0xff]  ;;  %v316_v52 = vld [vmem:[#allocation2 + $0x40] sm:$0xff]  ;;  %v319_v56 = vld [vmem:[#allocation2 + $0x58] sm:$0xff] }
  0x41   : > { %v309_v61 = vld [vmem:[#allocation2 + $0x8] sm:$0xff]  ;;  %v314_v9 = vld [vmem:[#allocation2 + $0x30] sm:$0xff]  ;;  %v312_v11 = vld [vmem:[#allocation2 + $0x20] sm:$0xff] }
  0x42   : > { %v317_v62 = vld [vmem:[#allocation2 + $0x48] sm:$0xff]  ;;  %v322_v10 = vld [vmem:[#allocation2 + $0x70] sm:$0xff]  ;;  %v320_v12 = vld [vmem:[#allocation2 + $0x60] sm:$0xff] }
  0x43   : > { %730 = vmatpush3.bf16.msra.mxu0 %v358_v26  ;;  %767 = vmatpush3.bf16.msra.mxu1 %v358_v26  ;;  %v315_v15 = vld [vmem:[#allocation2 + $0x38] sm:$0xff]  ;;  %v313_v21 = vld [vmem:[#allocation2 + $0x28] sm:$0xff] }
  0x44   : > { %731 = vmatprep.subr.bf16.mxu0 %v359_v30  ;;  %760 = vmatprep.subr.bf16.mxu1 %v359_v30  ;;  %v323_v16 = vld [vmem:[#allocation2 + $0x78] sm:$0xff]  ;;  %v321_v22 = vld [vmem:[#allocation2 + $0x68] sm:$0xff] }
  0x47   : > { %732 = vmatpush3.bf16.msra.mxu0 %v359_v30  ;;  %768 = vmatpush3.bf16.msra.mxu1 %v359_v30 }
  0x48   : > { %733 = vmatprep.subr.bf16.mxu0 %v360_v33  ;;  %761 = vmatprep.subr.bf16.mxu1 %v360_v33 }
  0x4b   : > { %734 = vmatpush3.bf16.msra.mxu0 %v360_v33  ;;  %769 = vmatpush3.bf16.msra.mxu1 %v360_v33 }
  0x4c   : > { %735 = vmatprep.subr.bf16.mxu0 %v361_v36  ;;  %762 = vmatprep.subr.bf16.mxu1 %v361_v36 }
  0x4f   : > { %736 = vmatpush3.bf16.msra.mxu0 %v361_v36  ;;  %770 = vmatpush3.bf16.msra.mxu1 %v361_v36 }
  0x50   : > { %737 = vmatprep.subr.bf16.mxu0 %v362_v39  ;;  %763 = vmatprep.subr.bf16.mxu1 %v362_v39 }
  0x53   : > { %738 = vmatpush3.bf16.msra.mxu0 %v362_v39  ;;  %771 = vmatpush3.bf16.msra.mxu1 %v362_v39 }
  0x54   : > { %739 = vmatprep.subr.bf16.mxu0 %v363_v42  ;;  %764 = vmatprep.subr.bf16.mxu1 %v363_v42 }
  0x57   : > { %740 = vmatpush3.bf16.msra.mxu0 %v363_v42  ;;  %772 = vmatpush3.bf16.msra.mxu1 %v363_v42 }
  0x5a   : > { %742 = vmatmul.mubr.bf16.vlgmr.msra.gmra.mrb[0].mxu0 %v832_v43  ;;  %750 = vmatmul.mubr.bf16.vlgmr.msra.gmra.mrb[0].mxu1 %v833_v44 }
  0x5b   : > { %745 = vmatprep.mubr.bf16.mxu0 %v834_v45  ;;  %753 = vmatprep.mubr.bf16.mxu1 %v835_v46 }
  0x62   : > { %746 = vmatmul.mubr.bf16.gmra.mrb[4].mxu0 %v836_v47  ;;  %754 = vmatmul.mubr.bf16.gmra.mrb[4].mxu1 %v837_v48 }
 0x12d   : > { %v743_v53 = vpop.f32.mrb[0].mxu0  ;;  %v751_v54 = vpop.f32.mrb[0].mxu1 }
 0x12e   : > { %v511_v57 = vadd.f32 %v743_v53, %v310_v49  ;;  %v519_v58 = vadd.f32 %v751_v54, %v318_v50  ;;  %v446_v59 = vpop.f32.mrb[1].mxu0  ;;  %v478_v60 = vpop.f32.mrb[1].mxu1 }
 0x12f   : > { %v509_v63 = vadd.f32 %v446_v59, %v308_v51  ;;  %v517_v0 = vadd.f32 %v478_v60, %v316_v52  ;;  %v744_v1 = vpop.f32.mrb[2].mxu0  ;;  %v752_v2 = vpop.f32.mrb[2].mxu1 }
 0x130   : > { %528 = vst.msk [vmem:[#allocation2 + $0x10] sm:$0xff] %vm525_vm1, %v511_v57  ;;  %536 = vst.msk [vmem:[#allocation2 + $0x50] sm:$0xff] %vm525_vm1, %v519_v58  ;;  %v512_v3 = vadd.f32 %v744_v1, %v311_v55  ;;  %v520_v4 = vadd.f32 %v752_v2, %v319_v56  ;;  %v449_v5 = vpop.f32.mrb[3].mxu0  ;;  %v481_v6 = vpop.f32.mrb[3].mxu1 }
 0x131   : > { %526 = vst.msk [vmem:[#allocation2] sm:$0xff] %vm525_vm1, %v509_v63  ;;  %534 = vst.msk [vmem:[#allocation2 + $0x40] sm:$0xff] %vm525_vm1, %v517_v0  ;;  %v510_v7 = vadd.f32 %v449_v5, %v309_v61  ;;  %v518_v8 = vadd.f32 %v481_v6, %v317_v62 }
 0x132   : > { %529 = vst.msk [vmem:[#allocation2 + $0x18] sm:$0xff] %vm525_vm1, %v512_v3  ;;  %537 = vst.msk [vmem:[#allocation2 + $0x58] sm:$0xff] %vm525_vm1, %v520_v4 }
 0x133   : > { %527 = vst.msk [vmem:[#allocation2 + $0x8] sm:$0xff] %vm525_vm1, %v510_v7  ;;  %535 = vst.msk [vmem:[#allocation2 + $0x48] sm:$0xff] %vm525_vm1, %v518_v8 }
 0x135   : > { %v747_v13 = vpop.f32.mrb[4].mxu0  ;;  %v755_v14 = vpop.f32.mrb[4].mxu1  ;;  %545 = sbr.rel (%p705_p13) target bundleno = 327 (0x147), region = 77 }
 0x136   : > { %v515_v17 = vadd.f32 %v747_v13, %v314_v9  ;;  %v523_v18 = vadd.f32 %v755_v14, %v322_v10  ;;  %v462_v19 = vpop.f32.mrb[5].mxu0  ;;  %v494_v20 = vpop.f32.mrb[5].mxu1 }
 0x137   : > { %v513_v23 = vadd.f32 %v462_v19, %v312_v11  ;;  %v521_v24 = vadd.f32 %v494_v20, %v320_v12  ;;  %v748_v25 = vpop.f32.mrb[6].mxu0  ;;  %v756_v26 = vpop.f32.mrb[6].mxu1  ;;  %v548_v35 = vld [vmem:[#allocation2 + $0x10] sm:$0xff] (!%p705_p13) }
 0x138   : > { %532 = vst.msk [vmem:[#allocation2 + $0x30] sm:$0xff] %vm525_vm1, %v515_v17  ;;  %540 = vst.msk [vmem:[#allocation2 + $0x70] sm:$0xff] %vm525_vm1, %v523_v18  ;;  %v516_v27 = vadd.f32 %v748_v25, %v315_v15  ;;  %v524_v28 = vadd.f32 %v756_v26, %v323_v16  ;;  %v465_v29 = vpop.f32.mrb[7].mxu0  ;;  %v497_v30 = vpop.f32.mrb[7].mxu1  ;;  %v546_v33 = vld [vmem:[#allocation2] sm:$0xff] (!%p705_p13)  ;;  %v564_v38 = vmax.f32 (!%p705_p13), %v548_v35, 0.0 }
 0x139   : > { %530 = vst.msk [vmem:[#allocation2 + $0x20] sm:$0xff] %vm525_vm1, %v513_v23  ;;  %538 = vst.msk [vmem:[#allocation2 + $0x60] sm:$0xff] %vm525_vm1, %v521_v24  ;;  %v514_v31 = vadd.f32 %v465_v29, %v313_v21  ;;  %v522_v32 = vadd.f32 %v497_v30, %v321_v22  ;;  %v562_v36 = vmax.f32 (!%p705_p13), %v546_v33, 0.0  ;;  %v549_v39 = vld [vmem:[#allocation2 + $0x18] sm:$0xff] (!%p705_p13)  ;;  %v554_v47 = vld [vmem:[#allocation2 + $0x40] sm:$0xff] (!%p705_p13) }
 0x13a   : > { %533 = vst.msk [vmem:[#allocation2 + $0x38] sm:$0xff] %vm525_vm1, %v516_v27  ;;  %541 = vst.msk [vmem:[#allocation2 + $0x78] sm:$0xff] %vm525_vm1, %v524_v28  ;;  %v547_v34 = vld [vmem:[#allocation2 + $0x8] sm:$0xff] (!%p705_p13)  ;;  %v565_v42 = vmax.f32 (!%p705_p13), %v549_v39, 0.0  ;;  %v570_v50 = vmax.f32 (!%p705_p13), %v554_v47, 0.0  ;;  %v556_v52 = vld [vmem:[#allocation2 + $0x50] sm:$0xff] (!%p705_p13) }
 0x13b   : > { %531 = vst.msk [vmem:[#allocation2 + $0x28] sm:$0xff] %vm525_vm1, %v514_v31  ;;  %539 = vst.msk [vmem:[#allocation2 + $0x68] sm:$0xff] %vm525_vm1, %v522_v32  ;;  %v563_v37 = vmax.f32 (!%p705_p13), %v547_v34, 0.0  ;;  %v555_v51 = vld [vmem:[#allocation2 + $0x48] sm:$0xff] (!%p705_p13)  ;;  %v557_v53 = vld [vmem:[#allocation2 + $0x58] sm:$0xff] (!%p705_p13)  ;;  %v572_v55 = vmax.f32 (!%p705_p13), %v556_v52, 0.0 }
 0x13c   : > { %578 = vst.msk [vmem:[%s1001_s25] sm:$0xff] %vm525_vm1, %v562_v36  ;;  %580 = vst.msk [vmem:[%s1001_s25 + $0x10] sm:$0xff] %vm525_vm1, %v564_v38  ;;  %v571_v54 = vmax.f32 %v555_v51, 0.0  ;;  %v573_v56 = vmax.f32 %v557_v53, 0.0 }
 0x13d   : > { %579 = vst.msk [vmem:[%s1001_s25 + $0x8] sm:$0xff] %vm525_vm1, %v563_v37  ;;  %581 = vst.msk [vmem:[%s1001_s25 + $0x18] sm:$0xff] %vm525_vm1, %v565_v42 }
 0x13e   : > { %586 = vst.msk [vmem:[%s1001_s25 + $0x40] sm:$0xff] %vm525_vm1, %v570_v50  ;;  %587 = vst.msk [vmem:[%s1001_s25 + $0x48] sm:$0xff] %vm525_vm1, %v571_v54 }
 0x13f   : > { %v552_v45 = vld [vmem:[#allocation2 + $0x30] sm:$0xff]  ;;  %588 = vst.msk [vmem:[%s1001_s25 + $0x50] sm:$0xff] %vm525_vm1, %v572_v55  ;;  %589 = vst.msk [vmem:[%s1001_s25 + $0x58] sm:$0xff] %vm525_vm1, %v573_v56 }
 0x140   : > { %v550_v40 = vld [vmem:[#allocation2 + $0x20] sm:$0xff]  ;;  %v568_v48 = vmax.f32 %v552_v45, 0.0  ;;  %v560_v59 = vld [vmem:[#allocation2 + $0x70] sm:$0xff] }
 0x141   : > { %v566_v43 = vmax.f32 %v550_v40, 0.0  ;;  %v553_v46 = vld [vmem:[#allocation2 + $0x38] sm:$0xff]  ;;  %v558_v57 = vld [vmem:[#allocation2 + $0x60] sm:$0xff]  ;;  %v576_v62 = vmax.f32 %v560_v59, 0.0 }
 0x142   : > { %v551_v41 = vld [vmem:[#allocation2 + $0x28] sm:$0xff]  ;;  %v569_v49 = vmax.f32 %v553_v46, 0.0  ;;  %584 = vst.msk [vmem:[%s1001_s25 + $0x30] sm:$0xff] %vm525_vm1, %v568_v48  ;;  %v574_v60 = vmax.f32 %v558_v57, 0.0  ;;  %v561_v63 = vld [vmem:[#allocation2 + $0x78] sm:$0xff] }
 0x143   : > { %v567_v44 = vmax.f32 %v551_v41, 0.0  ;;  %582 = vst.msk [vmem:[%s1001_s25 + $0x20] sm:$0xff] %vm525_vm1, %v566_v43  ;;  %v559_v58 = vld [vmem:[#allocation2 + $0x68] sm:$0xff]  ;;  %v577_v0 = vmax.f32 %v561_v63, 0.0  ;;  %592 = vst.msk [vmem:[%s1001_s25 + $0x70] sm:$0xff] %vm525_vm1, %v576_v62 }
 0x144   : > { %585 = vst.msk [vmem:[%s1001_s25 + $0x38] sm:$0xff] %vm525_vm1, %v569_v49  ;;  %v575_v61 = vmax.f32 %v559_v58, 0.0  ;;  %590 = vst.msk [vmem:[%s1001_s25 + $0x60] sm:$0xff] %vm525_vm1, %v574_v60 }
 0x145   : > { %583 = vst.msk [vmem:[%s1001_s25 + $0x28] sm:$0xff] %vm525_vm1, %v567_v44  ;;  %593 = vst.msk [vmem:[%s1001_s25 + $0x78] sm:$0xff] %vm525_vm1, %v577_v0 }
 0x146   : > { %591 = vst.msk [vmem:[%s1001_s25 + $0x68] sm:$0xff] %vm525_vm1, %v575_v61 }
 0x147 PF: > { %s12_s15 = sadd.s32 1, %s892_s15   ;;  %s1119_s9 = smov %s872_s10 }
 0x148   : > { %p9_p0 = scmp.ge.s32.totalorder %s12_s15, 6   ;;  %s1120_s10 = smov %s961_s22 }
 0x149   : > { %s1121_s11 = smov %s884_s13  ;;  %s1122_s12 = smov %s888_s14 }
 0x14a   : > { %s1123_s13 = smov %s1126_s16  ;;  %s1124_s14 = smov %s1130_s17 }
 0x14b   :  { %11 = sbr.rel (!%p9_p0) target bundleno = 4 (0x4), region = 115 }

// kernel: tsdcn_forward.20
= control target key start
LH: loop header
LB: loop body
LE: loop exit
PB: predicated region body
PF: predicated region fallthrough
CT: control target
= control target key end

     0   :  { %s571_s12 = smov 0   ;;  %s698_s0 = inlined_call_operand.vmem [shape: f32[256,128], index: 0, kind: input, shape index: {}]   ;;  %s699_s1 = inlined_call_operand.vmem [shape: f32[256,128], index: 1, kind: input, shape index: {}]   ;;  %s700_s2 = inlined_call_operand.vmem [shape: f32[128,128], index: 2, kind: input, shape index: {}]   ;;  %s701_s3 = inlined_call_operand.vmem [shape: f32[256,128], index: 3, kind: output, shape index: {}]  }
   0x1 LB: > { %s458_s13 = sadd.s32 4294967295, %s549_s12   ;;  %p462_p0 = scmp.ge.s32.totalorder %s549_s12, 1  ;;  %s549_s12 = sphi %s571_s12, %s13_s12  }
   0x2   : > { %p149_p1 = scmp.lt.s32.totalorder %s549_s12, 3 }
   0x4   : > { %p150_p2 = pnand %p462_p0, %p149_p1 }
   0x5   : > { %v253_v0 = vld [vmem:[%s700_s2] sm:$0xff] (!%p150_p2)  ;;  %v254_v1 = vld [vmem:[%s700_s2 + $0x8] sm:$0xff] (!%p150_p2)  ;;  %v255_v2 = vld [vmem:[%s700_s2 + $0x10] sm:$0xff] (!%p150_p2)  ;;  %s463_s20 = sshll.u32 (!%p150_p2), %s458_s13, 4 }
   0x6   : > { %153 = sbr.rel (%p150_p2) target bundleno = 264 (0x108), region = 32  ;;  %v269_v3 = vpack.c.bf16 (!%p150_p2), %v254_v1, %v253_v0  ;;  %v256_v4 = vld [vmem:[%s700_s2 + $0x18] sm:$0xff] (!%p150_p2)  ;;  %p179_p3 = scmp.lt.s32.totalorder (!%p150_p2), %s463_s20, 31  ;;  %v257_v6 = vld [vmem:[%s700_s2 + $0x20] sm:$0xff] (!%p150_p2)  ;;  %v258_v7 = vld [vmem:[%s700_s2 + $0x28] sm:$0xff] (!%p150_p2) }
   0x7   : > { %v270_v5 = vpack.c.bf16 (!%p150_p2), %v256_v4, %v255_v2  ;;  %v271_v8 = vpack.c.bf16 (!%p150_p2), %v258_v7, %v257_v6  ;;  %v259_v9 = vld [vmem:[%s700_s2 + $0x30] sm:$0xff] (!%p150_p2)  ;;  %v260_v10 = vld [vmem:[%s700_s2 + $0x38] sm:$0xff] (!%p150_p2)  ;;  %v261_v22 = vld [vmem:[%s700_s2 + $0x40] sm:$0xff] (!%p150_p2) }
   0x8   : > { %487 = vmatprep.subr.bf16.mxu0 (!%p150_p2), %v269_v3  ;;  %519 = vmatprep.subr.bf16.mxu1 (!%p150_p2), %v269_v3  ;;  %v272_v18 = vpack.c.bf16 (!%p150_p2), %v260_v10, %v259_v9  ;;  %v262_v23 = vld [vmem:[%s700_s2 + $0x48] sm:$0xff] (!%p150_p2)  ;;  %v263_v29 = vld [vmem:[%s700_s2 + $0x50] sm:$0xff] (!%p150_p2)  ;;  %v264_v30 = vld [vmem:[%s700_s2 + $0x58] sm:$0xff] (!%p150_p2) }
   0x9   : > { %488 = vmatpush3.bf16.msra.mxu0 (!%p150_p2), %v269_v3  ;;  %527 = vmatpush3.bf16.msra.mxu1 (!%p150_p2), %v269_v3  ;;  %v273_v28 = vpack.c.bf16 (!%p150_p2), %v262_v23, %v261_v22  ;;  %v274_v31 = vpack.c.bf16 (!%p150_p2), %v264_v30, %v263_v29  ;;  %v265_v32 = vld [vmem:[%s700_s2 + $0x60] sm:$0xff] (!%p150_p2)  ;;  %v266_v33 = vld [vmem:[%s700_s2 + $0x68] sm:$0xff] (!%p150_p2)  ;;  %v267_v34 = vld [vmem:[%s700_s2 + $0x70] sm:$0xff] (!%p150_p2) }
   0xa   : > { %489 = vmatprep.subr.bf16.mxu0 (!%p150_p2), %v270_v5  ;;  %520 = vmatprep.subr.bf16.mxu1 (!%p150_p2), %v270_v5  ;;  %v275_v35 = vpack.c.bf16 (!%p150_p2), %v266_v33, %v265_v32  ;;  %v268_v36 = vld [vmem:[%s700_s2 + $0x78] sm:$0xff] (!%p150_p2) }
   0xb   : > { %v276_v50 = vpack.c.bf16 (!%p150_p2), %v268_v36, %v267_v34 }
   0xd   : > { %s703_s20 = smov (!%p179_p3, %s463_s20), 31  ;;  %490 = vmatpush3.bf16.msra.mxu0 %v270_v5  ;;  %528 = vmatpush3.bf16.msra.mxu1 %v270_v5 }
   0xe   : > { %s597_s27 = sshll.u32 %s703_s20, 3  ;;  %491 = vmatprep.subr.bf16.mxu0 %v271_v8  ;;  %521 = vmatprep.subr.bf16.mxu1 %v271_v8 }
   0xf   : > { %s609_s7 = scalar_lea.vmem %s698_s0, %s597_s27  ;;  %s615_s10 = scalar_lea.vmem %s699_s1, %s597_s27 }
  0x10   : > { %v197_v11 = vld [vmem:[%s609_s7] sm:$0xff]  ;;  %v198_v12 = vld [vmem:[%s609_s7 + $0x8] sm:$0xff]  ;;  %v199_v37 = vld [vmem:[%s609_s7 + $0x10] sm:$0xff]  ;;  %s677_s4 = scalar_lea.vmem %s701_s3, %s597_s27 }
  0x11   : > { %v213_v13 = vld [vmem:[%s615_s10] sm:$0xff]  ;;  %v214_v14 = vld [vmem:[%s615_s10 + $0x8] sm:$0xff]  ;;  %492 = vmatpush3.bf16.msra.mxu0 %v271_v8  ;;  %529 = vmatpush3.bf16.msra.mxu1 %v271_v8  ;;  %v215_v38 = vld [vmem:[%s615_s10 + $0x10] sm:$0xff] }
  0x12   : > { %v229_v15 = vadd.f32 %v213_v13, %v197_v11  ;;  %v205_v16 = vld [vmem:[%s609_s7 + $0x40] sm:$0xff]  ;;  %v206_v17 = vld [vmem:[%s609_s7 + $0x48] sm:$0xff]  ;;  %v230_v19 = vadd.f32 %v214_v14, %v198_v12  ;;  %493 = vmatprep.subr.bf16.mxu0 %v272_v18  ;;  %522 = vmatprep.subr.bf16.mxu1 %v272_v18  ;;  %v200_v39 = vld [vmem:[%s609_s7 + $0x18] sm:$0xff]  ;;  %v231_v54 = vadd.f32 %v215_v38, %v199_v37 }
  0x13   : > { %v221_v20 = vld [vmem:[%s615_s10 + $0x40] sm:$0xff]  ;;  %v222_v21 = vld [vmem:[%s615_s10 + $0x48] sm:$0xff]  ;;  %v216_v40 = vld [vmem:[%s615_s10 + $0x18] sm:$0xff] }
  0x14   : > { %v237_v24 = vadd.f32 %v221_v20, %v205_v16  ;;  %v238_v25 = vadd.f32 %v222_v21, %v206_v17  ;;  %v245_v26 = vpack.c.bf16 %v230_v19, %v229_v15  ;;  %v207_v41 = vld [vmem:[%s609_s7 + $0x50] sm:$0xff]  ;;  %v208_v42 = vld [vmem:[%s609_s7 + $0x58] sm:$0xff]  ;;  %v201_v45 = vld [vmem:[%s609_s7 + $0x20] sm:$0xff]  ;;  %v232_v55 = vadd.f32 %v216_v40, %v200_v39 }
  0x15   : > { %494 = vmatpush3.bf16.msra.mxu0 %v272_v18  ;;  %530 = vmatpush3.bf16.msra.mxu1 %v272_v18  ;;  %v223_v43 = vld [vmem:[%s615_s10 + $0x50] sm:$0xff]  ;;  %v224_v44 = vld [vmem:[%s615_s10 + $0x58] sm:$0xff]  ;;  %v202_v46 = vld [vmem:[%s609_s7 + $0x28] sm:$0xff] }
  0x16   : > { %v249_v27 = vpack.c.bf16 %v238_v25, %v237_v24  ;;  %503 = vmatprep.mubr.bf16.mxu0 %v245_v26  ;;  %495 = vmatprep.subr.bf16.mxu0 %v273_v28  ;;  %v217_v47 = vld [vmem:[%s615_s10 + $0x20] sm:$0xff]  ;;  %v218_v48 = vld [vmem:[%s615_s10 + $0x28] sm:$0xff]  ;;  %v239_v56 = vadd.f32 %v223_v43, %v207_v41  ;;  %v240_v57 = vadd.f32 %v224_v44, %v208_v42  ;;  %v203_v62 = vld [vmem:[%s609_s7 + $0x30] sm:$0xff] }
  0x17   : > { %523 = vmatprep.subr.bf16.mxu1 %v273_v28  ;;  %v209_v49 = vld [vmem:[%s609_s7 + $0x60] sm:$0xff]  ;;  %v210_v51 = vld [vmem:[%s609_s7 + $0x68] sm:$0xff]  ;;  %v233_v58 = vadd.f32 %v217_v47, %v201_v45  ;;  %v234_v59 = vadd.f32 %v218_v48, %v202_v46  ;;  %v204_v63 = vld [vmem:[%s609_s7 + $0x38] sm:$0xff]  ;;  %v246_v0 = vpack.c.bf16 %v232_v55, %v231_v54 }
  0x18   : > { %511 = vmatprep.mubr.bf16.mxu1 %v249_v27  ;;  %v225_v52 = vld [vmem:[%s615_s10 + $0x60] sm:$0xff]  ;;  %v226_v53 = vld [vmem:[%s615_s10 + $0x68] sm:$0xff]  ;;  %v250_v1 = vpack.c.bf16 %v240_v57, %v239_v56  ;;  %v219_v2 = vld [vmem:[%s615_s10 + $0x30] sm:$0xff] }
  0x19   : > { %496 = vmatpush3.bf16.msra.mxu0 %v273_v28  ;;  %531 = vmatpush3.bf16.msra.mxu1 %v273_v28  ;;  %v241_v60 = vadd.f32 %v225_v52, %v209_v49  ;;  %v242_v61 = vadd.f32 %v226_v53, %v210_v51  ;;  %v220_v3 = vld [vmem:[%s615_s10 + $0x38] sm:$0xff]  ;;  %v211_v4 = vld [vmem:[%s609_s7 + $0x70] sm:$0xff]  ;;  %v247_v5 = vpack.c.bf16 %v234_v59, %v233_v58 }
  0x1a   : > { %497 = vmatprep.subr.bf16.mxu0 %v274_v31  ;;  %524 = vmatprep.subr.bf16.mxu1 %v274_v31  ;;  %v212_v7 = vld [vmem:[%s609_s7 + $0x78] sm:$0xff]  ;;  %v227_v8 = vld [vmem:[%s615_s10 + $0x70] sm:$0xff]  ;;  %v235_v10 = vadd.f32 %v219_v2, %v203_v62  ;;  %v236_v11 = vadd.f32 %v220_v3, %v204_v63 }
  0x1b   : > { %v251_v6 = vpack.c.bf16 %v242_v61, %v241_v60  ;;  %v228_v9 = vld [vmem:[%s615_s10 + $0x78] sm:$0xff]  ;;  %v243_v12 = vadd.f32 %v227_v8, %v211_v4 }
  0x1c   : > { %v244_v13 = vadd.f32 %v228_v9, %v212_v7  ;;  %v248_v14 = vpack.c.bf16 %v236_v11, %v235_v10 }
  0x1d   : > { %498 = vmatpush3.bf16.msra.mxu0 %v274_v31  ;;  %532 = vmatpush3.bf16.msra.mxu1 %v274_v31 }
  0x1e   : > { %499 = vmatprep.subr.bf16.mxu0 %v275_v35  ;;  %525 = vmatprep.subr.bf16.mxu1 %v275_v35  ;;  %v252_v15 = vpack.c.bf16 %v244_v13, %v243_v12 }
  0x21   : > { %500 = vmatpush3.bf16.msra.mxu0 %v275_v35  ;;  %533 = vmatpush3.bf16.msra.mxu1 %v275_v35 }
  0x22   : > { %501 = vmatprep.subr.bf16.mxu0 %v276_v50  ;;  %526 = vmatprep.subr.bf16.mxu1 %v276_v50 }
  0x25   : > { %502 = vmatpush3.bf16.msra.mxu0 %v276_v50  ;;  %534 = vmatpush3.bf16.msra.mxu1 %v276_v50 }
  0x28   : > { %504 = vmatmul.mubr.bf16.vlgmr.msra.gmra.mrb[0].mxu0 %v246_v0  ;;  %512 = vmatmul.mubr.bf16.vlgmr.msra.gmra.mrb[0].mxu1 %v250_v1 }
  0x29   : > { %507 = vmatprep.mubr.bf16.mxu0 %v247_v5  ;;  %515 = vmatprep.mubr.bf16.mxu1 %v251_v6 }
  0x30   : > { %508 = vmatmul.mubr.bf16.gmra.mrb[4].mxu0 %v248_v14  ;;  %516 = vmatmul.mubr.bf16.gmra.mrb[4].mxu1 %v252_v15 }
  0xfb   : > { %v505_v16 = vpop.f32.mrb[0].mxu0  ;;  %v513_v17 = vpop.f32.mrb[0].mxu1 }
  0xfc   : > { %376 = vst [vmem:[%s677_s4 + $0x10] sm:$0xff] %v505_v16  ;;  %384 = vst [vmem:[%s677_s4 + $0x50] sm:$0xff] %v513_v17  ;;  %v311_v18 = vpop.f32.mrb[1].mxu0  ;;  %v343_v19 = vpop.f32.mrb[1].mxu1 }
  0xfd   : > { %374 = vst [vmem:[%s677_s4] sm:$0xff] %v311_v18  ;;  %382 = vst [vmem:[%s677_s4 + $0x40] sm:$0xff] %v343_v19  ;;  %v506_v20 = vpop.f32.mrb[2].mxu0  ;;  %v514_v21 = vpop.f32.mrb[2].mxu1 }
  0xfe   : > { %377 = vst [vmem:[%s677_s4 + $0x18] sm:$0xff] %v506_v20  ;;  %385 = vst [vmem:[%s677_s4 + $0x58] sm:$0xff] %v514_v21  ;;  %v314_v22 = vpop.f32.mrb[3].mxu0  ;;  %v346_v23 = vpop.f32.mrb[3].mxu1 }
  0xff   : > { %375 = vst [vmem:[%s677_s4 + $0x8] sm:$0xff] %v314_v22  ;;  %383 = vst [vmem:[%s677_s4 + $0x48] sm:$0xff] %v346_v23 }
 0x103   : > { %v509_v24 = vpop.f32.mrb[4].mxu0  ;;  %v517_v25 = vpop.f32.mrb[4].mxu1 }
 0x104   : > { %380 = vst [vmem:[%s677_s4 + $0x30] sm:$0xff] %v509_v24  ;;  %388 = vst [vmem:[%s677_s4 + $0x70] sm:$0xff] %v517_v25  ;;  %v327_v26 = vpop.f32.mrb[5].mxu0  ;;  %v359_v27 = vpop.f32.mrb[5].mxu1 }
 0x105   : > { %378 = vst [vmem:[%s677_s4 + $0x20] sm:$0xff] %v327_v26  ;;  %386 = vst [vmem:[%s677_s4 + $0x60] sm:$0xff] %v359_v27  ;;  %v510_v28 = vpop.f32.mrb[6].mxu0  ;;  %v518_v29 = vpop.f32.mrb[6].mxu1 }
 0x106   : > { %381 = vst [vmem:[%s677_s4 + $0x38] sm:$0xff] %v510_v28  ;;  %389 = vst [vmem:[%s677_s4 + $0x78] sm:$0xff] %v518_v29  ;;  %v330_v30 = vpop.f32.mrb[7].mxu0  ;;  %v362_v31 = vpop.f32.mrb[7].mxu1 }
 0x107   : > { %379 = vst [vmem:[%s677_s4 + $0x28] sm:$0xff] %v330_v30  ;;  %387 = vst [vmem:[%s677_s4 + $0x68] sm:$0xff] %v362_v31 }
 0x108 PF: > { %s13_s12 = sadd.s32 1, %s549_s12  }
 0x109   : > { %p10_p4 = scmp.ge.s32.totalorder %s13_s12, 4  }
 0x10b   :  { %12 = sbr.rel (!%p10_p4) target bundleno = 1 (0x1), region = 65 }

// kernel: tsdcn_forward.21
= control target key start
LH: loop header
LB: loop body
LE: loop exit
PB: predicated region body
PF: predicated region fallthrough
CT: control target
= control target key end

     0   :  { %s1183_s9 = smov 0   ;;  %s1185_s10 = smov 0   ;;  %s1600_s0 = inlined_call_operand.vmem [shape: bf16[256,256], index: 0, kind: input, shape index: {}]   ;;  %s1601_s1 = inlined_call_operand.vmem [shape: f32[256,128], index: 1, kind: input, shape index: {}]   ;;  %s1602_s2 = inlined_call_operand.vmem [shape: f32[256,128], index: 2, kind: output, shape index: {}]  }
   0x1   :  { %s1187_s11 = smov 0   ;;  %s1189_s12 = smov 0  }
   0x2   :  { %s1191_s13 = smov 0   ;;  %s1193_s14 = smov 0  }
   0x3   :  { %s1195_s15 = smov 0  }
   0x4 LB: > { %s21_s16 = sadd.s32 1, %s1157_s13  ;;  %s24_s17 = sadd.s32 1, %s1161_s14  ;;  %s1165_s15 = sphi %s1195_s15, %s12_s15   ;;  %s1161_s14 = sphi %s1193_s14, %s1608_s14   ;;  %s1157_s13 = sphi %s1191_s13, %s1607_s13   ;;  %s1153_s12 = sphi %s1189_s12, %s1606_s12   ;;  %s1149_s11 = sphi %s1187_s11, %s1605_s11   ;;  %s1145_s10 = sphi %s1185_s10, %s1604_s10   ;;  %s1141_s9 = sphi %s1183_s9, %s1603_s9  }
   0x5   : > { %p22_p0 = scmp.ge.s32.totalorder %s21_s16, 2  ;;  %p40_p1 = scmp.ne.s32.totalorder %s1145_s10, %s1141_s9 }
   0x6   : > { %p41_p2 = scmp.eq.s32.totalorder %s1165_s15, 0  ;;  %s33_s21 = sadd.s32 1, %s1145_s10 }
   0x7   : > { %s1610_s16 = smov (%p22_p0, %s21_s16), 0  ;;  %s1612_s17 = smov (!%p22_p0, %s24_s17), %s1161_s14 }
   0x8   : > { %p42_p3 = por %p41_p2, %p40_p1  ;;  %p26_p4 = scmp.ge.s32.totalorder %s1612_s17, 2 }
   0x9   : > { %s29_s18 = ssub.s32 %s1157_s13, %s1610_s16  ;;  %p894_p6 = scmp.ge.s32.totalorder %s1165_s15, 4 }
   0xa   : > { %s1614_s17 = smov (%p26_p4, %s1612_s17), 0 }
   0xb   : > { %s28_s19 = ssub.s32 %s1161_s14, %s1614_s17  ;;  %118 = sbr.rel (%p894_p6) target bundleno = 34 (0x22), region = 16 }
   0xc   : > { %s30_s20 = sor.u32 %s29_s18, %s28_s19 }
   0xd   : > { %p31_p5 = scmp.eq.s32.totalorder %s30_s20, 0 }
   0xf   : > { %s1234_s22 = scalar_select %p31_p5, %s1145_s10, %s33_s21  }
  0x12   : > { %121 = sbr.rel (!%p42_p3) target bundleno = 34 (0x22), region = 20  ;;  %s123_s23 = sand.u32 (%p42_p3), 1, %s1145_s10  }
  0x13   : > { %s917_s24 = sshll.u32 (%p42_p3), %s1161_s14, 5  ;;  %s895_s25 = sshll.u32 (%p42_p3), %s123_s23, 6 }
  0x14   : > { %s128_s26 = sadd.s32 (%p42_p3), %s1157_s13, %s917_s24  ;;  %s125_s3 = scalar_lea.vmem (%p42_p3), [#allocation3], %s895_s25 }
  0x15   : > { %s898_s27 = sshll.u32 (%p42_p3), %s128_s26, 2 }
  0x16   : > { %s1243_s30 = scalar_lea.vmem (%p42_p3), %s1600_s0, %s898_s27 }
  0x17   : > { %v146_v0 = vld [vmem:[%s1243_s30] sm:$0xf] (%p42_p3)  ;;  %v148_v1 = vld [vmem:[%s1243_s30 + $0x8] sm:$0xf] (%p42_p3)  ;;  %v150_v2 = vld [vmem:[%s1243_s30 + $0x10] sm:$0xf] (%p42_p3) }
  0x18   : > { %147 = vst [vmem:[%s125_s3] sm:$0xf] (%p42_p3), %v146_v0  ;;  %149 = vst [vmem:[%s125_s3 + $0x4] sm:$0xf] (%p42_p3), %v148_v1  ;;  %v152_v3 = vld [vmem:[%s1243_s30 + $0x18] sm:$0xf] (%p42_p3) }
  0x19   : > { %151 = vst [vmem:[%s125_s3 + $0x8] sm:$0xf] %v150_v2  ;;  %v154_v4 = vld [vmem:[%s1243_s30 + $0x20] sm:$0xf]  ;;  %v156_v5 = vld [vmem:[%s1243_s30 + $0x28] sm:$0xf] }
  0x1a   : > { %153 = vst [vmem:[%s125_s3 + $0xc] sm:$0xf] %v152_v3  ;;  %155 = vst [vmem:[%s125_s3 + $0x10] sm:$0xf] %v154_v4  ;;  %v158_v6 = vld [vmem:[%s1243_s30 + $0x30] sm:$0xf] }
  0x1b   : > { %157 = vst [vmem:[%s125_s3 + $0x14] sm:$0xf] %v156_v5  ;;  %v160_v7 = vld [vmem:[%s1243_s30 + $0x38] sm:$0xf]  ;;  %v162_v8 = vld [vmem:[%s1243_s30 + $0x40] sm:$0xf] }
  0x1c   : > { %159 = vst [vmem:[%s125_s3 + $0x18] sm:$0xf] %v158_v6  ;;  %161 = vst [vmem:[%s125_s3 + $0x1c] sm:$0xf] %v160_v7  ;;  %v164_v9 = vld [vmem:[%s1243_s30 + $0x48] sm:$0xf] }
  0x1d   : > { %163 = vst [vmem:[%s125_s3 + $0x20] sm:$0xf] %v162_v8  ;;  %v166_v10 = vld [vmem:[%s1243_s30 + $0x50] sm:$0xf]  ;;  %v168_v11 = vld [vmem:[%s1243_s30 + $0x58] sm:$0xf] }
  0x1e   : > { %165 = vst [vmem:[%s125_s3 + $0x24] sm:$0xf] %v164_v9  ;;  %167 = vst [vmem:[%s125_s3 + $0x28] sm:$0xf] %v166_v10  ;;  %v170_v12 = vld [vmem:[%s1243_s30 + $0x60] sm:$0xf] }
  0x1f   : > { %169 = vst [vmem:[%s125_s3 + $0x2c] sm:$0xf] %v168_v11  ;;  %v172_v13 = vld [vmem:[%s1243_s30 + $0x68] sm:$0xf]  ;;  %v174_v14 = vld [vmem:[%s1243_s30 + $0x70] sm:$0xf] }
  0x20   : > { %171 = vst [vmem:[%s125_s3 + $0x30] sm:$0xf] %v170_v12  ;;  %173 = vst [vmem:[%s125_s3 + $0x34] sm:$0xf] %v172_v13  ;;  %v176_v15 = vld [vmem:[%s1243_s30 + $0x78] sm:$0xf] }
  0x21   : > { %175 = vst [vmem:[%s125_s3 + $0x38] sm:$0xf] %v174_v14  ;;  %177 = vst [vmem:[%s125_s3 + $0x3c] sm:$0xf] %v176_v15 }
  0x22 PF: > { %p899_p7 = scmp.ge.s32.totalorder %s1165_s15, 1  ;;  %p240_p8 = scmp.lt.s32.totalorder %s1165_s15, 5 }
  0x24   : > { %p241_p9 = pnand %p899_p7, %p240_p8 }
  0x25   : > { %s247_s4 = sand.u32 (!%p241_p9), 1, %s1141_s9   ;;  %s901_s5 = sshll.u32 (!%p241_p9), %s1149_s11, 4 }
  0x26   : > { %244 = sbr.rel (%p241_p9) target bundleno = 665 (0x299), region = 65  ;;  %s900_s6 = sshll.u32 (!%p241_p9), %s247_s4, 6 }
  0x27   : > { %p275_p10 = scmp.lt.s32.totalorder (!%p241_p9), %s901_s5, 31  ;;  %s903_s7 = sshll.u32 (!%p241_p9), %s1153_s12, 4 }
  0x28   : > { %p281_p11 = scmp.lt.s32.totalorder (!%p241_p9), %s903_s7, 31  ;;  %s1276_s9 = scalar_lea.vmem (!%p241_p9), [#allocation3], %s900_s6 }
  0x29   : > { %p905_p12 = scmp.ne.s32.totalorder (!%p241_p9), %s1149_s11, 0 }
  0x2d   : > { %s1616_s5 = smov (!%p275_p10, %s901_s5), 31  ;;  %s1618_s7 = smov (!%p281_p11, %s903_s7), 31 }
  0x2e   : > { %s902_s8 = sshll.u32 %s1616_s5, 3  ;;  %s904_s21 = sshll.u32 %s1618_s7, 3  ;;  %v1167_v16 = vmov (!%p905_p12), 0.0  }
  0x2f   : > { %s1269_s20 = scalar_lea.vmem %s1601_s1, %s902_s8  ;;  %s1274_s25 = scalar_lea.vmem %s1602_s2, %s904_s21  ;;  %291 = vst [vmem:[#allocation2] sm:$0xff] (!%p905_p12), %v1167_v16  ;;  %292 = vst [vmem:[#allocation2 + $0x8] sm:$0xff] (!%p905_p12), %v1167_v16 }
  0x30   : > { %290 = sbr.rel (%p905_p12) target bundleno = 55 (0x37), region = 73  ;;  %293 = vst [vmem:[#allocation2 + $0x10] sm:$0xff] (!%p905_p12), %v1167_v16  ;;  %294 = vst [vmem:[#allocation2 + $0x18] sm:$0xff] (!%p905_p12), %v1167_v16 }
  0x31   : > { %295 = vst [vmem:[#allocation2 + $0x20] sm:$0xff] (!%p905_p12), %v1167_v16  ;;  %296 = vst [vmem:[#allocation2 + $0x28] sm:$0xff] (!%p905_p12), %v1167_v16 }
  0x32   : > { %297 = vst [vmem:[#allocation2 + $0x30] sm:$0xff] (!%p905_p12), %v1167_v16  ;;  %298 = vst [vmem:[#allocation2 + $0x38] sm:$0xff] (!%p905_p12), %v1167_v16 }
  0x33   : > { %299 = vst [vmem:[#allocation2 + $0x40] sm:$0xff] (!%p905_p12), %v1167_v16  ;;  %300 = vst [vmem:[#allocation2 + $0x48] sm:$0xff] (!%p905_p12), %v1167_v16 }
  0x34   : > { %301 = vst [vmem:[#allocation2 + $0x50] sm:$0xff] (!%p905_p12), %v1167_v16  ;;  %302 = vst [vmem:[#allocation2 + $0x58] sm:$0xff] (!%p905_p12), %v1167_v16 }
  0x35   : > { %303 = vst [vmem:[#allocation2 + $0x60] sm:$0xff] (!%p905_p12), %v1167_v16  ;;  %304 = vst [vmem:[#allocation2 + $0x68] sm:$0xff] (!%p905_p12), %v1167_v16 }
  0x36   : > { %305 = vst [vmem:[#allocation2 + $0x70] sm:$0xff] (!%p905_p12), %v1167_v16  ;;  %306 = vst [vmem:[#allocation2 + $0x78] sm:$0xff] (!%p905_p12), %v1167_v16 }
  0x37 PF: > { %v339_v17 = vld [vmem:[%s1269_s20] sm:$0xff]  ;;  %v340_v18 = vld [vmem:[%s1269_s20 + $0x8] sm:$0xff]  ;;  %v341_v19 = vld [vmem:[%s1269_s20 + $0x10] sm:$0xff]  ;;  %p914_p13 = scmp.ne.s32.totalorder %s1149_s11, 1 }
  0x38   : > { %v355_v20 = vpack.c.bf16 %v340_v18, %v339_v17  ;;  %v342_v21 = vld [vmem:[%s1269_s20 + $0x18] sm:$0xff]  ;;  %v343_v23 = vld [vmem:[%s1269_s20 + $0x20] sm:$0xff]  ;;  %v344_v24 = vld [vmem:[%s1269_s20 + $0x28] sm:$0xff] }
  0x39   : > { %v356_v22 = vpack.c.bf16 %v342_v21, %v341_v19  ;;  %v345_v25 = vld [vmem:[%s1269_s20 + $0x30] sm:$0xff]  ;;  %v357_v26 = vpack.c.bf16 %v344_v24, %v343_v23  ;;  %v346_v27 = vld [vmem:[%s1269_s20 + $0x38] sm:$0xff]  ;;  %v1039_v28 = vld [vmem:[%s1276_s9] sm:$0xff]  }
  0x3a   : > { %934 = vmatprep.subr.bf16.mxu0 %v355_v20  ;;  %966 = vmatprep.subr.bf16.mxu1 %v355_v20  ;;  %v1040_v29 = vld [vmem:[%s1276_s9 + $0x20] sm:$0xff]   ;;  %v358_v30 = vpack.c.bf16 %v346_v27, %v345_v25  ;;  %v348_v32 = vld [vmem:[%s1269_s20 + $0x48] sm:$0xff]  ;;  %v349_v34 = vld [vmem:[%s1269_s20 + $0x50] sm:$0xff] }
  0x3b   : > { %935 = vmatpush3.bf16.msra.mxu0 %v355_v20  ;;  %974 = vmatpush3.bf16.msra.mxu1 %v355_v20  ;;  %v347_v31 = vld [vmem:[%s1269_s20 + $0x40] sm:$0xff]  ;;  %v350_v35 = vld [vmem:[%s1269_s20 + $0x58] sm:$0xff]  ;;  %v352_v38 = vld [vmem:[%s1269_s20 + $0x68] sm:$0xff] }
  0x3c   : > { %936 = vmatprep.subr.bf16.mxu0 %v356_v22  ;;  %967 = vmatprep.subr.bf16.mxu1 %v356_v22  ;;  %v359_v33 = vpack.c.bf16 %v348_v32, %v347_v31  ;;  %v360_v36 = vpack.c.bf16 %v350_v35, %v349_v34  ;;  %v351_v37 = vld [vmem:[%s1269_s20 + $0x60] sm:$0xff]  ;;  %v353_v40 = vld [vmem:[%s1269_s20 + $0x70] sm:$0xff]  ;;  %v354_v41 = vld [vmem:[%s1269_s20 + $0x78] sm:$0xff] }
  0x3d   : > { %950 = vmatprep.mubr.bf16.mxu0 %v1039_v28  ;;  %958 = vmatprep.mubr.bf16.mxu1 %v1040_v29  ;;  %v361_v39 = vpack.c.bf16 %v352_v38, %v351_v37  ;;  %v362_v42 = vpack.c.bf16 %v354_v41, %v353_v40  ;;  %v1041_v43 = vld [vmem:[%s1276_s9 + $0x8] sm:$0xff]   ;;  %v1043_v45 = vld [vmem:[%s1276_s9 + $0x10] sm:$0xff]   ;;  %v1045_v47 = vld [vmem:[%s1276_s9 + $0x18] sm:$0xff]  }
  0x3e   : > { %v1042_v44 = vld [vmem:[%s1276_s9 + $0x28] sm:$0xff]   ;;  %v1044_v46 = vld [vmem:[%s1276_s9 + $0x30] sm:$0xff]   ;;  %v1046_v48 = vld [vmem:[%s1276_s9 + $0x38] sm:$0xff]  }
  0x3f   : > { %937 = vmatpush3.bf16.msra.mxu0 %v356_v22  ;;  %975 = vmatpush3.bf16.msra.mxu1 %v356_v22  ;;  %v309_v49 = vld [vmem:[#allocation2 + $0x10] sm:$0xff]  ;;  %v307_v51 = vld [vmem:[#allocation2] sm:$0xff]  ;;  %v310_v55 = vld [vmem:[#allocation2 + $0x18] sm:$0xff] }
  0x40   : > { %938 = vmatprep.subr.bf16.mxu0 %v357_v26  ;;  %968 = vmatprep.subr.bf16.mxu1 %v357_v26  ;;  %v317_v50 = vld [vmem:[#allocation2 + $0x50] sm:$0xff]  ;;  %v315_v52 = vld [vmem:[#allocation2 + $0x40] sm:$0xff]  ;;  %v318_v56 = vld [vmem:[#allocation2 + $0x58] sm:$0xff] }
  0x41   : > { %v308_v61 = vld [vmem:[#allocation2 + $0x8] sm:$0xff]  ;;  %v313_v9 = vld [vmem:[#allocation2 + $0x30] sm:$0xff]  ;;  %v311_v11 = vld [vmem:[#allocation2 + $0x20] sm:$0xff] }
  0x42   : > { %v316_v62 = vld [vmem:[#allocation2 + $0x48] sm:$0xff]  ;;  %v321_v10 = vld [vmem:[#allocation2 + $0x70] sm:$0xff]  ;;  %v319_v12 = vld [vmem:[#allocation2 + $0x60] sm:$0xff] }
  0x43   : > { %939 = vmatpush3.bf16.msra.mxu0 %v357_v26  ;;  %976 = vmatpush3.bf16.msra.mxu1 %v357_v26  ;;  %v314_v15 = vld [vmem:[#allocation2 + $0x38] sm:$0xff]  ;;  %v312_v21 = vld [vmem:[#allocation2 + $0x28] sm:$0xff] }
  0x44   : > { %940 = vmatprep.subr.bf16.mxu0 %v358_v30  ;;  %969 = vmatprep.subr.bf16.mxu1 %v358_v30  ;;  %v322_v16 = vld [vmem:[#allocation2 + $0x78] sm:$0xff]  ;;  %v320_v22 = vld [vmem:[#allocation2 + $0x68] sm:$0xff] }
  0x47   : > { %941 = vmatpush3.bf16.msra.mxu0 %v358_v30  ;;  %977 = vmatpush3.bf16.msra.mxu1 %v358_v30 }
  0x48   : > { %942 = vmatprep.subr.bf16.mxu0 %v359_v33  ;;  %970 = vmatprep.subr.bf16.mxu1 %v359_v33 }
  0x4b   : > { %943 = vmatpush3.bf16.msra.mxu0 %v359_v33  ;;  %978 = vmatpush3.bf16.msra.mxu1 %v359_v33  ;;  %v560_v33 = vlaneseq (!%p914_p13) }
  0x4c   : > { %944 = vmatprep.subr.bf16.mxu0 %v360_v36  ;;  %971 = vmatprep.subr.bf16.mxu1 %v360_v36 }
  0x4d   : > { %v1306_v35 = vand.u32 (!%p914_p13), 127, %v560_v33 }
  0x4f   : > { %945 = vmatpush3.bf16.msra.mxu0 %v360_v36  ;;  %979 = vmatpush3.bf16.msra.mxu1 %v360_v36  ;;  %vm562_vm0 = vcmp.lt.s32.totalorder (!%p914_p13), %v1306_v35, 5 }
  0x50   : > { %946 = vmatprep.subr.bf16.mxu0 %v361_v39  ;;  %972 = vmatprep.subr.bf16.mxu1 %v361_v39 }
  0x53   : > { %947 = vmatpush3.bf16.msra.mxu0 %v361_v39  ;;  %980 = vmatpush3.bf16.msra.mxu1 %v361_v39 }
  0x54   : > { %948 = vmatprep.subr.bf16.mxu0 %v362_v42  ;;  %973 = vmatprep.subr.bf16.mxu1 %v362_v42 }
  0x57   : > { %949 = vmatpush3.bf16.msra.mxu0 %v362_v42  ;;  %981 = vmatpush3.bf16.msra.mxu1 %v362_v42 }
  0x5a   : > { %951 = vmatmul.mubr.bf16.vlgmr.msra.gmra.mrb[0].mxu0 %v1041_v43  ;;  %959 = vmatmul.mubr.bf16.vlgmr.msra.gmra.mrb[0].mxu1 %v1042_v44 }
  0x5b   : > { %954 = vmatprep.mubr.bf16.mxu0 %v1043_v45  ;;  %962 = vmatprep.mubr.bf16.mxu1 %v1044_v46 }
  0x62   : > { %955 = vmatmul.mubr.bf16.gmra.mrb[4].mxu0 %v1045_v47  ;;  %963 = vmatmul.mubr.bf16.gmra.mrb[4].mxu1 %v1046_v48 }
 0x12d   : > { %v952_v53 = vpop.f32.mrb[0].mxu0  ;;  %v960_v54 = vpop.f32.mrb[0].mxu1 }
 0x12e   : > { %v510_v57 = vadd.f32 %v952_v53, %v309_v49  ;;  %v518_v58 = vadd.f32 %v960_v54, %v317_v50  ;;  %v445_v59 = vpop.f32.mrb[1].mxu0  ;;  %v477_v60 = vpop.f32.mrb[1].mxu1 }
 0x12f   : > { %v508_v63 = vadd.f32 %v445_v59, %v307_v51  ;;  %v516_v0 = vadd.f32 %v477_v60, %v315_v52  ;;  %v953_v1 = vpop.f32.mrb[2].mxu0  ;;  %v961_v2 = vpop.f32.mrb[2].mxu1 }
 0x130   : > { %526 = vst [vmem:[#allocation2 + $0x10] sm:$0xff] %v510_v57  ;;  %534 = vst [vmem:[#allocation2 + $0x50] sm:$0xff] %v518_v58  ;;  %v511_v3 = vadd.f32 %v953_v1, %v310_v55  ;;  %v519_v4 = vadd.f32 %v961_v2, %v318_v56  ;;  %v448_v5 = vpop.f32.mrb[3].mxu0  ;;  %v480_v6 = vpop.f32.mrb[3].mxu1 }
 0x131   : > { %524 = vst [vmem:[#allocation2] sm:$0xff] %v508_v63  ;;  %532 = vst [vmem:[#allocation2 + $0x40] sm:$0xff] %v516_v0  ;;  %v509_v7 = vadd.f32 %v448_v5, %v308_v61  ;;  %v517_v8 = vadd.f32 %v480_v6, %v316_v62 }
 0x132   : > { %527 = vst [vmem:[#allocation2 + $0x18] sm:$0xff] %v511_v3  ;;  %535 = vst [vmem:[#allocation2 + $0x58] sm:$0xff] %v519_v4 }
 0x133   : > { %525 = vst [vmem:[#allocation2 + $0x8] sm:$0xff] %v509_v7  ;;  %533 = vst [vmem:[#allocation2 + $0x48] sm:$0xff] %v517_v8 }
 0x135   : > { %v956_v13 = vpop.f32.mrb[4].mxu0  ;;  %v964_v14 = vpop.f32.mrb[4].mxu1  ;;  %543 = sbr.rel (%p914_p13) target bundleno = 665 (0x299), region = 77 }
 0x136   : > { %v514_v17 = vadd.f32 %v956_v13, %v313_v9  ;;  %v522_v18 = vadd.f32 %v964_v14, %v321_v10  ;;  %v461_v19 = vpop.f32.mrb[5].mxu0  ;;  %v493_v20 = vpop.f32.mrb[5].mxu1 }
 0x137   : > { %v512_v23 = vadd.f32 %v461_v19, %v311_v11  ;;  %v520_v24 = vadd.f32 %v493_v20, %v319_v12  ;;  %v957_v25 = vpop.f32.mrb[6].mxu0  ;;  %v965_v26 = vpop.f32.mrb[6].mxu1  ;;  %v1308_v36 = vld [vmem:[#allocation2 + $0x10] sm:$0xff] (!%p914_p13) }
 0x138   : > { %530 = vst [vmem:[#allocation2 + $0x30] sm:$0xff] %v514_v17  ;;  %538 = vst [vmem:[#allocation2 + $0x70] sm:$0xff] %v522_v18  ;;  %v515_v27 = vadd.f32 %v957_v25, %v314_v15  ;;  %v523_v28 = vadd.f32 %v965_v26, %v322_v16  ;;  %v464_v29 = vpop.f32.mrb[7].mxu0  ;;  %v496_v30 = vpop.f32.mrb[7].mxu1  ;;  %v1304_v34 = vld [vmem:[#allocation2] sm:$0xff] (!%p914_p13)  ;;  %v1361_v55 = vld [vmem:[#allocation2 + $0x50] sm:$0xff] (!%p914_p13) }
 0x139   : > { %528 = vst [vmem:[#allocation2 + $0x20] sm:$0xff] %v512_v23  ;;  %536 = vst [vmem:[#allocation2 + $0x60] sm:$0xff] %v520_v24  ;;  %v513_v31 = vadd.f32 %v464_v29, %v312_v21  ;;  %v521_v32 = vadd.f32 %v496_v30, %v320_v22  ;;  %v1313_v38 = vld [vmem:[#allocation2 + $0x18] sm:$0xff] (!%p914_p13)  ;;  %v563_v39 = vsel (!%p914_p13), %vm562_vm0, %v1304_v34, -1e+30  ;;  %v1347_v51 = vld [vmem:[#allocation2 + $0x40] sm:$0xff] (!%p914_p13) }
 0x13a   : > { %531 = vst [vmem:[#allocation2 + $0x38] sm:$0xff] %v515_v27  ;;  %539 = vst [vmem:[#allocation2 + $0x78] sm:$0xff] %v523_v28  ;;  %v1311_v37 = vld [vmem:[#allocation2 + $0x8] sm:$0xff] (!%p914_p13)  ;;  %v565_v40 = vsel (!%p914_p13), %vm562_vm0, %v1308_v36, -1e+30  ;;  %579 = vmax.xlane.f32.xlu0 (!%p914_p13), %v563_v39  ;;  %v1363_v56 = vld [vmem:[#allocation2 + $0x58] sm:$0xff] (!%p914_p13) }
 0x13b   : > { %529 = vst [vmem:[#allocation2 + $0x28] sm:$0xff] %v513_v31  ;;  %537 = vst [vmem:[#allocation2 + $0x68] sm:$0xff] %v521_v32  ;;  %583 = vmax.xlane.f32.xlu1 (!%p914_p13), %v565_v40  ;;  %v564_v41 = vsel (!%p914_p13), %vm562_vm0, %v1311_v37, -1e+30  ;;  %v566_v42 = vsel (!%p914_p13), %vm562_vm0, %v1313_v38, -1e+30 }
 0x13c   : > { %v1349_v52 = vld [vmem:[#allocation2 + $0x48] sm:$0xff]  ;;  %v1354_v53 = vsel %vm562_vm0, %v1347_v51, -1e+30  ;;  %v1370_v57 = vsel %vm562_vm0, %v1361_v55, -1e+30 }
 0x13d   : > { %v1359_v54 = vsel %vm562_vm0, %v1349_v52, -1e+30  ;;  %v1375_v58 = vsel %vm562_vm0, %v1363_v56, -1e+30 }
 0x13e   : > { %581 = vmax.xlane.f32.xlu0 %v564_v41 }
 0x13f   : > { %585 = vmax.xlane.f32.xlu1 %v566_v42  ;;  %v1337_v47 = vld [vmem:[#allocation2 + $0x30] sm:$0xff] }
 0x140   : > { %v1327_v43 = vld [vmem:[#allocation2 + $0x20] sm:$0xff]  ;;  %v569_v49 = vsel %vm562_vm0, %v1337_v47, -1e+30  ;;  %v1393_v63 = vld [vmem:[#allocation2 + $0x70] sm:$0xff] }
 0x141   : > { %v567_v45 = vsel %vm562_vm0, %v1327_v43, -1e+30  ;;  %v1339_v48 = vld [vmem:[#allocation2 + $0x38] sm:$0xff]  ;;  %v1377_v59 = vld [vmem:[#allocation2 + $0x60] sm:$0xff]  ;;  %v1402_v1 = vsel %vm562_vm0, %v1393_v63, -1e+30 }
 0x142   : > { %v1329_v44 = vld [vmem:[#allocation2 + $0x28] sm:$0xff]  ;;  %587 = vmax.xlane.f32.xlu0 %v567_v45  ;;  %v570_v50 = vsel %vm562_vm0, %v1339_v48, -1e+30  ;;  %v1386_v61 = vsel %vm562_vm0, %v1377_v59, -1e+30  ;;  %v1395_v0 = vld [vmem:[#allocation2 + $0x78] sm:$0xff] }
 0x143   : > { %v568_v46 = vsel %vm562_vm0, %v1329_v44, -1e+30  ;;  %v1379_v60 = vld [vmem:[#allocation2 + $0x68] sm:$0xff]  ;;  %v1407_v2 = vsel %vm562_vm0, %v1395_v0, -1e+30 }
 0x144   : > { %589 = vmax.xlane.f32.xlu1 %v568_v46  ;;  %v1391_v62 = vsel %vm562_vm0, %v1379_v60, -1e+30 }
 0x146   : > { %591 = vmax.xlane.f32.xlu0 %v569_v49 }
 0x148   : > { %593 = vmax.xlane.f32.xlu1 %v570_v50 }
 0x14a   : > { %595 = vmax.xlane.f32.xlu0 %v1354_v53 }
 0x14c   : > { %597 = vmax.xlane.f32.xlu1 %v1359_v54 }
 0x14e   : > { %599 = vmax.xlane.f32.xlu0 %v1370_v57 }
 0x150   : > { %601 = vmax.xlane.f32.xlu1 %v1375_v58 }
 0x152   : > { %603 = vmax.xlane.f32.xlu0 %v1386_v61 }
 0x154   : > { %605 = vmax.xlane.f32.xlu1 %v1391_v62 }
 0x156   : > { %607 = vmax.xlane.f32.xlu0 %v1402_v1 }
 0x158   : > { %609 = vmax.xlane.f32.xlu1 %v1407_v2 }
 0x1c7   : > { %v1411_v3 = vpop.xlane.xlu0 %579 }
 0x1c8   : > { %v1413_v4 = vpop.xlane.xlu1 %583  ;;  %v611_v5 = vsub.f32 %v563_v39, %v1411_v3 }
 0x1c9   : > { %v613_v6 = vsub.f32 %v565_v40, %v1413_v4 }
 0x1ca   : > { %v627_v7 = vmul.f32 1.442695, %v611_v5 }
 0x1cb   : > { %v631_v8 = vmul.f32 1.442695, %v613_v6  ;;  %v1417_v9 = vpop.xlane.xlu0 %581 }
 0x1cc   : > { %v1419_v10 = vpop.xlane.xlu1 %585  ;;  %1047 = vpow2.f32 %v627_v7  ;;  %v612_v11 = vsub.f32 %v564_v41, %v1417_v9 }
 0x1cd   : > { %v614_v12 = vsub.f32 %v566_v42, %v1419_v10  ;;  %1049 = vpow2.f32 %v631_v8 }
 0x1ce   : > { %v629_v13 = vmul.f32 1.442695, %v612_v11 }
 0x1cf   : > { %v633_v14 = vmul.f32 1.442695, %v614_v12  ;;  %v1423_v15 = vpop.xlane.xlu0 %587 }
 0x1d0   : > { %1051 = vpow2.f32 %v629_v13  ;;  %v615_v17 = vsub.f32 %v567_v45, %v1423_v15 }
 0x1d1   : > { %v1425_v16 = vpop.xlane.xlu1 %589  ;;  %1053 = vpow2.f32 %v633_v14 }
 0x1d2   : > { %v616_v18 = vsub.f32 %v568_v46, %v1425_v16  ;;  %v635_v19 = vmul.f32 1.442695, %v615_v17 }
 0x1d3   : > { %v1429_v21 = vpop.xlane.xlu0 %591 }
 0x1d4   : > { %v637_v20 = vmul.f32 1.442695, %v616_v18  ;;  %1055 = vpow2.f32 %v635_v19  ;;  %v617_v23 = vsub.f32 %v569_v49, %v1429_v21 }
 0x1d5   : > { %v1431_v22 = vpop.xlane.xlu1 %593 }
 0x1d6   : > { %v618_v24 = vsub.f32 %v570_v50, %v1431_v22  ;;  %1057 = vpow2.f32 %v637_v20  ;;  %v1048_v25 = vpop.eup %1047  ;;  %v639_v26 = vmul.f32 1.442695, %v617_v23 }
 0x1d7   : > { %v1050_v28 = vpop.eup %1049  ;;  %v1435_v29 = vpop.xlane.xlu0 %595  ;;  %v659_v30 = vsel %vm562_vm0, %v1048_v25, 0.0 }
 0x1d8   : > { %v641_v27 = vmul.f32 1.442695, %v618_v24  ;;  %1059 = vpow2.f32 %v639_v26  ;;  %v619_v32 = vsub.f32 %v1354_v53, %v1435_v29  ;;  %675 = vadd.xlane.f32.xlu0 %v659_v30  ;;  %v661_v39 = vsel %vm562_vm0, %v1050_v28, 0.0 }
 0x1d9   : > { %v1439_v31 = vpop.xlane.xlu1 %597 }
 0x1da   : > { %v620_v33 = vsub.f32 %v1359_v54, %v1439_v31  ;;  %1061 = vpow2.f32 %v641_v27  ;;  %v1052_v40 = vpop.eup %1051  ;;  %v643_v41 = vmul.f32 1.442695, %v619_v32 }
 0x1db   : > { %v1054_v45 = vpop.eup %1053  ;;  %v1447_v46 = vpop.xlane.xlu0 %599  ;;  %v660_v49 = vsel %vm562_vm0, %v1052_v40, 0.0 }
 0x1dc   : > { %v645_v42 = vmul.f32 1.442695, %v620_v33  ;;  %1063 = vpow2.f32 %v643_v41  ;;  %v621_v53 = vsub.f32 %v1370_v57, %v1447_v46  ;;  %679 = vadd.xlane.f32.xlu0 %v661_v39  ;;  %677 = vadd.xlane.f32.xlu1 %v660_v49  ;;  %v662_v5 = vsel %vm562_vm0, %v1054_v45, 0.0 }
 0x1dd   : > { %v1451_v50 = vpop.xlane.xlu1 %601 }
 0x1de   : > { %v622_v54 = vsub.f32 %v1375_v58, %v1451_v50  ;;  %1065 = vpow2.f32 %v645_v42  ;;  %v1056_v6 = vpop.eup %1055  ;;  %v647_v7 = vmul.f32 1.442695, %v621_v53 }
 0x1df   : > { %v1459_v12 = vpop.xlane.xlu0 %603  ;;  %v663_v13 = vsel %vm562_vm0, %v1056_v6, 0.0 }
 0x1e0   : > { %v649_v8 = vmul.f32 1.442695, %v622_v54  ;;  %v1058_v11 = vpop.eup %1057  ;;  %1067 = vpow2.f32 %v647_v7  ;;  %v623_v57 = vsub.f32 %v1386_v61, %v1459_v12  ;;  %681 = vadd.xlane.f32.xlu1 %v662_v5  ;;  %683 = vadd.xlane.f32.xlu0 %v663_v13 }
 0x1e1   : > { %v1463_v14 = vpop.xlane.xlu1 %605  ;;  %v664_v17 = vsel %vm562_vm0, %v1058_v11, 0.0 }
 0x1e2   : > { %v624_v58 = vsub.f32 %v1391_v62, %v1463_v14  ;;  %1069 = vpow2.f32 %v649_v8  ;;  %v1060_v18 = vpop.eup %1059  ;;  %v651_v19 = vmul.f32 1.442695, %v623_v57 }
 0x1e3   : > { %v1471_v24 = vpop.xlane.xlu0 %607  ;;  %v665_v25 = vsel %vm562_vm0, %v1060_v18, 0.0 }
 0x1e4   : > { %v653_v20 = vmul.f32 1.442695, %v624_v58  ;;  %v1062_v23 = vpop.eup %1061  ;;  %1071 = vpow2.f32 %v651_v19  ;;  %v625_v61 = vsub.f32 %v1402_v1, %v1471_v24  ;;  %685 = vadd.xlane.f32.xlu1 %v664_v17  ;;  %687 = vadd.xlane.f32.xlu0 %v665_v25 }
 0x1e5   : > { %v1475_v26 = vpop.xlane.xlu1 %609  ;;  %v666_v27 = vsel %vm562_vm0, %v1062_v23, 0.0 }
 0x1e6   : > { %v626_v62 = vsub.f32 %v1407_v2, %v1475_v26  ;;  %1073 = vpow2.f32 %v653_v20  ;;  %v1064_v28 = vpop.eup %1063  ;;  %v655_v30 = vmul.f32 1.442695, %v625_v61 }
 0x1e7   : > { %v667_v39 = vsel %vm562_vm0, %v1064_v28, 0.0 }
 0x1e8   : > { %v657_v32 = vmul.f32 1.442695, %v626_v62  ;;  %v1066_v33 = vpop.eup %1065  ;;  %1075 = vpow2.f32 %v655_v30  ;;  %689 = vadd.xlane.f32.xlu1 %v666_v27  ;;  %691 = vadd.xlane.f32.xlu0 %v667_v39 }
 0x1e9   : > { %v668_v1 = vsel %vm562_vm0, %v1066_v33, 0.0 }
 0x1ea   : > { %1077 = vpow2.f32 %v657_v32  ;;  %v1068_v40 = vpop.eup %1067 }
 0x1eb   : > { %v669_v41 = vsel %vm562_vm0, %v1068_v40, 0.0 }
 0x1ec   : > { %v1070_v2 = vpop.eup %1069  ;;  %693 = vadd.xlane.f32.xlu1 %v668_v1  ;;  %695 = vadd.xlane.f32.xlu0 %v669_v41 }
 0x1ed   : > { %v670_v42 = vsel %vm562_vm0, %v1070_v2, 0.0 }
 0x1ee   : > { %v1072_v45 = vpop.eup %1071 }
 0x1ef   : > { %v671_v53 = vsel %vm562_vm0, %v1072_v45, 0.0 }
 0x1f0   : > { %v1074_v49 = vpop.eup %1073  ;;  %697 = vadd.xlane.f32.xlu1 %v670_v42  ;;  %699 = vadd.xlane.f32.xlu0 %v671_v53 }
 0x1f1   : > { %v672_v54 = vsel %vm562_vm0, %v1074_v49, 0.0 }
 0x1f2   : > { %v1076_v5 = vpop.eup %1075 }
 0x1f3   : > { %v673_v7 = vsel %vm562_vm0, %v1076_v5, 0.0 }
 0x1f4   : > { %v1078_v6 = vpop.eup %1077  ;;  %701 = vadd.xlane.f32.xlu1 %v672_v54  ;;  %703 = vadd.xlane.f32.xlu0 %v673_v7 }
 0x1f5   : > { %v674_v8 = vsel %vm562_vm0, %v1078_v6, 0.0 }
 0x1f8   : > { %705 = vadd.xlane.f32.xlu1 %v674_v8 }
 0x265   : > { %v676_v11 = vpop.xlane.xlu0 %675 }
 0x266   : > { %1079 = vlog2.f32 %v676_v11 }
 0x269   : > { %v678_v13 = vpop.xlane.xlu1 %677  ;;  %v680_v57 = vpop.xlane.xlu0 %679 }
 0x26a   : > { %1081 = vlog2.f32 %v678_v13 }
 0x26b   : > { %1083 = vlog2.f32 %v680_v57 }
 0x26d   : > { %v682_v58 = vpop.xlane.xlu1 %681  ;;  %v684_v17 = vpop.xlane.xlu0 %683 }
 0x26e   : > { %1085 = vlog2.f32 %v682_v58 }
 0x26f   : > { %1087 = vlog2.f32 %v684_v17 }
 0x270   : > { %v1080_v18 = vpop.eup %1079 }
 0x271   : > { %v708_v19 = vmul.f32 0.6931472, %v1080_v18  ;;  %v686_v20 = vpop.xlane.xlu1 %685  ;;  %v688_v23 = vpop.xlane.xlu0 %687 }
 0x272   : > { %1089 = vlog2.f32 %v686_v20 }
 0x273   : > { %v739_v25 = vadd.f32 %v708_v19, %v1411_v3  ;;  %1091 = vlog2.f32 %v688_v23 }
 0x274   : > { %v1082_v61 = vpop.eup %1081 }
 0x275   : > { %v1084_v62 = vpop.eup %1083  ;;  %v755_v27 = vsub.f32 %v1304_v34, %v739_v25  ;;  %v710_v28 = vmul.f32 0.6931472, %v1082_v61  ;;  %v690_v30 = vpop.xlane.xlu1 %689 }
 0x276   : > { %v692_v32 = vpop.xlane.xlu0 %691  ;;  %v712_v33 = vmul.f32 0.6931472, %v1084_v62  ;;  %1093 = vlog2.f32 %v690_v30 }
 0x277   : > { %v771_v39 = vsel %vm562_vm0, %v755_v27, 0.0  ;;  %v740_v1 = vadd.f32 %v710_v28, %v1417_v9  ;;  %1095 = vlog2.f32 %v692_v32 }
 0x278   : > { %v1086_v40 = vpop.eup %1085  ;;  %787 = vst [vmem:[%s1274_s25] sm:$0xff] %v771_v39  ;;  %v741_v3 = vadd.f32 %v712_v33, %v1413_v4 }
 0x279   : > { %v1088_v2 = vpop.eup %1087  ;;  %v756_v34 = vsub.f32 %v1311_v37, %v740_v1  ;;  %v714_v41 = vmul.f32 0.6931472, %v1086_v40  ;;  %v694_v42 = vpop.xlane.xlu1 %693 }
 0x27a   : > { %v696_v45 = vpop.xlane.xlu0 %695  ;;  %v757_v49 = vsub.f32 %v1308_v36, %v741_v3  ;;  %v716_v53 = vmul.f32 0.6931472, %v1088_v2  ;;  %1097 = vlog2.f32 %v694_v42 }
 0x27b   : > { %v772_v9 = vsel %vm562_vm0, %v756_v34, 0.0  ;;  %v742_v54 = vadd.f32 %v714_v41, %v1419_v10  ;;  %1099 = vlog2.f32 %v696_v45 }
 0x27c   : > { %v1090_v5 = vpop.eup %1089  ;;  %788 = vst [vmem:[%s1274_s25 + $0x8] sm:$0xff] %v772_v9  ;;  %v773_v4 = vsel %vm562_vm0, %v757_v49, 0.0  ;;  %v743_v37 = vadd.f32 %v716_v53, %v1423_v15 }
 0x27d   : > { %v1092_v6 = vpop.eup %1091  ;;  %789 = vst [vmem:[%s1274_s25 + $0x10] sm:$0xff] %v773_v4  ;;  %v758_v36 = vsub.f32 %v1313_v38, %v742_v54  ;;  %v718_v7 = vmul.f32 0.6931472, %v1090_v5  ;;  %v698_v8 = vpop.xlane.xlu1 %697 }
 0x27e   : > { %v700_v11 = vpop.xlane.xlu0 %699  ;;  %v759_v13 = vsub.f32 %v1327_v43, %v743_v37  ;;  %v720_v10 = vmul.f32 0.6931472, %v1092_v6  ;;  %1101 = vlog2.f32 %v698_v8 }
 0x27f   : > { %v774_v57 = vsel %vm562_vm0, %v758_v36, 0.0  ;;  %v744_v58 = vadd.f32 %v718_v7, %v1425_v16  ;;  %1103 = vlog2.f32 %v700_v11 }
 0x280   : > { %v1094_v17 = vpop.eup %1093  ;;  %790 = vst [vmem:[%s1274_s25 + $0x18] sm:$0xff] %v774_v57  ;;  %v775_v15 = vsel %vm562_vm0, %v759_v13, 0.0  ;;  %v745_v38 = vadd.f32 %v720_v10, %v1429_v21 }
 0x281   : > { %v1096_v18 = vpop.eup %1095  ;;  %791 = vst [vmem:[%s1274_s25 + $0x20] sm:$0xff] %v775_v15  ;;  %v760_v43 = vsub.f32 %v1329_v44, %v744_v58  ;;  %v722_v19 = vmul.f32 0.6931472, %v1094_v17  ;;  %v702_v20 = vpop.xlane.xlu1 %701 }
 0x282   : > { %v704_v23 = vpop.xlane.xlu0 %703  ;;  %v761_v25 = vsub.f32 %v1337_v47, %v745_v38  ;;  %v724_v16 = vmul.f32 0.6931472, %v1096_v18  ;;  %1105 = vlog2.f32 %v702_v20 }
 0x283   : > { %v776_v61 = vsel %vm562_vm0, %v760_v43, 0.0  ;;  %v746_v62 = vadd.f32 %v722_v19, %v1431_v22  ;;  %1107 = vlog2.f32 %v704_v23 }
 0x284   : > { %v1098_v21 = vpop.eup %1097  ;;  %792 = vst [vmem:[%s1274_s25 + $0x28] sm:$0xff] %v776_v61  ;;  %v777_v27 = vsel %vm562_vm0, %v761_v25, 0.0  ;;  %v747_v44 = vadd.f32 %v724_v16, %v1435_v29 }
 0x285   : > { %v1100_v28 = vpop.eup %1099  ;;  %793 = vst [vmem:[%s1274_s25 + $0x30] sm:$0xff] %v777_v27  ;;  %v762_v47 = vsub.f32 %v1339_v48, %v746_v62  ;;  %v726_v30 = vmul.f32 0.6931472, %v1098_v21  ;;  %v706_v32 = vpop.xlane.xlu1 %705 }
 0x286   : > { %v763_v33 = vsub.f32 %v1347_v51, %v747_v44  ;;  %v728_v39 = vmul.f32 0.6931472, %v1100_v28  ;;  %1109 = vlog2.f32 %v706_v32 }
 0x287   : > { %v778_v22 = vsel %vm562_vm0, %v762_v47, 0.0  ;;  %v748_v1 = vadd.f32 %v726_v30, %v1439_v31 }
 0x288   : > { %v1102_v40 = vpop.eup %1101  ;;  %794 = vst [vmem:[%s1274_s25 + $0x38] sm:$0xff] %v778_v22  ;;  %v779_v29 = vsel %vm562_vm0, %v763_v33, 0.0  ;;  %v749_v48 = vadd.f32 %v728_v39, %v1447_v46 }
 0x289   : > { %v1104_v3 = vpop.eup %1103  ;;  %795 = vst [vmem:[%s1274_s25 + $0x40] sm:$0xff] %v779_v29  ;;  %v764_v51 = vsub.f32 %v1349_v52, %v748_v1  ;;  %v730_v2 = vmul.f32 0.6931472, %v1102_v40 }
 0x28a   : > { %v765_v34 = vsub.f32 %v1361_v55, %v749_v48  ;;  %v732_v41 = vmul.f32 0.6931472, %v1104_v3 }
 0x28b   : > { %v780_v31 = vsel %vm562_vm0, %v764_v51, 0.0  ;;  %v750_v42 = vadd.f32 %v730_v2, %v1451_v50 }
 0x28c   : > { %v1106_v45 = vpop.eup %1105  ;;  %796 = vst [vmem:[%s1274_s25 + $0x48] sm:$0xff] %v780_v31  ;;  %v781_v46 = vsel %vm562_vm0, %v765_v34, 0.0  ;;  %v751_v49 = vadd.f32 %v732_v41, %v1459_v12 }
 0x28d   : > { %v1108_v53 = vpop.eup %1107  ;;  %797 = vst [vmem:[%s1274_s25 + $0x50] sm:$0xff] %v781_v46  ;;  %v766_v52 = vsub.f32 %v1363_v56, %v750_v42  ;;  %v734_v55 = vmul.f32 0.6931472, %v1106_v45 }
 0x28e   : > { %v767_v9 = vsub.f32 %v1377_v59, %v751_v49  ;;  %v736_v54 = vmul.f32 0.6931472, %v1108_v53 }
 0x28f   : > { %v782_v50 = vsel %vm562_vm0, %v766_v52, 0.0  ;;  %v752_v5 = vadd.f32 %v734_v55, %v1463_v14 }
 0x290   : > { %v1110_v4 = vpop.eup %1109  ;;  %798 = vst [vmem:[%s1274_s25 + $0x58] sm:$0xff] %v782_v50  ;;  %v783_v12 = vsel %vm562_vm0, %v767_v9, 0.0  ;;  %v753_v37 = vadd.f32 %v736_v54, %v1471_v24 }
 0x291   : > { %799 = vst [vmem:[%s1274_s25 + $0x60] sm:$0xff] %v783_v12  ;;  %v768_v56 = vsub.f32 %v1379_v60, %v752_v5  ;;  %v738_v6 = vmul.f32 0.6931472, %v1110_v4 }
 0x292   : > { %v769_v59 = vsub.f32 %v1393_v63, %v753_v37 }
 0x293   : > { %v784_v36 = vsel %vm562_vm0, %v768_v56, 0.0  ;;  %v754_v7 = vadd.f32 %v738_v6, %v1475_v26 }
 0x294   : > { %800 = vst [vmem:[%s1274_s25 + $0x68] sm:$0xff] %v784_v36  ;;  %v785_v14 = vsel %vm562_vm0, %v769_v59, 0.0 }
 0x295   : > { %801 = vst [vmem:[%s1274_s25 + $0x70] sm:$0xff] %v785_v14  ;;  %v770_v8 = vsub.f32 %v1395_v0, %v754_v7 }
 0x297   : > { %v786_v24 = vsel %vm562_vm0, %v770_v8, 0.0 }
 0x298   : > { %802 = vst [vmem:[%s1274_s25 + $0x78] sm:$0xff] %v786_v24 }
 0x299 PF: > { %s12_s15 = sadd.s32 1, %s1165_s15   ;;  %s1603_s9 = smov %s1145_s10 }
 0x29a   : > { %p9_p0 = scmp.ge.s32.totalorder %s12_s15, 6   ;;  %s1604_s10 = smov %s1234_s22 }
 0x29b   : > { %s1605_s11 = smov %s1157_s13  ;;  %s1606_s12 = smov %s1161_s14 }
 0x29c   : > { %s1607_s13 = smov %s1610_s16  ;;  %s1608_s14 = smov %s1614_s17 }
 0x29d   :  { %11 = sbr.rel (!%p9_p0) target bundleno = 4 (0x4), region = 115 }

</bundles_post_ra>
